<compile_context>
chip_gen: v7x
topology: tpu7x:2x2x1
jax: 0.10.0
libtpu: 0.0.40
codegen_flags: <defaults>
</compile_context>

<pallas_src>
import functools
import math

import jax
import jax.numpy as jnp
from jax.experimental import pallas as pl
from jax.experimental.pallas import tpu as pltpu


def _sigmoid(x):
    return 1.0 / (1.0 + jnp.exp(-x))


def _lstm_cell(gates, c):
    """Gates already contain x@W_ih + h@W_hh + b, PyTorch order i,f,g,o."""
    H = gates.shape[-1] // 4
    i_g = _sigmoid(gates[:, 0 * H:1 * H])
    f_g = _sigmoid(gates[:, 1 * H:2 * H])
    g_g = jnp.tanh(gates[:, 2 * H:3 * H])
    o_g = _sigmoid(gates[:, 3 * H:4 * H])
    c_new = f_g * c + i_g * g_g
    h_new = o_g * jnp.tanh(c_new)
    return h_new, c_new


# ----------------------------------------------------------------------------
# Fused whole-network kernel.
# Inputs (all VMEM, full blocks):
#   ids (T, B) i32, emb (V, E) f32,
#   per intermediate layer: w_ih (d_in, 8H) bf16, w_hh (2H, 8H) bf16 block-diag,
#                           b (1, 8H) f32,
#   final layer: w_ih_f/w_ih_b (d_in, 4H) bf16, w_hh_f (H, 4H) bf16,
#                b_f/b_b (1, 4H) f32,
#   fc_w_f/fc_w_b (H, V) bf16, fc_b (1, V) f32.
# Output: logits (B, V) f32.   Scratch: (T, B, 2H) f32 layer-output buffer.
# ----------------------------------------------------------------------------
def _poem_lstm_kernel(*refs, n_mid):
    ids_ref, emb_ref = refs[:2]
    p = 2
    mid = []
    for _ in range(n_mid):
        mid.append(refs[p:p + 3])
        p += 3
    (w_ih_f_ref, w_ih_b_ref, w_hh_f_ref, b_f_ref, b_b_ref,
     fc_wf_ref, fc_wb_ref, fc_b_ref) = refs[p:p + 8]
    p += 8
    o_ref = refs[p]
    x_ref = refs[p + 1]                     # VMEM scratch (T, B, 2H) f32

    T, B = ids_ref.shape
    V, E = emb_ref.shape
    H = w_hh_f_ref.shape[0]
    G = 4 * H

    # ---- Embedding lookup fused as an exact one-hot MXU matmul. ----
    ids = ids_ref[...]                                              # (T, B) i32
    onehot = (jax.lax.broadcasted_iota(jnp.int32, (T, B, V), 2)
              == ids[:, :, None]).astype(jnp.float32).reshape(T * B, V)
    x = jnp.dot(onehot, emb_ref[...],
                preferred_element_type=jnp.float32)                 # (T*B, E)
    x = x.astype(jnp.bfloat16)

    # ---- Intermediate bidirectional layers (both directions fused). ----
    for w_ih_ref, w_hh_ref, b_ref in mid:
        # Hoisted input projection: whole sequence, both directions, one matmul.
        gates_x = (jnp.dot(x, w_ih_ref[...],
                           preferred_element_type=jnp.float32)
                   + b_ref[...]).reshape(T, B, 2 * G)
        w_hh = w_hh_ref[...]                                        # (2H, 8H)
        h_cat = jnp.zeros((B, 2 * H), jnp.bfloat16)
        c_f = jnp.zeros((B, H), jnp.float32)
        c_b = jnp.zeros((B, H), jnp.float32)
        for s in range(T):                       # unrolled (T small)
            if s == 0:                           # h == 0 -> skip the matmul
                g_f = gates_x[0, :, :G]
                g_b = gates_x[T - 1, :, G:]
            else:
                # ONE K=2H matmul per step for both directions (block-diag W_hh).
                g = jnp.dot(h_cat, w_hh, preferred_element_type=jnp.float32)
                g_f = gates_x[s, :, :G] + g[:, :G]
                g_b = gates_x[T - 1 - s, :, G:] + g[:, G:]
            h_f, c_f = _lstm_cell(g_f, c_f)
            h_b, c_b = _lstm_cell(g_b, c_b)
            x_ref[s, :, :H] = h_f                # static time reversal for bwd
            x_ref[T - 1 - s, :, H:] = h_b
            h_cat = jnp.concatenate([h_f, h_b], axis=-1).astype(jnp.bfloat16)
        x = x_ref[...].reshape(T * B, 2 * H).astype(jnp.bfloat16)

    # ---- Final layer fused with FC: full forward recurrence + a single
    #      last-step backward cell (only lstm_out[:, -1] is consumed). ----
    gates_f = (jnp.dot(x, w_ih_f_ref[...],
                       preferred_element_type=jnp.float32)
               + b_f_ref[...]).reshape(T, B, G)
    w_hh_f = w_hh_f_ref[...]
    h1 = jnp.zeros((B, H), jnp.bfloat16)
    c1 = jnp.zeros((B, H), jnp.float32)
    for s in range(T):
        if s == 0:
            g = gates_f[0]
        else:
            g = gates_f[s] + jnp.dot(h1, w_hh_f,
                                     preferred_element_type=jnp.float32)
        h1_f32, c1 = _lstm_cell(g, c1)
        h1 = h1_f32.astype(jnp.bfloat16)

    # Backward direction: zero initial state => one cell step on x[T-1];
    # only the T-1 row of the backward input projection is ever computed.
    x_last = x.reshape(T, B, -1)[T - 1]                             # (B, d_in)
    g_b = (jnp.dot(x_last, w_ih_b_ref[...],
                   preferred_element_type=jnp.float32) + b_b_ref[...])
    h1b, _ = _lstm_cell(g_b, jnp.zeros((B, H), jnp.float32))

    # FC head with fc_w split at pack time -> no lane concat on the epilogue.
    o_ref[...] = (jnp.dot(h1, fc_wf_ref[...],
                          preferred_element_type=jnp.float32)
                  + jnp.dot(h1b.astype(jnp.bfloat16), fc_wb_ref[...],
                            preferred_element_type=jnp.float32)
                  + fc_b_ref[...])


def _cost_estimate(T, B, E, H, V, n_mid, inputs):
    flops = 2 * T * B * V * E                    # one-hot embedding matmul
    d_in = E
    for _ in range(n_mid):
        flops += 2 * T * B * d_in * 8 * H        # hoisted x @ W_ih
        flops += T * 2 * B * (2 * H) * (8 * H)   # per-step merged h @ W_hh
        d_in = 2 * H
    flops += 2 * T * B * d_in * 4 * H            # final fwd x @ W_ih
    flops += T * 2 * B * H * 4 * H               # final fwd recurrence
    flops += 2 * B * d_in * 4 * H                # final bwd last-step proj
    flops += 2 * 2 * B * H * V                   # FC (two halves)
    cells = (2 * n_mid * T + T + 1) * B * H
    transcendentals = 5 * cells                  # 3 sigmoid + 2 tanh per cell
    bytes_accessed = (sum(math.prod(a.shape) * a.dtype.itemsize for a in inputs)
                      + B * V * 4)
    return pl.CostEstimate(flops=int(flops), transcendentals=int(transcendentals),
                           bytes_accessed=int(bytes_accessed))


# ----------------------------------------------------------------------------
# Full PoemLSTM forward: one pallas_call.
# ----------------------------------------------------------------------------
def poem_lstm_forward(token_ids, params):
    B, T = token_ids.shape
    emb = params["embedding"]
    V, E = emb.shape
    H = params["final"]["w_hh_f"].shape[0]
    n_mid = len(params["mid"])

    # Pad batch to a multiple of 8 sublanes; pad ids hit the zero embedding row.
    B_pad = max(8, -(-B // 8) * 8)
    ids = jnp.transpose(token_ids).astype(jnp.int32)        # (T, B) time-major
    if B_pad != B:
        ids = jnp.pad(ids, ((0, 0), (0, B_pad - B)))

    fin = params["final"]
    inputs = [ids, emb]
    for lp in params["mid"]:
        inputs += [lp["w_ih"], lp["w_hh"], lp["b"]]
    inputs += [fin["w_ih_f"], fin["w_ih_b"], fin["w_hh_f"], fin["b_f"], fin["b_b"]]
    inputs += [params["fc_w_f"], params["fc_w_b"], params["fc_b"]]

    logits = pl.pallas_call(
        functools.partial(_poem_lstm_kernel, n_mid=n_mid),
        out_shape=jax.ShapeDtypeStruct((B_pad, V), jnp.float32),
        in_specs=[pl.BlockSpec(memory_space=pltpu.MemorySpace.VMEM)] * len(inputs),
        out_specs=pl.BlockSpec(memory_space=pltpu.MemorySpace.VMEM),
        scratch_shapes=[pltpu.VMEM((T, B_pad, 2 * H), jnp.float32)],
        compiler_params=pltpu.CompilerParams(vmem_limit_bytes=32 * 1024 * 1024),
        cost_estimate=_cost_estimate(T, B_pad, E, H, V, n_mid, inputs),
    )(*inputs)
    return logits[:B]


# ----------------------------------------------------------------------------
# Deterministic parameter construction (PyTorch-style init, pre-packed:
# weights stored transposed, b = b_ih + b_hh, intermediate-layer W_hh packed
# block-diagonally over [fwd, bwd], MXU weights in bf16, fc_w split).
# ----------------------------------------------------------------------------
def make_params(key, vocab_size, embed_size, hidden_size, num_layers):
    H = hidden_size
    keys = iter(jax.random.split(key, 8 * num_layers + 16))
    scale = 1.0 / float(H) ** 0.5

    def unif(shape, s=scale):
        return jax.random.uniform(next(keys), shape, jnp.float32, -s, s)

    # nn.Embedding(vocab, embed, padding_idx=0): row 0 zeroed at init.
    emb = jax.random.normal(next(keys), (vocab_size, embed_size), jnp.float32)
    emb = emb.at[0].set(0.0)

    mid = []
    d_in = embed_size
    for _ in range(num_layers - 1):
        w_ih_f, w_ih_b = unif((d_in, 4 * H)), unif((d_in, 4 * H))
        w_hh_f, w_hh_b = unif((H, 4 * H)), unif((H, 4 * H))
        b_f = unif((1, 4 * H)) + unif((1, 4 * H))       # b_ih + b_hh
        b_b = unif((1, 4 * H)) + unif((1, 4 * H))
        w_hh = jnp.zeros((2 * H, 8 * H), jnp.float32)
        w_hh = w_hh.at[:H, :4 * H].set(w_hh_f).at[H:, 4 * H:].set(w_hh_b)
        mid.append({
            "w_ih": jnp.concatenate([w_ih_f, w_ih_b], axis=1).astype(jnp.bfloat16),
            "w_hh": w_hh.astype(jnp.bfloat16),          # block-diag packed
            "b": jnp.concatenate([b_f, b_b], axis=1),
        })
        d_in = 2 * H

    final = {
        "w_ih_f": unif((d_in, 4 * H)).astype(jnp.bfloat16),
        "w_ih_b": unif((d_in, 4 * H)).astype(jnp.bfloat16),
        "w_hh_f": unif((H, 4 * H)).astype(jnp.bfloat16),
        # Only consumed by the pure-JAX reference: with zero initial state the
        # last-timestep backward output never touches W_hh_b (kernel skips it).
        "w_hh_b": unif((H, 4 * H)).astype(jnp.bfloat16),
        "b_f": unif((1, 4 * H)) + unif((1, 4 * H)),
        "b_b": unif((1, 4 * H)) + unif((1, 4 * H)),
    }

    fc_scale = 1.0 / float(2 * H) ** 0.5
    fc_w = jax.random.uniform(next(keys), (2 * H, vocab_size), jnp.float32,
                              -fc_scale, fc_scale)
    fc_b = jax.random.uniform(next(keys), (1, vocab_size), jnp.float32,
                              -fc_scale, fc_scale)

    return {"embedding": emb, "mid": mid, "final": final,
            "fc_w_f": fc_w[:H].astype(jnp.bfloat16),
            "fc_w_b": fc_w[H:].astype(jnp.bfloat16),
            "fc_b": fc_b}


# ----------------------------------------------------------------------------
# Pure-JAX reference (eval-mode bidirectional LSTM, PyTorch semantics).
# mxu_dtype=bfloat16 mirrors the kernel's MXU operand casting exactly;
# float32 is the full-precision module for a loose sanity check.
# ----------------------------------------------------------------------------
def _reference_forward(token_ids, params, mxu_dtype=jnp.float32):
    def dot(a, b):
        return jnp.dot(a.astype(mxu_dtype), b.astype(mxu_dtype),
                       preferred_element_type=jnp.float32)

    H = params["final"]["w_hh_f"].shape[0]
    G = 4 * H
    x = jnp.take(params["embedding"], token_ids, axis=0)        # (B, T, E) f32
    B = x.shape[0]

    def run_dir(x_seq, w_ih, w_hh, b, reverse):
        def step(carry, x_t):
            h, c = carry
            g = dot(x_t, w_ih) + dot(h, w_hh) + b.astype(jnp.float32)
            i = _sigmoid(g[:, :H])
            f = _sigmoid(g[:, H:2 * H])
            gg = jnp.tanh(g[:, 2 * H:3 * H])
            o = _sigmoid(g[:, 3 * H:])
            c = f * c + i * gg
            h = o * jnp.tanh(c)
            return (h, c), h

        xs = jnp.transpose(x_seq, (1, 0, 2))                    # (T, B, D)
        init = (jnp.zeros((B, H), jnp.float32), jnp.zeros((B, H), jnp.float32))
        _, hs = jax.lax.scan(step, init, xs, reverse=reverse)
        return jnp.transpose(hs, (1, 0, 2))                     # (B, T, H)

    for lp in params["mid"]:
        of = run_dir(x, lp["w_ih"][:, :G], lp["w_hh"][:H, :G], lp["b"][:, :G], False)
        ob = run_dir(x, lp["w_ih"][:, G:], lp["w_hh"][H:, G:], lp["b"][:, G:], True)
        x = jnp.concatenate([of, ob], axis=-1)

    fin = params["final"]
    of = run_dir(x, fin["w_ih_f"], fin["w_hh_f"], fin["b_f"], False)
    ob = run_dir(x, fin["w_ih_b"], fin["w_hh_b"], fin["b_b"], True)
    last = jnp.concatenate([of[:, -1], ob[:, -1]], axis=-1)     # (B, 2H)

    fc_w = jnp.concatenate([params["fc_w_f"], params["fc_w_b"]], axis=0)
    return dot(last, fc_w) + params["fc_b"]


if __name__ == "__main__":
    VOCAB = 256
    EMBED = 128
    HIDDEN = 128
    NUM_LAYERS = 2
    BATCH = 2
    SEQ = 8

    key = jax.random.PRNGKey(0)
    k_tok, k_par = jax.random.split(key)

    token_ids = jax.random.randint(k_tok, (BATCH, SEQ), 0, VOCAB, dtype=jnp.int32)
    params = make_params(k_par, VOCAB, EMBED, HIDDEN, NUM_LAYERS)

    fwd = jax.jit(poem_lstm_forward)
    logits = jax.block_until_ready(fwd(token_ids, params))

    assert logits.shape == (BATCH, VOCAB), logits.shape
    assert logits.dtype == jnp.float32

    # Tight check vs a reference with identical bf16 MXU-operand casting.
    ref_matched = _reference_forward(token_ids, params, jnp.bfloat16)
    err_m = float(jnp.max(jnp.abs(logits - ref_matched)))
    assert err_m < 2e-3, f"max abs err vs bf16-matched reference: {err_m}"

    # Loose sanity check vs the full-f32 module (bf16 MXU path tolerance).
    ref_f32 = _reference_forward(token_ids, params, jnp.float32)
    err_f = float(jnp.max(jnp.abs(logits - ref_f32)))
    assert err_f < 5e-2, f"max abs err vs f32 reference: {err_f}"

    print("KERNEL_OK")
</pallas_src>

<mosaic_0001>
module attributes {stable_mosaic.version = 11 : i64} {
  func.func @_poem_lstm_kernel(%arg0: memref<8x8xi32, #tpu.memory_space<vmem>>, %arg1: memref<256x128xf32, #tpu.memory_space<vmem>>, %arg2: memref<128x1024xbf16, #tpu.memory_space<vmem>>, %arg3: memref<256x1024xbf16, #tpu.memory_space<vmem>>, %arg4: memref<1x1024xf32, #tpu.memory_space<vmem>>, %arg5: memref<256x512xbf16, #tpu.memory_space<vmem>>, %arg6: memref<256x512xbf16, #tpu.memory_space<vmem>>, %arg7: memref<128x512xbf16, #tpu.memory_space<vmem>>, %arg8: memref<1x512xf32, #tpu.memory_space<vmem>>, %arg9: memref<1x512xf32, #tpu.memory_space<vmem>>, %arg10: memref<128x256xbf16, #tpu.memory_space<vmem>>, %arg11: memref<128x256xbf16, #tpu.memory_space<vmem>>, %arg12: memref<1x256xf32, #tpu.memory_space<vmem>>, %arg13: memref<8x256xf32, #tpu.memory_space<vmem>>, %arg14: memref<8x8x256xf32, #tpu.memory_space<vmem>>) attributes {dimension_semantics = [], scalar_prefetch = 0 : i64, scratch_operands = 1 : i64, tpu.core_type = #tpu.core_type<tc>} {
    %c0 = arith.constant 0 : index
    %c0_0 = arith.constant 0 : index
    %0 = vector.load %arg0[%c0, %c0_0] : memref<8x8xi32, #tpu.memory_space<vmem>>, vector<8x8xi32>
    %1 = tpu.iota {dimensions = array<i32: 2>} : vector<8x8x256xi32>
    %2 = vector.shape_cast %0 : vector<8x8xi32> to vector<8x8x1xi32>
    %3 = vector.broadcast %2 : vector<8x8x1xi32> to vector<8x8x256xi32>
    %4 = arith.cmpi eq, %1, %3 : vector<8x8x256xi32>
    %5 = arith.extui %4 : vector<8x8x256xi1> to vector<8x8x256xi32>
    %6 = arith.sitofp %5 : vector<8x8x256xi32> to vector<8x8x256xf32>
    %7 = vector.shape_cast %6 : vector<8x8x256xf32> to vector<64x256xf32>
    %c0_1 = arith.constant 0 : index
    %c0_2 = arith.constant 0 : index
    %8 = vector.load %arg1[%c0_1, %c0_2] : memref<256x128xf32, #tpu.memory_space<vmem>>, vector<256x128xf32>
    %cst = arith.constant dense<0.000000e+00> : vector<64x128xf32>
    %9 = tpu.matmul %7, %8, %cst {dimension_numbers = #tpu.dot_dimension_numbers<[1], [0], [0], [1], [0, 0, 1, 1], [], []>} : vector<64x256xf32>, vector<256x128xf32>, vector<64x128xf32> -> vector<64x128xf32>
    %10 = arith.truncf %9 : vector<64x128xf32> to vector<64x128xbf16>
    %c0_3 = arith.constant 0 : index
    %c0_4 = arith.constant 0 : index
    %11 = vector.load %arg2[%c0_3, %c0_4] : memref<128x1024xbf16, #tpu.memory_space<vmem>>, vector<128x1024xbf16>
    %cst_5 = arith.constant dense<0.000000e+00> : vector<64x1024xf32>
    %12 = tpu.matmul %10, %11, %cst_5 {dimension_numbers = #tpu.dot_dimension_numbers<[1], [0], [0], [1], [0, 0, 1, 1], [], []>} : vector<64x128xbf16>, vector<128x1024xbf16>, vector<64x1024xf32> -> vector<64x1024xf32>
    %c0_6 = arith.constant 0 : index
    %c0_7 = arith.constant 0 : index
    %13 = vector.load %arg4[%c0_6, %c0_7] : memref<1x1024xf32, #tpu.memory_space<vmem>>, vector<1x1024xf32>
    %14 = vector.broadcast %13 : vector<1x1024xf32> to vector<64x1024xf32>
    %15 = arith.addf %12, %14 : vector<64x1024xf32>
    %16 = vector.shape_cast %15 : vector<64x1024xf32> to vector<8x8x1024xf32>
    %c0_8 = arith.constant 0 : index
    %c0_9 = arith.constant 0 : index
    %17 = vector.load %arg3[%c0_8, %c0_9] : memref<256x1024xbf16, #tpu.memory_space<vmem>>, vector<256x1024xbf16>
    %cst_10 = arith.constant 0.000000e+00 : f32
    %18 = vector.broadcast %cst_10 : f32 to vector<8x128xf32>
    %cst_11 = arith.constant 0.000000e+00 : f32
    %19 = vector.broadcast %cst_11 : f32 to vector<8x128xf32>
    %20 = vector.extract_strided_slice %16 {offsets = [0, 0, 0], sizes = [1, 8, 512], strides = [1, 1, 1]} : vector<8x8x1024xf32> to vector<1x8x512xf32>
    %21 = vector.shape_cast %20 : vector<1x8x512xf32> to vector<8x512xf32>
    %22 = vector.extract_strided_slice %16 {offsets = [7, 0, 512], sizes = [1, 8, 512], strides = [1, 1, 1]} : vector<8x8x1024xf32> to vector<1x8x512xf32>
    %23 = vector.shape_cast %22 : vector<1x8x512xf32> to vector<8x512xf32>
    %24 = vector.extract_strided_slice %21 {offsets = [0, 0], sizes = [8, 128], strides = [1, 1]} : vector<8x512xf32> to vector<8x128xf32>
    %cst_12 = arith.constant 0.000000e+00 : f32
    %25 = vector.broadcast %cst_12 : f32 to vector<8x128xf32>
    %26 = arith.subf %25, %24 : vector<8x128xf32>
    %27 = math.exp %26 : vector<8x128xf32>
    %cst_13 = arith.constant 1.000000e+00 : f32
    %28 = vector.broadcast %cst_13 : f32 to vector<8x128xf32>
    %29 = arith.addf %28, %27 : vector<8x128xf32>
    %cst_14 = arith.constant 1.000000e+00 : f32
    %30 = vector.broadcast %cst_14 : f32 to vector<8x128xf32>
    %31 = arith.divf %30, %29 : vector<8x128xf32>
    %32 = vector.extract_strided_slice %21 {offsets = [0, 128], sizes = [8, 128], strides = [1, 1]} : vector<8x512xf32> to vector<8x128xf32>
    %cst_15 = arith.constant 0.000000e+00 : f32
    %33 = vector.broadcast %cst_15 : f32 to vector<8x128xf32>
    %34 = arith.subf %33, %32 : vector<8x128xf32>
    %35 = math.exp %34 : vector<8x128xf32>
    %cst_16 = arith.constant 1.000000e+00 : f32
    %36 = vector.broadcast %cst_16 : f32 to vector<8x128xf32>
    %37 = arith.addf %36, %35 : vector<8x128xf32>
    %cst_17 = arith.constant 1.000000e+00 : f32
    %38 = vector.broadcast %cst_17 : f32 to vector<8x128xf32>
    %39 = arith.divf %38, %37 : vector<8x128xf32>
    %40 = vector.extract_strided_slice %21 {offsets = [0, 256], sizes = [8, 128], strides = [1, 1]} : vector<8x512xf32> to vector<8x128xf32>
    %41 = math.tanh %40 : vector<8x128xf32>
    %42 = vector.extract_strided_slice %21 {offsets = [0, 384], sizes = [8, 128], strides = [1, 1]} : vector<8x512xf32> to vector<8x128xf32>
    %cst_18 = arith.constant 0.000000e+00 : f32
    %43 = vector.broadcast %cst_18 : f32 to vector<8x128xf32>
    %44 = arith.subf %43, %42 : vector<8x128xf32>
    %45 = math.exp %44 : vector<8x128xf32>
    %cst_19 = arith.constant 1.000000e+00 : f32
    %46 = vector.broadcast %cst_19 : f32 to vector<8x128xf32>
    %47 = arith.addf %46, %45 : vector<8x128xf32>
    %cst_20 = arith.constant 1.000000e+00 : f32
    %48 = vector.broadcast %cst_20 : f32 to vector<8x128xf32>
    %49 = arith.divf %48, %47 : vector<8x128xf32>
    %50 = arith.mulf %39, %18 : vector<8x128xf32>
    %51 = arith.mulf %31, %41 : vector<8x128xf32>
    %52 = arith.addf %50, %51 : vector<8x128xf32>
    %53 = math.tanh %52 : vector<8x128xf32>
    %54 = arith.mulf %49, %53 : vector<8x128xf32>
    %55 = vector.extract_strided_slice %23 {offsets = [0, 0], sizes = [8, 128], strides = [1, 1]} : vector<8x512xf32> to vector<8x128xf32>
    %cst_21 = arith.constant 0.000000e+00 : f32
    %56 = vector.broadcast %cst_21 : f32 to vector<8x128xf32>
    %57 = arith.subf %56, %55 : vector<8x128xf32>
    %58 = math.exp %57 : vector<8x128xf32>
    %cst_22 = arith.constant 1.000000e+00 : f32
    %59 = vector.broadcast %cst_22 : f32 to vector<8x128xf32>
    %60 = arith.addf %59, %58 : vector<8x128xf32>
    %cst_23 = arith.constant 1.000000e+00 : f32
    %61 = vector.broadcast %cst_23 : f32 to vector<8x128xf32>
    %62 = arith.divf %61, %60 : vector<8x128xf32>
    %63 = vector.extract_strided_slice %23 {offsets = [0, 128], sizes = [8, 128], strides = [1, 1]} : vector<8x512xf32> to vector<8x128xf32>
    %cst_24 = arith.constant 0.000000e+00 : f32
    %64 = vector.broadcast %cst_24 : f32 to vector<8x128xf32>
    %65 = arith.subf %64, %63 : vector<8x128xf32>
    %66 = math.exp %65 : vector<8x128xf32>
    %cst_25 = arith.constant 1.000000e+00 : f32
    %67 = vector.broadcast %cst_25 : f32 to vector<8x128xf32>
    %68 = arith.addf %67, %66 : vector<8x128xf32>
    %cst_26 = arith.constant 1.000000e+00 : f32
    %69 = vector.broadcast %cst_26 : f32 to vector<8x128xf32>
    %70 = arith.divf %69, %68 : vector<8x128xf32>
    %71 = vector.extract_strided_slice %23 {offsets = [0, 256], sizes = [8, 128], strides = [1, 1]} : vector<8x512xf32> to vector<8x128xf32>
    %72 = math.tanh %71 : vector<8x128xf32>
    %73 = vector.extract_strided_slice %23 {offsets = [0, 384], sizes = [8, 128], strides = [1, 1]} : vector<8x512xf32> to vector<8x128xf32>
    %cst_27 = arith.constant 0.000000e+00 : f32
    %74 = vector.broadcast %cst_27 : f32 to vector<8x128xf32>
    %75 = arith.subf %74, %73 : vector<8x128xf32>
    %76 = math.exp %75 : vector<8x128xf32>
    %cst_28 = arith.constant 1.000000e+00 : f32
    %77 = vector.broadcast %cst_28 : f32 to vector<8x128xf32>
    %78 = arith.addf %77, %76 : vector<8x128xf32>
    %cst_29 = arith.constant 1.000000e+00 : f32
    %79 = vector.broadcast %cst_29 : f32 to vector<8x128xf32>
    %80 = arith.divf %79, %78 : vector<8x128xf32>
    %81 = arith.mulf %70, %19 : vector<8x128xf32>
    %82 = arith.mulf %62, %72 : vector<8x128xf32>
    %83 = arith.addf %81, %82 : vector<8x128xf32>
    %84 = math.tanh %83 : vector<8x128xf32>
    %85 = arith.mulf %80, %84 : vector<8x128xf32>
    %c0_30 = arith.constant 0 : index
    %c0_31 = arith.constant 0 : index
    %c0_32 = arith.constant 0 : index
    %86 = vector.load %arg14[%c0_30, %c0_31, %c0_32] : memref<8x8x256xf32, #tpu.memory_space<vmem>>, vector<1x8x128xf32>
    %87 = vector.shape_cast %86 : vector<1x8x128xf32> to vector<8x128xf32>
    %88 = vector.shape_cast %54 : vector<8x128xf32> to vector<1x8x128xf32>
    tpu.vector_store %arg14[%c0_30, %c0_31, %c0_32], %88 {strides = array<i32>} : memref<8x8x256xf32, #tpu.memory_space<vmem>>, vector<1x8x128xf32>,
    %c7 = arith.constant 7 : index
    %c0_33 = arith.constant 0 : index
    %c128 = arith.constant 128 : index
    %89 = vector.load %arg14[%c7, %c0_33, %c128] : memref<8x8x256xf32, #tpu.memory_space<vmem>>, vector<1x8x128xf32>
    %90 = vector.shape_cast %89 : vector<1x8x128xf32> to vector<8x128xf32>
    %91 = vector.shape_cast %85 : vector<8x128xf32> to vector<1x8x128xf32>
    tpu.vector_store %arg14[%c7, %c0_33, %c128], %91 {strides = array<i32>} : memref<8x8x256xf32, #tpu.memory_space<vmem>>, vector<1x8x128xf32>,
    %92 = tpu.concatenate %54, %85 in 1 : vector<8x128xf32>, vector<8x128xf32> -> vector<8x256xf32>
    %93 = arith.truncf %92 : vector<8x256xf32> to vector<8x256xbf16>
    %cst_34 = arith.constant dense<0.000000e+00> : vector<8x1024xf32>
    %94 = tpu.matmul %93, %17, %cst_34 {dimension_numbers = #tpu.dot_dimension_numbers<[1], [0], [0], [1], [0, 0, 1, 1], [], []>} : vector<8x256xbf16>, vector<256x1024xbf16>, vector<8x1024xf32> -> vector<8x1024xf32>
    %95 = vector.extract_strided_slice %16 {offsets = [1, 0, 0], sizes = [1, 8, 512], strides = [1, 1, 1]} : vector<8x8x1024xf32> to vector<1x8x512xf32>
    %96 = vector.shape_cast %95 : vector<1x8x512xf32> to vector<8x512xf32>
    %97 = vector.extract_strided_slice %94 {offsets = [0, 0], sizes = [8, 512], strides = [1, 1]} : vector<8x1024xf32> to vector<8x512xf32>
    %98 = arith.addf %96, %97 : vector<8x512xf32>
    %99 = vector.extract_strided_slice %16 {offsets = [6, 0, 512], sizes = [1, 8, 512], strides = [1, 1, 1]} : vector<8x8x1024xf32> to vector<1x8x512xf32>
    %100 = vector.shape_cast %99 : vector<1x8x512xf32> to vector<8x512xf32>
    %101 = vector.extract_strided_slice %94 {offsets = [0, 512], sizes = [8, 512], strides = [1, 1]} : vector<8x1024xf32> to vector<8x512xf32>
    %102 = arith.addf %100, %101 : vector<8x512xf32>
    %103 = vector.extract_strided_slice %98 {offsets = [0, 0], sizes = [8, 128], strides = [1, 1]} : vector<8x512xf32> to vector<8x128xf32>
    %cst_35 = arith.constant 0.000000e+00 : f32
    %104 = vector.broadcast %cst_35 : f32 to vector<8x128xf32>
    %105 = arith.subf %104, %103 : vector<8x128xf32>
    %106 = math.exp %105 : vector<8x128xf32>
    %cst_36 = arith.constant 1.000000e+00 : f32
    %107 = vector.broadcast %cst_36 : f32 to vector<8x128xf32>
    %108 = arith.addf %107, %106 : vector<8x128xf32>
    %cst_37 = arith.constant 1.000000e+00 : f32
    %109 = vector.broadcast %cst_37 : f32 to vector<8x128xf32>
    %110 = arith.divf %109, %108 : vector<8x128xf32>
    %111 = vector.extract_strided_slice %98 {offsets = [0, 128], sizes = [8, 128], strides = [1, 1]} : vector<8x512xf32> to vector<8x128xf32>
    %cst_38 = arith.constant 0.000000e+00 : f32
    %112 = vector.broadcast %cst_38 : f32 to vector<8x128xf32>
    %113 = arith.subf %112, %111 : vector<8x128xf32>
    %114 = math.exp %113 : vector<8x128xf32>
    %cst_39 = arith.constant 1.000000e+00 : f32
    %115 = vector.broadcast %cst_39 : f32 to vector<8x128xf32>
    %116 = arith.addf %115, %114 : vector<8x128xf32>
    %cst_40 = arith.constant 1.000000e+00 : f32
    %117 = vector.broadcast %cst_40 : f32 to vector<8x128xf32>
    %118 = arith.divf %117, %116 : vector<8x128xf32>
    %119 = vector.extract_strided_slice %98 {offsets = [0, 256], sizes = [8, 128], strides = [1, 1]} : vector<8x512xf32> to vector<8x128xf32>
    %120 = math.tanh %119 : vector<8x128xf32>
    %121 = vector.extract_strided_slice %98 {offsets = [0, 384], sizes = [8, 128], strides = [1, 1]} : vector<8x512xf32> to vector<8x128xf32>
    %cst_41 = arith.constant 0.000000e+00 : f32
    %122 = vector.broadcast %cst_41 : f32 to vector<8x128xf32>
    %123 = arith.subf %122, %121 : vector<8x128xf32>
    %124 = math.exp %123 : vector<8x128xf32>
    %cst_42 = arith.constant 1.000000e+00 : f32
    %125 = vector.broadcast %cst_42 : f32 to vector<8x128xf32>
    %126 = arith.addf %125, %124 : vector<8x128xf32>
    %cst_43 = arith.constant 1.000000e+00 : f32
    %127 = vector.broadcast %cst_43 : f32 to vector<8x128xf32>
    %128 = arith.divf %127, %126 : vector<8x128xf32>
    %129 = arith.mulf %118, %52 : vector<8x128xf32>
    %130 = arith.mulf %110, %120 : vector<8x128xf32>
    %131 = arith.addf %129, %130 : vector<8x128xf32>
    %132 = math.tanh %131 : vector<8x128xf32>
    %133 = arith.mulf %128, %132 : vector<8x128xf32>
    %134 = vector.extract_strided_slice %102 {offsets = [0, 0], sizes = [8, 128], strides = [1, 1]} : vector<8x512xf32> to vector<8x128xf32>
    %cst_44 = arith.constant 0.000000e+00 : f32
    %135 = vector.broadcast %cst_44 : f32 to vector<8x128xf32>
    %136 = arith.subf %135, %134 : vector<8x128xf32>
    %137 = math.exp %136 : vector<8x128xf32>
    %cst_45 = arith.constant 1.000000e+00 : f32
    %138 = vector.broadcast %cst_45 : f32 to vector<8x128xf32>
    %139 = arith.addf %138, %137 : vector<8x128xf32>
    %cst_46 = arith.constant 1.000000e+00 : f32
    %140 = vector.broadcast %cst_46 : f32 to vector<8x128xf32>
    %141 = arith.divf %140, %139 : vector<8x128xf32>
    %142 = vector.extract_strided_slice %102 {offsets = [0, 128], sizes = [8, 128], strides = [1, 1]} : vector<8x512xf32> to vector<8x128xf32>
    %cst_47 = arith.constant 0.000000e+00 : f32
    %143 = vector.broadcast %cst_47 : f32 to vector<8x128xf32>
    %144 = arith.subf %143, %142 : vector<8x128xf32>
    %145 = math.exp %144 : vector<8x128xf32>
    %cst_48 = arith.constant 1.000000e+00 : f32
    %146 = vector.broadcast %cst_48 : f32 to vector<8x128xf32>
    %147 = arith.addf %146, %145 : vector<8x128xf32>
    %cst_49 = arith.constant 1.000000e+00 : f32
    %148 = vector.broadcast %cst_49 : f32 to vector<8x128xf32>
    %149 = arith.divf %148, %147 : vector<8x128xf32>
    %150 = vector.extract_strided_slice %102 {offsets = [0, 256], sizes = [8, 128], strides = [1, 1]} : vector<8x512xf32> to vector<8x128xf32>
    %151 = math.tanh %150 : vector<8x128xf32>
    %152 = vector.extract_strided_slice %102 {offsets = [0, 384], sizes = [8, 128], strides = [1, 1]} : vector<8x512xf32> to vector<8x128xf32>
    %cst_50 = arith.constant 0.000000e+00 : f32
    %153 = vector.broadcast %cst_50 : f32 to vector<8x128xf32>
    %154 = arith.subf %153, %152 : vector<8x128xf32>
    %155 = math.exp %154 : vector<8x128xf32>
    %cst_51 = arith.constant 1.000000e+00 : f32
    %156 = vector.broadcast %cst_51 : f32 to vector<8x128xf32>
    %157 = arith.addf %156, %155 : vector<8x128xf32>
    %cst_52 = arith.constant 1.000000e+00 : f32
    %158 = vector.broadcast %cst_52 : f32 to vector<8x128xf32>
    %159 = arith.divf %158, %157 : vector<8x128xf32>
    %160 = arith.mulf %149, %83 : vector<8x128xf32>
    %161 = arith.mulf %141, %151 : vector<8x128xf32>
    %162 = arith.addf %160, %161 : vector<8x128xf32>
    %163 = math.tanh %162 : vector<8x128xf32>
    %164 = arith.mulf %159, %163 : vector<8x128xf32>
    %c1 = arith.constant 1 : index
    %c0_53 = arith.constant 0 : index
    %c0_54 = arith.constant 0 : index
    %165 = vector.load %arg14[%c1, %c0_53, %c0_54] : memref<8x8x256xf32, #tpu.memory_space<vmem>>, vector<1x8x128xf32>
    %166 = vector.shape_cast %165 : vector<1x8x128xf32> to vector<8x128xf32>
    %167 = vector.shape_cast %133 : vector<8x128xf32> to vector<1x8x128xf32>
    tpu.vector_store %arg14[%c1, %c0_53, %c0_54], %167 {strides = array<i32>} : memref<8x8x256xf32, #tpu.memory_space<vmem>>, vector<1x8x128xf32>,
    %c6 = arith.constant 6 : index
    %c0_55 = arith.constant 0 : index
    %c128_56 = arith.constant 128 : index
    %168 = vector.load %arg14[%c6, %c0_55, %c128_56] : memref<8x8x256xf32, #tpu.memory_space<vmem>>, vector<1x8x128xf32>
    %169 = vector.shape_cast %168 : vector<1x8x128xf32> to vector<8x128xf32>
    %170 = vector.shape_cast %164 : vector<8x128xf32> to vector<1x8x128xf32>
    tpu.vector_store %arg14[%c6, %c0_55, %c128_56], %170 {strides = array<i32>} : memref<8x8x256xf32, #tpu.memory_space<vmem>>, vector<1x8x128xf32>,
    %171 = tpu.concatenate %133, %164 in 1 : vector<8x128xf32>, vector<8x128xf32> -> vector<8x256xf32>
    %172 = arith.truncf %171 : vector<8x256xf32> to vector<8x256xbf16>
    %cst_57 = arith.constant dense<0.000000e+00> : vector<8x1024xf32>
    %173 = tpu.matmul %172, %17, %cst_57 {dimension_numbers = #tpu.dot_dimension_numbers<[1], [0], [0], [1], [0, 0, 1, 1], [], []>} : vector<8x256xbf16>, vector<256x1024xbf16>, vector<8x1024xf32> -> vector<8x1024xf32>
    %174 = vector.extract_strided_slice %16 {offsets = [2, 0, 0], sizes = [1, 8, 512], strides = [1, 1, 1]} : vector<8x8x1024xf32> to vector<1x8x512xf32>
    %175 = vector.shape_cast %174 : vector<1x8x512xf32> to vector<8x512xf32>
    %176 = vector.extract_strided_slice %173 {offsets = [0, 0], sizes = [8, 512], strides = [1, 1]} : vector<8x1024xf32> to vector<8x512xf32>
    %177 = arith.addf %175, %176 : vector<8x512xf32>
    %178 = vector.extract_strided_slice %16 {offsets = [5, 0, 512], sizes = [1, 8, 512], strides = [1, 1, 1]} : vector<8x8x1024xf32> to vector<1x8x512xf32>
    %179 = vector.shape_cast %178 : vector<1x8x512xf32> to vector<8x512xf32>
    %180 = vector.extract_strided_slice %173 {offsets = [0, 512], sizes = [8, 512], strides = [1, 1]} : vector<8x1024xf32> to vector<8x512xf32>
    %181 = arith.addf %179, %180 : vector<8x512xf32>
    %182 = vector.extract_strided_slice %177 {offsets = [0, 0], sizes = [8, 128], strides = [1, 1]} : vector<8x512xf32> to vector<8x128xf32>
    %cst_58 = arith.constant 0.000000e+00 : f32
    %183 = vector.broadcast %cst_58 : f32 to vector<8x128xf32>
    %184 = arith.subf %183, %182 : vector<8x128xf32>
    %185 = math.exp %184 : vector<8x128xf32>
    %cst_59 = arith.constant 1.000000e+00 : f32
    %186 = vector.broadcast %cst_59 : f32 to vector<8x128xf32>
    %187 = arith.addf %186, %185 : vector<8x128xf32>
    %cst_60 = arith.constant 1.000000e+00 : f32
    %188 = vector.broadcast %cst_60 : f32 to vector<8x128xf32>
    %189 = arith.divf %188, %187 : vector<8x128xf32>
    %190 = vector.extract_strided_slice %177 {offsets = [0, 128], sizes = [8, 128], strides = [1, 1]} : vector<8x512xf32> to vector<8x128xf32>
    %cst_61 = arith.constant 0.000000e+00 : f32
    %191 = vector.broadcast %cst_61 : f32 to vector<8x128xf32>
    %192 = arith.subf %191, %190 : vector<8x128xf32>
    %193 = math.exp %192 : vector<8x128xf32>
    %cst_62 = arith.constant 1.000000e+00 : f32
    %194 = vector.broadcast %cst_62 : f32 to vector<8x128xf32>
    %195 = arith.addf %194, %193 : vector<8x128xf32>
    %cst_63 = arith.constant 1.000000e+00 : f32
    %196 = vector.broadcast %cst_63 : f32 to vector<8x128xf32>
    %197 = arith.divf %196, %195 : vector<8x128xf32>
    %198 = vector.extract_strided_slice %177 {offsets = [0, 256], sizes = [8, 128], strides = [1, 1]} : vector<8x512xf32> to vector<8x128xf32>
    %199 = math.tanh %198 : vector<8x128xf32>
    %200 = vector.extract_strided_slice %177 {offsets = [0, 384], sizes = [8, 128], strides = [1, 1]} : vector<8x512xf32> to vector<8x128xf32>
    %cst_64 = arith.constant 0.000000e+00 : f32
    %201 = vector.broadcast %cst_64 : f32 to vector<8x128xf32>
    %202 = arith.subf %201, %200 : vector<8x128xf32>
    %203 = math.exp %202 : vector<8x128xf32>
    %cst_65 = arith.constant 1.000000e+00 : f32
    %204 = vector.broadcast %cst_65 : f32 to vector<8x128xf32>
    %205 = arith.addf %204, %203 : vector<8x128xf32>
    %cst_66 = arith.constant 1.000000e+00 : f32
    %206 = vector.broadcast %cst_66 : f32 to vector<8x128xf32>
    %207 = arith.divf %206, %205 : vector<8x128xf32>
    %208 = arith.mulf %197, %131 : vector<8x128xf32>
    %209 = arith.mulf %189, %199 : vector<8x128xf32>
    %210 = arith.addf %208, %209 : vector<8x128xf32>
    %211 = math.tanh %210 : vector<8x128xf32>
    %212 = arith.mulf %207, %211 : vector<8x128xf32>
    %213 = vector.extract_strided_slice %181 {offsets = [0, 0], sizes = [8, 128], strides = [1, 1]} : vector<8x512xf32> to vector<8x128xf32>
    %cst_67 = arith.constant 0.000000e+00 : f32
    %214 = vector.broadcast %cst_67 : f32 to vector<8x128xf32>
    %215 = arith.subf %214, %213 : vector<8x128xf32>
    %216 = math.exp %215 : vector<8x128xf32>
    %cst_68 = arith.constant 1.000000e+00 : f32
    %217 = vector.broadcast %cst_68 : f32 to vector<8x128xf32>
    %218 = arith.addf %217, %216 : vector<8x128xf32>
    %cst_69 = arith.constant 1.000000e+00 : f32
    %219 = vector.broadcast %cst_69 : f32 to vector<8x128xf32>
    %220 = arith.divf %219, %218 : vector<8x128xf32>
    %221 = vector.extract_strided_slice %181 {offsets = [0, 128], sizes = [8, 128], strides = [1, 1]} : vector<8x512xf32> to vector<8x128xf32>
    %cst_70 = arith.constant 0.000000e+00 : f32
    %222 = vector.broadcast %cst_70 : f32 to vector<8x128xf32>
    %223 = arith.subf %222, %221 : vector<8x128xf32>
    %224 = math.exp %223 : vector<8x128xf32>
    %cst_71 = arith.constant 1.000000e+00 : f32
    %225 = vector.broadcast %cst_71 : f32 to vector<8x128xf32>
    %226 = arith.addf %225, %224 : vector<8x128xf32>
    %cst_72 = arith.constant 1.000000e+00 : f32
    %227 = vector.broadcast %cst_72 : f32 to vector<8x128xf32>
    %228 = arith.divf %227, %226 : vector<8x128xf32>
    %229 = vector.extract_strided_slice %181 {offsets = [0, 256], sizes = [8, 128], strides = [1, 1]} : vector<8x512xf32> to vector<8x128xf32>
    %230 = math.tanh %229 : vector<8x128xf32>
    %231 = vector.extract_strided_slice %181 {offsets = [0, 384], sizes = [8, 128], strides = [1, 1]} : vector<8x512xf32> to vector<8x128xf32>
    %cst_73 = arith.constant 0.000000e+00 : f32
    %232 = vector.broadcast %cst_73 : f32 to vector<8x128xf32>
    %233 = arith.subf %232, %231 : vector<8x128xf32>
    %234 = math.exp %233 : vector<8x128xf32>
    %cst_74 = arith.constant 1.000000e+00 : f32
    %235 = vector.broadcast %cst_74 : f32 to vector<8x128xf32>
    %236 = arith.addf %235, %234 : vector<8x128xf32>
    %cst_75 = arith.constant 1.000000e+00 : f32
    %237 = vector.broadcast %cst_75 : f32 to vector<8x128xf32>
    %238 = arith.divf %237, %236 : vector<8x128xf32>
    %239 = arith.mulf %228, %162 : vector<8x128xf32>
    %240 = arith.mulf %220, %230 : vector<8x128xf32>
    %241 = arith.addf %239, %240 : vector<8x128xf32>
    %242 = math.tanh %241 : vector<8x128xf32>
    %243 = arith.mulf %238, %242 : vector<8x128xf32>
    %c2 = arith.constant 2 : index
    %c0_76 = arith.constant 0 : index
    %c0_77 = arith.constant 0 : index
    %244 = vector.load %arg14[%c2, %c0_76, %c0_77] : memref<8x8x256xf32, #tpu.memory_space<vmem>>, vector<1x8x128xf32>
    %245 = vector.shape_cast %244 : vector<1x8x128xf32> to vector<8x128xf32>
    %246 = vector.shape_cast %212 : vector<8x128xf32> to vector<1x8x128xf32>
    tpu.vector_store %arg14[%c2, %c0_76, %c0_77], %246 {strides = array<i32>} : memref<8x8x256xf32, #tpu.memory_space<vmem>>, vector<1x8x128xf32>,
    %c5 = arith.constant 5 : index
    %c0_78 = arith.constant 0 : index
    %c128_79 = arith.constant 128 : index
    %247 = vector.load %arg14[%c5, %c0_78, %c128_79] : memref<8x8x256xf32, #tpu.memory_space<vmem>>, vector<1x8x128xf32>
    %248 = vector.shape_cast %247 : vector<1x8x128xf32> to vector<8x128xf32>
    %249 = vector.shape_cast %243 : vector<8x128xf32> to vector<1x8x128xf32>
    tpu.vector_store %arg14[%c5, %c0_78, %c128_79], %249 {strides = array<i32>} : memref<8x8x256xf32, #tpu.memory_space<vmem>>, vector<1x8x128xf32>,
    %250 = tpu.concatenate %212, %243 in 1 : vector<8x128xf32>, vector<8x128xf32> -> vector<8x256xf32>
    %251 = arith.truncf %250 : vector<8x256xf32> to vector<8x256xbf16>
    %cst_80 = arith.constant dense<0.000000e+00> : vector<8x1024xf32>
    %252 = tpu.matmul %251, %17, %cst_80 {dimension_numbers = #tpu.dot_dimension_numbers<[1], [0], [0], [1], [0, 0, 1, 1], [], []>} : vector<8x256xbf16>, vector<256x1024xbf16>, vector<8x1024xf32> -> vector<8x1024xf32>
    %253 = vector.extract_strided_slice %16 {offsets = [3, 0, 0], sizes = [1, 8, 512], strides = [1, 1, 1]} : vector<8x8x1024xf32> to vector<1x8x512xf32>
    %254 = vector.shape_cast %253 : vector<1x8x512xf32> to vector<8x512xf32>
    %255 = vector.extract_strided_slice %252 {offsets = [0, 0], sizes = [8, 512], strides = [1, 1]} : vector<8x1024xf32> to vector<8x512xf32>
    %256 = arith.addf %254, %255 : vector<8x512xf32>
    %257 = vector.extract_strided_slice %16 {offsets = [4, 0, 512], sizes = [1, 8, 512], strides = [1, 1, 1]} : vector<8x8x1024xf32> to vector<1x8x512xf32>
    %258 = vector.shape_cast %257 : vector<1x8x512xf32> to vector<8x512xf32>
    %259 = vector.extract_strided_slice %252 {offsets = [0, 512], sizes = [8, 512], strides = [1, 1]} : vector<8x1024xf32> to vector<8x512xf32>
    %260 = arith.addf %258, %259 : vector<8x512xf32>
    %261 = vector.extract_strided_slice %256 {offsets = [0, 0], sizes = [8, 128], strides = [1, 1]} : vector<8x512xf32> to vector<8x128xf32>
    %cst_81 = arith.constant 0.000000e+00 : f32
    %262 = vector.broadcast %cst_81 : f32 to vector<8x128xf32>
    %263 = arith.subf %262, %261 : vector<8x128xf32>
    %264 = math.exp %263 : vector<8x128xf32>
    %cst_82 = arith.constant 1.000000e+00 : f32
    %265 = vector.broadcast %cst_82 : f32 to vector<8x128xf32>
    %266 = arith.addf %265, %264 : vector<8x128xf32>
    %cst_83 = arith.constant 1.000000e+00 : f32
    %267 = vector.broadcast %cst_83 : f32 to vector<8x128xf32>
    %268 = arith.divf %267, %266 : vector<8x128xf32>
    %269 = vector.extract_strided_slice %256 {offsets = [0, 128], sizes = [8, 128], strides = [1, 1]} : vector<8x512xf32> to vector<8x128xf32>
    %cst_84 = arith.constant 0.000000e+00 : f32
    %270 = vector.broadcast %cst_84 : f32 to vector<8x128xf32>
    %271 = arith.subf %270, %269 : vector<8x128xf32>
    %272 = math.exp %271 : vector<8x128xf32>
    %cst_85 = arith.constant 1.000000e+00 : f32
    %273 = vector.broadcast %cst_85 : f32 to vector<8x128xf32>
    %274 = arith.addf %273, %272 : vector<8x128xf32>
    %cst_86 = arith.constant 1.000000e+00 : f32
    %275 = vector.broadcast %cst_86 : f32 to vector<8x128xf32>
    %276 = arith.divf %275, %274 : vector<8x128xf32>
    %277 = vector.extract_strided_slice %256 {offsets = [0, 256], sizes = [8, 128], strides = [1, 1]} : vector<8x512xf32> to vector<8x128xf32>
    %278 = math.tanh %277 : vector<8x128xf32>
    %279 = vector.extract_strided_slice %256 {offsets = [0, 384], sizes = [8, 128], strides = [1, 1]} : vector<8x512xf32> to vector<8x128xf32>
    %cst_87 = arith.constant 0.000000e+00 : f32
    %280 = vector.broadcast %cst_87 : f32 to vector<8x128xf32>
    %281 = arith.subf %280, %279 : vector<8x128xf32>
    %282 = math.exp %281 : vector<8x128xf32>
    %cst_88 = arith.constant 1.000000e+00 : f32
    %283 = vector.broadcast %cst_88 : f32 to vector<8x128xf32>
    %284 = arith.addf %283, %282 : vector<8x128xf32>
    %cst_89 = arith.constant 1.000000e+00 : f32
    %285 = vector.broadcast %cst_89 : f32 to vector<8x128xf32>
    %286 = arith.divf %285, %284 : vector<8x128xf32>
    %287 = arith.mulf %276, %210 : vector<8x128xf32>
    %288 = arith.mulf %268, %278 : vector<8x128xf32>
    %289 = arith.addf %287, %288 : vector<8x128xf32>
    %290 = math.tanh %289 : vector<8x128xf32>
    %291 = arith.mulf %286, %290 : vector<8x128xf32>
    %292 = vector.extract_strided_slice %260 {offsets = [0, 0], sizes = [8, 128], strides = [1, 1]} : vector<8x512xf32> to vector<8x128xf32>
    %cst_90 = arith.constant 0.000000e+00 : f32
    %293 = vector.broadcast %cst_90 : f32 to vector<8x128xf32>
    %294 = arith.subf %293, %292 : vector<8x128xf32>
    %295 = math.exp %294 : vector<8x128xf32>
    %cst_91 = arith.constant 1.000000e+00 : f32
    %296 = vector.broadcast %cst_91 : f32 to vector<8x128xf32>
    %297 = arith.addf %296, %295 : vector<8x128xf32>
    %cst_92 = arith.constant 1.000000e+00 : f32
    %298 = vector.broadcast %cst_92 : f32 to vector<8x128xf32>
    %299 = arith.divf %298, %297 : vector<8x128xf32>
    %300 = vector.extract_strided_slice %260 {offsets = [0, 128], sizes = [8, 128], strides = [1, 1]} : vector<8x512xf32> to vector<8x128xf32>
    %cst_93 = arith.constant 0.000000e+00 : f32
    %301 = vector.broadcast %cst_93 : f32 to vector<8x128xf32>
    %302 = arith.subf %301, %300 : vector<8x128xf32>
    %303 = math.exp %302 : vector<8x128xf32>
    %cst_94 = arith.constant 1.000000e+00 : f32
    %304 = vector.broadcast %cst_94 : f32 to vector<8x128xf32>
    %305 = arith.addf %304, %303 : vector<8x128xf32>
    %cst_95 = arith.constant 1.000000e+00 : f32
    %306 = vector.broadcast %cst_95 : f32 to vector<8x128xf32>
    %307 = arith.divf %306, %305 : vector<8x128xf32>
    %308 = vector.extract_strided_slice %260 {offsets = [0, 256], sizes = [8, 128], strides = [1, 1]} : vector<8x512xf32> to vector<8x128xf32>
    %309 = math.tanh %308 : vector<8x128xf32>
    %310 = vector.extract_strided_slice %260 {offsets = [0, 384], sizes = [8, 128], strides = [1, 1]} : vector<8x512xf32> to vector<8x128xf32>
    %cst_96 = arith.constant 0.000000e+00 : f32
    %311 = vector.broadcast %cst_96 : f32 to vector<8x128xf32>
    %312 = arith.subf %311, %310 : vector<8x128xf32>
    %313 = math.exp %312 : vector<8x128xf32>
    %cst_97 = arith.constant 1.000000e+00 : f32
    %314 = vector.broadcast %cst_97 : f32 to vector<8x128xf32>
    %315 = arith.addf %314, %313 : vector<8x128xf32>
    %cst_98 = arith.constant 1.000000e+00 : f32
    %316 = vector.broadcast %cst_98 : f32 to vector<8x128xf32>
    %317 = arith.divf %316, %315 : vector<8x128xf32>
    %318 = arith.mulf %307, %241 : vector<8x128xf32>
    %319 = arith.mulf %299, %309 : vector<8x128xf32>
    %320 = arith.addf %318, %319 : vector<8x128xf32>
    %321 = math.tanh %320 : vector<8x128xf32>
    %322 = arith.mulf %317, %321 : vector<8x128xf32>
    %c3 = arith.constant 3 : index
    %c0_99 = arith.constant 0 : index
    %c0_100 = arith.constant 0 : index
    %323 = vector.load %arg14[%c3, %c0_99, %c0_100] : memref<8x8x256xf32, #tpu.memory_space<vmem>>, vector<1x8x128xf32>
    %324 = vector.shape_cast %323 : vector<1x8x128xf32> to vector<8x128xf32>
    %325 = vector.shape_cast %291 : vector<8x128xf32> to vector<1x8x128xf32>
    tpu.vector_store %arg14[%c3, %c0_99, %c0_100], %325 {strides = array<i32>} : memref<8x8x256xf32, #tpu.memory_space<vmem>>, vector<1x8x128xf32>,
    %c4 = arith.constant 4 : index
    %c0_101 = arith.constant 0 : index
    %c128_102 = arith.constant 128 : index
    %326 = vector.load %arg14[%c4, %c0_101, %c128_102] : memref<8x8x256xf32, #tpu.memory_space<vmem>>, vector<1x8x128xf32>
    %327 = vector.shape_cast %326 : vector<1x8x128xf32> to vector<8x128xf32>
    %328 = vector.shape_cast %322 : vector<8x128xf32> to vector<1x8x128xf32>
    tpu.vector_store %arg14[%c4, %c0_101, %c128_102], %328 {strides = array<i32>} : memref<8x8x256xf32, #tpu.memory_space<vmem>>, vector<1x8x128xf32>,
    %329 = tpu.concatenate %291, %322 in 1 : vector<8x128xf32>, vector<8x128xf32> -> vector<8x256xf32>
    %330 = arith.truncf %329 : vector<8x256xf32> to vector<8x256xbf16>
    %cst_103 = arith.constant dense<0.000000e+00> : vector<8x1024xf32>
    %331 = tpu.matmul %330, %17, %cst_103 {dimension_numbers = #tpu.dot_dimension_numbers<[1], [0], [0], [1], [0, 0, 1, 1], [], []>} : vector<8x256xbf16>, vector<256x1024xbf16>, vector<8x1024xf32> -> vector<8x1024xf32>
    %332 = vector.extract_strided_slice %16 {offsets = [4, 0, 0], sizes = [1, 8, 512], strides = [1, 1, 1]} : vector<8x8x1024xf32> to vector<1x8x512xf32>
    %333 = vector.shape_cast %332 : vector<1x8x512xf32> to vector<8x512xf32>
    %334 = vector.extract_strided_slice %331 {offsets = [0, 0], sizes = [8, 512], strides = [1, 1]} : vector<8x1024xf32> to vector<8x512xf32>
    %335 = arith.addf %333, %334 : vector<8x512xf32>
    %336 = vector.extract_strided_slice %16 {offsets = [3, 0, 512], sizes = [1, 8, 512], strides = [1, 1, 1]} : vector<8x8x1024xf32> to vector<1x8x512xf32>
    %337 = vector.shape_cast %336 : vector<1x8x512xf32> to vector<8x512xf32>
    %338 = vector.extract_strided_slice %331 {offsets = [0, 512], sizes = [8, 512], strides = [1, 1]} : vector<8x1024xf32> to vector<8x512xf32>
    %339 = arith.addf %337, %338 : vector<8x512xf32>
    %340 = vector.extract_strided_slice %335 {offsets = [0, 0], sizes = [8, 128], strides = [1, 1]} : vector<8x512xf32> to vector<8x128xf32>
    %cst_104 = arith.constant 0.000000e+00 : f32
    %341 = vector.broadcast %cst_104 : f32 to vector<8x128xf32>
    %342 = arith.subf %341, %340 : vector<8x128xf32>
    %343 = math.exp %342 : vector<8x128xf32>
    %cst_105 = arith.constant 1.000000e+00 : f32
    %344 = vector.broadcast %cst_105 : f32 to vector<8x128xf32>
    %345 = arith.addf %344, %343 : vector<8x128xf32>
    %cst_106 = arith.constant 1.000000e+00 : f32
    %346 = vector.broadcast %cst_106 : f32 to vector<8x128xf32>
    %347 = arith.divf %346, %345 : vector<8x128xf32>
    %348 = vector.extract_strided_slice %335 {offsets = [0, 128], sizes = [8, 128], strides = [1, 1]} : vector<8x512xf32> to vector<8x128xf32>
    %cst_107 = arith.constant 0.000000e+00 : f32
    %349 = vector.broadcast %cst_107 : f32 to vector<8x128xf32>
    %350 = arith.subf %349, %348 : vector<8x128xf32>
    %351 = math.exp %350 : vector<8x128xf32>
    %cst_108 = arith.constant 1.000000e+00 : f32
    %352 = vector.broadcast %cst_108 : f32 to vector<8x128xf32>
    %353 = arith.addf %352, %351 : vector<8x128xf32>
    %cst_109 = arith.constant 1.000000e+00 : f32
    %354 = vector.broadcast %cst_109 : f32 to vector<8x128xf32>
    %355 = arith.divf %354, %353 : vector<8x128xf32>
    %356 = vector.extract_strided_slice %335 {offsets = [0, 256], sizes = [8, 128], strides = [1, 1]} : vector<8x512xf32> to vector<8x128xf32>
    %357 = math.tanh %356 : vector<8x128xf32>
    %358 = vector.extract_strided_slice %335 {offsets = [0, 384], sizes = [8, 128], strides = [1, 1]} : vector<8x512xf32> to vector<8x128xf32>
    %cst_110 = arith.constant 0.000000e+00 : f32
    %359 = vector.broadcast %cst_110 : f32 to vector<8x128xf32>
    %360 = arith.subf %359, %358 : vector<8x128xf32>
    %361 = math.exp %360 : vector<8x128xf32>
    %cst_111 = arith.constant 1.000000e+00 : f32
    %362 = vector.broadcast %cst_111 : f32 to vector<8x128xf32>
    %363 = arith.addf %362, %361 : vector<8x128xf32>
    %cst_112 = arith.constant 1.000000e+00 : f32
    %364 = vector.broadcast %cst_112 : f32 to vector<8x128xf32>
    %365 = arith.divf %364, %363 : vector<8x128xf32>
    %366 = arith.mulf %355, %289 : vector<8x128xf32>
    %367 = arith.mulf %347, %357 : vector<8x128xf32>
    %368 = arith.addf %366, %367 : vector<8x128xf32>
    %369 = math.tanh %368 : vector<8x128xf32>
    %370 = arith.mulf %365, %369 : vector<8x128xf32>
    %371 = vector.extract_strided_slice %339 {offsets = [0, 0], sizes = [8, 128], strides = [1, 1]} : vector<8x512xf32> to vector<8x128xf32>
    %cst_113 = arith.constant 0.000000e+00 : f32
    %372 = vector.broadcast %cst_113 : f32 to vector<8x128xf32>
    %373 = arith.subf %372, %371 : vector<8x128xf32>
    %374 = math.exp %373 : vector<8x128xf32>
    %cst_114 = arith.constant 1.000000e+00 : f32
    %375 = vector.broadcast %cst_114 : f32 to vector<8x128xf32>
    %376 = arith.addf %375, %374 : vector<8x128xf32>
    %cst_115 = arith.constant 1.000000e+00 : f32
    %377 = vector.broadcast %cst_115 : f32 to vector<8x128xf32>
    %378 = arith.divf %377, %376 : vector<8x128xf32>
    %379 = vector.extract_strided_slice %339 {offsets = [0, 128], sizes = [8, 128], strides = [1, 1]} : vector<8x512xf32> to vector<8x128xf32>
    %cst_116 = arith.constant 0.000000e+00 : f32
    %380 = vector.broadcast %cst_116 : f32 to vector<8x128xf32>
    %381 = arith.subf %380, %379 : vector<8x128xf32>
    %382 = math.exp %381 : vector<8x128xf32>
    %cst_117 = arith.constant 1.000000e+00 : f32
    %383 = vector.broadcast %cst_117 : f32 to vector<8x128xf32>
    %384 = arith.addf %383, %382 : vector<8x128xf32>
    %cst_118 = arith.constant 1.000000e+00 : f32
    %385 = vector.broadcast %cst_118 : f32 to vector<8x128xf32>
    %386 = arith.divf %385, %384 : vector<8x128xf32>
    %387 = vector.extract_strided_slice %339 {offsets = [0, 256], sizes = [8, 128], strides = [1, 1]} : vector<8x512xf32> to vector<8x128xf32>
    %388 = math.tanh %387 : vector<8x128xf32>
    %389 = vector.extract_strided_slice %339 {offsets = [0, 384], sizes = [8, 128], strides = [1, 1]} : vector<8x512xf32> to vector<8x128xf32>
    %cst_119 = arith.constant 0.000000e+00 : f32
    %390 = vector.broadcast %cst_119 : f32 to vector<8x128xf32>
    %391 = arith.subf %390, %389 : vector<8x128xf32>
    %392 = math.exp %391 : vector<8x128xf32>
    %cst_120 = arith.constant 1.000000e+00 : f32
    %393 = vector.broadcast %cst_120 : f32 to vector<8x128xf32>
    %394 = arith.addf %393, %392 : vector<8x128xf32>
    %cst_121 = arith.constant 1.000000e+00 : f32
    %395 = vector.broadcast %cst_121 : f32 to vector<8x128xf32>
    %396 = arith.divf %395, %394 : vector<8x128xf32>
    %397 = arith.mulf %386, %320 : vector<8x128xf32>
    %398 = arith.mulf %378, %388 : vector<8x128xf32>
    %399 = arith.addf %397, %398 : vector<8x128xf32>
    %400 = math.tanh %399 : vector<8x128xf32>
    %401 = arith.mulf %396, %400 : vector<8x128xf32>
    %c4_122 = arith.constant 4 : index
    %c0_123 = arith.constant 0 : index
    %c0_124 = arith.constant 0 : index
    %402 = vector.load %arg14[%c4_122, %c0_123, %c0_124] : memref<8x8x256xf32, #tpu.memory_space<vmem>>, vector<1x8x128xf32>
    %403 = vector.shape_cast %402 : vector<1x8x128xf32> to vector<8x128xf32>
    %404 = vector.shape_cast %370 : vector<8x128xf32> to vector<1x8x128xf32>
    tpu.vector_store %arg14[%c4_122, %c0_123, %c0_124], %404 {strides = array<i32>} : memref<8x8x256xf32, #tpu.memory_space<vmem>>, vector<1x8x128xf32>,
    %c3_125 = arith.constant 3 : index
    %c0_126 = arith.constant 0 : index
    %c128_127 = arith.constant 128 : index
    %405 = vector.load %arg14[%c3_125, %c0_126, %c128_127] : memref<8x8x256xf32, #tpu.memory_space<vmem>>, vector<1x8x128xf32>
    %406 = vector.shape_cast %405 : vector<1x8x128xf32> to vector<8x128xf32>
    %407 = vector.shape_cast %401 : vector<8x128xf32> to vector<1x8x128xf32>
    tpu.vector_store %arg14[%c3_125, %c0_126, %c128_127], %407 {strides = array<i32>} : memref<8x8x256xf32, #tpu.memory_space<vmem>>, vector<1x8x128xf32>,
    %408 = tpu.concatenate %370, %401 in 1 : vector<8x128xf32>, vector<8x128xf32> -> vector<8x256xf32>
    %409 = arith.truncf %408 : vector<8x256xf32> to vector<8x256xbf16>
    %cst_128 = arith.constant dense<0.000000e+00> : vector<8x1024xf32>
    %410 = tpu.matmul %409, %17, %cst_128 {dimension_numbers = #tpu.dot_dimension_numbers<[1], [0], [0], [1], [0, 0, 1, 1], [], []>} : vector<8x256xbf16>, vector<256x1024xbf16>, vector<8x1024xf32> -> vector<8x1024xf32>
    %411 = vector.extract_strided_slice %16 {offsets = [5, 0, 0], sizes = [1, 8, 512], strides = [1, 1, 1]} : vector<8x8x1024xf32> to vector<1x8x512xf32>
    %412 = vector.shape_cast %411 : vector<1x8x512xf32> to vector<8x512xf32>
    %413 = vector.extract_strided_slice %410 {offsets = [0, 0], sizes = [8, 512], strides = [1, 1]} : vector<8x1024xf32> to vector<8x512xf32>
    %414 = arith.addf %412, %413 : vector<8x512xf32>
    %415 = vector.extract_strided_slice %16 {offsets = [2, 0, 512], sizes = [1, 8, 512], strides = [1, 1, 1]} : vector<8x8x1024xf32> to vector<1x8x512xf32>
    %416 = vector.shape_cast %415 : vector<1x8x512xf32> to vector<8x512xf32>
    %417 = vector.extract_strided_slice %410 {offsets = [0, 512], sizes = [8, 512], strides = [1, 1]} : vector<8x1024xf32> to vector<8x512xf32>
    %418 = arith.addf %416, %417 : vector<8x512xf32>
    %419 = vector.extract_strided_slice %414 {offsets = [0, 0], sizes = [8, 128], strides = [1, 1]} : vector<8x512xf32> to vector<8x128xf32>
    %cst_129 = arith.constant 0.000000e+00 : f32
    %420 = vector.broadcast %cst_129 : f32 to vector<8x128xf32>
    %421 = arith.subf %420, %419 : vector<8x128xf32>
    %422 = math.exp %421 : vector<8x128xf32>
    %cst_130 = arith.constant 1.000000e+00 : f32
    %423 = vector.broadcast %cst_130 : f32 to vector<8x128xf32>
    %424 = arith.addf %423, %422 : vector<8x128xf32>
    %cst_131 = arith.constant 1.000000e+00 : f32
    %425 = vector.broadcast %cst_131 : f32 to vector<8x128xf32>
    %426 = arith.divf %425, %424 : vector<8x128xf32>
    %427 = vector.extract_strided_slice %414 {offsets = [0, 128], sizes = [8, 128], strides = [1, 1]} : vector<8x512xf32> to vector<8x128xf32>
    %cst_132 = arith.constant 0.000000e+00 : f32
    %428 = vector.broadcast %cst_132 : f32 to vector<8x128xf32>
    %429 = arith.subf %428, %427 : vector<8x128xf32>
    %430 = math.exp %429 : vector<8x128xf32>
    %cst_133 = arith.constant 1.000000e+00 : f32
    %431 = vector.broadcast %cst_133 : f32 to vector<8x128xf32>
    %432 = arith.addf %431, %430 : vector<8x128xf32>
    %cst_134 = arith.constant 1.000000e+00 : f32
    %433 = vector.broadcast %cst_134 : f32 to vector<8x128xf32>
    %434 = arith.divf %433, %432 : vector<8x128xf32>
    %435 = vector.extract_strided_slice %414 {offsets = [0, 256], sizes = [8, 128], strides = [1, 1]} : vector<8x512xf32> to vector<8x128xf32>
    %436 = math.tanh %435 : vector<8x128xf32>
    %437 = vector.extract_strided_slice %414 {offsets = [0, 384], sizes = [8, 128], strides = [1, 1]} : vector<8x512xf32> to vector<8x128xf32>
    %cst_135 = arith.constant 0.000000e+00 : f32
    %438 = vector.broadcast %cst_135 : f32 to vector<8x128xf32>
    %439 = arith.subf %438, %437 : vector<8x128xf32>
    %440 = math.exp %439 : vector<8x128xf32>
    %cst_136 = arith.constant 1.000000e+00 : f32
    %441 = vector.broadcast %cst_136 : f32 to vector<8x128xf32>
    %442 = arith.addf %441, %440 : vector<8x128xf32>
    %cst_137 = arith.constant 1.000000e+00 : f32
    %443 = vector.broadcast %cst_137 : f32 to vector<8x128xf32>
    %444 = arith.divf %443, %442 : vector<8x128xf32>
    %445 = arith.mulf %434, %368 : vector<8x128xf32>
    %446 = arith.mulf %426, %436 : vector<8x128xf32>
    %447 = arith.addf %445, %446 : vector<8x128xf32>
    %448 = math.tanh %447 : vector<8x128xf32>
    %449 = arith.mulf %444, %448 : vector<8x128xf32>
    %450 = vector.extract_strided_slice %418 {offsets = [0, 0], sizes = [8, 128], strides = [1, 1]} : vector<8x512xf32> to vector<8x128xf32>
    %cst_138 = arith.constant 0.000000e+00 : f32
    %451 = vector.broadcast %cst_138 : f32 to vector<8x128xf32>
    %452 = arith.subf %451, %450 : vector<8x128xf32>
    %453 = math.exp %452 : vector<8x128xf32>
    %cst_139 = arith.constant 1.000000e+00 : f32
    %454 = vector.broadcast %cst_139 : f32 to vector<8x128xf32>
    %455 = arith.addf %454, %453 : vector<8x128xf32>
    %cst_140 = arith.constant 1.000000e+00 : f32
    %456 = vector.broadcast %cst_140 : f32 to vector<8x128xf32>
    %457 = arith.divf %456, %455 : vector<8x128xf32>
    %458 = vector.extract_strided_slice %418 {offsets = [0, 128], sizes = [8, 128], strides = [1, 1]} : vector<8x512xf32> to vector<8x128xf32>
    %cst_141 = arith.constant 0.000000e+00 : f32
    %459 = vector.broadcast %cst_141 : f32 to vector<8x128xf32>
    %460 = arith.subf %459, %458 : vector<8x128xf32>
    %461 = math.exp %460 : vector<8x128xf32>
    %cst_142 = arith.constant 1.000000e+00 : f32
    %462 = vector.broadcast %cst_142 : f32 to vector<8x128xf32>
    %463 = arith.addf %462, %461 : vector<8x128xf32>
    %cst_143 = arith.constant 1.000000e+00 : f32
    %464 = vector.broadcast %cst_143 : f32 to vector<8x128xf32>
    %465 = arith.divf %464, %463 : vector<8x128xf32>
    %466 = vector.extract_strided_slice %418 {offsets = [0, 256], sizes = [8, 128], strides = [1, 1]} : vector<8x512xf32> to vector<8x128xf32>
    %467 = math.tanh %466 : vector<8x128xf32>
    %468 = vector.extract_strided_slice %418 {offsets = [0, 384], sizes = [8, 128], strides = [1, 1]} : vector<8x512xf32> to vector<8x128xf32>
    %cst_144 = arith.constant 0.000000e+00 : f32
    %469 = vector.broadcast %cst_144 : f32 to vector<8x128xf32>
    %470 = arith.subf %469, %468 : vector<8x128xf32>
    %471 = math.exp %470 : vector<8x128xf32>
    %cst_145 = arith.constant 1.000000e+00 : f32
    %472 = vector.broadcast %cst_145 : f32 to vector<8x128xf32>
    %473 = arith.addf %472, %471 : vector<8x128xf32>
    %cst_146 = arith.constant 1.000000e+00 : f32
    %474 = vector.broadcast %cst_146 : f32 to vector<8x128xf32>
    %475 = arith.divf %474, %473 : vector<8x128xf32>
    %476 = arith.mulf %465, %399 : vector<8x128xf32>
    %477 = arith.mulf %457, %467 : vector<8x128xf32>
    %478 = arith.addf %476, %477 : vector<8x128xf32>
    %479 = math.tanh %478 : vector<8x128xf32>
    %480 = arith.mulf %475, %479 : vector<8x128xf32>
    %c5_147 = arith.constant 5 : index
    %c0_148 = arith.constant 0 : index
    %c0_149 = arith.constant 0 : index
    %481 = vector.load %arg14[%c5_147, %c0_148, %c0_149] : memref<8x8x256xf32, #tpu.memory_space<vmem>>, vector<1x8x128xf32>
    %482 = vector.shape_cast %481 : vector<1x8x128xf32> to vector<8x128xf32>
    %483 = vector.shape_cast %449 : vector<8x128xf32> to vector<1x8x128xf32>
    tpu.vector_store %arg14[%c5_147, %c0_148, %c0_149], %483 {strides = array<i32>} : memref<8x8x256xf32, #tpu.memory_space<vmem>>, vector<1x8x128xf32>,
    %c2_150 = arith.constant 2 : index
    %c0_151 = arith.constant 0 : index
    %c128_152 = arith.constant 128 : index
    %484 = vector.load %arg14[%c2_150, %c0_151, %c128_152] : memref<8x8x256xf32, #tpu.memory_space<vmem>>, vector<1x8x128xf32>
    %485 = vector.shape_cast %484 : vector<1x8x128xf32> to vector<8x128xf32>
    %486 = vector.shape_cast %480 : vector<8x128xf32> to vector<1x8x128xf32>
    tpu.vector_store %arg14[%c2_150, %c0_151, %c128_152], %486 {strides = array<i32>} : memref<8x8x256xf32, #tpu.memory_space<vmem>>, vector<1x8x128xf32>,
    %487 = tpu.concatenate %449, %480 in 1 : vector<8x128xf32>, vector<8x128xf32> -> vector<8x256xf32>
    %488 = arith.truncf %487 : vector<8x256xf32> to vector<8x256xbf16>
    %cst_153 = arith.constant dense<0.000000e+00> : vector<8x1024xf32>
    %489 = tpu.matmul %488, %17, %cst_153 {dimension_numbers = #tpu.dot_dimension_numbers<[1], [0], [0], [1], [0, 0, 1, 1], [], []>} : vector<8x256xbf16>, vector<256x1024xbf16>, vector<8x1024xf32> -> vector<8x1024xf32>
    %490 = vector.extract_strided_slice %16 {offsets = [6, 0, 0], sizes = [1, 8, 512], strides = [1, 1, 1]} : vector<8x8x1024xf32> to vector<1x8x512xf32>
    %491 = vector.shape_cast %490 : vector<1x8x512xf32> to vector<8x512xf32>
    %492 = vector.extract_strided_slice %489 {offsets = [0, 0], sizes = [8, 512], strides = [1, 1]} : vector<8x1024xf32> to vector<8x512xf32>
    %493 = arith.addf %491, %492 : vector<8x512xf32>
    %494 = vector.extract_strided_slice %16 {offsets = [1, 0, 512], sizes = [1, 8, 512], strides = [1, 1, 1]} : vector<8x8x1024xf32> to vector<1x8x512xf32>
    %495 = vector.shape_cast %494 : vector<1x8x512xf32> to vector<8x512xf32>
    %496 = vector.extract_strided_slice %489 {offsets = [0, 512], sizes = [8, 512], strides = [1, 1]} : vector<8x1024xf32> to vector<8x512xf32>
    %497 = arith.addf %495, %496 : vector<8x512xf32>
    %498 = vector.extract_strided_slice %493 {offsets = [0, 0], sizes = [8, 128], strides = [1, 1]} : vector<8x512xf32> to vector<8x128xf32>
    %cst_154 = arith.constant 0.000000e+00 : f32
    %499 = vector.broadcast %cst_154 : f32 to vector<8x128xf32>
    %500 = arith.subf %499, %498 : vector<8x128xf32>
    %501 = math.exp %500 : vector<8x128xf32>
    %cst_155 = arith.constant 1.000000e+00 : f32
    %502 = vector.broadcast %cst_155 : f32 to vector<8x128xf32>
    %503 = arith.addf %502, %501 : vector<8x128xf32>
    %cst_156 = arith.constant 1.000000e+00 : f32
    %504 = vector.broadcast %cst_156 : f32 to vector<8x128xf32>
    %505 = arith.divf %504, %503 : vector<8x128xf32>
    %506 = vector.extract_strided_slice %493 {offsets = [0, 128], sizes = [8, 128], strides = [1, 1]} : vector<8x512xf32> to vector<8x128xf32>
    %cst_157 = arith.constant 0.000000e+00 : f32
    %507 = vector.broadcast %cst_157 : f32 to vector<8x128xf32>
    %508 = arith.subf %507, %506 : vector<8x128xf32>
    %509 = math.exp %508 : vector<8x128xf32>
    %cst_158 = arith.constant 1.000000e+00 : f32
    %510 = vector.broadcast %cst_158 : f32 to vector<8x128xf32>
    %511 = arith.addf %510, %509 : vector<8x128xf32>
    %cst_159 = arith.constant 1.000000e+00 : f32
    %512 = vector.broadcast %cst_159 : f32 to vector<8x128xf32>
    %513 = arith.divf %512, %511 : vector<8x128xf32>
    %514 = vector.extract_strided_slice %493 {offsets = [0, 256], sizes = [8, 128], strides = [1, 1]} : vector<8x512xf32> to vector<8x128xf32>
    %515 = math.tanh %514 : vector<8x128xf32>
    %516 = vector.extract_strided_slice %493 {offsets = [0, 384], sizes = [8, 128], strides = [1, 1]} : vector<8x512xf32> to vector<8x128xf32>
    %cst_160 = arith.constant 0.000000e+00 : f32
    %517 = vector.broadcast %cst_160 : f32 to vector<8x128xf32>
    %518 = arith.subf %517, %516 : vector<8x128xf32>
    %519 = math.exp %518 : vector<8x128xf32>
    %cst_161 = arith.constant 1.000000e+00 : f32
    %520 = vector.broadcast %cst_161 : f32 to vector<8x128xf32>
    %521 = arith.addf %520, %519 : vector<8x128xf32>
    %cst_162 = arith.constant 1.000000e+00 : f32
    %522 = vector.broadcast %cst_162 : f32 to vector<8x128xf32>
    %523 = arith.divf %522, %521 : vector<8x128xf32>
    %524 = arith.mulf %513, %447 : vector<8x128xf32>
    %525 = arith.mulf %505, %515 : vector<8x128xf32>
    %526 = arith.addf %524, %525 : vector<8x128xf32>
    %527 = math.tanh %526 : vector<8x128xf32>
    %528 = arith.mulf %523, %527 : vector<8x128xf32>
    %529 = vector.extract_strided_slice %497 {offsets = [0, 0], sizes = [8, 128], strides = [1, 1]} : vector<8x512xf32> to vector<8x128xf32>
    %cst_163 = arith.constant 0.000000e+00 : f32
    %530 = vector.broadcast %cst_163 : f32 to vector<8x128xf32>
    %531 = arith.subf %530, %529 : vector<8x128xf32>
    %532 = math.exp %531 : vector<8x128xf32>
    %cst_164 = arith.constant 1.000000e+00 : f32
    %533 = vector.broadcast %cst_164 : f32 to vector<8x128xf32>
    %534 = arith.addf %533, %532 : vector<8x128xf32>
    %cst_165 = arith.constant 1.000000e+00 : f32
    %535 = vector.broadcast %cst_165 : f32 to vector<8x128xf32>
    %536 = arith.divf %535, %534 : vector<8x128xf32>
    %537 = vector.extract_strided_slice %497 {offsets = [0, 128], sizes = [8, 128], strides = [1, 1]} : vector<8x512xf32> to vector<8x128xf32>
    %cst_166 = arith.constant 0.000000e+00 : f32
    %538 = vector.broadcast %cst_166 : f32 to vector<8x128xf32>
    %539 = arith.subf %538, %537 : vector<8x128xf32>
    %540 = math.exp %539 : vector<8x128xf32>
    %cst_167 = arith.constant 1.000000e+00 : f32
    %541 = vector.broadcast %cst_167 : f32 to vector<8x128xf32>
    %542 = arith.addf %541, %540 : vector<8x128xf32>
    %cst_168 = arith.constant 1.000000e+00 : f32
    %543 = vector.broadcast %cst_168 : f32 to vector<8x128xf32>
    %544 = arith.divf %543, %542 : vector<8x128xf32>
    %545 = vector.extract_strided_slice %497 {offsets = [0, 256], sizes = [8, 128], strides = [1, 1]} : vector<8x512xf32> to vector<8x128xf32>
    %546 = math.tanh %545 : vector<8x128xf32>
    %547 = vector.extract_strided_slice %497 {offsets = [0, 384], sizes = [8, 128], strides = [1, 1]} : vector<8x512xf32> to vector<8x128xf32>
    %cst_169 = arith.constant 0.000000e+00 : f32
    %548 = vector.broadcast %cst_169 : f32 to vector<8x128xf32>
    %549 = arith.subf %548, %547 : vector<8x128xf32>
    %550 = math.exp %549 : vector<8x128xf32>
    %cst_170 = arith.constant 1.000000e+00 : f32
    %551 = vector.broadcast %cst_170 : f32 to vector<8x128xf32>
    %552 = arith.addf %551, %550 : vector<8x128xf32>
    %cst_171 = arith.constant 1.000000e+00 : f32
    %553 = vector.broadcast %cst_171 : f32 to vector<8x128xf32>
    %554 = arith.divf %553, %552 : vector<8x128xf32>
    %555 = arith.mulf %544, %478 : vector<8x128xf32>
    %556 = arith.mulf %536, %546 : vector<8x128xf32>
    %557 = arith.addf %555, %556 : vector<8x128xf32>
    %558 = math.tanh %557 : vector<8x128xf32>
    %559 = arith.mulf %554, %558 : vector<8x128xf32>
    %c6_172 = arith.constant 6 : index
    %c0_173 = arith.constant 0 : index
    %c0_174 = arith.constant 0 : index
    %560 = vector.load %arg14[%c6_172, %c0_173, %c0_174] : memref<8x8x256xf32, #tpu.memory_space<vmem>>, vector<1x8x128xf32>
    %561 = vector.shape_cast %560 : vector<1x8x128xf32> to vector<8x128xf32>
    %562 = vector.shape_cast %528 : vector<8x128xf32> to vector<1x8x128xf32>
    tpu.vector_store %arg14[%c6_172, %c0_173, %c0_174], %562 {strides = array<i32>} : memref<8x8x256xf32, #tpu.memory_space<vmem>>, vector<1x8x128xf32>,
    %c1_175 = arith.constant 1 : index
    %c0_176 = arith.constant 0 : index
    %c128_177 = arith.constant 128 : index
    %563 = vector.load %arg14[%c1_175, %c0_176, %c128_177] : memref<8x8x256xf32, #tpu.memory_space<vmem>>, vector<1x8x128xf32>
    %564 = vector.shape_cast %563 : vector<1x8x128xf32> to vector<8x128xf32>
    %565 = vector.shape_cast %559 : vector<8x128xf32> to vector<1x8x128xf32>
    tpu.vector_store %arg14[%c1_175, %c0_176, %c128_177], %565 {strides = array<i32>} : memref<8x8x256xf32, #tpu.memory_space<vmem>>, vector<1x8x128xf32>,
    %566 = tpu.concatenate %528, %559 in 1 : vector<8x128xf32>, vector<8x128xf32> -> vector<8x256xf32>
    %567 = arith.truncf %566 : vector<8x256xf32> to vector<8x256xbf16>
    %cst_178 = arith.constant dense<0.000000e+00> : vector<8x1024xf32>
    %568 = tpu.matmul %567, %17, %cst_178 {dimension_numbers = #tpu.dot_dimension_numbers<[1], [0], [0], [1], [0, 0, 1, 1], [], []>} : vector<8x256xbf16>, vector<256x1024xbf16>, vector<8x1024xf32> -> vector<8x1024xf32>
    %569 = vector.extract_strided_slice %16 {offsets = [7, 0, 0], sizes = [1, 8, 512], strides = [1, 1, 1]} : vector<8x8x1024xf32> to vector<1x8x512xf32>
    %570 = vector.shape_cast %569 : vector<1x8x512xf32> to vector<8x512xf32>
    %571 = vector.extract_strided_slice %568 {offsets = [0, 0], sizes = [8, 512], strides = [1, 1]} : vector<8x1024xf32> to vector<8x512xf32>
    %572 = arith.addf %570, %571 : vector<8x512xf32>
    %573 = vector.extract_strided_slice %16 {offsets = [0, 0, 512], sizes = [1, 8, 512], strides = [1, 1, 1]} : vector<8x8x1024xf32> to vector<1x8x512xf32>
    %574 = vector.shape_cast %573 : vector<1x8x512xf32> to vector<8x512xf32>
    %575 = vector.extract_strided_slice %568 {offsets = [0, 512], sizes = [8, 512], strides = [1, 1]} : vector<8x1024xf32> to vector<8x512xf32>
    %576 = arith.addf %574, %575 : vector<8x512xf32>
    %577 = vector.extract_strided_slice %572 {offsets = [0, 0], sizes = [8, 128], strides = [1, 1]} : vector<8x512xf32> to vector<8x128xf32>
    %cst_179 = arith.constant 0.000000e+00 : f32
    %578 = vector.broadcast %cst_179 : f32 to vector<8x128xf32>
    %579 = arith.subf %578, %577 : vector<8x128xf32>
    %580 = math.exp %579 : vector<8x128xf32>
    %cst_180 = arith.constant 1.000000e+00 : f32
    %581 = vector.broadcast %cst_180 : f32 to vector<8x128xf32>
    %582 = arith.addf %581, %580 : vector<8x128xf32>
    %cst_181 = arith.constant 1.000000e+00 : f32
    %583 = vector.broadcast %cst_181 : f32 to vector<8x128xf32>
    %584 = arith.divf %583, %582 : vector<8x128xf32>
    %585 = vector.extract_strided_slice %572 {offsets = [0, 128], sizes = [8, 128], strides = [1, 1]} : vector<8x512xf32> to vector<8x128xf32>
    %cst_182 = arith.constant 0.000000e+00 : f32
    %586 = vector.broadcast %cst_182 : f32 to vector<8x128xf32>
    %587 = arith.subf %586, %585 : vector<8x128xf32>
    %588 = math.exp %587 : vector<8x128xf32>
    %cst_183 = arith.constant 1.000000e+00 : f32
    %589 = vector.broadcast %cst_183 : f32 to vector<8x128xf32>
    %590 = arith.addf %589, %588 : vector<8x128xf32>
    %cst_184 = arith.constant 1.000000e+00 : f32
    %591 = vector.broadcast %cst_184 : f32 to vector<8x128xf32>
    %592 = arith.divf %591, %590 : vector<8x128xf32>
    %593 = vector.extract_strided_slice %572 {offsets = [0, 256], sizes = [8, 128], strides = [1, 1]} : vector<8x512xf32> to vector<8x128xf32>
    %594 = math.tanh %593 : vector<8x128xf32>
    %595 = vector.extract_strided_slice %572 {offsets = [0, 384], sizes = [8, 128], strides = [1, 1]} : vector<8x512xf32> to vector<8x128xf32>
    %cst_185 = arith.constant 0.000000e+00 : f32
    %596 = vector.broadcast %cst_185 : f32 to vector<8x128xf32>
    %597 = arith.subf %596, %595 : vector<8x128xf32>
    %598 = math.exp %597 : vector<8x128xf32>
    %cst_186 = arith.constant 1.000000e+00 : f32
    %599 = vector.broadcast %cst_186 : f32 to vector<8x128xf32>
    %600 = arith.addf %599, %598 : vector<8x128xf32>
    %cst_187 = arith.constant 1.000000e+00 : f32
    %601 = vector.broadcast %cst_187 : f32 to vector<8x128xf32>
    %602 = arith.divf %601, %600 : vector<8x128xf32>
    %603 = arith.mulf %592, %526 : vector<8x128xf32>
    %604 = arith.mulf %584, %594 : vector<8x128xf32>
    %605 = arith.addf %603, %604 : vector<8x128xf32>
    %606 = math.tanh %605 : vector<8x128xf32>
    %607 = arith.mulf %602, %606 : vector<8x128xf32>
    %608 = vector.extract_strided_slice %576 {offsets = [0, 0], sizes = [8, 128], strides = [1, 1]} : vector<8x512xf32> to vector<8x128xf32>
    %cst_188 = arith.constant 0.000000e+00 : f32
    %609 = vector.broadcast %cst_188 : f32 to vector<8x128xf32>
    %610 = arith.subf %609, %608 : vector<8x128xf32>
    %611 = math.exp %610 : vector<8x128xf32>
    %cst_189 = arith.constant 1.000000e+00 : f32
    %612 = vector.broadcast %cst_189 : f32 to vector<8x128xf32>
    %613 = arith.addf %612, %611 : vector<8x128xf32>
    %cst_190 = arith.constant 1.000000e+00 : f32
    %614 = vector.broadcast %cst_190 : f32 to vector<8x128xf32>
    %615 = arith.divf %614, %613 : vector<8x128xf32>
    %616 = vector.extract_strided_slice %576 {offsets = [0, 128], sizes = [8, 128], strides = [1, 1]} : vector<8x512xf32> to vector<8x128xf32>
    %cst_191 = arith.constant 0.000000e+00 : f32
    %617 = vector.broadcast %cst_191 : f32 to vector<8x128xf32>
    %618 = arith.subf %617, %616 : vector<8x128xf32>
    %619 = math.exp %618 : vector<8x128xf32>
    %cst_192 = arith.constant 1.000000e+00 : f32
    %620 = vector.broadcast %cst_192 : f32 to vector<8x128xf32>
    %621 = arith.addf %620, %619 : vector<8x128xf32>
    %cst_193 = arith.constant 1.000000e+00 : f32
    %622 = vector.broadcast %cst_193 : f32 to vector<8x128xf32>
    %623 = arith.divf %622, %621 : vector<8x128xf32>
    %624 = vector.extract_strided_slice %576 {offsets = [0, 256], sizes = [8, 128], strides = [1, 1]} : vector<8x512xf32> to vector<8x128xf32>
    %625 = math.tanh %624 : vector<8x128xf32>
    %626 = vector.extract_strided_slice %576 {offsets = [0, 384], sizes = [8, 128], strides = [1, 1]} : vector<8x512xf32> to vector<8x128xf32>
    %cst_194 = arith.constant 0.000000e+00 : f32
    %627 = vector.broadcast %cst_194 : f32 to vector<8x128xf32>
    %628 = arith.subf %627, %626 : vector<8x128xf32>
    %629 = math.exp %628 : vector<8x128xf32>
    %cst_195 = arith.constant 1.000000e+00 : f32
    %630 = vector.broadcast %cst_195 : f32 to vector<8x128xf32>
    %631 = arith.addf %630, %629 : vector<8x128xf32>
    %cst_196 = arith.constant 1.000000e+00 : f32
    %632 = vector.broadcast %cst_196 : f32 to vector<8x128xf32>
    %633 = arith.divf %632, %631 : vector<8x128xf32>
    %634 = arith.mulf %623, %557 : vector<8x128xf32>
    %635 = arith.mulf %615, %625 : vector<8x128xf32>
    %636 = arith.addf %634, %635 : vector<8x128xf32>
    %637 = math.tanh %636 : vector<8x128xf32>
    %638 = arith.mulf %633, %637 : vector<8x128xf32>
    %c7_197 = arith.constant 7 : index
    %c0_198 = arith.constant 0 : index
    %c0_199 = arith.constant 0 : index
    %639 = vector.load %arg14[%c7_197, %c0_198, %c0_199] : memref<8x8x256xf32, #tpu.memory_space<vmem>>, vector<1x8x128xf32>
    %640 = vector.shape_cast %639 : vector<1x8x128xf32> to vector<8x128xf32>
    %641 = vector.shape_cast %607 : vector<8x128xf32> to vector<1x8x128xf32>
    tpu.vector_store %arg14[%c7_197, %c0_198, %c0_199], %641 {strides = array<i32>} : memref<8x8x256xf32, #tpu.memory_space<vmem>>, vector<1x8x128xf32>,
    %c0_200 = arith.constant 0 : index
    %c0_201 = arith.constant 0 : index
    %c128_202 = arith.constant 128 : index
    %642 = vector.load %arg14[%c0_200, %c0_201, %c128_202] : memref<8x8x256xf32, #tpu.memory_space<vmem>>, vector<1x8x128xf32>
    %643 = vector.shape_cast %642 : vector<1x8x128xf32> to vector<8x128xf32>
    %644 = vector.shape_cast %638 : vector<8x128xf32> to vector<1x8x128xf32>
    tpu.vector_store %arg14[%c0_200, %c0_201, %c128_202], %644 {strides = array<i32>} : memref<8x8x256xf32, #tpu.memory_space<vmem>>, vector<1x8x128xf32>,
    %c0_203 = arith.constant 0 : index
    %c0_204 = arith.constant 0 : index
    %c0_205 = arith.constant 0 : index
    %645 = vector.load %arg14[%c0_203, %c0_204, %c0_205] : memref<8x8x256xf32, #tpu.memory_space<vmem>>, vector<8x8x256xf32>
    %646 = vector.shape_cast %645 : vector<8x8x256xf32> to vector<64x256xf32>
    %647 = arith.truncf %646 : vector<64x256xf32> to vector<64x256xbf16>
    %c0_206 = arith.constant 0 : index
    %c0_207 = arith.constant 0 : index
    %648 = vector.load %arg5[%c0_206, %c0_207] : memref<256x512xbf16, #tpu.memory_space<vmem>>, vector<256x512xbf16>
    %cst_208 = arith.constant dense<0.000000e+00> : vector<64x512xf32>
    %649 = tpu.matmul %647, %648, %cst_208 {dimension_numbers = #tpu.dot_dimension_numbers<[1], [0], [0], [1], [0, 0, 1, 1], [], []>} : vector<64x256xbf16>, vector<256x512xbf16>, vector<64x512xf32> -> vector<64x512xf32>
    %c0_209 = arith.constant 0 : index
    %c0_210 = arith.constant 0 : index
    %650 = vector.load %arg8[%c0_209, %c0_210] : memref<1x512xf32, #tpu.memory_space<vmem>>, vector<1x512xf32>
    %651 = vector.broadcast %650 : vector<1x512xf32> to vector<64x512xf32>
    %652 = arith.addf %649, %651 : vector<64x512xf32>
    %653 = vector.shape_cast %652 : vector<64x512xf32> to vector<8x8x512xf32>
    %c0_211 = arith.constant 0 : index
    %c0_212 = arith.constant 0 : index
    %654 = vector.load %arg7[%c0_211, %c0_212] : memref<128x512xbf16, #tpu.memory_space<vmem>>, vector<128x512xbf16>
    %cst_213 = arith.constant 0.000000e+00 : f32
    %655 = vector.broadcast %cst_213 : f32 to vector<8x128xf32>
    %656 = vector.extract_strided_slice %653 {offsets = [0, 0, 0], sizes = [1, 8, 512], strides = [1, 1, 1]} : vector<8x8x512xf32> to vector<1x8x512xf32>
    %657 = vector.shape_cast %656 : vector<1x8x512xf32> to vector<8x512xf32>
    %658 = vector.extract_strided_slice %657 {offsets = [0, 0], sizes = [8, 128], strides = [1, 1]} : vector<8x512xf32> to vector<8x128xf32>
    %cst_214 = arith.constant 0.000000e+00 : f32
    %659 = vector.broadcast %cst_214 : f32 to vector<8x128xf32>
    %660 = arith.subf %659, %658 : vector<8x128xf32>
    %661 = math.exp %660 : vector<8x128xf32>
    %cst_215 = arith.constant 1.000000e+00 : f32
    %662 = vector.broadcast %cst_215 : f32 to vector<8x128xf32>
    %663 = arith.addf %662, %661 : vector<8x128xf32>
    %cst_216 = arith.constant 1.000000e+00 : f32
    %664 = vector.broadcast %cst_216 : f32 to vector<8x128xf32>
    %665 = arith.divf %664, %663 : vector<8x128xf32>
    %666 = vector.extract_strided_slice %657 {offsets = [0, 128], sizes = [8, 128], strides = [1, 1]} : vector<8x512xf32> to vector<8x128xf32>
    %cst_217 = arith.constant 0.000000e+00 : f32
    %667 = vector.broadcast %cst_217 : f32 to vector<8x128xf32>
    %668 = arith.subf %667, %666 : vector<8x128xf32>
    %669 = math.exp %668 : vector<8x128xf32>
    %cst_218 = arith.constant 1.000000e+00 : f32
    %670 = vector.broadcast %cst_218 : f32 to vector<8x128xf32>
    %671 = arith.addf %670, %669 : vector<8x128xf32>
    %cst_219 = arith.constant 1.000000e+00 : f32
    %672 = vector.broadcast %cst_219 : f32 to vector<8x128xf32>
    %673 = arith.divf %672, %671 : vector<8x128xf32>
    %674 = vector.extract_strided_slice %657 {offsets = [0, 256], sizes = [8, 128], strides = [1, 1]} : vector<8x512xf32> to vector<8x128xf32>
    %675 = math.tanh %674 : vector<8x128xf32>
    %676 = vector.extract_strided_slice %657 {offsets = [0, 384], sizes = [8, 128], strides = [1, 1]} : vector<8x512xf32> to vector<8x128xf32>
    %cst_220 = arith.constant 0.000000e+00 : f32
    %677 = vector.broadcast %cst_220 : f32 to vector<8x128xf32>
    %678 = arith.subf %677, %676 : vector<8x128xf32>
    %679 = math.exp %678 : vector<8x128xf32>
    %cst_221 = arith.constant 1.000000e+00 : f32
    %680 = vector.broadcast %cst_221 : f32 to vector<8x128xf32>
    %681 = arith.addf %680, %679 : vector<8x128xf32>
    %cst_222 = arith.constant 1.000000e+00 : f32
    %682 = vector.broadcast %cst_222 : f32 to vector<8x128xf32>
    %683 = arith.divf %682, %681 : vector<8x128xf32>
    %684 = arith.mulf %673, %655 : vector<8x128xf32>
    %685 = arith.mulf %665, %675 : vector<8x128xf32>
    %686 = arith.addf %684, %685 : vector<8x128xf32>
    %687 = math.tanh %686 : vector<8x128xf32>
    %688 = arith.mulf %683, %687 : vector<8x128xf32>
    %689 = arith.truncf %688 : vector<8x128xf32> to vector<8x128xbf16>
    %690 = vector.extract_strided_slice %653 {offsets = [1, 0, 0], sizes = [1, 8, 512], strides = [1, 1, 1]} : vector<8x8x512xf32> to vector<1x8x512xf32>
    %691 = vector.shape_cast %690 : vector<1x8x512xf32> to vector<8x512xf32>
    %cst_223 = arith.constant dense<0.000000e+00> : vector<8x512xf32>
    %692 = tpu.matmul %689, %654, %cst_223 {dimension_numbers = #tpu.dot_dimension_numbers<[1], [0], [0], [1], [0, 0, 1, 1], [], []>} : vector<8x128xbf16>, vector<128x512xbf16>, vector<8x512xf32> -> vector<8x512xf32>
    %693 = arith.addf %691, %692 : vector<8x512xf32>
    %694 = vector.extract_strided_slice %693 {offsets = [0, 0], sizes = [8, 128], strides = [1, 1]} : vector<8x512xf32> to vector<8x128xf32>
    %cst_224 = arith.constant 0.000000e+00 : f32
    %695 = vector.broadcast %cst_224 : f32 to vector<8x128xf32>
    %696 = arith.subf %695, %694 : vector<8x128xf32>
    %697 = math.exp %696 : vector<8x128xf32>
    %cst_225 = arith.constant 1.000000e+00 : f32
    %698 = vector.broadcast %cst_225 : f32 to vector<8x128xf32>
    %699 = arith.addf %698, %697 : vector<8x128xf32>
    %cst_226 = arith.constant 1.000000e+00 : f32
    %700 = vector.broadcast %cst_226 : f32 to vector<8x128xf32>
    %701 = arith.divf %700, %699 : vector<8x128xf32>
    %702 = vector.extract_strided_slice %693 {offsets = [0, 128], sizes = [8, 128], strides = [1, 1]} : vector<8x512xf32> to vector<8x128xf32>
    %cst_227 = arith.constant 0.000000e+00 : f32
    %703 = vector.broadcast %cst_227 : f32 to vector<8x128xf32>
    %704 = arith.subf %703, %702 : vector<8x128xf32>
    %705 = math.exp %704 : vector<8x128xf32>
    %cst_228 = arith.constant 1.000000e+00 : f32
    %706 = vector.broadcast %cst_228 : f32 to vector<8x128xf32>
    %707 = arith.addf %706, %705 : vector<8x128xf32>
    %cst_229 = arith.constant 1.000000e+00 : f32
    %708 = vector.broadcast %cst_229 : f32 to vector<8x128xf32>
    %709 = arith.divf %708, %707 : vector<8x128xf32>
    %710 = vector.extract_strided_slice %693 {offsets = [0, 256], sizes = [8, 128], strides = [1, 1]} : vector<8x512xf32> to vector<8x128xf32>
    %711 = math.tanh %710 : vector<8x128xf32>
    %712 = vector.extract_strided_slice %693 {offsets = [0, 384], sizes = [8, 128], strides = [1, 1]} : vector<8x512xf32> to vector<8x128xf32>
    %cst_230 = arith.constant 0.000000e+00 : f32
    %713 = vector.broadcast %cst_230 : f32 to vector<8x128xf32>
    %714 = arith.subf %713, %712 : vector<8x128xf32>
    %715 = math.exp %714 : vector<8x128xf32>
    %cst_231 = arith.constant 1.000000e+00 : f32
    %716 = vector.broadcast %cst_231 : f32 to vector<8x128xf32>
    %717 = arith.addf %716, %715 : vector<8x128xf32>
    %cst_232 = arith.constant 1.000000e+00 : f32
    %718 = vector.broadcast %cst_232 : f32 to vector<8x128xf32>
    %719 = arith.divf %718, %717 : vector<8x128xf32>
    %720 = arith.mulf %709, %686 : vector<8x128xf32>
    %721 = arith.mulf %701, %711 : vector<8x128xf32>
    %722 = arith.addf %720, %721 : vector<8x128xf32>
    %723 = math.tanh %722 : vector<8x128xf32>
    %724 = arith.mulf %719, %723 : vector<8x128xf32>
    %725 = arith.truncf %724 : vector<8x128xf32> to vector<8x128xbf16>
    %726 = vector.extract_strided_slice %653 {offsets = [2, 0, 0], sizes = [1, 8, 512], strides = [1, 1, 1]} : vector<8x8x512xf32> to vector<1x8x512xf32>
    %727 = vector.shape_cast %726 : vector<1x8x512xf32> to vector<8x512xf32>
    %cst_233 = arith.constant dense<0.000000e+00> : vector<8x512xf32>
    %728 = tpu.matmul %725, %654, %cst_233 {dimension_numbers = #tpu.dot_dimension_numbers<[1], [0], [0], [1], [0, 0, 1, 1], [], []>} : vector<8x128xbf16>, vector<128x512xbf16>, vector<8x512xf32> -> vector<8x512xf32>
    %729 = arith.addf %727, %728 : vector<8x512xf32>
    %730 = vector.extract_strided_slice %729 {offsets = [0, 0], sizes = [8, 128], strides = [1, 1]} : vector<8x512xf32> to vector<8x128xf32>
    %cst_234 = arith.constant 0.000000e+00 : f32
    %731 = vector.broadcast %cst_234 : f32 to vector<8x128xf32>
    %732 = arith.subf %731, %730 : vector<8x128xf32>
    %733 = math.exp %732 : vector<8x128xf32>
    %cst_235 = arith.constant 1.000000e+00 : f32
    %734 = vector.broadcast %cst_235 : f32 to vector<8x128xf32>
    %735 = arith.addf %734, %733 : vector<8x128xf32>
    %cst_236 = arith.constant 1.000000e+00 : f32
    %736 = vector.broadcast %cst_236 : f32 to vector<8x128xf32>
    %737 = arith.divf %736, %735 : vector<8x128xf32>
    %738 = vector.extract_strided_slice %729 {offsets = [0, 128], sizes = [8, 128], strides = [1, 1]} : vector<8x512xf32> to vector<8x128xf32>
    %cst_237 = arith.constant 0.000000e+00 : f32
    %739 = vector.broadcast %cst_237 : f32 to vector<8x128xf32>
    %740 = arith.subf %739, %738 : vector<8x128xf32>
    %741 = math.exp %740 : vector<8x128xf32>
    %cst_238 = arith.constant 1.000000e+00 : f32
    %742 = vector.broadcast %cst_238 : f32 to vector<8x128xf32>
    %743 = arith.addf %742, %741 : vector<8x128xf32>
    %cst_239 = arith.constant 1.000000e+00 : f32
    %744 = vector.broadcast %cst_239 : f32 to vector<8x128xf32>
    %745 = arith.divf %744, %743 : vector<8x128xf32>
    %746 = vector.extract_strided_slice %729 {offsets = [0, 256], sizes = [8, 128], strides = [1, 1]} : vector<8x512xf32> to vector<8x128xf32>
    %747 = math.tanh %746 : vector<8x128xf32>
    %748 = vector.extract_strided_slice %729 {offsets = [0, 384], sizes = [8, 128], strides = [1, 1]} : vector<8x512xf32> to vector<8x128xf32>
    %cst_240 = arith.constant 0.000000e+00 : f32
    %749 = vector.broadcast %cst_240 : f32 to vector<8x128xf32>
    %750 = arith.subf %749, %748 : vector<8x128xf32>
    %751 = math.exp %750 : vector<8x128xf32>
    %cst_241 = arith.constant 1.000000e+00 : f32
    %752 = vector.broadcast %cst_241 : f32 to vector<8x128xf32>
    %753 = arith.addf %752, %751 : vector<8x128xf32>
    %cst_242 = arith.constant 1.000000e+00 : f32
    %754 = vector.broadcast %cst_242 : f32 to vector<8x128xf32>
    %755 = arith.divf %754, %753 : vector<8x128xf32>
    %756 = arith.mulf %745, %722 : vector<8x128xf32>
    %757 = arith.mulf %737, %747 : vector<8x128xf32>
    %758 = arith.addf %756, %757 : vector<8x128xf32>
    %759 = math.tanh %758 : vector<8x128xf32>
    %760 = arith.mulf %755, %759 : vector<8x128xf32>
    %761 = arith.truncf %760 : vector<8x128xf32> to vector<8x128xbf16>
    %762 = vector.extract_strided_slice %653 {offsets = [3, 0, 0], sizes = [1, 8, 512], strides = [1, 1, 1]} : vector<8x8x512xf32> to vector<1x8x512xf32>
    %763 = vector.shape_cast %762 : vector<1x8x512xf32> to vector<8x512xf32>
    %cst_243 = arith.constant dense<0.000000e+00> : vector<8x512xf32>
    %764 = tpu.matmul %761, %654, %cst_243 {dimension_numbers = #tpu.dot_dimension_numbers<[1], [0], [0], [1], [0, 0, 1, 1], [], []>} : vector<8x128xbf16>, vector<128x512xbf16>, vector<8x512xf32> -> vector<8x512xf32>
    %765 = arith.addf %763, %764 : vector<8x512xf32>
    %766 = vector.extract_strided_slice %765 {offsets = [0, 0], sizes = [8, 128], strides = [1, 1]} : vector<8x512xf32> to vector<8x128xf32>
    %cst_244 = arith.constant 0.000000e+00 : f32
    %767 = vector.broadcast %cst_244 : f32 to vector<8x128xf32>
    %768 = arith.subf %767, %766 : vector<8x128xf32>
    %769 = math.exp %768 : vector<8x128xf32>
    %cst_245 = arith.constant 1.000000e+00 : f32
    %770 = vector.broadcast %cst_245 : f32 to vector<8x128xf32>
    %771 = arith.addf %770, %769 : vector<8x128xf32>
    %cst_246 = arith.constant 1.000000e+00 : f32
    %772 = vector.broadcast %cst_246 : f32 to vector<8x128xf32>
    %773 = arith.divf %772, %771 : vector<8x128xf32>
    %774 = vector.extract_strided_slice %765 {offsets = [0, 128], sizes = [8, 128], strides = [1, 1]} : vector<8x512xf32> to vector<8x128xf32>
    %cst_247 = arith.constant 0.000000e+00 : f32
    %775 = vector.broadcast %cst_247 : f32 to vector<8x128xf32>
    %776 = arith.subf %775, %774 : vector<8x128xf32>
    %777 = math.exp %776 : vector<8x128xf32>
    %cst_248 = arith.constant 1.000000e+00 : f32
    %778 = vector.broadcast %cst_248 : f32 to vector<8x128xf32>
    %779 = arith.addf %778, %777 : vector<8x128xf32>
    %cst_249 = arith.constant 1.000000e+00 : f32
    %780 = vector.broadcast %cst_249 : f32 to vector<8x128xf32>
    %781 = arith.divf %780, %779 : vector<8x128xf32>
    %782 = vector.extract_strided_slice %765 {offsets = [0, 256], sizes = [8, 128], strides = [1, 1]} : vector<8x512xf32> to vector<8x128xf32>
    %783 = math.tanh %782 : vector<8x128xf32>
    %784 = vector.extract_strided_slice %765 {offsets = [0, 384], sizes = [8, 128], strides = [1, 1]} : vector<8x512xf32> to vector<8x128xf32>
    %cst_250 = arith.constant 0.000000e+00 : f32
    %785 = vector.broadcast %cst_250 : f32 to vector<8x128xf32>
    %786 = arith.subf %785, %784 : vector<8x128xf32>
    %787 = math.exp %786 : vector<8x128xf32>
    %cst_251 = arith.constant 1.000000e+00 : f32
    %788 = vector.broadcast %cst_251 : f32 to vector<8x128xf32>
    %789 = arith.addf %788, %787 : vector<8x128xf32>
    %cst_252 = arith.constant 1.000000e+00 : f32
    %790 = vector.broadcast %cst_252 : f32 to vector<8x128xf32>
    %791 = arith.divf %790, %789 : vector<8x128xf32>
    %792 = arith.mulf %781, %758 : vector<8x128xf32>
    %793 = arith.mulf %773, %783 : vector<8x128xf32>
    %794 = arith.addf %792, %793 : vector<8x128xf32>
    %795 = math.tanh %794 : vector<8x128xf32>
    %796 = arith.mulf %791, %795 : vector<8x128xf32>
    %797 = arith.truncf %796 : vector<8x128xf32> to vector<8x128xbf16>
    %798 = vector.extract_strided_slice %653 {offsets = [4, 0, 0], sizes = [1, 8, 512], strides = [1, 1, 1]} : vector<8x8x512xf32> to vector<1x8x512xf32>
    %799 = vector.shape_cast %798 : vector<1x8x512xf32> to vector<8x512xf32>
    %cst_253 = arith.constant dense<0.000000e+00> : vector<8x512xf32>
    %800 = tpu.matmul %797, %654, %cst_253 {dimension_numbers = #tpu.dot_dimension_numbers<[1], [0], [0], [1], [0, 0, 1, 1], [], []>} : vector<8x128xbf16>, vector<128x512xbf16>, vector<8x512xf32> -> vector<8x512xf32>
    %801 = arith.addf %799, %800 : vector<8x512xf32>
    %802 = vector.extract_strided_slice %801 {offsets = [0, 0], sizes = [8, 128], strides = [1, 1]} : vector<8x512xf32> to vector<8x128xf32>
    %cst_254 = arith.constant 0.000000e+00 : f32
    %803 = vector.broadcast %cst_254 : f32 to vector<8x128xf32>
    %804 = arith.subf %803, %802 : vector<8x128xf32>
    %805 = math.exp %804 : vector<8x128xf32>
    %cst_255 = arith.constant 1.000000e+00 : f32
    %806 = vector.broadcast %cst_255 : f32 to vector<8x128xf32>
    %807 = arith.addf %806, %805 : vector<8x128xf32>
    %cst_256 = arith.constant 1.000000e+00 : f32
    %808 = vector.broadcast %cst_256 : f32 to vector<8x128xf32>
    %809 = arith.divf %808, %807 : vector<8x128xf32>
    %810 = vector.extract_strided_slice %801 {offsets = [0, 128], sizes = [8, 128], strides = [1, 1]} : vector<8x512xf32> to vector<8x128xf32>
    %cst_257 = arith.constant 0.000000e+00 : f32
    %811 = vector.broadcast %cst_257 : f32 to vector<8x128xf32>
    %812 = arith.subf %811, %810 : vector<8x128xf32>
    %813 = math.exp %812 : vector<8x128xf32>
    %cst_258 = arith.constant 1.000000e+00 : f32
    %814 = vector.broadcast %cst_258 : f32 to vector<8x128xf32>
    %815 = arith.addf %814, %813 : vector<8x128xf32>
    %cst_259 = arith.constant 1.000000e+00 : f32
    %816 = vector.broadcast %cst_259 : f32 to vector<8x128xf32>
    %817 = arith.divf %816, %815 : vector<8x128xf32>
    %818 = vector.extract_strided_slice %801 {offsets = [0, 256], sizes = [8, 128], strides = [1, 1]} : vector<8x512xf32> to vector<8x128xf32>
    %819 = math.tanh %818 : vector<8x128xf32>
    %820 = vector.extract_strided_slice %801 {offsets = [0, 384], sizes = [8, 128], strides = [1, 1]} : vector<8x512xf32> to vector<8x128xf32>
    %cst_260 = arith.constant 0.000000e+00 : f32
    %821 = vector.broadcast %cst_260 : f32 to vector<8x128xf32>
    %822 = arith.subf %821, %820 : vector<8x128xf32>
    %823 = math.exp %822 : vector<8x128xf32>
    %cst_261 = arith.constant 1.000000e+00 : f32
    %824 = vector.broadcast %cst_261 : f32 to vector<8x128xf32>
    %825 = arith.addf %824, %823 : vector<8x128xf32>
    %cst_262 = arith.constant 1.000000e+00 : f32
    %826 = vector.broadcast %cst_262 : f32 to vector<8x128xf32>
    %827 = arith.divf %826, %825 : vector<8x128xf32>
    %828 = arith.mulf %817, %794 : vector<8x128xf32>
    %829 = arith.mulf %809, %819 : vector<8x128xf32>
    %830 = arith.addf %828, %829 : vector<8x128xf32>
    %831 = math.tanh %830 : vector<8x128xf32>
    %832 = arith.mulf %827, %831 : vector<8x128xf32>
    %833 = arith.truncf %832 : vector<8x128xf32> to vector<8x128xbf16>
    %834 = vector.extract_strided_slice %653 {offsets = [5, 0, 0], sizes = [1, 8, 512], strides = [1, 1, 1]} : vector<8x8x512xf32> to vector<1x8x512xf32>
    %835 = vector.shape_cast %834 : vector<1x8x512xf32> to vector<8x512xf32>
    %cst_263 = arith.constant dense<0.000000e+00> : vector<8x512xf32>
    %836 = tpu.matmul %833, %654, %cst_263 {dimension_numbers = #tpu.dot_dimension_numbers<[1], [0], [0], [1], [0, 0, 1, 1], [], []>} : vector<8x128xbf16>, vector<128x512xbf16>, vector<8x512xf32> -> vector<8x512xf32>
    %837 = arith.addf %835, %836 : vector<8x512xf32>
    %838 = vector.extract_strided_slice %837 {offsets = [0, 0], sizes = [8, 128], strides = [1, 1]} : vector<8x512xf32> to vector<8x128xf32>
    %cst_264 = arith.constant 0.000000e+00 : f32
    %839 = vector.broadcast %cst_264 : f32 to vector<8x128xf32>
    %840 = arith.subf %839, %838 : vector<8x128xf32>
    %841 = math.exp %840 : vector<8x128xf32>
    %cst_265 = arith.constant 1.000000e+00 : f32
    %842 = vector.broadcast %cst_265 : f32 to vector<8x128xf32>
    %843 = arith.addf %842, %841 : vector<8x128xf32>
    %cst_266 = arith.constant 1.000000e+00 : f32
    %844 = vector.broadcast %cst_266 : f32 to vector<8x128xf32>
    %845 = arith.divf %844, %843 : vector<8x128xf32>
    %846 = vector.extract_strided_slice %837 {offsets = [0, 128], sizes = [8, 128], strides = [1, 1]} : vector<8x512xf32> to vector<8x128xf32>
    %cst_267 = arith.constant 0.000000e+00 : f32
    %847 = vector.broadcast %cst_267 : f32 to vector<8x128xf32>
    %848 = arith.subf %847, %846 : vector<8x128xf32>
    %849 = math.exp %848 : vector<8x128xf32>
    %cst_268 = arith.constant 1.000000e+00 : f32
    %850 = vector.broadcast %cst_268 : f32 to vector<8x128xf32>
    %851 = arith.addf %850, %849 : vector<8x128xf32>
    %cst_269 = arith.constant 1.000000e+00 : f32
    %852 = vector.broadcast %cst_269 : f32 to vector<8x128xf32>
    %853 = arith.divf %852, %851 : vector<8x128xf32>
    %854 = vector.extract_strided_slice %837 {offsets = [0, 256], sizes = [8, 128], strides = [1, 1]} : vector<8x512xf32> to vector<8x128xf32>
    %855 = math.tanh %854 : vector<8x128xf32>
    %856 = vector.extract_strided_slice %837 {offsets = [0, 384], sizes = [8, 128], strides = [1, 1]} : vector<8x512xf32> to vector<8x128xf32>
    %cst_270 = arith.constant 0.000000e+00 : f32
    %857 = vector.broadcast %cst_270 : f32 to vector<8x128xf32>
    %858 = arith.subf %857, %856 : vector<8x128xf32>
    %859 = math.exp %858 : vector<8x128xf32>
    %cst_271 = arith.constant 1.000000e+00 : f32
    %860 = vector.broadcast %cst_271 : f32 to vector<8x128xf32>
    %861 = arith.addf %860, %859 : vector<8x128xf32>
    %cst_272 = arith.constant 1.000000e+00 : f32
    %862 = vector.broadcast %cst_272 : f32 to vector<8x128xf32>
    %863 = arith.divf %862, %861 : vector<8x128xf32>
    %864 = arith.mulf %853, %830 : vector<8x128xf32>
    %865 = arith.mulf %845, %855 : vector<8x128xf32>
    %866 = arith.addf %864, %865 : vector<8x128xf32>
    %867 = math.tanh %866 : vector<8x128xf32>
    %868 = arith.mulf %863, %867 : vector<8x128xf32>
    %869 = arith.truncf %868 : vector<8x128xf32> to vector<8x128xbf16>
    %870 = vector.extract_strided_slice %653 {offsets = [6, 0, 0], sizes = [1, 8, 512], strides = [1, 1, 1]} : vector<8x8x512xf32> to vector<1x8x512xf32>
    %871 = vector.shape_cast %870 : vector<1x8x512xf32> to vector<8x512xf32>
    %cst_273 = arith.constant dense<0.000000e+00> : vector<8x512xf32>
    %872 = tpu.matmul %869, %654, %cst_273 {dimension_numbers = #tpu.dot_dimension_numbers<[1], [0], [0], [1], [0, 0, 1, 1], [], []>} : vector<8x128xbf16>, vector<128x512xbf16>, vector<8x512xf32> -> vector<8x512xf32>
    %873 = arith.addf %871, %872 : vector<8x512xf32>
    %874 = vector.extract_strided_slice %873 {offsets = [0, 0], sizes = [8, 128], strides = [1, 1]} : vector<8x512xf32> to vector<8x128xf32>
    %cst_274 = arith.constant 0.000000e+00 : f32
    %875 = vector.broadcast %cst_274 : f32 to vector<8x128xf32>
    %876 = arith.subf %875, %874 : vector<8x128xf32>
    %877 = math.exp %876 : vector<8x128xf32>
    %cst_275 = arith.constant 1.000000e+00 : f32
    %878 = vector.broadcast %cst_275 : f32 to vector<8x128xf32>
    %879 = arith.addf %878, %877 : vector<8x128xf32>
    %cst_276 = arith.constant 1.000000e+00 : f32
    %880 = vector.broadcast %cst_276 : f32 to vector<8x128xf32>
    %881 = arith.divf %880, %879 : vector<8x128xf32>
    %882 = vector.extract_strided_slice %873 {offsets = [0, 128], sizes = [8, 128], strides = [1, 1]} : vector<8x512xf32> to vector<8x128xf32>
    %cst_277 = arith.constant 0.000000e+00 : f32
    %883 = vector.broadcast %cst_277 : f32 to vector<8x128xf32>
    %884 = arith.subf %883, %882 : vector<8x128xf32>
    %885 = math.exp %884 : vector<8x128xf32>
    %cst_278 = arith.constant 1.000000e+00 : f32
    %886 = vector.broadcast %cst_278 : f32 to vector<8x128xf32>
    %887 = arith.addf %886, %885 : vector<8x128xf32>
    %cst_279 = arith.constant 1.000000e+00 : f32
    %888 = vector.broadcast %cst_279 : f32 to vector<8x128xf32>
    %889 = arith.divf %888, %887 : vector<8x128xf32>
    %890 = vector.extract_strided_slice %873 {offsets = [0, 256], sizes = [8, 128], strides = [1, 1]} : vector<8x512xf32> to vector<8x128xf32>
    %891 = math.tanh %890 : vector<8x128xf32>
    %892 = vector.extract_strided_slice %873 {offsets = [0, 384], sizes = [8, 128], strides = [1, 1]} : vector<8x512xf32> to vector<8x128xf32>
    %cst_280 = arith.constant 0.000000e+00 : f32
    %893 = vector.broadcast %cst_280 : f32 to vector<8x128xf32>
    %894 = arith.subf %893, %892 : vector<8x128xf32>
    %895 = math.exp %894 : vector<8x128xf32>
    %cst_281 = arith.constant 1.000000e+00 : f32
    %896 = vector.broadcast %cst_281 : f32 to vector<8x128xf32>
    %897 = arith.addf %896, %895 : vector<8x128xf32>
    %cst_282 = arith.constant 1.000000e+00 : f32
    %898 = vector.broadcast %cst_282 : f32 to vector<8x128xf32>
    %899 = arith.divf %898, %897 : vector<8x128xf32>
    %900 = arith.mulf %889, %866 : vector<8x128xf32>
    %901 = arith.mulf %881, %891 : vector<8x128xf32>
    %902 = arith.addf %900, %901 : vector<8x128xf32>
    %903 = math.tanh %902 : vector<8x128xf32>
    %904 = arith.mulf %899, %903 : vector<8x128xf32>
    %905 = arith.truncf %904 : vector<8x128xf32> to vector<8x128xbf16>
    %906 = vector.extract_strided_slice %653 {offsets = [7, 0, 0], sizes = [1, 8, 512], strides = [1, 1, 1]} : vector<8x8x512xf32> to vector<1x8x512xf32>
    %907 = vector.shape_cast %906 : vector<1x8x512xf32> to vector<8x512xf32>
    %cst_283 = arith.constant dense<0.000000e+00> : vector<8x512xf32>
    %908 = tpu.matmul %905, %654, %cst_283 {dimension_numbers = #tpu.dot_dimension_numbers<[1], [0], [0], [1], [0, 0, 1, 1], [], []>} : vector<8x128xbf16>, vector<128x512xbf16>, vector<8x512xf32> -> vector<8x512xf32>
    %909 = arith.addf %907, %908 : vector<8x512xf32>
    %910 = vector.extract_strided_slice %909 {offsets = [0, 0], sizes = [8, 128], strides = [1, 1]} : vector<8x512xf32> to vector<8x128xf32>
    %cst_284 = arith.constant 0.000000e+00 : f32
    %911 = vector.broadcast %cst_284 : f32 to vector<8x128xf32>
    %912 = arith.subf %911, %910 : vector<8x128xf32>
    %913 = math.exp %912 : vector<8x128xf32>
    %cst_285 = arith.constant 1.000000e+00 : f32
    %914 = vector.broadcast %cst_285 : f32 to vector<8x128xf32>
    %915 = arith.addf %914, %913 : vector<8x128xf32>
    %cst_286 = arith.constant 1.000000e+00 : f32
    %916 = vector.broadcast %cst_286 : f32 to vector<8x128xf32>
    %917 = arith.divf %916, %915 : vector<8x128xf32>
    %918 = vector.extract_strided_slice %909 {offsets = [0, 128], sizes = [8, 128], strides = [1, 1]} : vector<8x512xf32> to vector<8x128xf32>
    %cst_287 = arith.constant 0.000000e+00 : f32
    %919 = vector.broadcast %cst_287 : f32 to vector<8x128xf32>
    %920 = arith.subf %919, %918 : vector<8x128xf32>
    %921 = math.exp %920 : vector<8x128xf32>
    %cst_288 = arith.constant 1.000000e+00 : f32
    %922 = vector.broadcast %cst_288 : f32 to vector<8x128xf32>
    %923 = arith.addf %922, %921 : vector<8x128xf32>
    %cst_289 = arith.constant 1.000000e+00 : f32
    %924 = vector.broadcast %cst_289 : f32 to vector<8x128xf32>
    %925 = arith.divf %924, %923 : vector<8x128xf32>
    %926 = vector.extract_strided_slice %909 {offsets = [0, 256], sizes = [8, 128], strides = [1, 1]} : vector<8x512xf32> to vector<8x128xf32>
    %927 = math.tanh %926 : vector<8x128xf32>
    %928 = vector.extract_strided_slice %909 {offsets = [0, 384], sizes = [8, 128], strides = [1, 1]} : vector<8x512xf32> to vector<8x128xf32>
    %cst_290 = arith.constant 0.000000e+00 : f32
    %929 = vector.broadcast %cst_290 : f32 to vector<8x128xf32>
    %930 = arith.subf %929, %928 : vector<8x128xf32>
    %931 = math.exp %930 : vector<8x128xf32>
    %cst_291 = arith.constant 1.000000e+00 : f32
    %932 = vector.broadcast %cst_291 : f32 to vector<8x128xf32>
    %933 = arith.addf %932, %931 : vector<8x128xf32>
    %cst_292 = arith.constant 1.000000e+00 : f32
    %934 = vector.broadcast %cst_292 : f32 to vector<8x128xf32>
    %935 = arith.divf %934, %933 : vector<8x128xf32>
    %936 = arith.mulf %925, %902 : vector<8x128xf32>
    %937 = arith.mulf %917, %927 : vector<8x128xf32>
    %938 = arith.addf %936, %937 : vector<8x128xf32>
    %939 = math.tanh %938 : vector<8x128xf32>
    %940 = arith.mulf %935, %939 : vector<8x128xf32>
    %941 = arith.truncf %940 : vector<8x128xf32> to vector<8x128xbf16>
    %942 = vector.shape_cast %647 : vector<64x256xbf16> to vector<8x8x256xbf16>
    %943 = vector.extract_strided_slice %942 {offsets = [7, 0, 0], sizes = [1, 8, 256], strides = [1, 1, 1]} : vector<8x8x256xbf16> to vector<1x8x256xbf16>
    %944 = vector.shape_cast %943 : vector<1x8x256xbf16> to vector<8x256xbf16>
    %c0_293 = arith.constant 0 : index
    %c0_294 = arith.constant 0 : index
    %945 = vector.load %arg6[%c0_293, %c0_294] : memref<256x512xbf16, #tpu.memory_space<vmem>>, vector<256x512xbf16>
    %cst_295 = arith.constant dense<0.000000e+00> : vector<8x512xf32>
    %946 = tpu.matmul %944, %945, %cst_295 {dimension_numbers = #tpu.dot_dimension_numbers<[1], [0], [0], [1], [0, 0, 1, 1], [], []>} : vector<8x256xbf16>, vector<256x512xbf16>, vector<8x512xf32> -> vector<8x512xf32>
    %c0_296 = arith.constant 0 : index
    %c0_297 = arith.constant 0 : index
    %947 = vector.load %arg9[%c0_296, %c0_297] : memref<1x512xf32, #tpu.memory_space<vmem>>, vector<1x512xf32>
    %948 = vector.broadcast %947 : vector<1x512xf32> to vector<8x512xf32>
    %949 = arith.addf %946, %948 : vector<8x512xf32>
    %cst_298 = arith.constant 0.000000e+00 : f32
    %950 = vector.broadcast %cst_298 : f32 to vector<8x128xf32>
    %951 = vector.extract_strided_slice %949 {offsets = [0, 0], sizes = [8, 128], strides = [1, 1]} : vector<8x512xf32> to vector<8x128xf32>
    %cst_299 = arith.constant 0.000000e+00 : f32
    %952 = vector.broadcast %cst_299 : f32 to vector<8x128xf32>
    %953 = arith.subf %952, %951 : vector<8x128xf32>
    %954 = math.exp %953 : vector<8x128xf32>
    %cst_300 = arith.constant 1.000000e+00 : f32
    %955 = vector.broadcast %cst_300 : f32 to vector<8x128xf32>
    %956 = arith.addf %955, %954 : vector<8x128xf32>
    %cst_301 = arith.constant 1.000000e+00 : f32
    %957 = vector.broadcast %cst_301 : f32 to vector<8x128xf32>
    %958 = arith.divf %957, %956 : vector<8x128xf32>
    %959 = vector.extract_strided_slice %949 {offsets = [0, 128], sizes = [8, 128], strides = [1, 1]} : vector<8x512xf32> to vector<8x128xf32>
    %cst_302 = arith.constant 0.000000e+00 : f32
    %960 = vector.broadcast %cst_302 : f32 to vector<8x128xf32>
    %961 = arith.subf %960, %959 : vector<8x128xf32>
    %962 = math.exp %961 : vector<8x128xf32>
    %cst_303 = arith.constant 1.000000e+00 : f32
    %963 = vector.broadcast %cst_303 : f32 to vector<8x128xf32>
    %964 = arith.addf %963, %962 : vector<8x128xf32>
    %cst_304 = arith.constant 1.000000e+00 : f32
    %965 = vector.broadcast %cst_304 : f32 to vector<8x128xf32>
    %966 = arith.divf %965, %964 : vector<8x128xf32>
    %967 = vector.extract_strided_slice %949 {offsets = [0, 256], sizes = [8, 128], strides = [1, 1]} : vector<8x512xf32> to vector<8x128xf32>
    %968 = math.tanh %967 : vector<8x128xf32>
    %969 = vector.extract_strided_slice %949 {offsets = [0, 384], sizes = [8, 128], strides = [1, 1]} : vector<8x512xf32> to vector<8x128xf32>
    %cst_305 = arith.constant 0.000000e+00 : f32
    %970 = vector.broadcast %cst_305 : f32 to vector<8x128xf32>
    %971 = arith.subf %970, %969 : vector<8x128xf32>
    %972 = math.exp %971 : vector<8x128xf32>
    %cst_306 = arith.constant 1.000000e+00 : f32
    %973 = vector.broadcast %cst_306 : f32 to vector<8x128xf32>
    %974 = arith.addf %973, %972 : vector<8x128xf32>
    %cst_307 = arith.constant 1.000000e+00 : f32
    %975 = vector.broadcast %cst_307 : f32 to vector<8x128xf32>
    %976 = arith.divf %975, %974 : vector<8x128xf32>
    %977 = arith.mulf %966, %950 : vector<8x128xf32>
    %978 = arith.mulf %958, %968 : vector<8x128xf32>
    %979 = arith.addf %977, %978 : vector<8x128xf32>
    %980 = math.tanh %979 : vector<8x128xf32>
    %981 = arith.mulf %976, %980 : vector<8x128xf32>
    %c0_308 = arith.constant 0 : index
    %c0_309 = arith.constant 0 : index
    %982 = vector.load %arg10[%c0_308, %c0_309] : memref<128x256xbf16, #tpu.memory_space<vmem>>, vector<128x256xbf16>
    %cst_310 = arith.constant dense<0.000000e+00> : vector<8x256xf32>
    %983 = tpu.matmul %941, %982, %cst_310 {dimension_numbers = #tpu.dot_dimension_numbers<[1], [0], [0], [1], [0, 0, 1, 1], [], []>} : vector<8x128xbf16>, vector<128x256xbf16>, vector<8x256xf32> -> vector<8x256xf32>
    %984 = arith.truncf %981 : vector<8x128xf32> to vector<8x128xbf16>
    %c0_311 = arith.constant 0 : index
    %c0_312 = arith.constant 0 : index
    %985 = vector.load %arg11[%c0_311, %c0_312] : memref<128x256xbf16, #tpu.memory_space<vmem>>, vector<128x256xbf16>
    %cst_313 = arith.constant dense<0.000000e+00> : vector<8x256xf32>
    %986 = tpu.matmul %984, %985, %cst_313 {dimension_numbers = #tpu.dot_dimension_numbers<[1], [0], [0], [1], [0, 0, 1, 1], [], []>} : vector<8x128xbf16>, vector<128x256xbf16>, vector<8x256xf32> -> vector<8x256xf32>
    %987 = arith.addf %983, %986 : vector<8x256xf32>
    %c0_314 = arith.constant 0 : index
    %c0_315 = arith.constant 0 : index
    %988 = vector.load %arg12[%c0_314, %c0_315] : memref<1x256xf32, #tpu.memory_space<vmem>>, vector<1x256xf32>
    %989 = vector.broadcast %988 : vector<1x256xf32> to vector<8x256xf32>
    %990 = arith.addf %987, %989 : vector<8x256xf32>
    %c0_316 = arith.constant 0 : index
    %c0_317 = arith.constant 0 : index
    %991 = vector.load %arg13[%c0_316, %c0_317] : memref<8x256xf32, #tpu.memory_space<vmem>>, vector<8x256xf32>
    tpu.vector_store %arg13[%c0_316, %c0_317], %990 {strides = array<i32>} : memref<8x256xf32, #tpu.memory_space<vmem>>, vector<8x256xf32>,
    return
  }
}

</mosaic_0001>

<bundles_post_ra>
// kernel: poem_lstm_forward.1
= control target key start
LH: loop header
LB: loop body
LE: loop exit
PB: predicated region body
PF: predicated region fallthrough
CT: control target
= control target key end

     0   :  { %18 = vsyncpa [#allocation4], 0  ;;  %s9730_s0 = inlined_call_operand.vmem [shape: s32[8,8], index: 0, kind: input, shape index: {}]   ;;  %s9731_s1 = inlined_call_operand.hbm [shape: f32[256,128], index: 1, kind: input, shape index: {}]   ;;  %s9732_s2 = inlined_call_operand.hbm [shape: bf16[128,1024], index: 2, kind: input, shape index: {}]   ;;  %s9733_s3 = inlined_call_operand.hbm [shape: bf16[256,1024], index: 3, kind: input, shape index: {}]   ;;  %s9734_s4 = inlined_call_operand.vmem [shape: f32[1,1024], index: 4, kind: input, shape index: {}]   ;;  %s9735_s5 = inlined_call_operand.hbm [shape: bf16[256,512], index: 5, kind: input, shape index: {}]   ;;  %s9736_s6 = inlined_call_operand.hbm [shape: bf16[256,512], index: 6, kind: input, shape index: {}]   ;;  %s9737_s7 = inlined_call_operand.hbm [shape: bf16[128,512], index: 7, kind: input, shape index: {}]   ;;  %s9738_s8 = inlined_call_operand.vmem [shape: f32[1,512], index: 8, kind: input, shape index: {}]   ;;  %s9739_s9 = inlined_call_operand.vmem [shape: f32[1,512], index: 9, kind: input, shape index: {}]   ;;  %s9740_s10 = inlined_call_operand.hbm [shape: bf16[128,256], index: 10, kind: input, shape index: {}]   ;;  %s9741_s11 = inlined_call_operand.hbm [shape: bf16[128,256], index: 11, kind: input, shape index: {}]   ;;  %s9742_s12 = inlined_call_operand.vmem [shape: f32[1,256], index: 12, kind: input, shape index: {}]   ;;  %s9743_s13 = inlined_call_operand.vmem [shape: f32[8,256], index: 13, kind: output, shape index: {}]  }
   0x1   :  { %19 = vsyncpa [#allocation6], 0 }
   0x2   :  { %20 = vsyncpa [#allocation9], 0 }
   0x3   :  { %21 = vsyncpa [#allocation12], 0 }
   0x4   :  { %22 = vsyncpa [#allocation15], 0  ;;  %s7332_s25 = smov [#allocation5]   ;;  %s7146_s29 = scalar_lea.hbm %s9732_s2, 8192 }
   0x5   :  { %s42_s26 = sshll.u32 %s7332_s25, 4  ;;  %p7147_p0 = scmp.ne.s32.totalorder %s9732_s2, %s7146_s29  ;;  %s43_s26 = int_to_ptr.vmem [resolvable:$true] %s42_s26 }
   0x6   :  { %p7150_p1 = scmp.lt.u32.totalorder %s7146_s29, %s9732_s2 }
   0x8   :  { %p7152_p2 = pnand %p7150_p1, %p7147_p0 }
   0xa   :  { %7155 = shalt.err (!%p7152_p2)
}
   0xb   :  { %s7156_s17 = scalar_lea.vmem %s43_s26, 8192  ;;  %p7161_p4 = scmp.lt.s32.totalorder %s43_s26, %s43_s26 }
   0xc   :  { %p7157_p3 = scmp.ne.s32.totalorder %s43_s26, %s7156_s17  ;;  %p7162_p5 = scmp.lt.s32.totalorder %s7156_s17, %s7156_s17 }
   0xe   :  { %p7163_p6 = por %p7162_p5, %p7161_p4 }
  0x10   :  { %p7164_p7 = pnand %p7163_p6, %p7157_p3 }
  0x12   :  { %7167 = shalt.err (!%p7164_p7)
}
  0x13   :  { %s7333_s18 = smov 512   ;;  %s7334_s19 = smov 32  }
  0x14   :  { %48 = dma.hbm_to_vmem [thread:$0]  %s9732_s2, 8192, %s43_s26, [#allocation6], %s7333_s18, %s7333_s18, %s7334_s19  }
  0x15   :  { %s7335_s22 = smov [#allocation8]   ;;  %s7168_s27 = scalar_lea.hbm %s9735_s5, 8192 }
  0x16   :  { %s68_s23 = sshll.u32 %s7335_s22, 4  ;;  %p7169_p8 = scmp.ne.s32.totalorder %s9735_s5, %s7168_s27  ;;  %s69_s23 = int_to_ptr.vmem [resolvable:$true] %s68_s23 }
  0x17   :  { %p7172_p9 = scmp.lt.u32.totalorder %s7168_s27, %s9735_s5 }
  0x19   :  { %p7174_p10 = pnand %p7172_p9, %p7169_p8 }
  0x1b   :  { %7177 = shalt.err (!%p7174_p10)
}
  0x1c   :  { %s7178_s15 = scalar_lea.vmem %s69_s23, 8192  ;;  %p7183_p12 = scmp.lt.s32.totalorder %s69_s23, %s69_s23 }
  0x1d   :  { %p7179_p11 = scmp.ne.s32.totalorder %s69_s23, %s7178_s15  ;;  %p7184_p13 = scmp.lt.s32.totalorder %s7178_s15, %s7178_s15 }
  0x1f   :  { %p7185_p0 = por %p7184_p13, %p7183_p12 }
  0x21   :  { %p7186_p1 = pnand %p7185_p0, %p7179_p11 }
  0x23   :  { %7189 = shalt.err (!%p7186_p1)
}
  0x24   :  { %s7336_s2 = smov 256   ;;  %s7337_s26 = smov 16  }
  0x25   :  { %74 = dma.hbm_to_vmem [thread:$0]  %s9735_s5, 8192, %s69_s23, [#allocation9], %s7336_s2, %s7336_s2, %s7337_s26  }
  0x26   :  { %s7338_s20 = smov [#allocation11]   ;;  %s7339_s22 = smov [#allocation3]  }
  0x27   :  { %s92_s21 = sshll.u32 %s7338_s20, 4  ;;  %s30_s24 = sshll.u32 %s7339_s22, 4  ;;  %s93_s21 = int_to_ptr.vmem [resolvable:$true] %s92_s21  ;;  %s7448_s24 = int_to_ptr.vmem [resolvable:$true] %s30_s24 }
  0x28   :  { %s7190_s28 = scalar_lea.hbm %s9737_s7, 4096 }
  0x29   :  { %p7191_p2 = scmp.ne.s32.totalorder %s9737_s7, %s7190_s28  ;;  %p7194_p3 = scmp.lt.u32.totalorder %s7190_s28, %s9737_s7 }
  0x2b   :  { %p7196_p4 = pnand %p7194_p3, %p7191_p2 }
  0x2d   :  { %7199 = shalt.err (!%p7196_p4)
}
  0x2e   :  { %s7200_s5 = scalar_lea.vmem %s93_s21, 4096  ;;  %p7205_p6 = scmp.lt.s32.totalorder %s93_s21, %s93_s21 }
  0x2f   :  { %p7201_p5 = scmp.ne.s32.totalorder %s93_s21, %s7200_s5  ;;  %p7206_p7 = scmp.lt.s32.totalorder %s7200_s5, %s7200_s5 }
  0x31   :  { %p7207_p8 = por %p7206_p7, %p7205_p6 }
  0x33   :  { %p7208_p9 = pnand %p7207_p8, %p7201_p5 }
  0x35   :  { %7211 = shalt.err (!%p7208_p9)
}
  0x36   :  { %98 = dma.hbm_to_vmem [thread:$0]  %s9737_s7, 4096, %s93_s21, [#allocation12], %s7336_s2, %s7336_s2, %s7337_s26  }
  0x37   :  { %s7212_s22 = scalar_lea.hbm %s9731_s1, 4096 }
  0x38   :  { %p7213_p10 = scmp.ne.s32.totalorder %s9731_s1, %s7212_s22  ;;  %p7216_p11 = scmp.lt.u32.totalorder %s7212_s22, %s9731_s1 }
  0x3a   :  { %p7218_p12 = pnand %p7216_p11, %p7213_p10 }
  0x3c   :  { %7221 = shalt.err (!%p7218_p12)
}
  0x3d   :  { %s7222_s30 = scalar_lea.vmem %s7448_s24, 4096  ;;  %p7227_p0 = scmp.lt.s32.totalorder %s7448_s24, %s7448_s24 }
  0x3e   :  { %p7223_p13 = scmp.ne.s32.totalorder %s7448_s24, %s7222_s30  ;;  %p7228_p1 = scmp.lt.s32.totalorder %s7222_s30, %s7222_s30 }
  0x40   :  { %p7229_p2 = por %p7228_p1, %p7227_p0 }
  0x42   :  { %p7230_p3 = pnand %p7229_p2, %p7223_p13 }
  0x44   :  { %7233 = shalt.err (!%p7230_p3)
}
  0x45   :  { %s7340_s7 = smov 128   ;;  %s7341_s21 = smov 8  }
  0x46   :  { %36 = dma.hbm_to_vmem [thread:$0]  %s9731_s1, 4096, %s7448_s24, [#allocation4], %s7340_s7, %s7340_s7, %s7341_s21  }
  0x47   :  { %s7342_s5 = smov [#allocation7]   ;;  %s7343_s16 = smov [#allocation10]  }
  0x48   :  { %s54_s23 = sshll.u32 %s7342_s5, 4  ;;  %s80_s17 = sshll.u32 %s7343_s16, 4  ;;  %s55_s23 = int_to_ptr.vmem [resolvable:$true] %s54_s23  ;;  %s7485_s17 = int_to_ptr.vmem [resolvable:$true] %s80_s17 }
  0x49   :  { %s7234_s25 = scalar_lea.hbm %s9733_s3, 16384 }
  0x4a   :  { %p7235_p4 = scmp.ne.s32.totalorder %s9733_s3, %s7234_s25  ;;  %p7238_p5 = scmp.lt.u32.totalorder %s7234_s25, %s9733_s3 }
  0x4c   :  { %p7240_p6 = pnand %p7238_p5, %p7235_p4 }
  0x4e   :  { %7243 = shalt.err (!%p7240_p6)
}
  0x4f   :  { %s7244_s1 = scalar_lea.vmem %s55_s23, 16384  ;;  %p7249_p8 = scmp.lt.s32.totalorder %s55_s23, %s55_s23 }
  0x50   :  { %p7245_p7 = scmp.ne.s32.totalorder %s55_s23, %s7244_s1  ;;  %p7250_p9 = scmp.lt.s32.totalorder %s7244_s1, %s7244_s1 }
  0x52   :  { %p7251_p10 = por %p7250_p9, %p7249_p8 }
  0x54   :  { %p7252_p11 = pnand %p7251_p10, %p7245_p7 }
  0x56   :  { %7255 = shalt.err (!%p7252_p11)
}
  0x57   :  { %60 = dma.hbm_to_vmem [thread:$0]  %s9733_s3, 16384, %s55_s23, [#allocation6], %s7333_s18, %s7333_s18, %s7334_s19  }
  0x58   :  { %s7256_s16 = scalar_lea.hbm %s9736_s6, 8192 }
  0x59   :  { %p7257_p12 = scmp.ne.s32.totalorder %s9736_s6, %s7256_s16  ;;  %p7260_p13 = scmp.lt.u32.totalorder %s7256_s16, %s9736_s6 }
  0x5b   :  { %p7262_p0 = pnand %p7260_p13, %p7257_p12 }
  0x5d   :  { %7265 = shalt.err (!%p7262_p0)
}
  0x5e   :  { %s7266_s28 = scalar_lea.vmem %s7485_s17, 8192  ;;  %p7271_p2 = scmp.lt.s32.totalorder %s7485_s17, %s7485_s17 }
  0x5f   :  { %p7267_p1 = scmp.ne.s32.totalorder %s7485_s17, %s7266_s28  ;;  %p7272_p3 = scmp.lt.s32.totalorder %s7266_s28, %s7266_s28 }
  0x61   :  { %p7273_p4 = por %p7272_p3, %p7271_p2 }
  0x63   :  { %p7274_p5 = pnand %p7273_p4, %p7267_p1 }
  0x65   :  { %7277 = shalt.err (!%p7274_p5)
}
  0x66   :  { %86 = dma.hbm_to_vmem [thread:$0]  %s9736_s6, 8192, %s7485_s17, [#allocation9], %s7336_s2, %s7336_s2, %s7337_s26  }
  0x67   :  { %s7344_s19 = smov [#allocation13]   ;;  %s7345_s29 = smov [#allocation14]  }
  0x68   :  { %s108_s23 = sshll.u32 %s7344_s19, 4  ;;  %s120_s30 = sshll.u32 %s7345_s29, 4  ;;  %s109_s23 = int_to_ptr.vmem [resolvable:$true] %s108_s23  ;;  %s7522_s30 = int_to_ptr.vmem [resolvable:$true] %s120_s30 }
  0x69   :  { %s7278_s14 = scalar_lea.hbm %s9740_s10, 2048 }
  0x6a   :  { %p7279_p6 = scmp.ne.s32.totalorder %s9740_s10, %s7278_s14  ;;  %p7282_p7 = scmp.lt.u32.totalorder %s7278_s14, %s9740_s10 }
  0x6c   :  { %p7284_p8 = pnand %p7282_p7, %p7279_p6 }
  0x6e   :  { %7287 = shalt.err (!%p7284_p8)
}
  0x6f   :  { %s7288_s6 = scalar_lea.vmem %s109_s23, 2048  ;;  %p7293_p10 = scmp.lt.s32.totalorder %s109_s23, %s109_s23 }
  0x70   :  { %p7289_p9 = scmp.ne.s32.totalorder %s109_s23, %s7288_s6  ;;  %p7294_p11 = scmp.lt.s32.totalorder %s7288_s6, %s7288_s6 }
  0x72   :  { %p7295_p12 = por %p7294_p11, %p7293_p10 }
  0x74   :  { %p7296_p13 = pnand %p7295_p12, %p7289_p9 }
  0x76   :  { %7299 = shalt.err (!%p7296_p13)
}
  0x77   :  { %114 = dma.hbm_to_vmem [thread:$0]  %s9740_s10, 2048, %s109_s23, [#allocation12], %s7340_s7, %s7340_s7, %s7341_s21  }
  0x78   :  { %s7300_s25 = scalar_lea.hbm %s9741_s11, 2048 }
  0x79   :  { %p7301_p0 = scmp.ne.s32.totalorder %s9741_s11, %s7300_s25  ;;  %p7304_p1 = scmp.lt.u32.totalorder %s7300_s25, %s9741_s11 }
  0x7b   :  { %p7306_p2 = pnand %p7304_p1, %p7301_p0 }
  0x7d   :  { %7309 = shalt.err (!%p7306_p2)
}
  0x7e   :  { %s7310_s19 = scalar_lea.vmem %s7522_s30, 2048  ;;  %p7315_p4 = scmp.lt.s32.totalorder %s7522_s30, %s7522_s30 }
  0x7f   :  { %p7311_p3 = scmp.ne.s32.totalorder %s7522_s30, %s7310_s19  ;;  %p7316_p5 = scmp.lt.s32.totalorder %s7310_s19, %s7310_s19 }
  0x81   :  { %p7317_p6 = por %p7316_p5, %p7315_p4 }
  0x83   :  { %p7318_p7 = pnand %p7317_p6, %p7311_p3 }
  0x85   :  { %7321 = shalt.err (!%p7318_p7)
}
  0x86   :  { %126 = dma.hbm_to_vmem [thread:$0]  %s9741_s11, 2048, %s7522_s30, [#allocation15], %s7340_s7, %s7340_s7, %s7341_s21  }
  0x87   :  { %7322 = dma.done.wait [#allocation4], 4096  }
  0x88   :  { %7323 = vsyncadd [#allocation4], 4294963200 }
  0x89   :  { %7324 = dma.done.wait [#allocation6], 24576  }
  0x8a   :  { %7325 = vsyncadd [#allocation6], 4294942720 }
  0x8b   :  { %7326 = dma.done.wait [#allocation9], 16384  }
  0x8c   :  { %7327 = vsyncadd [#allocation9], 4294950912 }
  0x8d   :  { %7328 = dma.done.wait [#allocation12], 6144  }
  0x8e   :  { %7329 = vsyncadd [#allocation12], 4294961152 }
  0x8f   :  { %7330 = dma.done.wait [#allocation15], 2048  }
  0x90   :  { %7331 = vsyncadd [#allocation15], 4294965248  ;;  %v155_v0 = vlaneseq  ;;  %v154_v5 = vld [vmem:[%s9730_s0] sm:$0xff]  ;;  %v279_v10 = vld [vmem:[#allocation3 + $0x88] sm:$0xff] }
  0x91   :  { %v278_v9 = vld [vmem:[#allocation3 + $0x80] sm:$0xff]  ;;  %v263_v14 = vld [vmem:[#allocation3 + $0x8] sm:$0xff]  ;;  %v280_v15 = vld [vmem:[#allocation3 + $0x90] sm:$0xff] }
  0x92   :  { %v7560_v1 = vshrl.u32 %v155_v0, 7  ;;  %v262_v11 = vld [vmem:[#allocation3] sm:$0xff]  ;;  %v281_v16 = vld [vmem:[#allocation3 + $0x98] sm:$0xff]  ;;  %v6380_v19 = vpack.c.bf16 %v279_v10, %v278_v9  ;;  %v264_v22 = vld [vmem:[#allocation3 + $0x10] sm:$0xff] }
  0x93   :  { %v6382_v20 = vpack.c.bf16 %v263_v14, %v262_v11  ;;  %v6384_v21 = vpack.c.bf16 %v281_v16, %v280_v15  ;;  %v265_v23 = vld [vmem:[#allocation3 + $0x18] sm:$0xff]  ;;  %v282_v26 = vld [vmem:[#allocation3 + $0xa0] sm:$0xff]  ;;  %v283_v27 = vld [vmem:[#allocation3 + $0xa8] sm:$0xff] }
  0x94   :  { %v7563_v2 = vsub.s32 0, %v7560_v1  ;;  %v7566_v3 = vsub.s32 2, %v7560_v1  ;;  %v7569_v4 = vsub.s32 1, %v7560_v1  ;;  %v7575_v6 = vsub.s32 3, %v7560_v1  ;;  %6381 = vmatprep.subr.bf16.mxu0 %v6380_v19  ;;  %v266_v32 = vld [vmem:[#allocation3 + $0x20] sm:$0xff]  ;;  %v267_v33 = vld [vmem:[#allocation3 + $0x28] sm:$0xff] }
  0x95   :  { %v9749_v13 = vsub.s32 4, %v7560_v1  ;;  %v9747_v18 = vsub.s32 5, %v7560_v1  ;;  %v9748_v25 = vsub.s32 6, %v7560_v1  ;;  %v9746_v29 = vsub.s32 7, %v7560_v1  ;;  %6383 = vmatpush3.bf16.msra.mxu0 %v6382_v20  ;;  %v284_v35 = vld [vmem:[#allocation3 + $0xb0] sm:$0xff]  ;;  %v285_v36 = vld [vmem:[#allocation3 + $0xb8] sm:$0xff] }
  0x96   :  { %10036 = vst [vmem:[#allocation21_spill] sm:$0xff] %v7563_v2  ;;  %10037 = vst [vmem:[#allocation22_spill] sm:$0xff] %v7566_v3  ;;  %v161_v7 = vrot.slane %v154_v5, %v7563_v2  ;;  %v175_v8 = vrot.slane %v154_v5, %v7566_v3  ;;  %v168_v12 = vrot.slane %v154_v5, %v7569_v4  ;;  %6385 = vmatprep.subr.bf16.mxu0 %v6384_v21  ;;  %v268_v38 = vld [vmem:[#allocation3 + $0x30] sm:$0xff]  ;;  %v269_v39 = vld [vmem:[#allocation3 + $0x38] sm:$0xff] }
  0x97   :  { %10038 = vst [vmem:[#allocation23_spill] sm:$0xff] %v7569_v4  ;;  %10039 = vst [vmem:[#allocation24_spill] sm:$0xff] %v7575_v6  ;;  %v182_v17 = vrot.slane %v154_v5, %v7575_v6  ;;  %v189_v24 = vrot.slane %v154_v5, %v9749_v13  ;;  %v196_v28 = vrot.slane %v154_v5, %v9747_v18  ;;  %v286_v41 = vld [vmem:[#allocation3 + $0xc0] sm:$0xff]  ;;  %v287_v42 = vld [vmem:[#allocation3 + $0xc8] sm:$0xff] }
  0x98   :  { %163 = vbcast.lane.b32.xlu0 %v161_v7, 256  ;;  %177 = vbcast.lane.b32.xlu1 %v175_v8, 256  ;;  %v6386_v30 = vpack.c.bf16 %v265_v23, %v264_v22  ;;  %v6388_v31 = vpack.c.bf16 %v283_v27, %v282_v26  ;;  %v203_v34 = vrot.slane %v154_v5, %v9748_v25  ;;  %v270_v44 = vld [vmem:[#allocation3 + $0x40] sm:$0xff]  ;;  %v271_v45 = vld [vmem:[#allocation3 + $0x48] sm:$0xff]  ;;  %v288_v47 = vld [vmem:[#allocation3 + $0xd0] sm:$0xff] }
  0x99   :  { %v210_v37 = vrot.slane %v154_v5, %v9746_v29  ;;  %v6390_v40 = vpack.c.bf16 %v267_v33, %v266_v32  ;;  %v6392_v43 = vpack.c.bf16 %v285_v36, %v284_v35  ;;  %v6394_v46 = vpack.c.bf16 %v269_v39, %v268_v38  ;;  %v289_v48 = vld [vmem:[#allocation3 + $0xd8] sm:$0xff]  ;;  %v403_v50 = vld [vmem:[#allocation5] sm:$0xff]  ;;  %v7593_v52 = vld [vmem:[#allocation5 + $0x8] sm:$0xff] }
  0x9a   :  { %6387 = vmatpush3.bf16.msra.mxu0 %v6386_v30  ;;  %v6396_v49 = vpack.c.bf16 %v287_v42, %v286_v41  ;;  %v407_v51 = vld [vmem:[#allocation5 + $0x20] sm:$0xff]  ;;  %v6398_v53 = vpack.c.bf16 %v271_v45, %v270_v44  ;;  %v7595_v56 = vld [vmem:[#allocation5 + $0x28] sm:$0xff]  ;;  %v6400_v59 = vpack.c.bf16 %v289_v48, %v288_v47  ;;  %v272_v60 = vld [vmem:[#allocation3 + $0x50] sm:$0xff]  ;;  %v7602_v41 = vand.u32 127, %v155_v0 }
  0x9b   :  { %6389 = vmatprep.subr.bf16.mxu0 %v6388_v31  ;;  %v5937_v54 = vcombine.high %v403_v50, %v407_v51  ;;  %v5936_v55 = vcombine.low %v403_v50, %v407_v51  ;;  %v411_v57 = vld [vmem:[#allocation5 + $0x40] sm:$0xff]  ;;  %v273_v61 = vld [vmem:[#allocation3 + $0x58] sm:$0xff]  ;;  %v5938_v62 = vcombine.low %v7593_v52, %v7595_v56  ;;  %v291_v8 = vld [vmem:[#allocation3 + $0xe8] sm:$0xff]  ;;  %v7346_v48 = vmov 1.0  }
  0x9c   :  { %170 = vbcast.lane.b32.xlu0 %v168_v12, 256  ;;  %184 = vbcast.lane.b32.xlu1 %v182_v17, 256  ;;  %v415_v58 = vld [vmem:[#allocation5 + $0x60] sm:$0xff]  ;;  %v6402_v11 = vpack.c.bf16 %v273_v61, %v272_v60  ;;  %v275_v16 = vld [vmem:[#allocation3 + $0x68] sm:$0xff]  ;;  %v292_v20 = vld [vmem:[#allocation3 + $0xf0] sm:$0xff]  ;;  %v7605_v42 = vadd.s32 128, %v7602_v41 }
  0x9d   :  { %v5945_v63 = vcombine.high %v411_v57, %v415_v58  ;;  %v419_v5 = vld [vmem:[#allocation5 + $0x80] sm:$0xff]  ;;  %829 = vmatprep.subr.bf16.mxu1 %v5937_v54  ;;  %v5944_v10 = vcombine.low %v411_v57, %v415_v58  ;;  %v293_v21 = vld [vmem:[#allocation3 + $0xf8] sm:$0xff]  ;;  %v276_v22 = vld [vmem:[#allocation3 + $0x70] sm:$0xff] }
  0x9e   :  { %6391 = vmatpush3.bf16.msra.mxu0 %v6390_v40  ;;  %v290_v7 = vld [vmem:[#allocation3 + $0xe0] sm:$0xff]  ;;  %830 = vmatpush1.bf16.msra.mxu1 %v5936_v55  ;;  %v277_v23 = vld [vmem:[#allocation3 + $0x78] sm:$0xff]  ;;  %v6408_v31 = vpack.c.bf16 %v293_v21, %v292_v20  ;;  %v416_v44 = vld [vmem:[#allocation5 + $0x68] sm:$0xff] }
  0x9f   :  { %6393 = vmatprep.subr.bf16.mxu0 %v6392_v43  ;;  %v423_v9 = vld [vmem:[#allocation5 + $0xa0] sm:$0xff]  ;;  %831 = vmatprep.subr.bf16.mxu1 %v5945_v63  ;;  %v6404_v15 = vpack.c.bf16 %v291_v8, %v290_v7  ;;  %v6410_v35 = vpack.c.bf16 %v277_v23, %v276_v22  ;;  %v412_v43 = vld [vmem:[#allocation5 + $0x48] sm:$0xff] }
  0xa0   :  { %191 = vbcast.lane.b32.xlu0 %v189_v24, 256  ;;  %198 = vbcast.lane.b32.xlu1 %v196_v28, 256  ;;  %v274_v12 = vld [vmem:[#allocation3 + $0x60] sm:$0xff]  ;;  %v5953_v14 = vcombine.high %v419_v5, %v423_v9  ;;  %v5952_v24 = vcombine.low %v419_v5, %v423_v9  ;;  %v5947_v47 = vcombine.high %v412_v43, %v416_v44  ;;  %v424_v50 = vld [vmem:[#allocation5 + $0xa8] sm:$0xff] }
  0xa1   :  { %v427_v17 = vld [vmem:[#allocation5 + $0xc0] sm:$0xff]  ;;  %v6406_v28 = vpack.c.bf16 %v275_v16, %v274_v12  ;;  %v5946_v51 = vcombine.low %v412_v43, %v416_v44  ;;  %v428_v55 = vld [vmem:[#allocation5 + $0xc8] sm:$0xff] }
  0xa2   :  { %6395 = vmatpush3.bf16.msra.mxu0 %v6394_v46  ;;  %v431_v19 = vld [vmem:[#allocation5 + $0xe0] sm:$0xff]  ;;  %832 = vmatpush1.bf16.msra.mxu1 %v5944_v10  ;;  %v432_v57 = vld [vmem:[#allocation5 + $0xe8] sm:$0xff] }
  0xa3   :  { %6397 = vmatprep.subr.bf16.mxu0 %v6396_v49  ;;  %v435_v26 = vld [vmem:[#allocation5 + $0x100] sm:$0xff]  ;;  %833 = vmatprep.subr.bf16.mxu1 %v5953_v14  ;;  %v5961_v30 = vcombine.high %v427_v17, %v431_v19  ;;  %v5960_v32 = vcombine.low %v427_v17, %v431_v19  ;;  %v420_v49 = vld [vmem:[#allocation5 + $0x88] sm:$0xff]  ;;  %v5962_v61 = vcombine.low %v428_v55, %v432_v57 }
  0xa4   :  { %205 = vbcast.lane.b32.xlu0 %v203_v34, 256  ;;  %212 = vbcast.lane.b32.xlu1 %v210_v37, 256  ;;  %v439_v27 = vld [vmem:[#allocation5 + $0x120] sm:$0xff]  ;;  %v5939_v37 = vcombine.high %v7593_v52, %v7595_v56  ;;  %v5954_v52 = vcombine.low %v420_v49, %v424_v50  ;;  %v5963_v56 = vcombine.high %v428_v55, %v432_v57  ;;  %v440_v60 = vld [vmem:[#allocation5 + $0x128] sm:$0xff]  ;;  %v421_v57 = vld [vmem:[#allocation5 + $0x90] sm:$0xff] }
  0xa5   :  { %v443_v33 = vld [vmem:[#allocation5 + $0x140] sm:$0xff]  ;;  %v5969_v36 = vcombine.high %v435_v26, %v439_v27  ;;  %v5968_v38 = vcombine.low %v435_v26, %v439_v27  ;;  %v444_v5 = vld [vmem:[#allocation5 + $0x148] sm:$0xff] }
  0xa6   :  { %6399 = vmatpush3.bf16.msra.mxu0 %v6398_v53  ;;  %834 = vmatpush1.bf16.msra.mxu1 %v5952_v24  ;;  %v447_v34 = vld [vmem:[#allocation5 + $0x160] sm:$0xff]  ;;  %v5955_v53 = vcombine.high %v420_v49, %v424_v50  ;;  %v448_v7 = vld [vmem:[#allocation5 + $0x168] sm:$0xff]  ;;  %v414_v49 = vld [vmem:[#allocation5 + $0x58] sm:$0xff] }
  0xa7   :  { %6401 = vmatprep.subr.bf16.mxu0 %v6400_v59  ;;  %835 = vmatprep.subr.bf16.mxu1 %v5961_v30  ;;  %v5977_v39 = vcombine.high %v443_v33, %v447_v34  ;;  %v5976_v40 = vcombine.low %v443_v33, %v447_v34  ;;  %v436_v59 = vld [vmem:[#allocation5 + $0x108] sm:$0xff]  ;;  %v5979_v9 = vcombine.high %v444_v5, %v448_v7  ;;  %v451_v14 = vld [vmem:[#allocation5 + $0x180] sm:$0xff]  ;;  %v405_v33 = vld [vmem:[#allocation5 + $0x10] sm:$0xff] }
  0xa8   :  { %v5970_v8 = vcombine.low %v436_v59, %v440_v60  ;;  %v452_v16 = vld [vmem:[#allocation5 + $0x188] sm:$0xff]  ;;  %v459_v23 = vld [vmem:[#allocation5 + $0x1c0] sm:$0xff]  ;;  %v409_v34 = vld [vmem:[#allocation5 + $0x30] sm:$0xff] }
  0xa9   :  { %v456_v19 = vld [vmem:[#allocation5 + $0x1a8] sm:$0xff]  ;;  %v463_v24 = vld [vmem:[#allocation5 + $0x1e0] sm:$0xff]  ;;  %v418_v50 = vld [vmem:[#allocation5 + $0x78] sm:$0xff] }
  0xaa   :  { %6403 = vmatpush3.bf16.msra.mxu0 %v6402_v11  ;;  %836 = vmatpush1.bf16.msra.mxu1 %v5960_v32  ;;  %v5978_v11 = vcombine.low %v444_v5, %v448_v7  ;;  %v5986_v21 = vcombine.low %v452_v16, %v456_v19  ;;  %v5987_v22 = vcombine.high %v452_v16, %v456_v19  ;;  %v460_v26 = vld [vmem:[#allocation5 + $0x1c8] sm:$0xff] }
  0xab   :  { %6405 = vmatprep.subr.bf16.mxu0 %v6404_v15  ;;  %837 = vmatprep.subr.bf16.mxu1 %v5969_v36  ;;  %v455_v15 = vld [vmem:[#allocation5 + $0x1a0] sm:$0xff]  ;;  %v5993_v27 = vcombine.high %v459_v23, %v463_v24  ;;  %v5992_v30 = vcombine.low %v459_v23, %v463_v24  ;;  %v5941_v36 = vcombine.high %v405_v33, %v409_v34  ;;  %v441_v24 = vld [vmem:[#allocation5 + $0x130] sm:$0xff]  ;;  %v1222_v18 = vld [vmem:[#allocation7 + $0x328] sm:$0xff] }
  0xac   :  { %v5985_v17 = vcombine.high %v451_v14, %v455_v15  ;;  %v5984_v20 = vcombine.low %v451_v14, %v455_v15  ;;  %v5951_v55 = vcombine.high %v414_v49, %v418_v50  ;;  %v1226_v13 = vld [vmem:[#allocation7 + $0x348] sm:$0xff] }
  0xae   :  { %6407 = vmatpush3.bf16.msra.mxu0 %v6406_v28  ;;  %838 = vmatpush1.bf16.msra.mxu1 %v5968_v38  ;;  %v464_v28 = vld [vmem:[#allocation5 + $0x1e8] sm:$0xff]  ;;  %v9744_v38 = vmov 0  }
  0xaf   :  { %6409 = vmatprep.subr.bf16.mxu0 %v6408_v31  ;;  %839 = vmatprep.subr.bf16.mxu1 %v5977_v39  ;;  %v5994_v31 = vcombine.low %v460_v26, %v464_v28  ;;  %v5995_v32 = vcombine.high %v460_v26, %v464_v28  ;;  %v5940_v39 = vcombine.low %v405_v33, %v409_v34  ;;  %v438_v26 = vld [vmem:[#allocation5 + $0x118] sm:$0xff] }
  0xb0   :  { %861 = vmatprep.mubr.bf16.mxu1 %v9744_v38 }
  0xb2   :  { %6411 = vmatpush3.bf16.msra.mxu0 %v6410_v35  ;;  %840 = vmatpush1.bf16.msra.mxu1 %v5976_v40  ;;  %v406_v35 = vld [vmem:[#allocation5 + $0x18] sm:$0xff] }
  0xb3   :  { %902 = vmatprep.subr.bf16.mxu0 %v5939_v37  ;;  %841 = vmatprep.subr.bf16.mxu1 %v5985_v17  ;;  %v410_v37 = vld [vmem:[#allocation5 + $0x38] sm:$0xff] }
  0xb4   :  { %v5942_v40 = vcombine.low %v406_v35, %v410_v37 }
  0xb6   :  { %842 = vmatpush1.bf16.msra.mxu1 %v5984_v20 }
  0xb7   :  { %843 = vmatprep.subr.bf16.mxu1 %v5993_v27  ;;  %v442_v27 = vld [vmem:[#allocation5 + $0x138] sm:$0xff] }
  0xb8   :  { %v5975_v34 = vcombine.high %v438_v26, %v442_v27 }
  0xba   :  { %844 = vmatpush1.bf16.msra.mxu1 %v5992_v30 }
  0xbb   :  { %975 = vmatprep.subr.bf16.mxu1 %v5941_v36 }
 0x10a   :  { %v164_v45 = vpop.permute.xlu0 %163  ;;  %v178_v46 = vpop.permute.xlu1 %177 }
 0x10b   :  { %vm214_vm0 = vcmp.eq.s32.totalorder %v7602_v41, %v164_v45  ;;  %vm215_vm1 = vcmp.eq.s32.totalorder %v7605_v42, %v164_v45  ;;  %vm219_vm4 = vcmp.eq.s32.totalorder %v7605_v42, %v178_v46  ;;  %vm218_vm5 = vcmp.eq.s32.totalorder %v7602_v41, %v178_v46  ;;  %v413_v46 = vld [vmem:[#allocation5 + $0x50] sm:$0xff] }
 0x10c   :  { %5920 = vmatprep.mubr.msk.f32.mxu0 %vm215_vm1, %v7346_v48 }
 0x10d   :  { %5921 = vmatmul.mubr.msk.f32.vlgmr.msra.gmra.mrb[0].mxu0 %vm214_vm0, %v7346_v48 }
 0x10e   :  { %v171_v0 = vpop.permute.xlu0 %170  ;;  %903 = vmatpush1.bf16.msra.mxu0 %v5938_v62  ;;  %v185_v54 = vpop.permute.xlu1 %184  ;;  %v5971_v62 = vcombine.high %v436_v59, %v440_v60  ;;  %v426_v59 = vld [vmem:[#allocation5 + $0xb8] sm:$0xff] }
 0x10f   :  { %vm216_vm2 = vcmp.eq.s32.totalorder %v7602_v41, %v171_v0  ;;  %vm217_vm3 = vcmp.eq.s32.totalorder %v7605_v42, %v171_v0  ;;  %904 = vmatprep.subr.bf16.mxu0 %v5947_v47  ;;  %vm221_vm6 = vcmp.eq.s32.totalorder %v7605_v42, %v185_v54  ;;  %vm220_vm7 = vcmp.eq.s32.totalorder %v7602_v41, %v185_v54 }
 0x110   :  { %5922 = vmatprep.mubr.msk.f32.mxu0 %vm217_vm3, %v7346_v48 }
 0x111   :  { %5923 = vmatmul.mubr.msk.f32.gmra.mrb[2].mxu0 %vm216_vm2, %v7346_v48 }
 0x112   :  { %5924 = vmatprep.mubr.msk.f32.mxu0 %vm219_vm4, %v7346_v48  ;;  %905 = vmatpush1.bf16.msra.mxu0 %v5946_v51  ;;  %v192_v58 = vpop.permute.xlu0 %191  ;;  %v199_v63 = vpop.permute.xlu1 %198 }
 0x113   :  { %906 = vmatprep.subr.bf16.mxu0 %v5955_v53  ;;  %vm223_vm8 = vcmp.eq.s32.totalorder %v7605_v42, %v192_v58  ;;  %vm222_vm9 = vcmp.eq.s32.totalorder %v7602_v41, %v192_v58  ;;  %vm225_vm10 = vcmp.eq.s32.totalorder %v7605_v42, %v199_v63  ;;  %vm224_vm11 = vcmp.eq.s32.totalorder %v7602_v41, %v199_v63  ;;  %v422_v58 = vld [vmem:[#allocation5 + $0x98] sm:$0xff] }
 0x114   :  { %v5959_v7 = vcombine.high %v422_v58, %v426_v59  ;;  %v5958_v16 = vcombine.low %v422_v58, %v426_v59  ;;  %v461_v59 = vld [vmem:[#allocation5 + $0x1d0] sm:$0xff] }
 0x115   :  { %5925 = vmatmul.mubr.msk.f32.gmra.mrb[4].mxu0 %vm218_vm5, %v7346_v48 }
 0x116   :  { %5926 = vmatprep.mubr.msk.f32.mxu0 %vm221_vm6, %v7346_v48  ;;  %907 = vmatpush1.bf16.msra.mxu0 %v5954_v52  ;;  %v206_v10 = vpop.permute.xlu0 %205  ;;  %v213_v12 = vpop.permute.xlu1 %212 }
 0x117   :  { %908 = vmatprep.subr.bf16.mxu0 %v5963_v56  ;;  %vm227_vm12 = vcmp.eq.s32.totalorder %v7605_v42, %v206_v10  ;;  %vm226_vm13 = vcmp.eq.s32.totalorder %v7602_v41, %v206_v10  ;;  %vm229_vm14 = vcmp.eq.s32.totalorder %v7605_v42, %v213_v12  ;;  %vm228_vm15 = vcmp.eq.s32.totalorder %v7602_v41, %v213_v12  ;;  %v425_v56 = vld [vmem:[#allocation5 + $0xb0] sm:$0xff]  ;;  %v434_v12 = vld [vmem:[#allocation5 + $0xf8] sm:$0xff] }
 0x118   :  { %v5943_v41 = vcombine.high %v406_v35, %v410_v37  ;;  %v5957_v5 = vcombine.high %v421_v57, %v425_v56  ;;  %v433_v10 = vld [vmem:[#allocation5 + $0xf0] sm:$0xff]  ;;  %v5956_v15 = vcombine.low %v421_v57, %v425_v56 }
 0x119   :  { %5927 = vmatmul.mubr.msk.f32.gmra.mrb[6].mxu0 %vm220_vm7, %v7346_v48  ;;  %v445_v35 = vld [vmem:[#allocation5 + $0x150] sm:$0xff] }
 0x11a   :  { %5928 = vmatprep.mubr.msk.f32.mxu0 %vm223_vm8, %v7346_v48  ;;  %909 = vmatpush1.bf16.msra.mxu0 %v5962_v61  ;;  %v449_v37 = vld [vmem:[#allocation5 + $0x170] sm:$0xff] }
 0x11b   :  { %910 = vmatprep.subr.bf16.mxu0 %v5971_v62  ;;  %v5950_v62 = vcombine.low %v414_v49, %v418_v50  ;;  %v457_v50 = vld [vmem:[#allocation5 + $0x1b0] sm:$0xff] }
 0x11d   :  { %5929 = vmatmul.mubr.msk.f32.gmra.mrb[8].mxu0 %vm222_vm9, %v7346_v48 }
 0x11e   :  { %5930 = vmatprep.mubr.msk.f32.mxu0 %vm225_vm10, %v7346_v48  ;;  %911 = vmatpush1.bf16.msra.mxu0 %v5970_v8  ;;  %v429_v8 = vld [vmem:[#allocation5 + $0xd0] sm:$0xff] }
 0x11f   :  { %912 = vmatprep.subr.bf16.mxu0 %v5979_v9  ;;  %v5965_v20 = vcombine.high %v429_v8, %v433_v10  ;;  %v5964_v30 = vcombine.low %v429_v8, %v433_v10 }
 0x121   :  { %5931 = vmatmul.mubr.msk.f32.gmra.mrb[10].mxu0 %vm224_vm11, %v7346_v48 }
 0x122   :  { %5932 = vmatprep.mubr.msk.f32.mxu0 %vm227_vm12, %v7346_v48  ;;  %913 = vmatpush1.bf16.msra.mxu0 %v5978_v11  ;;  %v430_v11 = vld [vmem:[#allocation5 + $0xd8] sm:$0xff] }
 0x123   :  { %914 = vmatprep.subr.bf16.mxu0 %v5987_v22  ;;  %v437_v22 = vld [vmem:[#allocation5 + $0x110] sm:$0xff] }
 0x124   :  { %v5973_v33 = vcombine.high %v437_v22, %v441_v24 }
 0x125   :  { %5933 = vmatmul.mubr.msk.f32.gmra.mrb[12].mxu0 %vm226_vm13, %v7346_v48 }
 0x126   :  { %5934 = vmatprep.mubr.msk.f32.mxu0 %vm229_vm14, %v7346_v48  ;;  %915 = vmatpush1.bf16.msra.mxu0 %v5986_v21  ;;  %v5967_v21 = vcombine.high %v430_v11, %v434_v12 }
 0x127   :  { %916 = vmatprep.subr.bf16.mxu0 %v5995_v32 }
 0x129   :  { %5935 = vmatmul.mubr.msk.f32.gmra.mrb[14].mxu0 %vm228_vm15, %v7346_v48  ;;  %v417_v48 = vld [vmem:[#allocation5 + $0x70] sm:$0xff] }
 0x12a   :  { %917 = vmatpush1.bf16.msra.mxu0 %v5994_v31  ;;  %934 = vmatprep.mubr.bf16.mxu0 %v9744_v38  ;;  %v5949_v54 = vcombine.high %v413_v46, %v417_v48  ;;  %v5948_v61 = vcombine.low %v413_v46, %v417_v48  ;;  %v5966_v31 = vcombine.low %v430_v11, %v434_v12  ;;  %v453_v48 = vld [vmem:[#allocation5 + $0x190] sm:$0xff] }
 0x12b   :  { %1048 = vmatprep.subr.bf16.mxu0 %v5943_v41  ;;  %v5981_v46 = vcombine.high %v445_v35, %v449_v37  ;;  %v5989_v56 = vcombine.high %v453_v48, %v457_v50 }
 0x1e0   :  { %v6356_v42 = vpop.f32.mrb[0].mxu0 }
 0x1e1   :  { %v6357_v43 = vpop.f32.mrb[1].mxu0 }
 0x1e2   :  { %v6358_v44 = vadd.f32 %v6357_v43, %v6356_v42  ;;  %v5972_v42 = vcombine.low %v437_v22, %v441_v24  ;;  %v5974_v43 = vcombine.low %v438_v26, %v442_v27  ;;  %v1133_v24 = vld [vmem:[#allocation7 + $0x60] sm:$0xff]  ;;  %v1130_v26 = vld [vmem:[#allocation7 + $0x48] sm:$0xff] }
 0x1e4   :  { %v6359_v45 = vpop.f32.mrb[2].mxu0 }
 0x1e5   :  { %v6360_v47 = vpop.f32.mrb[3].mxu0 }
 0x1e6   :  { %v6361_v0 = vadd.f32 %v6360_v47, %v6359_v45 }
 0x1e8   :  { %v7644_v51 = vpack.c.bf16 %v6361_v0, %v6358_v44  ;;  %v6362_v53 = vpop.f32.mrb[4].mxu0  ;;  %v454_v0 = vld [vmem:[#allocation5 + $0x198] sm:$0xff] }
 0x1e9   :  { %v6363_v52 = vpop.f32.mrb[5].mxu0 }
 0x1ea   :  { %v6364_v60 = vadd.f32 %v6363_v52, %v6362_v53  ;;  %862 = vmatmul.mubr.bf16.vlgmr.msra.gmra.mrb[0].mxu1 %v7644_v51  ;;  %935 = vmatmul.mubr.bf16.vlgmr.msra.gmra.mrb[16].mxu0 %v7644_v51  ;;  %v458_v53 = vld [vmem:[#allocation5 + $0x1b8] sm:$0xff] }
 0x1eb   :  { %976 = vmatpush1.bf16.msra.mxu1 %v5940_v39  ;;  %1049 = vmatpush1.bf16.msra.mxu0 %v5942_v40  ;;  %v446_v39 = vld [vmem:[#allocation5 + $0x158] sm:$0xff]  ;;  %v5991_v58 = vcombine.high %v454_v0, %v458_v53  ;;  %v5990_v8 = vcombine.low %v454_v0, %v458_v53  ;;  %v1157_v0 = vld [vmem:[#allocation7 + $0x120] sm:$0xff]  ;;  %v1154_v53 = vld [vmem:[#allocation7 + $0x108] sm:$0xff] }
 0x1ec   :  { %v6365_v63 = vpop.f32.mrb[6].mxu0  ;;  %977 = vmatprep.subr.bf16.mxu1 %v5949_v54  ;;  %1050 = vmatprep.subr.bf16.mxu0 %v5951_v55  ;;  %v450_v40 = vld [vmem:[#allocation5 + $0x178] sm:$0xff]  ;;  %v5980_v55 = vcombine.low %v445_v35, %v449_v37  ;;  %v1138_v35 = vld [vmem:[#allocation7 + $0x88] sm:$0xff] }
 0x1ed   :  { %v6366_v9 = vpop.f32.mrb[7].mxu0  ;;  %871 = vmatprep.mubr.bf16.mxu1 %v9744_v38  ;;  %944 = vmatprep.mubr.bf16.mxu0 %v9744_v38  ;;  %v5983_v47 = vcombine.high %v446_v39, %v450_v40  ;;  %v5982_v57 = vcombine.low %v446_v39, %v450_v40  ;;  %v1142_v37 = vld [vmem:[#allocation7 + $0xa8] sm:$0xff] }
 0x1ee   :  { %v6367_v14 = vadd.f32 %v6366_v9, %v6365_v63  ;;  %v466_v63 = vld [vmem:[#allocation5 + $0x1f8] sm:$0xff]  ;;  %v7698_v40 = vcombine.high %v1138_v35, %v1142_v37 }
 0x1ef   :  { %978 = vmatpush1.bf16.msra.mxu1 %v5948_v61  ;;  %1051 = vmatpush1.bf16.msra.mxu0 %v5950_v62  ;;  %v465_v61 = vld [vmem:[#allocation5 + $0x1f0] sm:$0xff]  ;;  %v462_v62 = vld [vmem:[#allocation5 + $0x1d8] sm:$0xff] }
 0x1f0   :  { %v7650_v17 = vpack.c.bf16 %v6367_v14, %v6364_v60  ;;  %v6368_v19 = vpop.f32.mrb[8].mxu0  ;;  %979 = vmatprep.subr.bf16.mxu1 %v5957_v5  ;;  %1052 = vmatprep.subr.bf16.mxu0 %v5959_v7  ;;  %v5988_v7 = vcombine.low %v453_v48, %v457_v50  ;;  %v5997_v10 = vcombine.high %v461_v59, %v465_v61  ;;  %v1153_v50 = vld [vmem:[#allocation7 + $0x100] sm:$0xff] }
 0x1f1   :  { %v6369_v23 = vpop.f32.mrb[9].mxu0  ;;  %v5999_v11 = vcombine.high %v462_v62, %v466_v63  ;;  %v5996_v12 = vcombine.low %v461_v59, %v465_v61  ;;  %v5998_v14 = vcombine.low %v462_v62, %v466_v63  ;;  %10050 = vst [vmem:[#allocation35_spill] sm:$0xff] %v7698_v40  ;;  %v1165_v59 = vld [vmem:[#allocation7 + $0x160] sm:$0xff]  ;;  %v1166_v62 = vld [vmem:[#allocation7 + $0x168] sm:$0xff] }
 0x1f2   :  { %v6370_v28 = vadd.f32 %v6369_v23, %v6368_v19  ;;  %872 = vmatmul.mubr.bf16.gmra.mrb[4].mxu1 %v7650_v17  ;;  %945 = vmatmul.mubr.bf16.gmra.mrb[20].mxu0 %v7650_v17  ;;  %v1129_v23 = vld [vmem:[#allocation7 + $0x40] sm:$0xff] }
 0x1f3   :  { %980 = vmatpush1.bf16.msra.mxu1 %v5956_v15  ;;  %1053 = vmatpush1.bf16.msra.mxu0 %v5958_v16  ;;  %v1125_v15 = vld [vmem:[#allocation7 + $0x20] sm:$0xff]  ;;  %v1122_v16 = vld [vmem:[#allocation7 + $0x8] sm:$0xff]  ;;  %v7682_v27 = vcombine.high %v1129_v23, %v1133_v24 }
 0x1f4   :  { %v6371_v32 = vpop.f32.mrb[10].mxu0  ;;  %981 = vmatprep.subr.bf16.mxu1 %v5965_v20  ;;  %1054 = vmatprep.subr.bf16.mxu0 %v5967_v21  ;;  %v1126_v20 = vld [vmem:[#allocation7 + $0x28] sm:$0xff] }
 0x1f5   :  { %v6372_v36 = vpop.f32.mrb[11].mxu0  ;;  %881 = vmatprep.mubr.bf16.mxu1 %v9744_v38  ;;  %954 = vmatprep.mubr.bf16.mxu0 %v9744_v38  ;;  %v7676_v22 = vcombine.low %v1122_v16, %v1126_v20  ;;  %10044 = vst [vmem:[#allocation29_spill] sm:$0xff] %v7682_v27 }
 0x1f6   :  { %v6373_v41 = vadd.f32 %v6372_v36, %v6371_v32 }
 0x1f7   :  { %982 = vmatpush1.bf16.msra.mxu1 %v5964_v30  ;;  %1055 = vmatpush1.bf16.msra.mxu0 %v5966_v31  ;;  %10043 = vst [vmem:[#allocation28_spill] sm:$0xff] %v7676_v22  ;;  %v7686_v31 = vcombine.low %v1129_v23, %v1133_v24  ;;  %v1178_v23 = vld [vmem:[#allocation7 + $0x1c8] sm:$0xff] }
 0x1f8   :  { %v401_v44 = vpack.c.bf16 %v6373_v41, %v6370_v28  ;;  %v6374_v45 = vpop.f32.mrb[12].mxu0  ;;  %983 = vmatprep.subr.bf16.mxu1 %v5973_v33  ;;  %1056 = vmatprep.subr.bf16.mxu0 %v5975_v34  ;;  %v1134_v28 = vld [vmem:[#allocation7 + $0x68] sm:$0xff]  ;;  %v1137_v33 = vld [vmem:[#allocation7 + $0x80] sm:$0xff]  ;;  %v7700_v41 = vcombine.low %v1138_v35, %v1142_v37 }
 0x1f9   :  { %v6375_v49 = vpop.f32.mrb[13].mxu0  ;;  %v7684_v30 = vcombine.high %v1130_v26, %v1134_v28  ;;  %10046 = vst [vmem:[#allocation31_spill] sm:$0xff] %v7686_v31  ;;  %v7688_v32 = vcombine.low %v1130_v26, %v1134_v28  ;;  %v1141_v34 = vld [vmem:[#allocation7 + $0xa0] sm:$0xff]  ;;  %v1182_v26 = vld [vmem:[#allocation7 + $0x1e8] sm:$0xff] }
 0x1fa   :  { %v6376_v54 = vadd.f32 %v6375_v49, %v6374_v45  ;;  %882 = vmatmul.mubr.bf16.gmra.mrb[8].mxu1 %v401_v44  ;;  %955 = vmatmul.mubr.bf16.gmra.mrb[24].mxu0 %v401_v44  ;;  %v7694_v36 = vcombine.high %v1137_v33, %v1141_v34  ;;  %v7696_v39 = vcombine.low %v1137_v33, %v1141_v34  ;;  %v1185_v35 = vld [vmem:[#allocation7 + $0x200] sm:$0xff] }
 0x1fb   :  { %984 = vmatpush1.bf16.msra.mxu1 %v5972_v42  ;;  %1057 = vmatpush1.bf16.msra.mxu0 %v5974_v43  ;;  %10045 = vst [vmem:[#allocation30_spill] sm:$0xff] %v7684_v30  ;;  %10047 = vst [vmem:[#allocation32_spill] sm:$0xff] %v7688_v32  ;;  %v1145_v42 = vld [vmem:[#allocation7 + $0xc0] sm:$0xff]  ;;  %v7756_v28 = vcombine.high %v1178_v23, %v1182_v26  ;;  %v7760_v34 = vcombine.low %v1178_v23, %v1182_v26  ;;  %v1206_v23 = vld [vmem:[#allocation7 + $0x2a8] sm:$0xff] }
 0x1fc   :  { %v6377_v52 = vpop.f32.mrb[14].mxu0  ;;  %985 = vmatprep.subr.bf16.mxu1 %v5981_v46  ;;  %1058 = vmatprep.subr.bf16.mxu0 %v5983_v47  ;;  %10048 = vst [vmem:[#allocation33_spill] sm:$0xff] %v7694_v36  ;;  %10049 = vst [vmem:[#allocation34_spill] sm:$0xff] %v7696_v39  ;;  %v1149_v43 = vld [vmem:[#allocation7 + $0xe0] sm:$0xff]  ;;  %v1150_v46 = vld [vmem:[#allocation7 + $0xe8] sm:$0xff] }
 0x1fd   :  { %v6378_v60 = vpop.f32.mrb[15].mxu0  ;;  %891 = vmatprep.mubr.bf16.mxu1 %v9744_v38  ;;  %964 = vmatprep.mubr.bf16.mxu0 %v9744_v38  ;;  %10051 = vst [vmem:[#allocation36_spill] sm:$0xff] %v7700_v41  ;;  %v7706_v45 = vcombine.high %v1145_v42, %v1149_v43  ;;  %v7710_v48 = vcombine.low %v1145_v42, %v1149_v43  ;;  %10069 = vst [vmem:[#allocation54_spill] sm:$0xff] %v7756_v28  ;;  %v1189_v37 = vld [vmem:[#allocation7 + $0x220] sm:$0xff]  ;;  %v1186_v42 = vld [vmem:[#allocation7 + $0x208] sm:$0xff] }
 0x1fe   :  { %v6379_v5 = vadd.f32 %v6378_v60, %v6377_v52  ;;  %v7722_v52 = vcombine.low %v1153_v50, %v1157_v0  ;;  %v1162_v60 = vld [vmem:[#allocation7 + $0x148] sm:$0xff]  ;;  %10071 = vst [vmem:[#allocation56_spill] sm:$0xff] %v7760_v34  ;;  %v7766_v43 = vcombine.high %v1185_v35, %v1189_v37 }
 0x1ff   :  { %986 = vmatpush1.bf16.msra.mxu1 %v5980_v55  ;;  %1059 = vmatpush1.bf16.msra.mxu0 %v5982_v57  ;;  %10052 = vst [vmem:[#allocation37_spill] sm:$0xff] %v7706_v45  ;;  %10054 = vst [vmem:[#allocation39_spill] sm:$0xff] %v7710_v48  ;;  %v1158_v55 = vld [vmem:[#allocation7 + $0x128] sm:$0xff]  ;;  %v7732_v63 = vcombine.high %v1162_v60, %v1166_v62 }
 0x200   :  { %v402_v9 = vpack.c.bf16 %v6379_v5, %v6376_v54  ;;  %987 = vmatprep.subr.bf16.mxu1 %v5989_v56  ;;  %1060 = vmatprep.subr.bf16.mxu0 %v5991_v58  ;;  %v7718_v54 = vcombine.high %v1153_v50, %v1157_v0  ;;  %v7720_v57 = vcombine.high %v1154_v53, %v1158_v55  ;;  %v1161_v58 = vld [vmem:[#allocation7 + $0x140] sm:$0xff] }
 0x201   :  { %10058 = vst [vmem:[#allocation43_spill] sm:$0xff] %v7722_v52  ;;  %v7724_v56 = vcombine.low %v1154_v53, %v1158_v55  ;;  %v7730_v61 = vcombine.high %v1161_v58, %v1165_v59  ;;  %10061 = vst [vmem:[#allocation46_spill] sm:$0xff] %v7732_v63  ;;  %v7734_v5 = vcombine.low %v1161_v58, %v1165_v59  ;;  %v1193_v53 = vld [vmem:[#allocation7 + $0x240] sm:$0xff]  ;;  %v1194_v58 = vld [vmem:[#allocation7 + $0x248] sm:$0xff] }
 0x202   :  { %892 = vmatmul.mubr.bf16.gmra.mrb[12].mxu1 %v402_v9  ;;  %965 = vmatmul.mubr.bf16.gmra.mrb[28].mxu0 %v402_v9  ;;  %10056 = vst [vmem:[#allocation41_spill] sm:$0xff] %v7718_v54  ;;  %10057 = vst [vmem:[#allocation42_spill] sm:$0xff] %v7720_v57  ;;  %v7770_v50 = vcombine.low %v1185_v35, %v1189_v37  ;;  %v1197_v55 = vld [vmem:[#allocation7 + $0x260] sm:$0xff] }
 0x203   :  { %988 = vmatpush1.bf16.msra.mxu1 %v5988_v7  ;;  %1061 = vmatpush1.bf16.msra.mxu0 %v5990_v8  ;;  %10059 = vst [vmem:[#allocation44_spill] sm:$0xff] %v7724_v56  ;;  %10060 = vst [vmem:[#allocation45_spill] sm:$0xff] %v7730_v61  ;;  %v7736_v7 = vcombine.low %v1162_v60, %v1166_v62  ;;  %v1169_v8 = vld [vmem:[#allocation7 + $0x180] sm:$0xff]  ;;  %v7778_v59 = vcombine.high %v1193_v53, %v1197_v55  ;;  %v1198_v60 = vld [vmem:[#allocation7 + $0x268] sm:$0xff] }
 0x204   :  { %989 = vmatprep.subr.bf16.mxu1 %v5997_v10  ;;  %1062 = vmatprep.subr.bf16.mxu0 %v5999_v11  ;;  %10062 = vst [vmem:[#allocation47_spill] sm:$0xff] %v7734_v5  ;;  %v1170_v10 = vld [vmem:[#allocation7 + $0x188] sm:$0xff]  ;;  %10072 = vst [vmem:[#allocation57_spill] sm:$0xff] %v7766_v43  ;;  %v7780_v62 = vcombine.high %v1194_v58, %v1198_v60 }
 0x205   :  { %1007 = vmatprep.mubr.bf16.mxu1 %v9744_v38  ;;  %1080 = vmatprep.mubr.bf16.mxu0 %v9744_v38  ;;  %10063 = vst [vmem:[#allocation48_spill] sm:$0xff] %v7736_v7  ;;  %10074 = vst [vmem:[#allocation59_spill] sm:$0xff] %v7770_v50 }
 0x206   :  { %10076 = vst [vmem:[#allocation61_spill] sm:$0xff] %v7778_v59  ;;  %10077 = vst [vmem:[#allocation62_spill] sm:$0xff] %v7780_v62 }
 0x207   :  { %990 = vmatpush1.bf16.msra.mxu1 %v5996_v12  ;;  %1063 = vmatpush1.bf16.msra.mxu0 %v5998_v14  ;;  %v1174_v12 = vld [vmem:[#allocation7 + $0x1a8] sm:$0xff] }
 0x208   :  { %v7744_v14 = vcombine.high %v1170_v10, %v1174_v12 }
 0x20a   :  { %1008 = vmatmul.mubr.bf16.vlgmr.msra.gmra.mrb[16].mxu1 %v7644_v51  ;;  %1081 = vmatmul.mubr.bf16.vlgmr.msra.gmra.mrb[32].mxu0 %v7644_v51  ;;  %v1121_v51 = vld [vmem:[#allocation7] sm:$0xff]  ;;  %10065 = vst [vmem:[#allocation50_spill] sm:$0xff] %v7744_v14 }
 0x20b   :  { %1017 = vmatprep.mubr.bf16.mxu1 %v9744_v38  ;;  %1090 = vmatprep.mubr.bf16.mxu0 %v9744_v38  ;;  %v7670_v19 = vcombine.high %v1121_v51, %v1125_v15  ;;  %v7672_v21 = vcombine.low %v1121_v51, %v1125_v15  ;;  %v7748_v15 = vcombine.low %v1170_v10, %v1174_v12  ;;  %v1201_v10 = vld [vmem:[#allocation7 + $0x280] sm:$0xff] }
 0x20c   :  { %v1205_v12 = vld [vmem:[#allocation7 + $0x2a0] sm:$0xff] }
 0x20d   :  { %10040 = vst [vmem:[#allocation25_spill] sm:$0xff] %v7670_v19  ;;  %10041 = vst [vmem:[#allocation26_spill] sm:$0xff] %v7672_v21  ;;  %1942 = vmatprep.subr.bf16.mxu1 %v7670_v19  ;;  %v7794_v35 = vcombine.low %v1201_v10, %v1205_v12 }
 0x20e   :  { %1943 = vmatpush1.bf16.msra.mxu1 %v7672_v21  ;;  %10067 = vst [vmem:[#allocation52_spill] sm:$0xff] %v7748_v15 }
 0x20f   :  { %1944 = vmatprep.subr.bf16.mxu1 %v7682_v27  ;;  %10082 = vst [vmem:[#allocation67_spill] sm:$0xff] %v7794_v35 }
 0x212   :  { %1018 = vmatmul.mubr.bf16.gmra.mrb[20].mxu1 %v7650_v17  ;;  %1091 = vmatmul.mubr.bf16.gmra.mrb[36].mxu0 %v7650_v17  ;;  %v7674_v17 = vcombine.high %v1122_v16, %v1126_v20  ;;  %v1177_v16 = vld [vmem:[#allocation7 + $0x1c0] sm:$0xff] }
 0x213   :  { %1027 = vmatprep.mubr.bf16.mxu1 %v9744_v38  ;;  %1100 = vmatprep.mubr.bf16.mxu0 %v9744_v38  ;;  %v1181_v20 = vld [vmem:[#allocation7 + $0x1e0] sm:$0xff] }
 0x214   :  { %10042 = vst [vmem:[#allocation27_spill] sm:$0xff] %v7674_v17  ;;  %1983 = vmatprep.subr.bf16.mxu0 %v7674_v17  ;;  %1945 = vmatpush1.bf16.msra.mxu1 %v7686_v31  ;;  %v7754_v24 = vcombine.high %v1177_v16, %v1181_v20  ;;  %v7758_v33 = vcombine.low %v1177_v16, %v1181_v20  ;;  %v1202_v16 = vld [vmem:[#allocation7 + $0x288] sm:$0xff] }
 0x215   :  { %1984 = vmatpush1.bf16.msra.mxu0 %v7676_v22  ;;  %1946 = vmatprep.subr.bf16.mxu1 %v7694_v36  ;;  %v7790_v20 = vcombine.high %v1201_v10, %v1205_v12  ;;  %v7792_v26 = vcombine.high %v1202_v16, %v1206_v23  ;;  %v7796_v37 = vcombine.low %v1202_v16, %v1206_v23  ;;  %v1217_v16 = vld [vmem:[#allocation7 + $0x300] sm:$0xff] }
 0x216   :  { %1985 = vmatprep.subr.bf16.mxu0 %v7684_v30  ;;  %10068 = vst [vmem:[#allocation53_spill] sm:$0xff] %v7754_v24  ;;  %10070 = vst [vmem:[#allocation55_spill] sm:$0xff] %v7758_v33  ;;  %v1221_v23 = vld [vmem:[#allocation7 + $0x320] sm:$0xff] }
 0x217   :  { %10080 = vst [vmem:[#allocation65_spill] sm:$0xff] %v7790_v20  ;;  %10081 = vst [vmem:[#allocation66_spill] sm:$0xff] %v7792_v26  ;;  %v7814_v29 = vcombine.high %v1217_v16, %v1221_v23 }
 0x218   :  { %1947 = vmatpush1.bf16.msra.mxu1 %v7696_v39  ;;  %10083 = vst [vmem:[#allocation68_spill] sm:$0xff] %v7796_v37 }
 0x219   :  { %1986 = vmatpush1.bf16.msra.mxu0 %v7688_v32  ;;  %1948 = vmatprep.subr.bf16.mxu1 %v7706_v45  ;;  %10088 = vst [vmem:[#allocation73_spill] sm:$0xff] %v7814_v29 }
 0x21a   :  { %1028 = vmatmul.mubr.bf16.gmra.mrb[24].mxu1 %v401_v44  ;;  %1101 = vmatmul.mubr.bf16.gmra.mrb[40].mxu0 %v401_v44  ;;  %v1146_v44 = vld [vmem:[#allocation7 + $0xc8] sm:$0xff] }
 0x21b   :  { %1037 = vmatprep.mubr.bf16.mxu1 %v9744_v38  ;;  %1110 = vmatprep.mubr.bf16.mxu0 %v9744_v38  ;;  %v7708_v47 = vcombine.high %v1146_v44, %v1150_v46  ;;  %v7712_v49 = vcombine.low %v1146_v44, %v1150_v46  ;;  %v1190_v44 = vld [vmem:[#allocation7 + $0x228] sm:$0xff] }
 0x21c   :  { %1987 = vmatprep.subr.bf16.mxu0 %v7698_v40  ;;  %1949 = vmatpush1.bf16.msra.mxu1 %v7710_v48  ;;  %v7768_v46 = vcombine.high %v1186_v42, %v1190_v44  ;;  %v7772_v0 = vcombine.low %v1186_v42, %v1190_v44  ;;  %v1209_v42 = vld [vmem:[#allocation7 + $0x2c0] sm:$0xff]  ;;  %v1218_v38 = vld [vmem:[#allocation7 + $0x308] sm:$0xff] }
 0x21d   :  { %1988 = vmatpush1.bf16.msra.mxu0 %v7700_v41  ;;  %10053 = vst [vmem:[#allocation38_spill] sm:$0xff] %v7708_v47  ;;  %10055 = vst [vmem:[#allocation40_spill] sm:$0xff] %v7712_v49  ;;  %1950 = vmatprep.subr.bf16.mxu1 %v7718_v54  ;;  %v1213_v44 = vld [vmem:[#allocation7 + $0x2e0] sm:$0xff]  ;;  %v7816_v25 = vcombine.high %v1218_v38, %v1222_v18 }
 0x21e   :  { %1989 = vmatprep.subr.bf16.mxu0 %v7708_v47  ;;  %10073 = vst [vmem:[#allocation58_spill] sm:$0xff] %v7768_v46  ;;  %10075 = vst [vmem:[#allocation60_spill] sm:$0xff] %v7772_v0  ;;  %v7806_v10 = vcombine.low %v1209_v42, %v1213_v44 }
 0x21f   :  { %10089 = vst [vmem:[#allocation74_spill] sm:$0xff] %v7816_v25 }
 0x220   :  { %1951 = vmatpush1.bf16.msra.mxu1 %v7722_v52  ;;  %10086 = vst [vmem:[#allocation71_spill] sm:$0xff] %v7806_v10 }
 0x221   :  { %1990 = vmatpush1.bf16.msra.mxu0 %v7712_v49  ;;  %1952 = vmatprep.subr.bf16.mxu1 %v7730_v61 }
 0x222   :  { %1038 = vmatmul.mubr.bf16.gmra.mrb[28].mxu1 %v402_v9  ;;  %1111 = vmatmul.mubr.bf16.gmra.mrb[44].mxu0 %v402_v9  ;;  %v1173_v9 = vld [vmem:[#allocation7 + $0x1a0] sm:$0xff] }
 0x223   :  { %1991 = vmatprep.subr.bf16.mxu0 %v7720_v57  ;;  %v7742_v11 = vcombine.high %v1169_v8, %v1173_v9  ;;  %v7746_v51 = vcombine.low %v1169_v8, %v1173_v9  ;;  %v7782_v8 = vcombine.low %v1193_v53, %v1197_v55  ;;  %v7784_v9 = vcombine.low %v1194_v58, %v1198_v60  ;;  %v1210_v53 = vld [vmem:[#allocation7 + $0x2c8] sm:$0xff] }
 0x224   :  { %1953 = vmatpush1.bf16.msra.mxu1 %v7734_v5  ;;  %v7802_v55 = vcombine.high %v1209_v42, %v1213_v44  ;;  %v1214_v58 = vld [vmem:[#allocation7 + $0x2e8] sm:$0xff]  ;;  %v7818_v42 = vcombine.low %v1217_v16, %v1221_v23  ;;  %v7820_v44 = vcombine.low %v1218_v38, %v1222_v18  ;;  %v1233_v38 = vld [vmem:[#allocation7 + $0x380] sm:$0xff] }
 0x225   :  { %1992 = vmatpush1.bf16.msra.mxu0 %v7724_v56  ;;  %10064 = vst [vmem:[#allocation49_spill] sm:$0xff] %v7742_v11  ;;  %10066 = vst [vmem:[#allocation51_spill] sm:$0xff] %v7746_v51  ;;  %1954 = vmatprep.subr.bf16.mxu1 %v7742_v11  ;;  %v7804_v60 = vcombine.high %v1210_v53, %v1214_v58  ;;  %v7808_v12 = vcombine.low %v1210_v53, %v1214_v58  ;;  %v1225_v53 = vld [vmem:[#allocation7 + $0x340] sm:$0xff] }
 0x226   :  { %1993 = vmatprep.subr.bf16.mxu0 %v7732_v63  ;;  %10078 = vst [vmem:[#allocation63_spill] sm:$0xff] %v7782_v8  ;;  %10079 = vst [vmem:[#allocation64_spill] sm:$0xff] %v7784_v9  ;;  %v1229_v58 = vld [vmem:[#allocation7 + $0x360] sm:$0xff] }
 0x227   :  { %10084 = vst [vmem:[#allocation69_spill] sm:$0xff] %v7802_v55  ;;  %10085 = vst [vmem:[#allocation70_spill] sm:$0xff] %v7804_v60  ;;  %v7830_v16 = vcombine.low %v1225_v53, %v1229_v58  ;;  %v1237_v23 = vld [vmem:[#allocation7 + $0x3a0] sm:$0xff] }
 0x228   :  { %1955 = vmatpush1.bf16.msra.mxu1 %v7746_v51  ;;  %10087 = vst [vmem:[#allocation72_spill] sm:$0xff] %v7808_v12  ;;  %10090 = vst [vmem:[#allocation75_spill] sm:$0xff] %v7818_v42 }
 0x229   :  { %1994 = vmatpush1.bf16.msra.mxu0 %v7736_v7  ;;  %1956 = vmatprep.subr.bf16.mxu1 %v7754_v24  ;;  %10091 = vst [vmem:[#allocation76_spill] sm:$0xff] %v7820_v44  ;;  %10094 = vst [vmem:[#allocation79_spill] sm:$0xff] %v7830_v16 }
 0x22a   :  { %1995 = vmatprep.subr.bf16.mxu0 %v7744_v14 }
 0x22c   :  { %1957 = vmatpush1.bf16.msra.mxu1 %v7758_v33 }
 0x22d   :  { %1996 = vmatpush1.bf16.msra.mxu0 %v7748_v15  ;;  %1958 = vmatprep.subr.bf16.mxu1 %v7766_v43 }
 0x22e   :  { %1997 = vmatprep.subr.bf16.mxu0 %v7756_v28 }
 0x230   :  { %1959 = vmatpush1.bf16.msra.mxu1 %v7770_v50 }
 0x231   :  { %1998 = vmatpush1.bf16.msra.mxu0 %v7760_v34  ;;  %1960 = vmatprep.subr.bf16.mxu1 %v7778_v59 }
 0x232   :  { %1999 = vmatprep.subr.bf16.mxu0 %v7768_v46 }
 0x234   :  { %1961 = vmatpush1.bf16.msra.mxu1 %v7782_v8 }
 0x235   :  { %2000 = vmatpush1.bf16.msra.mxu0 %v7772_v0  ;;  %1962 = vmatprep.subr.bf16.mxu1 %v7790_v20 }
 0x236   :  { %2001 = vmatprep.subr.bf16.mxu0 %v7780_v62 }
 0x238   :  { %1963 = vmatpush1.bf16.msra.mxu1 %v7794_v35 }
 0x239   :  { %2002 = vmatpush1.bf16.msra.mxu0 %v7784_v9  ;;  %1964 = vmatprep.subr.bf16.mxu1 %v7802_v55 }
 0x23a   :  { %2003 = vmatprep.subr.bf16.mxu0 %v7792_v26 }
 0x23c   :  { %1965 = vmatpush1.bf16.msra.mxu1 %v7806_v10  ;;  %v1230_v10 = vld [vmem:[#allocation7 + $0x368] sm:$0xff] }
 0x23d   :  { %2004 = vmatpush1.bf16.msra.mxu0 %v7796_v37  ;;  %1966 = vmatprep.subr.bf16.mxu1 %v7814_v29  ;;  %v7832_v18 = vcombine.low %v1226_v13, %v1230_v10 }
 0x23e   :  { %2005 = vmatprep.subr.bf16.mxu0 %v7804_v60  ;;  %v7828_v60 = vcombine.high %v1226_v13, %v1230_v10  ;;  %v1241_v10 = vld [vmem:[#allocation7 + $0x3c0] sm:$0xff] }
 0x23f   :  { %10095 = vst [vmem:[#allocation80_spill] sm:$0xff] %v7832_v18 }
 0x240   :  { %1967 = vmatpush1.bf16.msra.mxu1 %v7818_v42  ;;  %10093 = vst [vmem:[#allocation78_spill] sm:$0xff] %v7828_v60  ;;  %v1234_v42 = vld [vmem:[#allocation7 + $0x388] sm:$0xff] }
 0x241   :  { %2006 = vmatpush1.bf16.msra.mxu0 %v7808_v12  ;;  %v7826_v12 = vcombine.high %v1225_v53, %v1229_v58  ;;  %v7842_v53 = vcombine.low %v1233_v38, %v1237_v23  ;;  %v1245_v58 = vld [vmem:[#allocation7 + $0x3e0] sm:$0xff] }
 0x242   :  { %2007 = vmatprep.subr.bf16.mxu0 %v7816_v25  ;;  %v1238_v25 = vld [vmem:[#allocation7 + $0x3a8] sm:$0xff] }
 0x243   :  { %10092 = vst [vmem:[#allocation77_spill] sm:$0xff] %v7826_v12  ;;  %1968 = vmatprep.subr.bf16.mxu1 %v7826_v12  ;;  %v7840_v29 = vcombine.high %v1234_v42, %v1238_v25  ;;  %10098 = vst [vmem:[#allocation83_spill] sm:$0xff] %v7842_v53  ;;  %v7844_v13 = vcombine.low %v1234_v42, %v1238_v25  ;;  %v1123_v42 = vld [vmem:[#allocation7 + $0x10] sm:$0xff] }
 0x244   :  { %1969 = vmatpush1.bf16.msra.mxu1 %v7830_v16  ;;  %v1242_v16 = vld [vmem:[#allocation7 + $0x3c8] sm:$0xff] }
 0x245   :  { %2008 = vmatpush1.bf16.msra.mxu0 %v7820_v44  ;;  %v7838_v44 = vcombine.high %v1233_v38, %v1237_v23  ;;  %10097 = vst [vmem:[#allocation82_spill] sm:$0xff] %v7840_v29  ;;  %10099 = vst [vmem:[#allocation84_spill] sm:$0xff] %v7844_v13  ;;  %v7854_v38 = vcombine.low %v1241_v10, %v1245_v58  ;;  %v1127_v23 = vld [vmem:[#allocation7 + $0x30] sm:$0xff] }
 0x246   :  { %2009 = vmatprep.subr.bf16.mxu0 %v7828_v60  ;;  %v1246_v60 = vld [vmem:[#allocation7 + $0x3e8] sm:$0xff] }
 0x247   :  { %10096 = vst [vmem:[#allocation81_spill] sm:$0xff] %v7838_v44  ;;  %1970 = vmatprep.subr.bf16.mxu1 %v7838_v44  ;;  %v7852_v12 = vcombine.high %v1242_v16, %v1246_v60  ;;  %10102 = vst [vmem:[#allocation87_spill] sm:$0xff] %v7854_v38  ;;  %v7856_v25 = vcombine.low %v1242_v16, %v1246_v60  ;;  %v7875_v16 = vld [vmem:[%s9734_s4] sm:$0xff] }
 0x248   :  { %1971 = vmatpush1.bf16.msra.mxu1 %v7842_v53  ;;  %v1124_v53 = vld [vmem:[#allocation7 + $0x18] sm:$0xff] }
 0x249   :  { %2010 = vmatpush1.bf16.msra.mxu0 %v7832_v18  ;;  %v7850_v18 = vcombine.high %v1241_v10, %v1245_v58  ;;  %10101 = vst [vmem:[#allocation86_spill] sm:$0xff] %v7852_v12  ;;  %10103 = vst [vmem:[#allocation88_spill] sm:$0xff] %v7856_v25  ;;  %v7866_v10 = vcombine.low %v1123_v42, %v1127_v23  ;;  %v7879_v58 = vrot.slane %v7875_v16, %v7563_v2 }
 0x24a   :  { %2011 = vmatprep.subr.bf16.mxu0 %v7840_v29  ;;  %v1128_v29 = vld [vmem:[#allocation7 + $0x38] sm:$0xff] }
 0x24b   :  { %10100 = vst [vmem:[#allocation85_spill] sm:$0xff] %v7850_v18  ;;  %1972 = vmatprep.subr.bf16.mxu1 %v7850_v18  ;;  %v7864_v44 = vcombine.high %v1124_v53, %v1128_v29  ;;  %v7868_v60 = vcombine.low %v1124_v53, %v1128_v29  ;;  %v7887_v53 = vrot.slane %v7875_v16, %v7566_v3 }
 0x24c   :  { %1973 = vmatpush1.bf16.msra.mxu1 %v7854_v38  ;;  %v7894_v38 = vrot.slane %v7875_v16, %v7575_v6 }
 0x24d   :  { %2012 = vmatpush1.bf16.msra.mxu0 %v7844_v13  ;;  %v7862_v13 = vcombine.high %v1123_v42, %v1127_v23  ;;  %10105 = vst [vmem:[#allocation90_spill] sm:$0xff] %v7864_v44 }
 0x24e   :  { %2013 = vmatprep.subr.bf16.mxu0 %v7852_v12 }
 0x24f   :  { %10104 = vst [vmem:[#allocation89_spill] sm:$0xff] %v7862_v13  ;;  %2024 = vmatprep.subr.bf16.mxu1 %v7862_v13 }
 0x251   :  { %2014 = vmatpush1.bf16.msra.mxu0 %v7856_v25  ;;  %v7883_v25 = vrot.slane %v7875_v16, %v7569_v4 }
 0x252   :  { %2065 = vmatprep.subr.bf16.mxu0 %v7864_v44 }
 0x2bd   :  { %v863_v42 = vpop.f32.mrb[0].mxu1  ;;  %v936_v29 = vpop.f32.mrb[16].mxu0 }
 0x2be   :  { %v864_v23 = vadd.f32 %v863_v42, %v7879_v58  ;;  %v865_v44 = vpop.f32.mrb[1].mxu1  ;;  %v7890_v13 = vpop.f32.mrb[17].mxu0 }
 0x2bf   :  { %v866_v2 = vadd.f32 %v865_v44, %v7883_v25  ;;  %v867_v12 = vpop.f32.mrb[2].mxu1  ;;  %v940_v4 = vpop.f32.mrb[18].mxu0 }
 0x2c0   :  { %v1249_v18 = vsub.f32 0.0, %v864_v23  ;;  %v7898_v55 = vadd.f32 %v867_v12, %v7879_v58  ;;  %v7901_v3 = vadd.f32 %v940_v4, %v7887_v53  ;;  %v869_v37 = vpop.f32.mrb[3].mxu1  ;;  %v942_v42 = vpop.f32.mrb[19].mxu0 }
 0x2c1   :  { %v1255_v35 = vsub.f32 0.0, %v866_v2  ;;  %v7904_v26 = vadd.f32 %v869_v37, %v7883_v25  ;;  %v7907_v6 = vadd.f32 %v942_v42, %v7894_v38 }
 0x2c2   :  { %10106 = vst [vmem:[#allocation91_spill] sm:$0xff] %v7898_v55  ;;  %10107 = vst [vmem:[#allocation92_spill] sm:$0xff] %v7901_v3  ;;  %v1250_v20 = vmul.f32 1.442695, %v1249_v18 }
 0x2c3   :  { %10108 = vst [vmem:[#allocation93_spill] sm:$0xff] %v7904_v26  ;;  %10109 = vst [vmem:[#allocation94_spill] sm:$0xff] %v7907_v6  ;;  %v1256_v44 = vmul.f32 1.442695, %v1255_v35 }
 0x2c4   :  { %6716 = vpow2.f32 %v1250_v20 }
 0x2c5   :  { %6718 = vpow2.f32 %v1256_v44  ;;  %v873_v23 = vpop.f32.mrb[4].mxu1  ;;  %v946_v9 = vpop.f32.mrb[20].mxu0 }
 0x2c6   :  { %v7910_v12 = vadd.f32 %v873_v23, %v7879_v58  ;;  %v7913_v4 = vadd.f32 %v946_v9, %v7887_v53  ;;  %v875_v3 = vpop.f32.mrb[5].mxu1  ;;  %v948_v2 = vpop.f32.mrb[21].mxu0 }
 0x2c7   :  { %v7916_v37 = vadd.f32 %v875_v3, %v7883_v25  ;;  %v7919_v42 = vadd.f32 %v948_v2, %v7894_v38  ;;  %v877_v18 = vpop.f32.mrb[6].mxu1  ;;  %v950_v35 = vpop.f32.mrb[22].mxu0  ;;  %v937_v3 = vadd.f32 %v936_v29, %v7887_v53 }
 0x2c8   :  { %10110 = vst [vmem:[#allocation95_spill] sm:$0xff] %v7910_v12  ;;  %10111 = vst [vmem:[#allocation96_spill] sm:$0xff] %v7913_v4  ;;  %v7922_v20 = vadd.f32 %v877_v18, %v7879_v58  ;;  %v7925_v44 = vadd.f32 %v950_v35, %v7887_v53  ;;  %v879_v23 = vpop.f32.mrb[7].mxu1  ;;  %v952_v12 = vpop.f32.mrb[23].mxu0 }
 0x2c9   :  { %10112 = vst [vmem:[#allocation97_spill] sm:$0xff] %v7916_v37  ;;  %10113 = vst [vmem:[#allocation98_spill] sm:$0xff] %v7919_v42  ;;  %v7928_v9 = vadd.f32 %v879_v23, %v7883_v25  ;;  %v7931_v4 = vadd.f32 %v952_v12, %v7894_v38  ;;  %6720 = vtanh.f32 %v937_v3 }
 0x2ca   :  { %10114 = vst [vmem:[#allocation99_spill] sm:$0xff] %v7922_v20  ;;  %10115 = vst [vmem:[#allocation100_spill] sm:$0xff] %v7925_v44 }
 0x2cb   :  { %10116 = vst [vmem:[#allocation101_spill] sm:$0xff] %v7928_v9  ;;  %10117 = vst [vmem:[#allocation102_spill] sm:$0xff] %v7931_v4 }
 0x2cd   :  { %v883_v2 = vpop.f32.mrb[8].mxu1  ;;  %v956_v42 = vpop.f32.mrb[24].mxu0 }
 0x2ce   :  { %v6717_v37 = vpop.eup %6716  ;;  %v7935_v6 = vadd.f32 %v883_v2, %v7879_v58  ;;  %v7938_v18 = vadd.f32 %v956_v42, %v7887_v53  ;;  %v885_v35 = vpop.f32.mrb[9].mxu1 }
 0x2cf   :  { %v958_v44 = vpop.f32.mrb[25].mxu0  ;;  %v6719_v20 = vpop.eup %6718  ;;  %v1252_v26 = vadd.f32 1.0, %v6717_v37  ;;  %v7941_v23 = vadd.f32 %v885_v35, %v7883_v25 }
 0x2d0   :  { %10118 = vst [vmem:[#allocation103_spill] sm:$0xff] %v7935_v6  ;;  %10119 = vst [vmem:[#allocation104_spill] sm:$0xff] %v7938_v18  ;;  %v7944_v12 = vadd.f32 %v958_v44, %v7894_v38  ;;  %v887_v29 = vpop.f32.mrb[10].mxu1  ;;  %v960_v4 = vpop.f32.mrb[26].mxu0  ;;  %v1258_v9 = vadd.f32 1.0, %v6719_v20 }
 0x2d1   :  { %10120 = vst [vmem:[#allocation105_spill] sm:$0xff] %v7941_v23  ;;  %v7947_v2 = vadd.f32 %v887_v29, %v7879_v58  ;;  %v7950_v42 = vadd.f32 %v960_v4, %v7887_v53  ;;  %v889_v18 = vpop.f32.mrb[11].mxu1  ;;  %v962_v6 = vpop.f32.mrb[27].mxu0  ;;  %6722 = vrcp.f32 %v1252_v26 }
 0x2d2   :  { %10121 = vst [vmem:[#allocation106_spill] sm:$0xff] %v7944_v12  ;;  %v7953_v37 = vadd.f32 %v889_v18, %v7883_v25  ;;  %v7956_v35 = vadd.f32 %v962_v6, %v7894_v38  ;;  %6724 = vrcp.f32 %v1258_v9 }
 0x2d3   :  { %10122 = vst [vmem:[#allocation107_spill] sm:$0xff] %v7947_v2  ;;  %10123 = vst [vmem:[#allocation108_spill] sm:$0xff] %v7950_v42 }
 0x2d4   :  { %10124 = vst [vmem:[#allocation109_spill] sm:$0xff] %v7953_v37  ;;  %10125 = vst [vmem:[#allocation110_spill] sm:$0xff] %v7956_v35 }
 0x2d5   :  { %v893_v44 = vpop.f32.mrb[12].mxu1  ;;  %v966_v12 = vpop.f32.mrb[28].mxu0 }
 0x2d6   :  { %v7959_v20 = vadd.f32 %v893_v44, %v7879_v58  ;;  %v7962_v3 = vadd.f32 %v966_v12, %v7887_v53  ;;  %v895_v4 = vpop.f32.mrb[13].mxu1  ;;  %v968_v29 = vpop.f32.mrb[29].mxu0 }
 0x2d7   :  { %v7965_v42 = vadd.f32 %v895_v4, %v7883_v25  ;;  %v7968_v26 = vadd.f32 %v968_v29, %v7894_v38  ;;  %v897_v18 = vpop.f32.mrb[14].mxu1  ;;  %v970_v6 = vpop.f32.mrb[30].mxu0  ;;  %v10134_v29 = vsub.s32 4, %v7560_v1 }
 0x2d8   :  { %10126 = vst [vmem:[#allocation111_spill] sm:$0xff] %v7959_v20  ;;  %10127 = vst [vmem:[#allocation112_spill] sm:$0xff] %v7962_v3  ;;  %v7971_v9 = vadd.f32 %v897_v18, %v7879_v58  ;;  %v7974_v35 = vadd.f32 %v970_v6, %v7887_v53  ;;  %v899_v44 = vpop.f32.mrb[15].mxu1  ;;  %v972_v20 = vpop.f32.mrb[31].mxu0  ;;  %v10135_v58 = vsub.s32 6, %v7560_v1  ;;  %v10136_v6 = vsub.s32 5, %v7560_v1 }
 0x2d9   :  { %10128 = vst [vmem:[#allocation113_spill] sm:$0xff] %v7965_v42  ;;  %10129 = vst [vmem:[#allocation114_spill] sm:$0xff] %v7968_v26  ;;  %v7977_v12 = vadd.f32 %v899_v44, %v7883_v25  ;;  %v7980_v3 = vadd.f32 %v972_v20, %v7894_v38  ;;  %v6721_v4 = vpop.eup %6720  ;;  %v7985_v26 = vrot.slane %v7875_v16, %v10134_v29  ;;  %v10137_v20 = vsub.s32 7, %v7560_v1 }
 0x2da   :  { %10130 = vst [vmem:[#allocation115_spill] sm:$0xff] %v7971_v9  ;;  %10131 = vst [vmem:[#allocation116_spill] sm:$0xff] %v7974_v35  ;;  %v7990_v18 = vrot.slane %v7875_v16, %v10135_v58  ;;  %v7995_v25 = vrot.slane %v7875_v16, %v10136_v6 }
 0x2db   :  { %10132 = vst [vmem:[#allocation117_spill] sm:$0xff] %v7977_v12  ;;  %10133 = vst [vmem:[#allocation118_spill] sm:$0xff] %v7980_v3  ;;  %v6723_v53 = vpop.eup %6722  ;;  %v8000_v44 = vrot.slane %v7875_v16, %v10137_v20 }
 0x2dc   :  { %v6725_v3 = vpop.eup %6724  ;;  %v1269_v12 = vmul.f32 %v6723_v53, %v6721_v4 }
 0x2dd   :  { %v1268_v29 = vmul.f32 0.0, %v6725_v3  ;;  %v1009_v35 = vpop.f32.mrb[16].mxu1  ;;  %v1082_v9 = vpop.f32.mrb[32].mxu0 }
 0x2de   :  { %v8003_v42 = vadd.f32 %v1009_v35, %v7985_v26  ;;  %v8006_v58 = vadd.f32 %v1082_v9, %v7990_v18  ;;  %v1011_v37 = vpop.f32.mrb[17].mxu1  ;;  %v1084_v2 = vpop.f32.mrb[33].mxu0 }
 0x2df   :  { %v8008_v6 = vadd.f32 %v1269_v12, %v1268_v29  ;;  %v8011_v1 = vadd.f32 %v1011_v37, %v7995_v25  ;;  %v8014_v16 = vadd.f32 %v1084_v2, %v8000_v44  ;;  %v1013_v4 = vpop.f32.mrb[18].mxu1  ;;  %v1086_v3 = vpop.f32.mrb[34].mxu0 }
 0x2e0   :  { %10138 = vst [vmem:[#allocation119_spill] sm:$0xff] %v8003_v42  ;;  %10139 = vst [vmem:[#allocation120_spill] sm:$0xff] %v8006_v58  ;;  %v8017_v53 = vadd.f32 %v1013_v4, %v7985_v26  ;;  %v8020_v35 = vadd.f32 %v1086_v3, %v7990_v18  ;;  %v1015_v9 = vpop.f32.mrb[19].mxu1  ;;  %v1088_v20 = vpop.f32.mrb[35].mxu0 }
 0x2e1   :  { %10140 = vst [vmem:[#allocation121_spill] sm:$0xff] %v8011_v1  ;;  %10141 = vst [vmem:[#allocation122_spill] sm:$0xff] %v8014_v16  ;;  %v8023_v58 = vadd.f32 %v1015_v9, %v7995_v25  ;;  %v8026_v12 = vadd.f32 %v1088_v20, %v8000_v44 }
 0x2e2   :  { %10142 = vst [vmem:[#allocation123_spill] sm:$0xff] %v8017_v53  ;;  %10143 = vst [vmem:[#allocation124_spill] sm:$0xff] %v8020_v35 }
 0x2e3   :  { %10144 = vst [vmem:[#allocation125_spill] sm:$0xff] %v8023_v58  ;;  %10145 = vst [vmem:[#allocation126_spill] sm:$0xff] %v8026_v12 }
 0x2e5   :  { %v1019_v37 = vpop.f32.mrb[20].mxu1  ;;  %v1092_v29 = vpop.f32.mrb[36].mxu0 }
 0x2e6   :  { %v8029_v2 = vadd.f32 %v1019_v37, %v7985_v26  ;;  %v8032_v16 = vadd.f32 %v1092_v29, %v7990_v18  ;;  %v1021_v4 = vpop.f32.mrb[21].mxu1  ;;  %v1094_v1 = vpop.f32.mrb[37].mxu0 }
 0x2e7   :  { %v8035_v3 = vadd.f32 %v1021_v4, %v7995_v25  ;;  %v8038_v42 = vadd.f32 %v1094_v1, %v8000_v44  ;;  %v1023_v9 = vpop.f32.mrb[22].mxu1  ;;  %v1096_v58 = vpop.f32.mrb[38].mxu0 }
 0x2e8   :  { %10146 = vst [vmem:[#allocation127_spill] sm:$0xff] %v8029_v2  ;;  %10147 = vst [vmem:[#allocation128_spill] sm:$0xff] %v8032_v16  ;;  %v8041_v20 = vadd.f32 %v1023_v9, %v7985_v26  ;;  %v8044_v12 = vadd.f32 %v1096_v58, %v7990_v18  ;;  %v1025_v37 = vpop.f32.mrb[23].mxu1  ;;  %v1098_v35 = vpop.f32.mrb[39].mxu0 }
 0x2e9   :  { %10148 = vst [vmem:[#allocation129_spill] sm:$0xff] %v8035_v3  ;;  %10149 = vst [vmem:[#allocation130_spill] sm:$0xff] %v8038_v42  ;;  %v8047_v29 = vadd.f32 %v1025_v37, %v7995_v25  ;;  %v8050_v53 = vadd.f32 %v1098_v35, %v8000_v44 }
 0x2ea   :  { %10150 = vst [vmem:[#allocation131_spill] sm:$0xff] %v8041_v20  ;;  %10151 = vst [vmem:[#allocation132_spill] sm:$0xff] %v8044_v12 }
 0x2eb   :  { %10152 = vst [vmem:[#allocation133_spill] sm:$0xff] %v8047_v29  ;;  %10153 = vst [vmem:[#allocation134_spill] sm:$0xff] %v8050_v53 }
 0x2ed   :  { %v1029_v4 = vpop.f32.mrb[24].mxu1  ;;  %v1102_v3 = vpop.f32.mrb[40].mxu0 }
 0x2ee   :  { %v8053_v1 = vadd.f32 %v1029_v4, %v7985_v26  ;;  %v8056_v42 = vadd.f32 %v1102_v3, %v7990_v18  ;;  %v1031_v9 = vpop.f32.mrb[25].mxu1  ;;  %v1104_v16 = vpop.f32.mrb[41].mxu0 }
 0x2ef   :  { %v8059_v58 = vadd.f32 %v1031_v9, %v7995_v25  ;;  %v8062_v2 = vadd.f32 %v1104_v16, %v8000_v44  ;;  %v1033_v37 = vpop.f32.mrb[26].mxu1  ;;  %v1106_v29 = vpop.f32.mrb[42].mxu0 }
 0x2f0   :  { %10154 = vst [vmem:[#allocation135_spill] sm:$0xff] %v8053_v1  ;;  %10155 = vst [vmem:[#allocation136_spill] sm:$0xff] %v8056_v42  ;;  %v8065_v35 = vadd.f32 %v1033_v37, %v7985_v26  ;;  %v8068_v53 = vadd.f32 %v1106_v29, %v7990_v18  ;;  %v1035_v4 = vpop.f32.mrb[27].mxu1  ;;  %v1108_v12 = vpop.f32.mrb[43].mxu0 }
 0x2f1   :  { %10156 = vst [vmem:[#allocation137_spill] sm:$0xff] %v8059_v58  ;;  %10157 = vst [vmem:[#allocation138_spill] sm:$0xff] %v8062_v2  ;;  %v8071_v3 = vadd.f32 %v1035_v4, %v7995_v25  ;;  %v8074_v20 = vadd.f32 %v1108_v12, %v8000_v44 }
 0x2f2   :  { %10158 = vst [vmem:[#allocation139_spill] sm:$0xff] %v8065_v35  ;;  %10159 = vst [vmem:[#allocation140_spill] sm:$0xff] %v8068_v53 }
 0x2f3   :  { %10160 = vst [vmem:[#allocation141_spill] sm:$0xff] %v8071_v3  ;;  %10161 = vst [vmem:[#allocation142_spill] sm:$0xff] %v8074_v20 }
 0x2f5   :  { %v1039_v9 = vpop.f32.mrb[28].mxu1  ;;  %v1112_v23 = vpop.f32.mrb[44].mxu0 }
 0x2f6   :  { %v8077_v16 = vadd.f32 %v1039_v9, %v7985_v26  ;;  %v8080_v2 = vadd.f32 %v1112_v23, %v7990_v18  ;;  %v1041_v37 = vpop.f32.mrb[29].mxu1  ;;  %v1114_v58 = vpop.f32.mrb[45].mxu0 }
 0x2f7   :  { %v8083_v29 = vadd.f32 %v1041_v37, %v7995_v25  ;;  %v8086_v42 = vadd.f32 %v1114_v58, %v8000_v44  ;;  %v1043_v4 = vpop.f32.mrb[30].mxu1  ;;  %v1116_v1 = vpop.f32.mrb[46].mxu0  ;;  %v939_v37 = vadd.f32 %v7890_v13, %v7894_v38 }
 0x2f8   :  { %10162 = vst [vmem:[#allocation143_spill] sm:$0xff] %v8077_v16  ;;  %10163 = vst [vmem:[#allocation144_spill] sm:$0xff] %v8080_v2  ;;  %v1044_v12 = vadd.f32 %v1043_v4, %v7985_v26  ;;  %v1117_v20 = vadd.f32 %v1116_v1, %v7990_v18  ;;  %v1045_v3 = vpop.f32.mrb[31].mxu1  ;;  %v1118_v9 = vpop.f32.mrb[47].mxu0 }
 0x2f9   :  { %10164 = vst [vmem:[#allocation145_spill] sm:$0xff] %v8083_v29  ;;  %10165 = vst [vmem:[#allocation146_spill] sm:$0xff] %v8086_v42  ;;  %v1046_v53 = vadd.f32 %v1045_v3, %v7995_v25  ;;  %v1119_v23 = vadd.f32 %v1118_v9, %v8000_v44  ;;  %v1262_v42 = vsub.f32 0.0, %v939_v37 }
 0x2fa   :  { %v1273_v35 = vsub.f32 0.0, %v1044_v12 }
 0x2fb   :  { %v1279_v2 = vsub.f32 0.0, %v1046_v53  ;;  %v1286_v16 = vsub.f32 0.0, %v1119_v23  ;;  %v1263_v26 = vmul.f32 1.442695, %v1262_v42 }
 0x2fc   :  { %v1274_v29 = vmul.f32 1.442695, %v1273_v35 }
 0x2fd   :  { %v1280_v58 = vmul.f32 1.442695, %v1279_v2  ;;  %v1287_v4 = vmul.f32 1.442695, %v1286_v16 }
 0x2fe   :  { %6726 = vpow2.f32 %v1274_v29 }
 0x2ff   :  { %6728 = vpow2.f32 %v1280_v58  ;;  %v1131_v58 = vld [vmem:[#allocation7 + $0x50] sm:$0xff] }
 0x300   :  { %6730 = vpow2.f32 %v1263_v26  ;;  %v1135_v26 = vld [vmem:[#allocation7 + $0x70] sm:$0xff] }
 0x301   :  { %6732 = vpow2.f32 %v1287_v4  ;;  %v1132_v4 = vld [vmem:[#allocation7 + $0x58] sm:$0xff] }
 0x302   :  { %6734 = vtanh.f32 %v1117_v20 }
 0x308   :  { %v6727_v18 = vpop.eup %6726 }
 0x309   :  { %v6729_v1 = vpop.eup %6728  ;;  %v1276_v55 = vadd.f32 1.0, %v6727_v18  ;;  %v1136_v18 = vld [vmem:[#allocation7 + $0x78] sm:$0xff] }
 0x30a   :  { %v1282_v25 = vadd.f32 1.0, %v6729_v1  ;;  %v6731_v44 = vpop.eup %6730 }
 0x30b   :  { %6736 = vrcp.f32 %v1276_v55  ;;  %v6733_v53 = vpop.eup %6732  ;;  %v1265_v2 = vadd.f32 1.0, %v6731_v44  ;;  %v1139_v44 = vld [vmem:[#allocation7 + $0x90] sm:$0xff] }
 0x30c   :  { %6738 = vrcp.f32 %v1282_v25  ;;  %v6735_v13 = vpop.eup %6734  ;;  %v1289_v29 = vadd.f32 1.0, %v6733_v53  ;;  %v8112_v53 = vcombine.high %v1131_v58, %v1135_v26 }
 0x30d   :  { %6740 = vtanh.f32 %v8008_v6 }
 0x30e   :  { %6742 = vrcp.f32 %v1265_v2  ;;  %10169 = vst [vmem:[#allocation150_spill] sm:$0xff] %v8112_v53  ;;  %v1140_v2 = vld [vmem:[#allocation7 + $0x98] sm:$0xff] }
 0x30f   :  { %6744 = vrcp.f32 %v1289_v29  ;;  %v8122_v29 = vcombine.low %v1132_v4, %v1136_v18 }
 0x311   :  { %10172 = vst [vmem:[#allocation153_spill] sm:$0xff] %v8122_v29 }
 0x315   :  { %v6737_v38 = vpop.eup %6736 }
 0x316   :  { %v6739_v35 = vpop.eup %6738  ;;  %v1293_v3 = vmul.f32 %v6737_v38, %v6735_v13  ;;  %v8114_v13 = vcombine.high %v1132_v4, %v1136_v18  ;;  %v1143_v38 = vld [vmem:[#allocation7 + $0xb0] sm:$0xff] }
 0x317   :  { %v1292_v12 = vmul.f32 0.0, %v6739_v35  ;;  %v6741_v20 = vpop.eup %6740  ;;  %v1144_v35 = vld [vmem:[#allocation7 + $0xb8] sm:$0xff] }
 0x318   :  { %v6743_v55 = vpop.eup %6742  ;;  %10170 = vst [vmem:[#allocation151_spill] sm:$0xff] %v8114_v13 }
 0x319   :  { %v8095_v42 = vadd.f32 %v1293_v3, %v1292_v12  ;;  %v6745_v16 = vpop.eup %6744  ;;  %v8098_v23 = vmul.f32 %v6743_v55, %v6741_v20  ;;  %v8120_v3 = vcombine.low %v1131_v58, %v1135_v26  ;;  %v8126_v12 = vcombine.high %v1139_v44, %v1143_v38  ;;  %v1147_v55 = vld [vmem:[#allocation7 + $0xd0] sm:$0xff] }
 0x31a   :  { %v8128_v20 = vcombine.high %v1140_v2, %v1144_v35  ;;  %v8134_v58 = vcombine.low %v1139_v44, %v1143_v38  ;;  %v8136_v26 = vcombine.low %v1140_v2, %v1144_v35 }
 0x31b   :  { %6746 = vtanh.f32 %v8095_v42  ;;  %10166 = vst [vmem:[#allocation147_spill] sm:$0xff] %v8098_v23  ;;  %v8108_v25 = vpack.c.bf16 %v8098_v23, %v8098_v23  ;;  %10171 = vst [vmem:[#allocation152_spill] sm:$0xff] %v8120_v3  ;;  %v1159_v23 = vld [vmem:[#allocation7 + $0x130] sm:$0xff] }
 0x31c   :  { %10173 = vst [vmem:[#allocation154_spill] sm:$0xff] %v8126_v12  ;;  %10174 = vst [vmem:[#allocation155_spill] sm:$0xff] %v8128_v20 }
 0x31d   :  { %10175 = vst [vmem:[#allocation156_spill] sm:$0xff] %v8134_v58  ;;  %10176 = vst [vmem:[#allocation157_spill] sm:$0xff] %v8136_v26 }
 0x325   :  { %v6747_v9 = vpop.eup %6746 }
 0x326   :  { %v8100_v37 = vmul.f32 %v6747_v9, %v6745_v16  ;;  %v1151_v16 = vld [vmem:[#allocation7 + $0xf0] sm:$0xff]  ;;  %v1148_v9 = vld [vmem:[#allocation7 + $0xd8] sm:$0xff] }
 0x327   :  { %v8140_v4 = vcombine.high %v1147_v55, %v1151_v16  ;;  %v8146_v44 = vcombine.low %v1147_v55, %v1151_v16 }
 0x328   :  { %10167 = vst [vmem:[#allocation148_spill] sm:$0xff] %v8100_v37  ;;  %v8104_v1 = vpack.c.bf16 %v8100_v37, %v8100_v37  ;;  %v1152_v37 = vld [vmem:[#allocation7 + $0xf8] sm:$0xff] }
 0x329   :  { %10177 = vst [vmem:[#allocation158_spill] sm:$0xff] %v8140_v4  ;;  %v8142_v18 = vcombine.high %v1148_v9, %v1152_v37  ;;  %10179 = vst [vmem:[#allocation160_spill] sm:$0xff] %v8146_v44  ;;  %v8148_v38 = vcombine.low %v1148_v9, %v1152_v37 }
 0x32a   :  { %10168 = vst [vmem:[#allocation149_spill] sm:$0xff] %v8104_v1  ;;  %1974 = vmatprep.mubr.bf16.mxu1 %v8104_v1  ;;  %2015 = vmatprep.mubr.bf16.mxu0 %v8104_v1 }
 0x32b   :  { %1975 = vmatmul.mubr.bf16.vlgmr.msra.gmra.mrb[32].mxu1 %v8108_v25  ;;  %2016 = vmatmul.mubr.bf16.vlgmr.msra.gmra.mrb[48].mxu0 %v8108_v25  ;;  %10178 = vst [vmem:[#allocation159_spill] sm:$0xff] %v8142_v18  ;;  %10180 = vst [vmem:[#allocation161_spill] sm:$0xff] %v8148_v38 }
 0x32c   :  { %2025 = vmatpush1.bf16.msra.mxu1 %v7866_v10  ;;  %2066 = vmatpush1.bf16.msra.mxu0 %v7868_v60 }
 0x32d   :  { %2056 = vmatprep.mubr.bf16.mxu1 %v8104_v1  ;;  %2097 = vmatprep.mubr.bf16.mxu0 %v8104_v1  ;;  %v1155_v1 = vld [vmem:[#allocation7 + $0x110] sm:$0xff] }
 0x32e   :  { %2026 = vmatprep.subr.bf16.mxu1 %v8112_v53  ;;  %2067 = vmatprep.subr.bf16.mxu0 %v8114_v13  ;;  %v1156_v13 = vld [vmem:[#allocation7 + $0x118] sm:$0xff]  ;;  %v8152_v2 = vcombine.high %v1155_v1, %v1159_v23  ;;  %v8158_v55 = vcombine.low %v1155_v1, %v1159_v23 }
 0x32f   :  { %v1160_v53 = vld [vmem:[#allocation7 + $0x138] sm:$0xff] }
 0x330   :  { %2027 = vmatpush1.bf16.msra.mxu1 %v8120_v3  ;;  %2068 = vmatpush1.bf16.msra.mxu0 %v8122_v29  ;;  %10181 = vst [vmem:[#allocation162_spill] sm:$0xff] %v8152_v2  ;;  %v8154_v35 = vcombine.high %v1156_v13, %v1160_v53  ;;  %v1164_v29 = vld [vmem:[#allocation7 + $0x158] sm:$0xff]  ;;  %10183 = vst [vmem:[#allocation164_spill] sm:$0xff] %v8158_v55  ;;  %v8160_v37 = vcombine.low %v1156_v13, %v1160_v53 }
 0x331   :  { %2028 = vmatprep.subr.bf16.mxu1 %v8126_v12  ;;  %2069 = vmatprep.subr.bf16.mxu0 %v8128_v20  ;;  %v1163_v20 = vld [vmem:[#allocation7 + $0x150] sm:$0xff]  ;;  %v1168_v3 = vld [vmem:[#allocation7 + $0x178] sm:$0xff] }
 0x332   :  { %10182 = vst [vmem:[#allocation163_spill] sm:$0xff] %v8154_v35  ;;  %v1167_v12 = vld [vmem:[#allocation7 + $0x170] sm:$0xff]  ;;  %10184 = vst [vmem:[#allocation165_spill] sm:$0xff] %v8160_v37  ;;  %v8166_v9 = vcombine.high %v1164_v29, %v1168_v3  ;;  %v8172_v1 = vcombine.low %v1164_v29, %v1168_v3 }
 0x333   :  { %v8164_v16 = vcombine.high %v1163_v20, %v1167_v12  ;;  %v8170_v23 = vcombine.low %v1163_v20, %v1167_v12 }
 0x334   :  { %2029 = vmatpush1.bf16.msra.mxu1 %v8134_v58  ;;  %2070 = vmatpush1.bf16.msra.mxu0 %v8136_v26  ;;  %10186 = vst [vmem:[#allocation167_spill] sm:$0xff] %v8166_v9  ;;  %v1172_v26 = vld [vmem:[#allocation7 + $0x198] sm:$0xff]  ;;  %10188 = vst [vmem:[#allocation169_spill] sm:$0xff] %v8172_v1 }
 0x335   :  { %2030 = vmatprep.subr.bf16.mxu1 %v8140_v4  ;;  %2071 = vmatprep.subr.bf16.mxu0 %v8142_v18  ;;  %10185 = vst [vmem:[#allocation166_spill] sm:$0xff] %v8164_v16  ;;  %v1171_v18 = vld [vmem:[#allocation7 + $0x190] sm:$0xff]  ;;  %v1176_v58 = vld [vmem:[#allocation7 + $0x1b8] sm:$0xff]  ;;  %10187 = vst [vmem:[#allocation168_spill] sm:$0xff] %v8170_v23 }
 0x336   :  { %v1175_v4 = vld [vmem:[#allocation7 + $0x1b0] sm:$0xff]  ;;  %v8178_v13 = vcombine.high %v1172_v26, %v1176_v58  ;;  %v8184_v3 = vcombine.low %v1172_v26, %v1176_v58 }
 0x337   :  { %v8176_v53 = vcombine.high %v1171_v18, %v1175_v4  ;;  %v8182_v12 = vcombine.low %v1171_v18, %v1175_v4 }
 0x338   :  { %2031 = vmatpush1.bf16.msra.mxu1 %v8146_v44  ;;  %2072 = vmatpush1.bf16.msra.mxu0 %v8148_v38  ;;  %10190 = vst [vmem:[#allocation171_spill] sm:$0xff] %v8178_v13  ;;  %v1180_v38 = vld [vmem:[#allocation7 + $0x1d8] sm:$0xff]  ;;  %10192 = vst [vmem:[#allocation173_spill] sm:$0xff] %v8184_v3 }
 0x339   :  { %2032 = vmatprep.subr.bf16.mxu1 %v8152_v2  ;;  %2073 = vmatprep.subr.bf16.mxu0 %v8154_v35  ;;  %10189 = vst [vmem:[#allocation170_spill] sm:$0xff] %v8176_v53  ;;  %v1179_v35 = vld [vmem:[#allocation7 + $0x1d0] sm:$0xff]  ;;  %v1184_v44 = vld [vmem:[#allocation7 + $0x1f8] sm:$0xff]  ;;  %10191 = vst [vmem:[#allocation172_spill] sm:$0xff] %v8182_v12 }
 0x33a   :  { %v1183_v2 = vld [vmem:[#allocation7 + $0x1f0] sm:$0xff]  ;;  %v8190_v20 = vcombine.high %v1180_v38, %v1184_v44  ;;  %v8196_v58 = vcombine.low %v1180_v38, %v1184_v44 }
 0x33b   :  { %v8188_v29 = vcombine.high %v1179_v35, %v1183_v2  ;;  %v8194_v4 = vcombine.low %v1179_v35, %v1183_v2 }
 0x33c   :  { %2033 = vmatpush1.bf16.msra.mxu1 %v8158_v55  ;;  %2074 = vmatpush1.bf16.msra.mxu0 %v8160_v37  ;;  %10194 = vst [vmem:[#allocation175_spill] sm:$0xff] %v8190_v20  ;;  %v1188_v37 = vld [vmem:[#allocation7 + $0x218] sm:$0xff]  ;;  %10196 = vst [vmem:[#allocation177_spill] sm:$0xff] %v8196_v58 }
 0x33d   :  { %2034 = vmatprep.subr.bf16.mxu1 %v8164_v16  ;;  %2075 = vmatprep.subr.bf16.mxu0 %v8166_v9  ;;  %10193 = vst [vmem:[#allocation174_spill] sm:$0xff] %v8188_v29  ;;  %v1187_v9 = vld [vmem:[#allocation7 + $0x210] sm:$0xff]  ;;  %v1192_v55 = vld [vmem:[#allocation7 + $0x238] sm:$0xff]  ;;  %10195 = vst [vmem:[#allocation176_spill] sm:$0xff] %v8194_v4 }
 0x33e   :  { %v1191_v16 = vld [vmem:[#allocation7 + $0x230] sm:$0xff]  ;;  %v8202_v18 = vcombine.high %v1188_v37, %v1192_v55  ;;  %v8208_v44 = vcombine.low %v1188_v37, %v1192_v55 }
 0x33f   :  { %v8200_v26 = vcombine.high %v1187_v9, %v1191_v16  ;;  %v8206_v2 = vcombine.low %v1187_v9, %v1191_v16 }
 0x340   :  { %2035 = vmatpush1.bf16.msra.mxu1 %v8170_v23  ;;  %2076 = vmatpush1.bf16.msra.mxu0 %v8172_v1  ;;  %10198 = vst [vmem:[#allocation179_spill] sm:$0xff] %v8202_v18  ;;  %v1196_v1 = vld [vmem:[#allocation7 + $0x258] sm:$0xff]  ;;  %10200 = vst [vmem:[#allocation181_spill] sm:$0xff] %v8208_v44 }
 0x341   :  { %2036 = vmatprep.subr.bf16.mxu1 %v8176_v53  ;;  %2077 = vmatprep.subr.bf16.mxu0 %v8178_v13  ;;  %10197 = vst [vmem:[#allocation178_spill] sm:$0xff] %v8200_v26  ;;  %v1195_v13 = vld [vmem:[#allocation7 + $0x250] sm:$0xff]  ;;  %v1200_v23 = vld [vmem:[#allocation7 + $0x278] sm:$0xff]  ;;  %10199 = vst [vmem:[#allocation180_spill] sm:$0xff] %v8206_v2 }
 0x342   :  { %v1199_v53 = vld [vmem:[#allocation7 + $0x270] sm:$0xff]  ;;  %v8214_v35 = vcombine.high %v1196_v1, %v1200_v23  ;;  %v8220_v55 = vcombine.low %v1196_v1, %v1200_v23 }
 0x343   :  { %v8212_v38 = vcombine.high %v1195_v13, %v1199_v53  ;;  %v8218_v16 = vcombine.low %v1195_v13, %v1199_v53 }
 0x344   :  { %2037 = vmatpush1.bf16.msra.mxu1 %v8182_v12  ;;  %2078 = vmatpush1.bf16.msra.mxu0 %v8184_v3  ;;  %10202 = vst [vmem:[#allocation183_spill] sm:$0xff] %v8214_v35  ;;  %v1204_v3 = vld [vmem:[#allocation7 + $0x298] sm:$0xff]  ;;  %10204 = vst [vmem:[#allocation185_spill] sm:$0xff] %v8220_v55 }
 0x345   :  { %2038 = vmatprep.subr.bf16.mxu1 %v8188_v29  ;;  %2079 = vmatprep.subr.bf16.mxu0 %v8190_v20  ;;  %10201 = vst [vmem:[#allocation182_spill] sm:$0xff] %v8212_v38  ;;  %v1203_v20 = vld [vmem:[#allocation7 + $0x290] sm:$0xff]  ;;  %v1208_v12 = vld [vmem:[#allocation7 + $0x2b8] sm:$0xff]  ;;  %10203 = vst [vmem:[#allocation184_spill] sm:$0xff] %v8218_v16 }
 0x346   :  { %v1207_v29 = vld [vmem:[#allocation7 + $0x2b0] sm:$0xff]  ;;  %v8226_v9 = vcombine.high %v1204_v3, %v1208_v12  ;;  %v8232_v23 = vcombine.low %v1204_v3, %v1208_v12 }
 0x347   :  { %v8224_v37 = vcombine.high %v1203_v20, %v1207_v29  ;;  %v8230_v53 = vcombine.low %v1203_v20, %v1207_v29 }
 0x348   :  { %2039 = vmatpush1.bf16.msra.mxu1 %v8194_v4  ;;  %2080 = vmatpush1.bf16.msra.mxu0 %v8196_v58  ;;  %10206 = vst [vmem:[#allocation187_spill] sm:$0xff] %v8226_v9  ;;  %v1212_v58 = vld [vmem:[#allocation7 + $0x2d8] sm:$0xff]  ;;  %10208 = vst [vmem:[#allocation189_spill] sm:$0xff] %v8232_v23 }
 0x349   :  { %2040 = vmatprep.subr.bf16.mxu1 %v8200_v26  ;;  %2081 = vmatprep.subr.bf16.mxu0 %v8202_v18  ;;  %10205 = vst [vmem:[#allocation186_spill] sm:$0xff] %v8224_v37  ;;  %v1211_v18 = vld [vmem:[#allocation7 + $0x2d0] sm:$0xff]  ;;  %v1216_v4 = vld [vmem:[#allocation7 + $0x2f8] sm:$0xff]  ;;  %10207 = vst [vmem:[#allocation188_spill] sm:$0xff] %v8230_v53 }
 0x34a   :  { %v1215_v26 = vld [vmem:[#allocation7 + $0x2f0] sm:$0xff]  ;;  %v8238_v13 = vcombine.high %v1212_v58, %v1216_v4  ;;  %v8244_v12 = vcombine.low %v1212_v58, %v1216_v4 }
 0x34b   :  { %v8236_v1 = vcombine.high %v1211_v18, %v1215_v26  ;;  %v8242_v29 = vcombine.low %v1211_v18, %v1215_v26 }
 0x34c   :  { %2041 = vmatpush1.bf16.msra.mxu1 %v8206_v2  ;;  %2082 = vmatpush1.bf16.msra.mxu0 %v8208_v44  ;;  %10210 = vst [vmem:[#allocation191_spill] sm:$0xff] %v8238_v13  ;;  %v1220_v44 = vld [vmem:[#allocation7 + $0x318] sm:$0xff]  ;;  %10212 = vst [vmem:[#allocation193_spill] sm:$0xff] %v8244_v12 }
 0x34d   :  { %2042 = vmatprep.subr.bf16.mxu1 %v8212_v38  ;;  %2083 = vmatprep.subr.bf16.mxu0 %v8214_v35  ;;  %10209 = vst [vmem:[#allocation190_spill] sm:$0xff] %v8236_v1  ;;  %v1219_v35 = vld [vmem:[#allocation7 + $0x310] sm:$0xff]  ;;  %v1224_v2 = vld [vmem:[#allocation7 + $0x338] sm:$0xff]  ;;  %10211 = vst [vmem:[#allocation192_spill] sm:$0xff] %v8242_v29 }
 0x34e   :  { %v1223_v38 = vld [vmem:[#allocation7 + $0x330] sm:$0xff]  ;;  %v8250_v20 = vcombine.high %v1220_v44, %v1224_v2  ;;  %v8256_v4 = vcombine.low %v1220_v44, %v1224_v2 }
 0x34f   :  { %v8248_v3 = vcombine.high %v1219_v35, %v1223_v38  ;;  %v8254_v26 = vcombine.low %v1219_v35, %v1223_v38 }
 0x350   :  { %2043 = vmatpush1.bf16.msra.mxu1 %v8218_v16  ;;  %2084 = vmatpush1.bf16.msra.mxu0 %v8220_v55  ;;  %10214 = vst [vmem:[#allocation195_spill] sm:$0xff] %v8250_v20  ;;  %v1228_v55 = vld [vmem:[#allocation7 + $0x358] sm:$0xff]  ;;  %10216 = vst [vmem:[#allocation197_spill] sm:$0xff] %v8256_v4 }
 0x351   :  { %2044 = vmatprep.subr.bf16.mxu1 %v8224_v37  ;;  %2085 = vmatprep.subr.bf16.mxu0 %v8226_v9  ;;  %10213 = vst [vmem:[#allocation194_spill] sm:$0xff] %v8248_v3  ;;  %v1227_v9 = vld [vmem:[#allocation7 + $0x350] sm:$0xff]  ;;  %v1232_v16 = vld [vmem:[#allocation7 + $0x378] sm:$0xff]  ;;  %10215 = vst [vmem:[#allocation196_spill] sm:$0xff] %v8254_v26 }
 0x352   :  { %v1231_v37 = vld [vmem:[#allocation7 + $0x370] sm:$0xff]  ;;  %v8262_v18 = vcombine.high %v1228_v55, %v1232_v16  ;;  %v8268_v2 = vcombine.low %v1228_v55, %v1232_v16 }
 0x353   :  { %v8260_v58 = vcombine.high %v1227_v9, %v1231_v37  ;;  %v8266_v38 = vcombine.low %v1227_v9, %v1231_v37 }
 0x354   :  { %2045 = vmatpush1.bf16.msra.mxu1 %v8230_v53  ;;  %2086 = vmatpush1.bf16.msra.mxu0 %v8232_v23  ;;  %10218 = vst [vmem:[#allocation199_spill] sm:$0xff] %v8262_v18  ;;  %v1236_v23 = vld [vmem:[#allocation7 + $0x398] sm:$0xff]  ;;  %10220 = vst [vmem:[#allocation201_spill] sm:$0xff] %v8268_v2 }
 0x355   :  { %2046 = vmatprep.subr.bf16.mxu1 %v8236_v1  ;;  %2087 = vmatprep.subr.bf16.mxu0 %v8238_v13  ;;  %10217 = vst [vmem:[#allocation198_spill] sm:$0xff] %v8260_v58  ;;  %v1235_v13 = vld [vmem:[#allocation7 + $0x390] sm:$0xff]  ;;  %v1240_v53 = vld [vmem:[#allocation7 + $0x3b8] sm:$0xff]  ;;  %10219 = vst [vmem:[#allocation200_spill] sm:$0xff] %v8266_v38 }
 0x356   :  { %v1239_v1 = vld [vmem:[#allocation7 + $0x3b0] sm:$0xff]  ;;  %v8274_v35 = vcombine.high %v1236_v23, %v1240_v53  ;;  %v8280_v16 = vcombine.low %v1236_v23, %v1240_v53  ;;  %v10230_v53 = vld [vmem:[#allocation65_spill] sm:$0xff]  ;;  %v10231_v23 = vld [vmem:[#allocation66_spill] sm:$0xff] }
 0x357   :  { %v8272_v44 = vcombine.high %v1235_v13, %v1239_v1  ;;  %v8278_v37 = vcombine.low %v1235_v13, %v1239_v1  ;;  %v10232_v1 = vld [vmem:[#allocation67_spill] sm:$0xff]  ;;  %v10233_v13 = vld [vmem:[#allocation68_spill] sm:$0xff] }
 0x358   :  { %2047 = vmatpush1.bf16.msra.mxu1 %v8242_v29  ;;  %2088 = vmatpush1.bf16.msra.mxu0 %v8244_v12  ;;  %10222 = vst [vmem:[#allocation203_spill] sm:$0xff] %v8274_v35  ;;  %v1244_v12 = vld [vmem:[#allocation7 + $0x3d8] sm:$0xff]  ;;  %10224 = vst [vmem:[#allocation205_spill] sm:$0xff] %v8280_v16 }
 0x359   :  { %2048 = vmatprep.subr.bf16.mxu1 %v8248_v3  ;;  %2089 = vmatprep.subr.bf16.mxu0 %v8250_v20  ;;  %10221 = vst [vmem:[#allocation202_spill] sm:$0xff] %v8272_v44  ;;  %v1243_v20 = vld [vmem:[#allocation7 + $0x3d0] sm:$0xff]  ;;  %v1248_v29 = vld [vmem:[#allocation7 + $0x3f8] sm:$0xff]  ;;  %10223 = vst [vmem:[#allocation204_spill] sm:$0xff] %v8278_v37 }
 0x35a   :  { %v1247_v3 = vld [vmem:[#allocation7 + $0x3f0] sm:$0xff]  ;;  %v8286_v9 = vcombine.high %v1244_v12, %v1248_v29 }
 0x35b   :  { %v8284_v55 = vcombine.high %v1243_v20, %v1247_v3 }
 0x35c   :  { %2049 = vmatpush1.bf16.msra.mxu1 %v8254_v26  ;;  %2090 = vmatpush1.bf16.msra.mxu0 %v8256_v4  ;;  %10226 = vst [vmem:[#allocation207_spill] sm:$0xff] %v8286_v9 }
 0x35d   :  { %2050 = vmatprep.subr.bf16.mxu1 %v8260_v58  ;;  %2091 = vmatprep.subr.bf16.mxu0 %v8262_v18  ;;  %10225 = vst [vmem:[#allocation206_spill] sm:$0xff] %v8284_v55  ;;  %v8290_v18 = vcombine.low %v1243_v20, %v1247_v3  ;;  %v10236_v3 = vld [vmem:[#allocation71_spill] sm:$0xff]  ;;  %v10237_v20 = vld [vmem:[#allocation72_spill] sm:$0xff] }
 0x35f   :  { %10227 = vst [vmem:[#allocation208_spill] sm:$0xff] %v8290_v18 }
 0x360   :  { %2051 = vmatpush1.bf16.msra.mxu1 %v8266_v38  ;;  %2092 = vmatpush1.bf16.msra.mxu0 %v8268_v2  ;;  %v8292_v38 = vcombine.low %v1244_v12, %v1248_v29  ;;  %v10234_v29 = vld [vmem:[#allocation69_spill] sm:$0xff]  ;;  %v10235_v12 = vld [vmem:[#allocation70_spill] sm:$0xff] }
 0x361   :  { %2052 = vmatprep.subr.bf16.mxu1 %v8272_v44  ;;  %2093 = vmatprep.subr.bf16.mxu0 %v8274_v35 }
 0x362   :  { %10228 = vst [vmem:[#allocation209_spill] sm:$0xff] %v8292_v38 }
 0x364   :  { %2053 = vmatpush1.bf16.msra.mxu1 %v8278_v37  ;;  %2094 = vmatpush1.bf16.msra.mxu0 %v8280_v16 }
 0x365   :  { %2054 = vmatprep.subr.bf16.mxu1 %v8284_v55  ;;  %2095 = vmatprep.subr.bf16.mxu0 %v8286_v9 }
 0x368   :  { %2055 = vmatpush1.bf16.msra.mxu1 %v8290_v18  ;;  %2096 = vmatpush1.bf16.msra.mxu0 %v8292_v38 }
 0x369   :  { %2168 = vmatprep.subr.bf16.mxu1 %v7670_v19  ;;  %2209 = vmatprep.subr.bf16.mxu0 %v7674_v17 }
 0x36b   :  { %2057 = vmatmul.mubr.bf16.vlgmr.msra.gmra.mrb[36].mxu1 %v8108_v25  ;;  %2098 = vmatmul.mubr.bf16.vlgmr.msra.gmra.mrb[52].mxu0 %v8108_v25  ;;  %v10229_v25 = vld [vmem:[#allocation64_spill] sm:$0xff] }
 0x36c   :  { %2169 = vmatpush1.bf16.msra.mxu1 %v7672_v21  ;;  %2210 = vmatpush1.bf16.msra.mxu0 %v7676_v22 }
 0x36d   :  { %2170 = vmatprep.subr.bf16.mxu1 %v7682_v27  ;;  %2211 = vmatprep.subr.bf16.mxu0 %v7684_v30 }
 0x370   :  { %2171 = vmatpush1.bf16.msra.mxu1 %v7686_v31  ;;  %2212 = vmatpush1.bf16.msra.mxu0 %v7688_v32 }
 0x371   :  { %2172 = vmatprep.subr.bf16.mxu1 %v7694_v36  ;;  %2213 = vmatprep.subr.bf16.mxu0 %v7698_v40 }
 0x374   :  { %2173 = vmatpush1.bf16.msra.mxu1 %v7696_v39  ;;  %2214 = vmatpush1.bf16.msra.mxu0 %v7700_v41 }
 0x375   :  { %2174 = vmatprep.subr.bf16.mxu1 %v7706_v45  ;;  %2215 = vmatprep.subr.bf16.mxu0 %v7708_v47 }
 0x378   :  { %2175 = vmatpush1.bf16.msra.mxu1 %v7710_v48  ;;  %2216 = vmatpush1.bf16.msra.mxu0 %v7712_v49 }
 0x379   :  { %2176 = vmatprep.subr.bf16.mxu1 %v7718_v54  ;;  %2217 = vmatprep.subr.bf16.mxu0 %v7720_v57 }
 0x37c   :  { %2177 = vmatpush1.bf16.msra.mxu1 %v7722_v52  ;;  %2218 = vmatpush1.bf16.msra.mxu0 %v7724_v56 }
 0x37d   :  { %2178 = vmatprep.subr.bf16.mxu1 %v7730_v61  ;;  %2219 = vmatprep.subr.bf16.mxu0 %v7732_v63 }
 0x380   :  { %2179 = vmatpush1.bf16.msra.mxu1 %v7734_v5  ;;  %2220 = vmatpush1.bf16.msra.mxu0 %v7736_v7 }
 0x381   :  { %2180 = vmatprep.subr.bf16.mxu1 %v7742_v11  ;;  %2221 = vmatprep.subr.bf16.mxu0 %v7744_v14 }
 0x384   :  { %2181 = vmatpush1.bf16.msra.mxu1 %v7746_v51  ;;  %2222 = vmatpush1.bf16.msra.mxu0 %v7748_v15 }
 0x385   :  { %2182 = vmatprep.subr.bf16.mxu1 %v7754_v24  ;;  %2223 = vmatprep.subr.bf16.mxu0 %v7756_v28 }
 0x388   :  { %2183 = vmatpush1.bf16.msra.mxu1 %v7758_v33  ;;  %2224 = vmatpush1.bf16.msra.mxu0 %v7760_v34 }
 0x389   :  { %2184 = vmatprep.subr.bf16.mxu1 %v7766_v43  ;;  %2225 = vmatprep.subr.bf16.mxu0 %v7768_v46  ;;  %v10258_v46 = vld [vmem:[#allocation93_spill] sm:$0xff]  ;;  %v10259_v43 = vld [vmem:[#allocation94_spill] sm:$0xff] }
 0x38c   :  { %2185 = vmatpush1.bf16.msra.mxu1 %v7770_v50  ;;  %2226 = vmatpush1.bf16.msra.mxu0 %v7772_v0  ;;  %v10257_v0 = vld [vmem:[#allocation92_spill] sm:$0xff] }
 0x38d   :  { %2186 = vmatprep.subr.bf16.mxu1 %v7778_v59  ;;  %2227 = vmatprep.subr.bf16.mxu0 %v7780_v62  ;;  %v10238_v62 = vld [vmem:[#allocation73_spill] sm:$0xff]  ;;  %v10256_v59 = vld [vmem:[#allocation91_spill] sm:$0xff] }
 0x390   :  { %2187 = vmatpush1.bf16.msra.mxu1 %v7782_v8  ;;  %2228 = vmatpush1.bf16.msra.mxu0 %v10229_v25  ;;  %v10239_v8 = vld [vmem:[#allocation74_spill] sm:$0xff]  ;;  %v10240_v25 = vld [vmem:[#allocation75_spill] sm:$0xff] }
 0x391   :  { %2188 = vmatprep.subr.bf16.mxu1 %v10230_v53  ;;  %2229 = vmatprep.subr.bf16.mxu0 %v10231_v23  ;;  %v10241_v53 = vld [vmem:[#allocation76_spill] sm:$0xff]  ;;  %v10242_v23 = vld [vmem:[#allocation77_spill] sm:$0xff] }
 0x394   :  { %2189 = vmatpush1.bf16.msra.mxu1 %v10232_v1  ;;  %2230 = vmatpush1.bf16.msra.mxu0 %v10233_v13  ;;  %v10243_v1 = vld [vmem:[#allocation78_spill] sm:$0xff]  ;;  %v10244_v13 = vld [vmem:[#allocation79_spill] sm:$0xff] }
 0x395   :  { %2190 = vmatprep.subr.bf16.mxu1 %v10234_v29  ;;  %2231 = vmatprep.subr.bf16.mxu0 %v10235_v12  ;;  %v10245_v29 = vld [vmem:[#allocation80_spill] sm:$0xff]  ;;  %v10246_v12 = vld [vmem:[#allocation81_spill] sm:$0xff] }
 0x398   :  { %2191 = vmatpush1.bf16.msra.mxu1 %v10236_v3  ;;  %2232 = vmatpush1.bf16.msra.mxu0 %v10237_v20  ;;  %v10247_v3 = vld [vmem:[#allocation82_spill] sm:$0xff]  ;;  %v10248_v20 = vld [vmem:[#allocation83_spill] sm:$0xff] }
 0x399   :  { %2192 = vmatprep.subr.bf16.mxu1 %v10238_v62  ;;  %2233 = vmatprep.subr.bf16.mxu0 %v10239_v8  ;;  %v10249_v62 = vld [vmem:[#allocation84_spill] sm:$0xff]  ;;  %v10250_v8 = vld [vmem:[#allocation85_spill] sm:$0xff] }
 0x39c   :  { %2193 = vmatpush1.bf16.msra.mxu1 %v10240_v25  ;;  %2234 = vmatpush1.bf16.msra.mxu0 %v10241_v53  ;;  %v10251_v25 = vld [vmem:[#allocation86_spill] sm:$0xff]  ;;  %v10252_v53 = vld [vmem:[#allocation87_spill] sm:$0xff] }
 0x39d   :  { %2194 = vmatprep.subr.bf16.mxu1 %v10242_v23  ;;  %2235 = vmatprep.subr.bf16.mxu0 %v10243_v1  ;;  %v10253_v23 = vld [vmem:[#allocation88_spill] sm:$0xff]  ;;  %v10254_v1 = vld [vmem:[#allocation89_spill] sm:$0xff] }
 0x3a0   :  { %2195 = vmatpush1.bf16.msra.mxu1 %v10244_v13  ;;  %2236 = vmatpush1.bf16.msra.mxu0 %v10245_v29  ;;  %v10255_v13 = vld [vmem:[#allocation90_spill] sm:$0xff] }
 0x3a1   :  { %2196 = vmatprep.subr.bf16.mxu1 %v10246_v12  ;;  %2237 = vmatprep.subr.bf16.mxu0 %v10247_v3 }
 0x3a4   :  { %2197 = vmatpush1.bf16.msra.mxu1 %v10248_v20  ;;  %2238 = vmatpush1.bf16.msra.mxu0 %v10249_v62 }
 0x3a5   :  { %2198 = vmatprep.subr.bf16.mxu1 %v10250_v8  ;;  %2239 = vmatprep.subr.bf16.mxu0 %v10251_v25 }
 0x3a8   :  { %2199 = vmatpush1.bf16.msra.mxu1 %v10252_v53  ;;  %2240 = vmatpush1.bf16.msra.mxu0 %v10253_v23 }
 0x3a9   :  { %2250 = vmatprep.subr.bf16.mxu1 %v10254_v1  ;;  %2291 = vmatprep.subr.bf16.mxu0 %v10255_v13 }
 0x3fe   :  { %v1976_v29 = vpop.f32.mrb[32].mxu1  ;;  %v2017_v12 = vpop.f32.mrb[48].mxu0 }
 0x3ff   :  { %v2106_v3 = vadd.f32 %v1976_v29, %v10256_v59  ;;  %v2108_v20 = vadd.f32 %v2017_v12, %v10257_v0  ;;  %v1978_v50 = vpop.f32.mrb[33].mxu1  ;;  %v2019_v62 = vpop.f32.mrb[49].mxu0  ;;  %v10262_v12 = vld [vmem:[#allocation145_spill] sm:$0xff] }
 0x400   :  { %v2107_v8 = vadd.f32 %v1978_v50, %v10258_v46  ;;  %v2109_v25 = vadd.f32 %v2019_v62, %v10259_v43  ;;  %v1980_v34 = vpop.f32.mrb[34].mxu1  ;;  %v2021_v53 = vpop.f32.mrb[50].mxu0 }
 0x401   :  { %v2114_v33 = vsub.f32 0.0, %v2106_v3  ;;  %v1981_v23 = vpop.f32.mrb[35].mxu1  ;;  %v2022_v28 = vpop.f32.mrb[51].mxu0 }
 0x402   :  { %v2120_v1 = vsub.f32 0.0, %v2107_v8  ;;  %v10260_v8 = vld [vmem:[#allocation143_spill] sm:$0xff]  ;;  %v10261_v23 = vld [vmem:[#allocation144_spill] sm:$0xff] }
 0x403   :  { %v2115_v24 = vmul.f32 1.442695, %v2114_v33 }
 0x404   :  { %v2121_v13 = vmul.f32 1.442695, %v2120_v1 }
 0x405   :  { %6748 = vpow2.f32 %v2115_v24 }
 0x406   :  { %6750 = vpow2.f32 %v2121_v13 }
 0x407   :  { %6752 = vtanh.f32 %v2108_v20  ;;  %v10263_v20 = vld [vmem:[#allocation146_spill] sm:$0xff] }
 0x40f   :  { %v6749_v15 = vpop.eup %6748 }
 0x410   :  { %v6751_v59 = vpop.eup %6750  ;;  %v2117_v29 = vadd.f32 1.0, %v6749_v15 }
 0x411   :  { %v2123_v0 = vadd.f32 1.0, %v6751_v59  ;;  %v6753_v46 = vpop.eup %6752 }
 0x412   :  { %6754 = vrcp.f32 %v2117_v29 }
 0x413   :  { %6756 = vrcp.f32 %v2123_v0 }
 0x41c   :  { %v6755_v50 = vpop.eup %6754 }
 0x41d   :  { %v6757_v43 = vpop.eup %6756  ;;  %v2134_v34 = vmul.f32 %v6755_v50, %v6753_v46 }
 0x41e   :  { %v2133_v62 = vmul.f32 %v6757_v43, %v8008_v6 }
 0x420   :  { %v8371_v53 = vadd.f32 %v2134_v34, %v2133_v62  ;;  %v2127_v62 = vsub.f32 0.0, %v2109_v25 }
 0x43e   :  { %v2058_v28 = vpop.f32.mrb[36].mxu1  ;;  %v2099_v33 = vpop.f32.mrb[52].mxu0 }
 0x43f   :  { %v2110_v24 = vadd.f32 %v2058_v28, %v10260_v8  ;;  %v2112_v1 = vadd.f32 %v2099_v33, %v10261_v23  ;;  %v2060_v13 = vpop.f32.mrb[37].mxu1  ;;  %v2101_v15 = vpop.f32.mrb[53].mxu0  ;;  %v2128_v8 = vmul.f32 1.442695, %v2127_v62 }
 0x440   :  { %v2111_v3 = vadd.f32 %v2060_v13, %v10262_v12  ;;  %v2113_v59 = vadd.f32 %v2101_v15, %v10263_v20  ;;  %v2062_v29 = vpop.f32.mrb[38].mxu1  ;;  %v2103_v0 = vpop.f32.mrb[54].mxu0 }
 0x441   :  { %v2138_v51 = vsub.f32 0.0, %v2110_v24  ;;  %v2063_v46 = vpop.f32.mrb[39].mxu1  ;;  %v2104_v50 = vpop.f32.mrb[55].mxu0 }
 0x442   :  { %v2144_v6 = vsub.f32 0.0, %v2111_v3  ;;  %v2151_v28 = vsub.f32 0.0, %v2113_v59 }
 0x443   :  { %v2139_v43 = vmul.f32 1.442695, %v2138_v51 }
 0x444   :  { %v2145_v34 = vmul.f32 1.442695, %v2144_v6  ;;  %v2152_v33 = vmul.f32 1.442695, %v2151_v28  ;;  %v10266_v28 = vld [vmem:[#allocation150_spill] sm:$0xff] }
 0x445   :  { %6758 = vpow2.f32 %v2139_v43 }
 0x446   :  { %6760 = vpow2.f32 %v2145_v34 }
 0x447   :  { %6762 = vpow2.f32 %v2128_v8  ;;  %v10267_v8 = vld [vmem:[#allocation151_spill] sm:$0xff] }
 0x448   :  { %6764 = vpow2.f32 %v2152_v33  ;;  %v10268_v33 = vld [vmem:[#allocation152_spill] sm:$0xff] }
 0x449   :  { %6766 = vtanh.f32 %v2112_v1 }
 0x44f   :  { %v6759_v23 = vpop.eup %6758 }
 0x450   :  { %v6761_v14 = vpop.eup %6760  ;;  %v2141_v13 = vadd.f32 1.0, %v6759_v23  ;;  %v10269_v23 = vld [vmem:[#allocation153_spill] sm:$0xff] }
 0x451   :  { %v2147_v15 = vadd.f32 1.0, %v6761_v14  ;;  %v6763_v24 = vpop.eup %6762 }
 0x452   :  { %6768 = vrcp.f32 %v2141_v13  ;;  %v6765_v12 = vpop.eup %6764  ;;  %v2130_v20 = vadd.f32 1.0, %v6763_v24  ;;  %v10270_v13 = vld [vmem:[#allocation154_spill] sm:$0xff]  ;;  %v10272_v24 = vld [vmem:[#allocation156_spill] sm:$0xff] }
 0x453   :  { %6770 = vrcp.f32 %v2147_v15  ;;  %v6767_v3 = vpop.eup %6766  ;;  %v2154_v25 = vadd.f32 1.0, %v6765_v12  ;;  %v10271_v15 = vld [vmem:[#allocation155_spill] sm:$0xff]  ;;  %v10273_v12 = vld [vmem:[#allocation157_spill] sm:$0xff] }
 0x454   :  { %6772 = vtanh.f32 %v8371_v53 }
 0x455   :  { %6774 = vrcp.f32 %v2130_v20  ;;  %v10276_v20 = vld [vmem:[#allocation160_spill] sm:$0xff] }
 0x456   :  { %6776 = vrcp.f32 %v2154_v25  ;;  %v10279_v25 = vld [vmem:[#allocation163_spill] sm:$0xff] }
 0x45c   :  { %v6769_v51 = vpop.eup %6768 }
 0x45d   :  { %v6771_v29 = vpop.eup %6770  ;;  %v2158_v0 = vmul.f32 %v6769_v51, %v6767_v3  ;;  %v10274_v3 = vld [vmem:[#allocation158_spill] sm:$0xff]  ;;  %v10275_v51 = vld [vmem:[#allocation159_spill] sm:$0xff] }
 0x45e   :  { %v2157_v59 = vmul.f32 %v6771_v29, %v8095_v42  ;;  %v6773_v14 = vpop.eup %6772  ;;  %v10277_v29 = vld [vmem:[#allocation161_spill] sm:$0xff] }
 0x45f   :  { %v6775_v1 = vpop.eup %6774 }
 0x460   :  { %v8379_v46 = vadd.f32 %v2158_v0, %v2157_v59  ;;  %v6777_v50 = vpop.eup %6776  ;;  %v8382_v43 = vmul.f32 %v6775_v1, %v6773_v14  ;;  %v10278_v0 = vld [vmem:[#allocation162_spill] sm:$0xff]  ;;  %v10280_v59 = vld [vmem:[#allocation164_spill] sm:$0xff]  ;;  %v10281_v14 = vld [vmem:[#allocation165_spill] sm:$0xff] }
 0x461   :  { %v10282_v1 = vld [vmem:[#allocation166_spill] sm:$0xff] }
 0x462   :  { %6778 = vtanh.f32 %v8379_v46  ;;  %10264 = vst [vmem:[#allocation91_spill] sm:$0xff] %v8382_v43  ;;  %v8390_v42 = vpack.c.bf16 %v8382_v43, %v8382_v43  ;;  %v10287_v43 = vld [vmem:[#allocation171_spill] sm:$0xff] }
 0x46c   :  { %v6779_v6 = vpop.eup %6778 }
 0x46d   :  { %v8384_v34 = vmul.f32 %v6779_v6, %v6777_v50  ;;  %v10283_v50 = vld [vmem:[#allocation167_spill] sm:$0xff]  ;;  %v10284_v6 = vld [vmem:[#allocation168_spill] sm:$0xff] }
 0x46f   :  { %10265 = vst [vmem:[#allocation92_spill] sm:$0xff] %v8384_v34  ;;  %v2167_v62 = vpack.c.bf16 %v8384_v34, %v8384_v34  ;;  %v10286_v34 = vld [vmem:[#allocation170_spill] sm:$0xff] }
 0x471   :  { %2200 = vmatprep.mubr.bf16.mxu1 %v2167_v62  ;;  %2241 = vmatprep.mubr.bf16.mxu0 %v2167_v62 }
 0x472   :  { %2201 = vmatmul.mubr.bf16.vlgmr.msra.gmra.mrb[40].mxu1 %v8390_v42  ;;  %2242 = vmatmul.mubr.bf16.vlgmr.msra.gmra.mrb[56].mxu0 %v8390_v42 }
 0x473   :  { %2251 = vmatpush1.bf16.msra.mxu1 %v7866_v10  ;;  %2292 = vmatpush1.bf16.msra.mxu0 %v7868_v60 }
 0x474   :  { %2282 = vmatprep.mubr.bf16.mxu1 %v2167_v62  ;;  %2323 = vmatprep.mubr.bf16.mxu0 %v2167_v62  ;;  %v10285_v62 = vld [vmem:[#allocation169_spill] sm:$0xff] }
 0x475   :  { %2252 = vmatprep.subr.bf16.mxu1 %v10266_v28  ;;  %2293 = vmatprep.subr.bf16.mxu0 %v10267_v8 }
 0x477   :  { %2253 = vmatpush1.bf16.msra.mxu1 %v10268_v33  ;;  %2294 = vmatpush1.bf16.msra.mxu0 %v10269_v23 }
 0x478   :  { %2254 = vmatprep.subr.bf16.mxu1 %v10270_v13  ;;  %2295 = vmatprep.subr.bf16.mxu0 %v10271_v15 }
 0x47b   :  { %2255 = vmatpush1.bf16.msra.mxu1 %v10272_v24  ;;  %2296 = vmatpush1.bf16.msra.mxu0 %v10273_v12 }
 0x47c   :  { %2256 = vmatprep.subr.bf16.mxu1 %v10274_v3  ;;  %2297 = vmatprep.subr.bf16.mxu0 %v10275_v51 }
 0x47f   :  { %2257 = vmatpush1.bf16.msra.mxu1 %v10276_v20  ;;  %2298 = vmatpush1.bf16.msra.mxu0 %v10277_v29  ;;  %v10288_v29 = vld [vmem:[#allocation172_spill] sm:$0xff] }
 0x480   :  { %2258 = vmatprep.subr.bf16.mxu1 %v10278_v0  ;;  %2299 = vmatprep.subr.bf16.mxu0 %v10279_v25  ;;  %v10289_v0 = vld [vmem:[#allocation173_spill] sm:$0xff]  ;;  %v10290_v25 = vld [vmem:[#allocation174_spill] sm:$0xff] }
 0x483   :  { %2259 = vmatpush1.bf16.msra.mxu1 %v10280_v59  ;;  %2300 = vmatpush1.bf16.msra.mxu0 %v10281_v14  ;;  %v10291_v59 = vld [vmem:[#allocation175_spill] sm:$0xff]  ;;  %v10292_v14 = vld [vmem:[#allocation176_spill] sm:$0xff] }
 0x484   :  { %2260 = vmatprep.subr.bf16.mxu1 %v10282_v1  ;;  %2301 = vmatprep.subr.bf16.mxu0 %v10283_v50  ;;  %v10293_v1 = vld [vmem:[#allocation177_spill] sm:$0xff]  ;;  %v10294_v50 = vld [vmem:[#allocation178_spill] sm:$0xff] }
 0x487   :  { %2261 = vmatpush1.bf16.msra.mxu1 %v10284_v6  ;;  %2302 = vmatpush1.bf16.msra.mxu0 %v10285_v62  ;;  %v10295_v6 = vld [vmem:[#allocation179_spill] sm:$0xff]  ;;  %v10296_v62 = vld [vmem:[#allocation180_spill] sm:$0xff] }
 0x488   :  { %2262 = vmatprep.subr.bf16.mxu1 %v10286_v34  ;;  %2303 = vmatprep.subr.bf16.mxu0 %v10287_v43  ;;  %v10297_v34 = vld [vmem:[#allocation181_spill] sm:$0xff]  ;;  %v10298_v43 = vld [vmem:[#allocation182_spill] sm:$0xff] }
 0x48b   :  { %2263 = vmatpush1.bf16.msra.mxu1 %v10288_v29  ;;  %2304 = vmatpush1.bf16.msra.mxu0 %v10289_v0  ;;  %v10299_v29 = vld [vmem:[#allocation183_spill] sm:$0xff]  ;;  %v10300_v0 = vld [vmem:[#allocation184_spill] sm:$0xff] }
 0x48c   :  { %2264 = vmatprep.subr.bf16.mxu1 %v10290_v25  ;;  %2305 = vmatprep.subr.bf16.mxu0 %v10291_v59  ;;  %v10301_v25 = vld [vmem:[#allocation185_spill] sm:$0xff]  ;;  %v10302_v59 = vld [vmem:[#allocation186_spill] sm:$0xff] }
 0x48f   :  { %2265 = vmatpush1.bf16.msra.mxu1 %v10292_v14  ;;  %2306 = vmatpush1.bf16.msra.mxu0 %v10293_v1  ;;  %v10303_v14 = vld [vmem:[#allocation187_spill] sm:$0xff]  ;;  %v10304_v1 = vld [vmem:[#allocation188_spill] sm:$0xff] }
 0x490   :  { %2266 = vmatprep.subr.bf16.mxu1 %v10294_v50  ;;  %2307 = vmatprep.subr.bf16.mxu0 %v10295_v6  ;;  %v10305_v50 = vld [vmem:[#allocation189_spill] sm:$0xff]  ;;  %v10306_v6 = vld [vmem:[#allocation190_spill] sm:$0xff] }
 0x493   :  { %2267 = vmatpush1.bf16.msra.mxu1 %v10296_v62  ;;  %2308 = vmatpush1.bf16.msra.mxu0 %v10297_v34  ;;  %v10307_v62 = vld [vmem:[#allocation191_spill] sm:$0xff]  ;;  %v10308_v34 = vld [vmem:[#allocation192_spill] sm:$0xff] }
 0x494   :  { %2268 = vmatprep.subr.bf16.mxu1 %v10298_v43  ;;  %2309 = vmatprep.subr.bf16.mxu0 %v10299_v29  ;;  %v10309_v43 = vld [vmem:[#allocation193_spill] sm:$0xff]  ;;  %v10310_v29 = vld [vmem:[#allocation194_spill] sm:$0xff] }
 0x497   :  { %2269 = vmatpush1.bf16.msra.mxu1 %v10300_v0  ;;  %2310 = vmatpush1.bf16.msra.mxu0 %v10301_v25  ;;  %v10311_v0 = vld [vmem:[#allocation195_spill] sm:$0xff] }
 0x498   :  { %2270 = vmatprep.subr.bf16.mxu1 %v10302_v59  ;;  %2311 = vmatprep.subr.bf16.mxu0 %v10303_v14 }
 0x49b   :  { %2271 = vmatpush1.bf16.msra.mxu1 %v10304_v1  ;;  %2312 = vmatpush1.bf16.msra.mxu0 %v10305_v50  ;;  %v10312_v1 = vld [vmem:[#allocation199_spill] sm:$0xff]  ;;  %v10313_v50 = vld [vmem:[#allocation200_spill] sm:$0xff] }
 0x49c   :  { %2272 = vmatprep.subr.bf16.mxu1 %v10306_v6  ;;  %2313 = vmatprep.subr.bf16.mxu0 %v10307_v62 }
 0x49f   :  { %2273 = vmatpush1.bf16.msra.mxu1 %v10308_v34  ;;  %2314 = vmatpush1.bf16.msra.mxu0 %v10309_v43 }
 0x4a0   :  { %2274 = vmatprep.subr.bf16.mxu1 %v10310_v29  ;;  %2315 = vmatprep.subr.bf16.mxu0 %v10311_v0 }
 0x4a3   :  { %2275 = vmatpush1.bf16.msra.mxu1 %v8254_v26  ;;  %2316 = vmatpush1.bf16.msra.mxu0 %v8256_v4 }
 0x4a4   :  { %2276 = vmatprep.subr.bf16.mxu1 %v8260_v58  ;;  %2317 = vmatprep.subr.bf16.mxu0 %v10312_v1 }
 0x4a7   :  { %2277 = vmatpush1.bf16.msra.mxu1 %v10313_v50  ;;  %2318 = vmatpush1.bf16.msra.mxu0 %v8268_v2 }
 0x4a8   :  { %2278 = vmatprep.subr.bf16.mxu1 %v8272_v44  ;;  %2319 = vmatprep.subr.bf16.mxu0 %v8274_v35 }
 0x4ab   :  { %2279 = vmatpush1.bf16.msra.mxu1 %v8278_v37  ;;  %2320 = vmatpush1.bf16.msra.mxu0 %v8280_v16 }
 0x4ac   :  { %2280 = vmatprep.subr.bf16.mxu1 %v8284_v55  ;;  %2321 = vmatprep.subr.bf16.mxu0 %v8286_v9 }
 0x4af   :  { %2281 = vmatpush1.bf16.msra.mxu1 %v8290_v18  ;;  %2322 = vmatpush1.bf16.msra.mxu0 %v8292_v38 }
 0x4b0   :  { %2394 = vmatprep.subr.bf16.mxu1 %v7670_v19  ;;  %2435 = vmatprep.subr.bf16.mxu0 %v7674_v17 }
 0x4b2   :  { %2283 = vmatmul.mubr.bf16.vlgmr.msra.gmra.mrb[44].mxu1 %v8390_v42  ;;  %2324 = vmatmul.mubr.bf16.vlgmr.msra.gmra.mrb[60].mxu0 %v8390_v42  ;;  %v10314_v42 = vld [vmem:[#allocation50_spill] sm:$0xff] }
 0x4b3   :  { %2395 = vmatpush1.bf16.msra.mxu1 %v7672_v21  ;;  %2436 = vmatpush1.bf16.msra.mxu0 %v7676_v22 }
 0x4b4   :  { %2396 = vmatprep.subr.bf16.mxu1 %v7682_v27  ;;  %2437 = vmatprep.subr.bf16.mxu0 %v7684_v30 }
 0x4b7   :  { %2397 = vmatpush1.bf16.msra.mxu1 %v7686_v31  ;;  %2438 = vmatpush1.bf16.msra.mxu0 %v7688_v32 }
 0x4b8   :  { %2398 = vmatprep.subr.bf16.mxu1 %v7694_v36  ;;  %2439 = vmatprep.subr.bf16.mxu0 %v7698_v40 }
 0x4bb   :  { %2399 = vmatpush1.bf16.msra.mxu1 %v7696_v39  ;;  %2440 = vmatpush1.bf16.msra.mxu0 %v7700_v41  ;;  %v10357_v41 = vld [vmem:[#allocation97_spill] sm:$0xff]  ;;  %v10358_v39 = vld [vmem:[#allocation98_spill] sm:$0xff] }
 0x4bc   :  { %2400 = vmatprep.subr.bf16.mxu1 %v7706_v45  ;;  %2441 = vmatprep.subr.bf16.mxu0 %v7708_v47  ;;  %v10356_v47 = vld [vmem:[#allocation96_spill] sm:$0xff] }
 0x4bf   :  { %2401 = vmatpush1.bf16.msra.mxu1 %v7710_v48  ;;  %2442 = vmatpush1.bf16.msra.mxu0 %v7712_v49  ;;  %v10315_v49 = vld [vmem:[#allocation51_spill] sm:$0xff] }
 0x4c0   :  { %2402 = vmatprep.subr.bf16.mxu1 %v7718_v54  ;;  %2443 = vmatprep.subr.bf16.mxu0 %v7720_v57  ;;  %v10316_v54 = vld [vmem:[#allocation52_spill] sm:$0xff]  ;;  %v10317_v57 = vld [vmem:[#allocation53_spill] sm:$0xff]  ;;  %v10355_v48 = vld [vmem:[#allocation95_spill] sm:$0xff] }
 0x4c3   :  { %2403 = vmatpush1.bf16.msra.mxu1 %v7722_v52  ;;  %2444 = vmatpush1.bf16.msra.mxu0 %v7724_v56  ;;  %v10318_v52 = vld [vmem:[#allocation54_spill] sm:$0xff]  ;;  %v10319_v56 = vld [vmem:[#allocation55_spill] sm:$0xff] }
 0x4c4   :  { %2404 = vmatprep.subr.bf16.mxu1 %v7730_v61  ;;  %2445 = vmatprep.subr.bf16.mxu0 %v7732_v63  ;;  %v10320_v61 = vld [vmem:[#allocation56_spill] sm:$0xff]  ;;  %v10321_v63 = vld [vmem:[#allocation57_spill] sm:$0xff] }
 0x4c7   :  { %2405 = vmatpush1.bf16.msra.mxu1 %v7734_v5  ;;  %2446 = vmatpush1.bf16.msra.mxu0 %v7736_v7  ;;  %v10322_v5 = vld [vmem:[#allocation58_spill] sm:$0xff]  ;;  %v10323_v7 = vld [vmem:[#allocation59_spill] sm:$0xff] }
 0x4c8   :  { %2406 = vmatprep.subr.bf16.mxu1 %v7742_v11  ;;  %2447 = vmatprep.subr.bf16.mxu0 %v10314_v42  ;;  %v10324_v11 = vld [vmem:[#allocation60_spill] sm:$0xff]  ;;  %v10325_v42 = vld [vmem:[#allocation61_spill] sm:$0xff] }
 0x4cb   :  { %2407 = vmatpush1.bf16.msra.mxu1 %v10315_v49  ;;  %2448 = vmatpush1.bf16.msra.mxu0 %v10316_v54  ;;  %v10326_v49 = vld [vmem:[#allocation62_spill] sm:$0xff]  ;;  %v10327_v54 = vld [vmem:[#allocation63_spill] sm:$0xff] }
 0x4cc   :  { %2408 = vmatprep.subr.bf16.mxu1 %v10317_v57  ;;  %2449 = vmatprep.subr.bf16.mxu0 %v10318_v52  ;;  %v10328_v57 = vld [vmem:[#allocation64_spill] sm:$0xff]  ;;  %v10329_v52 = vld [vmem:[#allocation65_spill] sm:$0xff] }
 0x4cf   :  { %2409 = vmatpush1.bf16.msra.mxu1 %v10319_v56  ;;  %2450 = vmatpush1.bf16.msra.mxu0 %v10320_v61  ;;  %v10330_v56 = vld [vmem:[#allocation66_spill] sm:$0xff]  ;;  %v10331_v61 = vld [vmem:[#allocation67_spill] sm:$0xff] }
 0x4d0   :  { %2410 = vmatprep.subr.bf16.mxu1 %v10321_v63  ;;  %2451 = vmatprep.subr.bf16.mxu0 %v10322_v5  ;;  %v10332_v63 = vld [vmem:[#allocation68_spill] sm:$0xff]  ;;  %v10333_v5 = vld [vmem:[#allocation69_spill] sm:$0xff] }
 0x4d3   :  { %2411 = vmatpush1.bf16.msra.mxu1 %v10323_v7  ;;  %2452 = vmatpush1.bf16.msra.mxu0 %v10324_v11  ;;  %v10334_v7 = vld [vmem:[#allocation70_spill] sm:$0xff]  ;;  %v10335_v11 = vld [vmem:[#allocation71_spill] sm:$0xff] }
 0x4d4   :  { %2412 = vmatprep.subr.bf16.mxu1 %v10325_v42  ;;  %2453 = vmatprep.subr.bf16.mxu0 %v10326_v49  ;;  %v10336_v42 = vld [vmem:[#allocation72_spill] sm:$0xff]  ;;  %v10337_v49 = vld [vmem:[#allocation73_spill] sm:$0xff] }
 0x4d7   :  { %2413 = vmatpush1.bf16.msra.mxu1 %v10327_v54  ;;  %2454 = vmatpush1.bf16.msra.mxu0 %v10328_v57  ;;  %v10338_v54 = vld [vmem:[#allocation74_spill] sm:$0xff]  ;;  %v10339_v57 = vld [vmem:[#allocation75_spill] sm:$0xff] }
 0x4d8   :  { %2414 = vmatprep.subr.bf16.mxu1 %v10329_v52  ;;  %2455 = vmatprep.subr.bf16.mxu0 %v10330_v56  ;;  %v10340_v52 = vld [vmem:[#allocation76_spill] sm:$0xff]  ;;  %v10341_v56 = vld [vmem:[#allocation77_spill] sm:$0xff] }
 0x4db   :  { %2415 = vmatpush1.bf16.msra.mxu1 %v10331_v61  ;;  %2456 = vmatpush1.bf16.msra.mxu0 %v10332_v63  ;;  %v10342_v61 = vld [vmem:[#allocation78_spill] sm:$0xff]  ;;  %v10343_v63 = vld [vmem:[#allocation79_spill] sm:$0xff] }
 0x4dc   :  { %2416 = vmatprep.subr.bf16.mxu1 %v10333_v5  ;;  %2457 = vmatprep.subr.bf16.mxu0 %v10334_v7  ;;  %v10344_v5 = vld [vmem:[#allocation80_spill] sm:$0xff]  ;;  %v10345_v7 = vld [vmem:[#allocation81_spill] sm:$0xff] }
 0x4df   :  { %2417 = vmatpush1.bf16.msra.mxu1 %v10335_v11  ;;  %2458 = vmatpush1.bf16.msra.mxu0 %v10336_v42  ;;  %v10346_v11 = vld [vmem:[#allocation82_spill] sm:$0xff]  ;;  %v10347_v42 = vld [vmem:[#allocation83_spill] sm:$0xff] }
 0x4e0   :  { %2418 = vmatprep.subr.bf16.mxu1 %v10337_v49  ;;  %2459 = vmatprep.subr.bf16.mxu0 %v10338_v54  ;;  %v10348_v49 = vld [vmem:[#allocation84_spill] sm:$0xff]  ;;  %v10349_v54 = vld [vmem:[#allocation85_spill] sm:$0xff] }
 0x4e3   :  { %2419 = vmatpush1.bf16.msra.mxu1 %v10339_v57  ;;  %2460 = vmatpush1.bf16.msra.mxu0 %v10340_v52  ;;  %v10350_v57 = vld [vmem:[#allocation86_spill] sm:$0xff]  ;;  %v10351_v52 = vld [vmem:[#allocation87_spill] sm:$0xff] }
 0x4e4   :  { %2420 = vmatprep.subr.bf16.mxu1 %v10341_v56  ;;  %2461 = vmatprep.subr.bf16.mxu0 %v10342_v61  ;;  %v10352_v56 = vld [vmem:[#allocation88_spill] sm:$0xff]  ;;  %v10353_v61 = vld [vmem:[#allocation89_spill] sm:$0xff] }
 0x4e7   :  { %2421 = vmatpush1.bf16.msra.mxu1 %v10343_v63  ;;  %2462 = vmatpush1.bf16.msra.mxu0 %v10344_v5  ;;  %v10354_v63 = vld [vmem:[#allocation90_spill] sm:$0xff] }
 0x4e8   :  { %2422 = vmatprep.subr.bf16.mxu1 %v10345_v7  ;;  %2463 = vmatprep.subr.bf16.mxu0 %v10346_v11 }
 0x4eb   :  { %2423 = vmatpush1.bf16.msra.mxu1 %v10347_v42  ;;  %2464 = vmatpush1.bf16.msra.mxu0 %v10348_v49 }
 0x4ec   :  { %2424 = vmatprep.subr.bf16.mxu1 %v10349_v54  ;;  %2465 = vmatprep.subr.bf16.mxu0 %v10350_v57 }
 0x4ef   :  { %2425 = vmatpush1.bf16.msra.mxu1 %v10351_v52  ;;  %2466 = vmatpush1.bf16.msra.mxu0 %v10352_v56 }
 0x4f0   :  { %2476 = vmatprep.subr.bf16.mxu1 %v10353_v61  ;;  %2517 = vmatprep.subr.bf16.mxu0 %v10354_v63 }
 0x545   :  { %v2202_v5 = vpop.f32.mrb[40].mxu1  ;;  %v2243_v7 = vpop.f32.mrb[56].mxu0 }
 0x546   :  { %v2332_v11 = vadd.f32 %v2202_v5, %v10355_v48  ;;  %v2334_v42 = vadd.f32 %v2243_v7, %v10356_v47  ;;  %v2204_v45 = vpop.f32.mrb[41].mxu1  ;;  %v2245_v49 = vpop.f32.mrb[57].mxu0  ;;  %v10361_v7 = vld [vmem:[#allocation141_spill] sm:$0xff] }
 0x547   :  { %v2333_v54 = vadd.f32 %v2204_v45, %v10357_v41  ;;  %v2335_v57 = vadd.f32 %v2245_v49, %v10358_v39  ;;  %v2206_v40 = vpop.f32.mrb[42].mxu1  ;;  %v2247_v52 = vpop.f32.mrb[58].mxu0 }
 0x548   :  { %v2340_v36 = vsub.f32 0.0, %v2332_v11  ;;  %v2207_v56 = vpop.f32.mrb[43].mxu1  ;;  %v2248_v32 = vpop.f32.mrb[59].mxu0 }
 0x549   :  { %v2346_v61 = vsub.f32 0.0, %v2333_v54  ;;  %v10359_v54 = vld [vmem:[#allocation139_spill] sm:$0xff]  ;;  %v10360_v56 = vld [vmem:[#allocation140_spill] sm:$0xff] }
 0x54a   :  { %v2341_v31 = vmul.f32 1.442695, %v2340_v36 }
 0x54b   :  { %v2347_v63 = vmul.f32 1.442695, %v2346_v61 }
 0x54c   :  { %6780 = vpow2.f32 %v2341_v31 }
 0x54d   :  { %6782 = vpow2.f32 %v2347_v63 }
 0x54e   :  { %6784 = vtanh.f32 %v2334_v42  ;;  %v10362_v42 = vld [vmem:[#allocation142_spill] sm:$0xff] }
 0x556   :  { %v6781_v30 = vpop.eup %6780 }
 0x557   :  { %v6783_v48 = vpop.eup %6782  ;;  %v2343_v5 = vadd.f32 1.0, %v6781_v30 }
 0x558   :  { %v2349_v47 = vadd.f32 1.0, %v6783_v48  ;;  %v6785_v41 = vpop.eup %6784 }
 0x559   :  { %6786 = vrcp.f32 %v2343_v5 }
 0x55a   :  { %6788 = vrcp.f32 %v2349_v47 }
 0x563   :  { %v6787_v45 = vpop.eup %6786 }
 0x564   :  { %v6789_v39 = vpop.eup %6788  ;;  %v2360_v40 = vmul.f32 %v6787_v45, %v6785_v41 }
 0x565   :  { %v2359_v49 = vmul.f32 %v6789_v39, %v8371_v53 }
 0x567   :  { %v8529_v52 = vadd.f32 %v2360_v40, %v2359_v49  ;;  %v2353_v49 = vsub.f32 0.0, %v2335_v57 }
 0x585   :  { %v2284_v32 = vpop.f32.mrb[44].mxu1  ;;  %v2325_v36 = vpop.f32.mrb[60].mxu0 }
 0x586   :  { %v2336_v31 = vadd.f32 %v2284_v32, %v10359_v54  ;;  %v2338_v61 = vadd.f32 %v2325_v36, %v10360_v56  ;;  %v2286_v63 = vpop.f32.mrb[45].mxu1  ;;  %v2327_v30 = vpop.f32.mrb[61].mxu0  ;;  %v2354_v54 = vmul.f32 1.442695, %v2353_v49 }
 0x587   :  { %v2337_v11 = vadd.f32 %v2286_v63, %v10361_v7  ;;  %v2339_v48 = vadd.f32 %v2327_v30, %v10362_v42  ;;  %v2288_v5 = vpop.f32.mrb[46].mxu1  ;;  %v2329_v47 = vpop.f32.mrb[62].mxu0 }
 0x588   :  { %v2364_v27 = vsub.f32 0.0, %v2336_v31  ;;  %v2289_v41 = vpop.f32.mrb[47].mxu1  ;;  %v2330_v45 = vpop.f32.mrb[63].mxu0 }
 0x589   :  { %v2370_v53 = vsub.f32 0.0, %v2337_v11  ;;  %v2377_v32 = vsub.f32 0.0, %v2339_v48 }
 0x58a   :  { %v2365_v39 = vmul.f32 1.442695, %v2364_v27 }
 0x58b   :  { %v2371_v40 = vmul.f32 1.442695, %v2370_v53  ;;  %v2378_v36 = vmul.f32 1.442695, %v2377_v32  ;;  %v10365_v32 = vld [vmem:[#allocation161_spill] sm:$0xff] }
 0x58c   :  { %6790 = vpow2.f32 %v2365_v39 }
 0x58d   :  { %6792 = vpow2.f32 %v2371_v40 }
 0x58e   :  { %6794 = vpow2.f32 %v2354_v54  ;;  %v10366_v54 = vld [vmem:[#allocation162_spill] sm:$0xff] }
 0x58f   :  { %6796 = vpow2.f32 %v2378_v36  ;;  %v10367_v36 = vld [vmem:[#allocation163_spill] sm:$0xff] }
 0x590   :  { %6798 = vtanh.f32 %v2338_v61 }
 0x596   :  { %v6791_v56 = vpop.eup %6790 }
 0x597   :  { %v6793_v22 = vpop.eup %6792  ;;  %v2367_v63 = vadd.f32 1.0, %v6791_v56  ;;  %v10368_v56 = vld [vmem:[#allocation164_spill] sm:$0xff] }
 0x598   :  { %v2373_v30 = vadd.f32 1.0, %v6793_v22  ;;  %v6795_v31 = vpop.eup %6794 }
 0x599   :  { %6800 = vrcp.f32 %v2367_v63  ;;  %v6797_v7 = vpop.eup %6796  ;;  %v2356_v42 = vadd.f32 1.0, %v6795_v31  ;;  %v10369_v63 = vld [vmem:[#allocation165_spill] sm:$0xff]  ;;  %v10371_v31 = vld [vmem:[#allocation167_spill] sm:$0xff] }
 0x59a   :  { %6802 = vrcp.f32 %v2373_v30  ;;  %v6799_v11 = vpop.eup %6798  ;;  %v2380_v57 = vadd.f32 1.0, %v6797_v7  ;;  %v10370_v30 = vld [vmem:[#allocation166_spill] sm:$0xff]  ;;  %v10372_v7 = vld [vmem:[#allocation168_spill] sm:$0xff] }
 0x59b   :  { %6804 = vtanh.f32 %v8529_v52 }
 0x59c   :  { %6806 = vrcp.f32 %v2356_v42  ;;  %v10375_v42 = vld [vmem:[#allocation171_spill] sm:$0xff] }
 0x59d   :  { %6808 = vrcp.f32 %v2380_v57  ;;  %v10378_v57 = vld [vmem:[#allocation174_spill] sm:$0xff] }
 0x5a3   :  { %v6801_v27 = vpop.eup %6800 }
 0x5a4   :  { %v6803_v5 = vpop.eup %6802  ;;  %v2384_v47 = vmul.f32 %v6801_v27, %v6799_v11  ;;  %v10373_v11 = vld [vmem:[#allocation169_spill] sm:$0xff]  ;;  %v10374_v27 = vld [vmem:[#allocation170_spill] sm:$0xff] }
 0x5a5   :  { %v2383_v48 = vmul.f32 %v6803_v5, %v8379_v46  ;;  %v6805_v22 = vpop.eup %6804  ;;  %v10376_v5 = vld [vmem:[#allocation172_spill] sm:$0xff] }
 0x5a6   :  { %v6807_v61 = vpop.eup %6806 }
 0x5a7   :  { %v8537_v41 = vadd.f32 %v2384_v47, %v2383_v48  ;;  %v6809_v45 = vpop.eup %6808  ;;  %v8540_v39 = vmul.f32 %v6807_v61, %v6805_v22  ;;  %v10377_v47 = vld [vmem:[#allocation173_spill] sm:$0xff]  ;;  %v10379_v48 = vld [vmem:[#allocation175_spill] sm:$0xff]  ;;  %v10380_v22 = vld [vmem:[#allocation176_spill] sm:$0xff] }
 0x5a8   :  { %v10381_v61 = vld [vmem:[#allocation177_spill] sm:$0xff] }
 0x5a9   :  { %6810 = vtanh.f32 %v8537_v41  ;;  %10363 = vst [vmem:[#allocation93_spill] sm:$0xff] %v8540_v39  ;;  %v8548_v46 = vpack.c.bf16 %v8540_v39, %v8540_v39  ;;  %v10386_v39 = vld [vmem:[#allocation182_spill] sm:$0xff] }
 0x5b3   :  { %v6811_v53 = vpop.eup %6810 }
 0x5b4   :  { %v8542_v40 = vmul.f32 %v6811_v53, %v6809_v45  ;;  %v10382_v45 = vld [vmem:[#allocation178_spill] sm:$0xff]  ;;  %v10383_v53 = vld [vmem:[#allocation179_spill] sm:$0xff] }
 0x5b6   :  { %10364 = vst [vmem:[#allocation94_spill] sm:$0xff] %v8542_v40  ;;  %v2393_v49 = vpack.c.bf16 %v8542_v40, %v8542_v40  ;;  %v10385_v40 = vld [vmem:[#allocation181_spill] sm:$0xff] }
 0x5b8   :  { %2426 = vmatprep.mubr.bf16.mxu1 %v2393_v49  ;;  %2467 = vmatprep.mubr.bf16.mxu0 %v2393_v49 }
 0x5b9   :  { %2427 = vmatmul.mubr.bf16.vlgmr.msra.gmra.mrb[48].mxu1 %v8548_v46  ;;  %2468 = vmatmul.mubr.bf16.vlgmr.msra.gmra.mrb[64].mxu0 %v8548_v46 }
 0x5ba   :  { %2477 = vmatpush1.bf16.msra.mxu1 %v7866_v10  ;;  %2518 = vmatpush1.bf16.msra.mxu0 %v7868_v60 }
 0x5bb   :  { %2508 = vmatprep.mubr.bf16.mxu1 %v2393_v49  ;;  %2549 = vmatprep.mubr.bf16.mxu0 %v2393_v49  ;;  %v10384_v49 = vld [vmem:[#allocation180_spill] sm:$0xff] }
 0x5bc   :  { %2478 = vmatprep.subr.bf16.mxu1 %v10266_v28  ;;  %2519 = vmatprep.subr.bf16.mxu0 %v10267_v8 }
 0x5be   :  { %2479 = vmatpush1.bf16.msra.mxu1 %v10268_v33  ;;  %2520 = vmatpush1.bf16.msra.mxu0 %v10269_v23 }
 0x5bf   :  { %2480 = vmatprep.subr.bf16.mxu1 %v10270_v13  ;;  %2521 = vmatprep.subr.bf16.mxu0 %v10271_v15 }
 0x5c2   :  { %2481 = vmatpush1.bf16.msra.mxu1 %v10272_v24  ;;  %2522 = vmatpush1.bf16.msra.mxu0 %v10273_v12 }
 0x5c3   :  { %2482 = vmatprep.subr.bf16.mxu1 %v10274_v3  ;;  %2523 = vmatprep.subr.bf16.mxu0 %v10275_v51 }
 0x5c6   :  { %2483 = vmatpush1.bf16.msra.mxu1 %v10276_v20  ;;  %2524 = vmatpush1.bf16.msra.mxu0 %v10365_v32 }
 0x5c7   :  { %2484 = vmatprep.subr.bf16.mxu1 %v10366_v54  ;;  %2525 = vmatprep.subr.bf16.mxu0 %v10367_v36 }
 0x5ca   :  { %2485 = vmatpush1.bf16.msra.mxu1 %v10368_v56  ;;  %2526 = vmatpush1.bf16.msra.mxu0 %v10369_v63 }
 0x5cb   :  { %2486 = vmatprep.subr.bf16.mxu1 %v10370_v30  ;;  %2527 = vmatprep.subr.bf16.mxu0 %v10371_v31 }
 0x5ce   :  { %2487 = vmatpush1.bf16.msra.mxu1 %v10372_v7  ;;  %2528 = vmatpush1.bf16.msra.mxu0 %v10373_v11 }
 0x5cf   :  { %2488 = vmatprep.subr.bf16.mxu1 %v10374_v27  ;;  %2529 = vmatprep.subr.bf16.mxu0 %v10375_v42 }
 0x5d2   :  { %2489 = vmatpush1.bf16.msra.mxu1 %v10376_v5  ;;  %2530 = vmatpush1.bf16.msra.mxu0 %v10377_v47  ;;  %v10387_v5 = vld [vmem:[#allocation183_spill] sm:$0xff]  ;;  %v10388_v47 = vld [vmem:[#allocation184_spill] sm:$0xff] }
 0x5d3   :  { %2490 = vmatprep.subr.bf16.mxu1 %v10378_v57  ;;  %2531 = vmatprep.subr.bf16.mxu0 %v10379_v48 }
 0x5d6   :  { %2491 = vmatpush1.bf16.msra.mxu1 %v10380_v22  ;;  %2532 = vmatpush1.bf16.msra.mxu0 %v10381_v61  ;;  %v10389_v61 = vld [vmem:[#allocation188_spill] sm:$0xff] }
 0x5d7   :  { %2492 = vmatprep.subr.bf16.mxu1 %v10382_v45  ;;  %2533 = vmatprep.subr.bf16.mxu0 %v10383_v53  ;;  %v10390_v45 = vld [vmem:[#allocation189_spill] sm:$0xff] }
 0x5da   :  { %2493 = vmatpush1.bf16.msra.mxu1 %v10384_v49  ;;  %2534 = vmatpush1.bf16.msra.mxu0 %v10385_v40 }
 0x5db   :  { %2494 = vmatprep.subr.bf16.mxu1 %v10386_v39  ;;  %2535 = vmatprep.subr.bf16.mxu0 %v10387_v5 }
 0x5de   :  { %2495 = vmatpush1.bf16.msra.mxu1 %v10388_v47  ;;  %2536 = vmatpush1.bf16.msra.mxu0 %v10301_v25 }
 0x5df   :  { %2496 = vmatprep.subr.bf16.mxu1 %v10302_v59  ;;  %2537 = vmatprep.subr.bf16.mxu0 %v10303_v14 }
 0x5e2   :  { %2497 = vmatpush1.bf16.msra.mxu1 %v10389_v61  ;;  %2538 = vmatpush1.bf16.msra.mxu0 %v10390_v45 }
 0x5e3   :  { %2498 = vmatprep.subr.bf16.mxu1 %v10306_v6  ;;  %2539 = vmatprep.subr.bf16.mxu0 %v10307_v62 }
 0x5e6   :  { %2499 = vmatpush1.bf16.msra.mxu1 %v10308_v34  ;;  %2540 = vmatpush1.bf16.msra.mxu0 %v10309_v43 }
 0x5e7   :  { %2500 = vmatprep.subr.bf16.mxu1 %v10310_v29  ;;  %2541 = vmatprep.subr.bf16.mxu0 %v10311_v0 }
 0x5ea   :  { %2501 = vmatpush1.bf16.msra.mxu1 %v8254_v26  ;;  %2542 = vmatpush1.bf16.msra.mxu0 %v8256_v4 }
 0x5eb   :  { %2502 = vmatprep.subr.bf16.mxu1 %v8260_v58  ;;  %2543 = vmatprep.subr.bf16.mxu0 %v10312_v1  ;;  %v10456_v1 = vld [vmem:[#allocation101_spill] sm:$0xff]  ;;  %v10457_v58 = vld [vmem:[#allocation102_spill] sm:$0xff] }
 0x5ee   :  { %2503 = vmatpush1.bf16.msra.mxu1 %v10313_v50  ;;  %2544 = vmatpush1.bf16.msra.mxu0 %v8268_v2  ;;  %v10455_v2 = vld [vmem:[#allocation100_spill] sm:$0xff] }
 0x5ef   :  { %2504 = vmatprep.subr.bf16.mxu1 %v8272_v44  ;;  %2545 = vmatprep.subr.bf16.mxu0 %v8274_v35  ;;  %v10399_v35 = vld [vmem:[#allocation36_spill] sm:$0xff]  ;;  %v10454_v44 = vld [vmem:[#allocation99_spill] sm:$0xff] }
 0x5f2   :  { %2505 = vmatpush1.bf16.msra.mxu1 %v8278_v37  ;;  %2546 = vmatpush1.bf16.msra.mxu0 %v8280_v16  ;;  %v10391_v37 = vld [vmem:[#allocation28_spill] sm:$0xff]  ;;  %v10392_v16 = vld [vmem:[#allocation29_spill] sm:$0xff] }
 0x5f3   :  { %2506 = vmatprep.subr.bf16.mxu1 %v8284_v55  ;;  %2547 = vmatprep.subr.bf16.mxu0 %v8286_v9  ;;  %v10393_v55 = vld [vmem:[#allocation30_spill] sm:$0xff]  ;;  %v10394_v9 = vld [vmem:[#allocation31_spill] sm:$0xff] }
 0x5f6   :  { %2507 = vmatpush1.bf16.msra.mxu1 %v8290_v18  ;;  %2548 = vmatpush1.bf16.msra.mxu0 %v8292_v38  ;;  %v10395_v18 = vld [vmem:[#allocation32_spill] sm:$0xff]  ;;  %v10396_v38 = vld [vmem:[#allocation33_spill] sm:$0xff] }
 0x5f7   :  { %2620 = vmatprep.subr.bf16.mxu1 %v7670_v19  ;;  %2661 = vmatprep.subr.bf16.mxu0 %v7674_v17  ;;  %v10397_v19 = vld [vmem:[#allocation35_spill] sm:$0xff]  ;;  %v10398_v17 = vld [vmem:[#allocation34_spill] sm:$0xff] }
 0x5f9   :  { %2509 = vmatmul.mubr.bf16.vlgmr.msra.gmra.mrb[52].mxu1 %v8548_v46  ;;  %2550 = vmatmul.mubr.bf16.vlgmr.msra.gmra.mrb[68].mxu0 %v8548_v46  ;;  %v10400_v46 = vld [vmem:[#allocation37_spill] sm:$0xff] }
 0x5fa   :  { %2621 = vmatpush1.bf16.msra.mxu1 %v7672_v21  ;;  %2662 = vmatpush1.bf16.msra.mxu0 %v10391_v37  ;;  %v10401_v21 = vld [vmem:[#allocation38_spill] sm:$0xff]  ;;  %v10402_v37 = vld [vmem:[#allocation39_spill] sm:$0xff] }
 0x5fb   :  { %2622 = vmatprep.subr.bf16.mxu1 %v10392_v16  ;;  %2663 = vmatprep.subr.bf16.mxu0 %v10393_v55  ;;  %v10403_v16 = vld [vmem:[#allocation40_spill] sm:$0xff]  ;;  %v10404_v55 = vld [vmem:[#allocation41_spill] sm:$0xff] }
 0x5fe   :  { %2623 = vmatpush1.bf16.msra.mxu1 %v10394_v9  ;;  %2664 = vmatpush1.bf16.msra.mxu0 %v10395_v18  ;;  %v10405_v9 = vld [vmem:[#allocation42_spill] sm:$0xff]  ;;  %v10406_v18 = vld [vmem:[#allocation43_spill] sm:$0xff] }
 0x5ff   :  { %2624 = vmatprep.subr.bf16.mxu1 %v10396_v38  ;;  %2665 = vmatprep.subr.bf16.mxu0 %v10397_v19  ;;  %v10407_v38 = vld [vmem:[#allocation44_spill] sm:$0xff]  ;;  %v10408_v19 = vld [vmem:[#allocation45_spill] sm:$0xff] }
 0x602   :  { %2625 = vmatpush1.bf16.msra.mxu1 %v10398_v17  ;;  %2666 = vmatpush1.bf16.msra.mxu0 %v10399_v35  ;;  %v10409_v17 = vld [vmem:[#allocation46_spill] sm:$0xff]  ;;  %v10410_v35 = vld [vmem:[#allocation47_spill] sm:$0xff] }
 0x603   :  { %2626 = vmatprep.subr.bf16.mxu1 %v10400_v46  ;;  %2667 = vmatprep.subr.bf16.mxu0 %v10401_v21  ;;  %v10411_v46 = vld [vmem:[#allocation48_spill] sm:$0xff]  ;;  %v10412_v21 = vld [vmem:[#allocation49_spill] sm:$0xff] }
 0x606   :  { %2627 = vmatpush1.bf16.msra.mxu1 %v10402_v37  ;;  %2668 = vmatpush1.bf16.msra.mxu0 %v10403_v16  ;;  %v10413_v37 = vld [vmem:[#allocation50_spill] sm:$0xff]  ;;  %v10414_v16 = vld [vmem:[#allocation51_spill] sm:$0xff] }
 0x607   :  { %2628 = vmatprep.subr.bf16.mxu1 %v10404_v55  ;;  %2669 = vmatprep.subr.bf16.mxu0 %v10405_v9  ;;  %v10415_v55 = vld [vmem:[#allocation52_spill] sm:$0xff]  ;;  %v10416_v9 = vld [vmem:[#allocation53_spill] sm:$0xff] }
 0x60a   :  { %2629 = vmatpush1.bf16.msra.mxu1 %v10406_v18  ;;  %2670 = vmatpush1.bf16.msra.mxu0 %v10407_v38  ;;  %v10417_v18 = vld [vmem:[#allocation54_spill] sm:$0xff]  ;;  %v10418_v38 = vld [vmem:[#allocation55_spill] sm:$0xff] }
 0x60b   :  { %2630 = vmatprep.subr.bf16.mxu1 %v10408_v19  ;;  %2671 = vmatprep.subr.bf16.mxu0 %v10409_v17  ;;  %v10419_v19 = vld [vmem:[#allocation56_spill] sm:$0xff]  ;;  %v10420_v17 = vld [vmem:[#allocation57_spill] sm:$0xff] }
 0x60e   :  { %2631 = vmatpush1.bf16.msra.mxu1 %v10410_v35  ;;  %2672 = vmatpush1.bf16.msra.mxu0 %v10411_v46  ;;  %v10421_v35 = vld [vmem:[#allocation58_spill] sm:$0xff]  ;;  %v10422_v46 = vld [vmem:[#allocation59_spill] sm:$0xff] }
 0x60f   :  { %2632 = vmatprep.subr.bf16.mxu1 %v10412_v21  ;;  %2673 = vmatprep.subr.bf16.mxu0 %v10413_v37  ;;  %v10423_v21 = vld [vmem:[#allocation60_spill] sm:$0xff]  ;;  %v10424_v37 = vld [vmem:[#allocation61_spill] sm:$0xff] }
 0x612   :  { %2633 = vmatpush1.bf16.msra.mxu1 %v10414_v16  ;;  %2674 = vmatpush1.bf16.msra.mxu0 %v10415_v55  ;;  %v10425_v16 = vld [vmem:[#allocation62_spill] sm:$0xff]  ;;  %v10426_v55 = vld [vmem:[#allocation63_spill] sm:$0xff] }
 0x613   :  { %2634 = vmatprep.subr.bf16.mxu1 %v10416_v9  ;;  %2675 = vmatprep.subr.bf16.mxu0 %v10417_v18  ;;  %v10427_v9 = vld [vmem:[#allocation64_spill] sm:$0xff]  ;;  %v10428_v18 = vld [vmem:[#allocation65_spill] sm:$0xff] }
 0x616   :  { %2635 = vmatpush1.bf16.msra.mxu1 %v10418_v38  ;;  %2676 = vmatpush1.bf16.msra.mxu0 %v10419_v19  ;;  %v10429_v38 = vld [vmem:[#allocation66_spill] sm:$0xff]  ;;  %v10430_v19 = vld [vmem:[#allocation67_spill] sm:$0xff] }
 0x617   :  { %2636 = vmatprep.subr.bf16.mxu1 %v10420_v17  ;;  %2677 = vmatprep.subr.bf16.mxu0 %v10421_v35  ;;  %v10431_v17 = vld [vmem:[#allocation68_spill] sm:$0xff]  ;;  %v10432_v35 = vld [vmem:[#allocation69_spill] sm:$0xff] }
 0x61a   :  { %2637 = vmatpush1.bf16.msra.mxu1 %v10422_v46  ;;  %2678 = vmatpush1.bf16.msra.mxu0 %v10423_v21  ;;  %v10433_v46 = vld [vmem:[#allocation70_spill] sm:$0xff]  ;;  %v10434_v21 = vld [vmem:[#allocation71_spill] sm:$0xff] }
 0x61b   :  { %2638 = vmatprep.subr.bf16.mxu1 %v10424_v37  ;;  %2679 = vmatprep.subr.bf16.mxu0 %v10425_v16  ;;  %v10435_v37 = vld [vmem:[#allocation72_spill] sm:$0xff]  ;;  %v10436_v16 = vld [vmem:[#allocation73_spill] sm:$0xff] }
 0x61e   :  { %2639 = vmatpush1.bf16.msra.mxu1 %v10426_v55  ;;  %2680 = vmatpush1.bf16.msra.mxu0 %v10427_v9  ;;  %v10437_v55 = vld [vmem:[#allocation74_spill] sm:$0xff]  ;;  %v10438_v9 = vld [vmem:[#allocation75_spill] sm:$0xff] }
 0x61f   :  { %2640 = vmatprep.subr.bf16.mxu1 %v10428_v18  ;;  %2681 = vmatprep.subr.bf16.mxu0 %v10429_v38  ;;  %v10439_v18 = vld [vmem:[#allocation76_spill] sm:$0xff]  ;;  %v10440_v38 = vld [vmem:[#allocation77_spill] sm:$0xff] }
 0x622   :  { %2641 = vmatpush1.bf16.msra.mxu1 %v10430_v19  ;;  %2682 = vmatpush1.bf16.msra.mxu0 %v10431_v17  ;;  %v10441_v19 = vld [vmem:[#allocation78_spill] sm:$0xff]  ;;  %v10442_v17 = vld [vmem:[#allocation79_spill] sm:$0xff] }
 0x623   :  { %2642 = vmatprep.subr.bf16.mxu1 %v10432_v35  ;;  %2683 = vmatprep.subr.bf16.mxu0 %v10433_v46  ;;  %v10443_v35 = vld [vmem:[#allocation80_spill] sm:$0xff]  ;;  %v10444_v46 = vld [vmem:[#allocation81_spill] sm:$0xff] }
 0x626   :  { %2643 = vmatpush1.bf16.msra.mxu1 %v10434_v21  ;;  %2684 = vmatpush1.bf16.msra.mxu0 %v10435_v37  ;;  %v10445_v21 = vld [vmem:[#allocation82_spill] sm:$0xff]  ;;  %v10446_v37 = vld [vmem:[#allocation83_spill] sm:$0xff] }
 0x627   :  { %2644 = vmatprep.subr.bf16.mxu1 %v10436_v16  ;;  %2685 = vmatprep.subr.bf16.mxu0 %v10437_v55  ;;  %v10447_v16 = vld [vmem:[#allocation84_spill] sm:$0xff]  ;;  %v10448_v55 = vld [vmem:[#allocation85_spill] sm:$0xff] }
 0x62a   :  { %2645 = vmatpush1.bf16.msra.mxu1 %v10438_v9  ;;  %2686 = vmatpush1.bf16.msra.mxu0 %v10439_v18  ;;  %v10449_v9 = vld [vmem:[#allocation86_spill] sm:$0xff]  ;;  %v10450_v18 = vld [vmem:[#allocation87_spill] sm:$0xff] }
 0x62b   :  { %2646 = vmatprep.subr.bf16.mxu1 %v10440_v38  ;;  %2687 = vmatprep.subr.bf16.mxu0 %v10441_v19  ;;  %v10451_v38 = vld [vmem:[#allocation88_spill] sm:$0xff]  ;;  %v10452_v19 = vld [vmem:[#allocation89_spill] sm:$0xff] }
 0x62e   :  { %2647 = vmatpush1.bf16.msra.mxu1 %v10442_v17  ;;  %2688 = vmatpush1.bf16.msra.mxu0 %v10443_v35  ;;  %v10453_v17 = vld [vmem:[#allocation90_spill] sm:$0xff] }
 0x62f   :  { %2648 = vmatprep.subr.bf16.mxu1 %v10444_v46  ;;  %2689 = vmatprep.subr.bf16.mxu0 %v10445_v21 }
 0x632   :  { %2649 = vmatpush1.bf16.msra.mxu1 %v10446_v37  ;;  %2690 = vmatpush1.bf16.msra.mxu0 %v10447_v16 }
 0x633   :  { %2650 = vmatprep.subr.bf16.mxu1 %v10448_v55  ;;  %2691 = vmatprep.subr.bf16.mxu0 %v10449_v9 }
 0x636   :  { %2651 = vmatpush1.bf16.msra.mxu1 %v10450_v18  ;;  %2692 = vmatpush1.bf16.msra.mxu0 %v10451_v38 }
 0x637   :  { %2702 = vmatprep.subr.bf16.mxu1 %v10452_v19  ;;  %2743 = vmatprep.subr.bf16.mxu0 %v10453_v17 }
 0x68c   :  { %v2428_v35 = vpop.f32.mrb[48].mxu1  ;;  %v2469_v46 = vpop.f32.mrb[64].mxu0 }
 0x68d   :  { %v2558_v21 = vadd.f32 %v2428_v35, %v10454_v44  ;;  %v2560_v37 = vadd.f32 %v2469_v46, %v10455_v2  ;;  %v2430_v50 = vpop.f32.mrb[49].mxu1  ;;  %v2471_v16 = vpop.f32.mrb[65].mxu0  ;;  %v10461_v46 = vld [vmem:[#allocation138_spill] sm:$0xff] }
 0x68e   :  { %v2559_v55 = vadd.f32 %v2430_v50, %v10456_v1  ;;  %v2561_v9 = vadd.f32 %v2471_v16, %v10457_v58  ;;  %v2432_v4 = vpop.f32.mrb[50].mxu1  ;;  %v2473_v18 = vpop.f32.mrb[66].mxu0 }
 0x68f   :  { %v2566_v26 = vsub.f32 0.0, %v2558_v21  ;;  %v2433_v38 = vpop.f32.mrb[51].mxu1  ;;  %v2474_v0 = vpop.f32.mrb[67].mxu0 }
 0x690   :  { %v2572_v19 = vsub.f32 0.0, %v2559_v55 }
 0x691   :  { %v2567_v29 = vmul.f32 1.442695, %v2566_v26 }
 0x692   :  { %v2573_v17 = vmul.f32 1.442695, %v2572_v19  ;;  %v10458_v19 = vld [vmem:[#allocation135_spill] sm:$0xff] }
 0x693   :  { %6812 = vpow2.f32 %v2567_v29 }
 0x694   :  { %6814 = vpow2.f32 %v2573_v17  ;;  %v10459_v17 = vld [vmem:[#allocation136_spill] sm:$0xff] }
 0x695   :  { %6816 = vtanh.f32 %v2560_v37  ;;  %v10460_v37 = vld [vmem:[#allocation137_spill] sm:$0xff] }
 0x69d   :  { %v6813_v43 = vpop.eup %6812 }
 0x69e   :  { %v6815_v44 = vpop.eup %6814  ;;  %v2569_v35 = vadd.f32 1.0, %v6813_v43 }
 0x69f   :  { %v2575_v2 = vadd.f32 1.0, %v6815_v44  ;;  %v6817_v1 = vpop.eup %6816 }
 0x6a0   :  { %6818 = vrcp.f32 %v2569_v35 }
 0x6a1   :  { %6820 = vrcp.f32 %v2575_v2 }
 0x6aa   :  { %v6819_v50 = vpop.eup %6818 }
 0x6ab   :  { %v6821_v58 = vpop.eup %6820  ;;  %v2586_v4 = vmul.f32 %v6819_v50, %v6817_v1 }
 0x6ac   :  { %v2585_v21 = vmul.f32 %v6821_v58, %v8529_v52 }
 0x6ae   :  { %v8687_v18 = vadd.f32 %v2586_v4, %v2585_v21  ;;  %v2579_v21 = vsub.f32 0.0, %v2561_v9 }
 0x6cc   :  { %v2510_v38 = vpop.f32.mrb[52].mxu1  ;;  %v2551_v26 = vpop.f32.mrb[68].mxu0 }
 0x6cd   :  { %v2562_v16 = vadd.f32 %v2510_v38, %v10458_v19  ;;  %v2564_v55 = vadd.f32 %v2551_v26, %v10459_v17  ;;  %v2512_v29 = vpop.f32.mrb[53].mxu1  ;;  %v2553_v43 = vpop.f32.mrb[69].mxu0  ;;  %v2580_v19 = vmul.f32 1.442695, %v2579_v21 }
 0x6ce   :  { %v2563_v0 = vadd.f32 %v2512_v29, %v10460_v37  ;;  %v2565_v44 = vadd.f32 %v2553_v43, %v10461_v46  ;;  %v2514_v35 = vpop.f32.mrb[54].mxu1  ;;  %v2555_v2 = vpop.f32.mrb[70].mxu0 }
 0x6cf   :  { %v2590_v34 = vsub.f32 0.0, %v2562_v16  ;;  %v2515_v1 = vpop.f32.mrb[55].mxu1  ;;  %v2556_v50 = vpop.f32.mrb[71].mxu0 }
 0x6d0   :  { %v2596_v52 = vsub.f32 0.0, %v2563_v0  ;;  %v2603_v38 = vsub.f32 0.0, %v2565_v44 }
 0x6d1   :  { %v2591_v58 = vmul.f32 1.442695, %v2590_v34 }
 0x6d2   :  { %v2597_v4 = vmul.f32 1.442695, %v2596_v52  ;;  %v2604_v26 = vmul.f32 1.442695, %v2603_v38  ;;  %v10464_v38 = vld [vmem:[#allocation172_spill] sm:$0xff] }
 0x6d3   :  { %6822 = vpow2.f32 %v2591_v58 }
 0x6d4   :  { %6824 = vpow2.f32 %v2597_v4 }
 0x6d5   :  { %6826 = vpow2.f32 %v2580_v19  ;;  %v10465_v19 = vld [vmem:[#allocation173_spill] sm:$0xff] }
 0x6d6   :  { %6828 = vpow2.f32 %v2604_v26  ;;  %v10466_v26 = vld [vmem:[#allocation177_spill] sm:$0xff] }
 0x6d7   :  { %6830 = vtanh.f32 %v2564_v55 }
 0x6dd   :  { %v6823_v17 = vpop.eup %6822 }
 0x6de   :  { %v6825_v62 = vpop.eup %6824  ;;  %v2593_v29 = vadd.f32 1.0, %v6823_v17  ;;  %v10467_v17 = vld [vmem:[#allocation178_spill] sm:$0xff] }
 0x6df   :  { %v2599_v43 = vadd.f32 1.0, %v6825_v62  ;;  %v6827_v16 = vpop.eup %6826 }
 0x6e0   :  { %6832 = vrcp.f32 %v2593_v29  ;;  %v6829_v37 = vpop.eup %6828  ;;  %v2582_v46 = vadd.f32 1.0, %v6827_v16  ;;  %v10468_v29 = vld [vmem:[#allocation191_spill] sm:$0xff]  ;;  %v10470_v16 = vld [vmem:[#allocation193_spill] sm:$0xff] }
 0x6e1   :  { %6834 = vrcp.f32 %v2599_v43  ;;  %v6831_v0 = vpop.eup %6830  ;;  %v2606_v9 = vadd.f32 1.0, %v6829_v37  ;;  %v10469_v43 = vld [vmem:[#allocation192_spill] sm:$0xff]  ;;  %v10471_v37 = vld [vmem:[#allocation194_spill] sm:$0xff] }
 0x6e2   :  { %6836 = vtanh.f32 %v8687_v18 }
 0x6e3   :  { %6838 = vrcp.f32 %v2582_v46  ;;  %v10474_v46 = vld [vmem:[#allocation197_spill] sm:$0xff] }
 0x6e4   :  { %6840 = vrcp.f32 %v2606_v9  ;;  %v10477_v9 = vld [vmem:[#allocation200_spill] sm:$0xff] }
 0x6ea   :  { %v6833_v34 = vpop.eup %6832 }
 0x6eb   :  { %v6835_v35 = vpop.eup %6834  ;;  %v2610_v2 = vmul.f32 %v6833_v34, %v6831_v0  ;;  %v10472_v0 = vld [vmem:[#allocation195_spill] sm:$0xff]  ;;  %v10473_v34 = vld [vmem:[#allocation196_spill] sm:$0xff] }
 0x6ec   :  { %v2609_v44 = vmul.f32 %v6835_v35, %v8537_v41  ;;  %v6837_v62 = vpop.eup %6836  ;;  %v10475_v35 = vld [vmem:[#allocation198_spill] sm:$0xff] }
 0x6ed   :  { %v6839_v55 = vpop.eup %6838 }
 0x6ee   :  { %v8695_v1 = vadd.f32 %v2610_v2, %v2609_v44  ;;  %v6841_v50 = vpop.eup %6840  ;;  %v8698_v58 = vmul.f32 %v6839_v55, %v6837_v62  ;;  %v10476_v2 = vld [vmem:[#allocation199_spill] sm:$0xff]  ;;  %v10478_v44 = vld [vmem:[#allocation201_spill] sm:$0xff]  ;;  %v10479_v62 = vld [vmem:[#allocation202_spill] sm:$0xff] }
 0x6ef   :  { %v10480_v55 = vld [vmem:[#allocation203_spill] sm:$0xff] }
 0x6f0   :  { %6842 = vtanh.f32 %v8695_v1  ;;  %10462 = vst [vmem:[#allocation143_spill] sm:$0xff] %v8698_v58  ;;  %v8706_v41 = vpack.c.bf16 %v8698_v58, %v8698_v58  ;;  %v10485_v58 = vld [vmem:[#allocation208_spill] sm:$0xff] }
 0x6fa   :  { %v6843_v52 = vpop.eup %6842 }
 0x6fb   :  { %v8700_v4 = vmul.f32 %v6843_v52, %v6841_v50  ;;  %v10481_v50 = vld [vmem:[#allocation204_spill] sm:$0xff]  ;;  %v10482_v52 = vld [vmem:[#allocation205_spill] sm:$0xff] }
 0x6fd   :  { %10463 = vst [vmem:[#allocation144_spill] sm:$0xff] %v8700_v4  ;;  %v2619_v21 = vpack.c.bf16 %v8700_v4, %v8700_v4  ;;  %v10484_v4 = vld [vmem:[#allocation207_spill] sm:$0xff] }
 0x6ff   :  { %2652 = vmatprep.mubr.bf16.mxu1 %v2619_v21  ;;  %2693 = vmatprep.mubr.bf16.mxu0 %v2619_v21 }
 0x700   :  { %2653 = vmatmul.mubr.bf16.vlgmr.msra.gmra.mrb[56].mxu1 %v8706_v41  ;;  %2694 = vmatmul.mubr.bf16.vlgmr.msra.gmra.mrb[72].mxu0 %v8706_v41 }
 0x701   :  { %2703 = vmatpush1.bf16.msra.mxu1 %v7866_v10  ;;  %2744 = vmatpush1.bf16.msra.mxu0 %v7868_v60 }
 0x702   :  { %2734 = vmatprep.mubr.bf16.mxu1 %v2619_v21  ;;  %2775 = vmatprep.mubr.bf16.mxu0 %v2619_v21  ;;  %v10483_v21 = vld [vmem:[#allocation206_spill] sm:$0xff] }
 0x703   :  { %2704 = vmatprep.subr.bf16.mxu1 %v10266_v28  ;;  %2745 = vmatprep.subr.bf16.mxu0 %v10267_v8 }
 0x705   :  { %2705 = vmatpush1.bf16.msra.mxu1 %v10268_v33  ;;  %2746 = vmatpush1.bf16.msra.mxu0 %v10269_v23 }
 0x706   :  { %2706 = vmatprep.subr.bf16.mxu1 %v10270_v13  ;;  %2747 = vmatprep.subr.bf16.mxu0 %v10271_v15 }
 0x709   :  { %2707 = vmatpush1.bf16.msra.mxu1 %v10272_v24  ;;  %2748 = vmatpush1.bf16.msra.mxu0 %v10273_v12 }
 0x70a   :  { %2708 = vmatprep.subr.bf16.mxu1 %v10274_v3  ;;  %2749 = vmatprep.subr.bf16.mxu0 %v10275_v51 }
 0x70d   :  { %2709 = vmatpush1.bf16.msra.mxu1 %v10276_v20  ;;  %2750 = vmatpush1.bf16.msra.mxu0 %v10365_v32 }
 0x70e   :  { %2710 = vmatprep.subr.bf16.mxu1 %v10366_v54  ;;  %2751 = vmatprep.subr.bf16.mxu0 %v10367_v36 }
 0x711   :  { %2711 = vmatpush1.bf16.msra.mxu1 %v10368_v56  ;;  %2752 = vmatpush1.bf16.msra.mxu0 %v10369_v63 }
 0x712   :  { %2712 = vmatprep.subr.bf16.mxu1 %v10370_v30  ;;  %2753 = vmatprep.subr.bf16.mxu0 %v10371_v31 }
 0x715   :  { %2713 = vmatpush1.bf16.msra.mxu1 %v10372_v7  ;;  %2754 = vmatpush1.bf16.msra.mxu0 %v10373_v11 }
 0x716   :  { %2714 = vmatprep.subr.bf16.mxu1 %v10374_v27  ;;  %2755 = vmatprep.subr.bf16.mxu0 %v10375_v42 }
 0x719   :  { %2715 = vmatpush1.bf16.msra.mxu1 %v10464_v38  ;;  %2756 = vmatpush1.bf16.msra.mxu0 %v10465_v19 }
 0x71a   :  { %2716 = vmatprep.subr.bf16.mxu1 %v10378_v57  ;;  %2757 = vmatprep.subr.bf16.mxu0 %v10379_v48 }
 0x71d   :  { %2717 = vmatpush1.bf16.msra.mxu1 %v10380_v22  ;;  %2758 = vmatpush1.bf16.msra.mxu0 %v10466_v26 }
 0x71e   :  { %2718 = vmatprep.subr.bf16.mxu1 %v10467_v17  ;;  %2759 = vmatprep.subr.bf16.mxu0 %v10383_v53 }
 0x721   :  { %2719 = vmatpush1.bf16.msra.mxu1 %v10384_v49  ;;  %2760 = vmatpush1.bf16.msra.mxu0 %v10385_v40 }
 0x722   :  { %2720 = vmatprep.subr.bf16.mxu1 %v10386_v39  ;;  %2761 = vmatprep.subr.bf16.mxu0 %v10387_v5 }
 0x725   :  { %2721 = vmatpush1.bf16.msra.mxu1 %v10388_v47  ;;  %2762 = vmatpush1.bf16.msra.mxu0 %v10301_v25 }
 0x726   :  { %2722 = vmatprep.subr.bf16.mxu1 %v10302_v59  ;;  %2763 = vmatprep.subr.bf16.mxu0 %v10303_v14 }
 0x729   :  { %2723 = vmatpush1.bf16.msra.mxu1 %v10389_v61  ;;  %2764 = vmatpush1.bf16.msra.mxu0 %v10390_v45 }
 0x72a   :  { %2724 = vmatprep.subr.bf16.mxu1 %v10306_v6  ;;  %2765 = vmatprep.subr.bf16.mxu0 %v10468_v29 }
 0x72d   :  { %2725 = vmatpush1.bf16.msra.mxu1 %v10469_v43  ;;  %2766 = vmatpush1.bf16.msra.mxu0 %v10470_v16 }
 0x72e   :  { %2726 = vmatprep.subr.bf16.mxu1 %v10471_v37  ;;  %2767 = vmatprep.subr.bf16.mxu0 %v10472_v0  ;;  %v10555_v0 = vld [vmem:[#allocation105_spill] sm:$0xff]  ;;  %v10556_v37 = vld [vmem:[#allocation106_spill] sm:$0xff] }
 0x731   :  { %2727 = vmatpush1.bf16.msra.mxu1 %v10473_v34  ;;  %2768 = vmatpush1.bf16.msra.mxu0 %v10474_v46  ;;  %v10554_v46 = vld [vmem:[#allocation104_spill] sm:$0xff] }
 0x732   :  { %2728 = vmatprep.subr.bf16.mxu1 %v10475_v35  ;;  %2769 = vmatprep.subr.bf16.mxu0 %v10476_v2  ;;  %v10486_v35 = vld [vmem:[#allocation209_spill] sm:$0xff] }
 0x733   :  { %v10487_v2 = vld [vmem:[#allocation25_spill] sm:$0xff] }
 0x735   :  { %2729 = vmatpush1.bf16.msra.mxu1 %v10477_v9  ;;  %2770 = vmatpush1.bf16.msra.mxu0 %v10478_v44  ;;  %v10488_v9 = vld [vmem:[#allocation27_spill] sm:$0xff] }
 0x736   :  { %2730 = vmatprep.subr.bf16.mxu1 %v10479_v62  ;;  %2771 = vmatprep.subr.bf16.mxu0 %v10480_v55  ;;  %v10489_v55 = vld [vmem:[#allocation26_spill] sm:$0xff]  ;;  %v10498_v62 = vld [vmem:[#allocation36_spill] sm:$0xff]  ;;  %v10553_v44 = vld [vmem:[#allocation103_spill] sm:$0xff] }
 0x739   :  { %2731 = vmatpush1.bf16.msra.mxu1 %v10481_v50  ;;  %2772 = vmatpush1.bf16.msra.mxu0 %v10482_v52  ;;  %v10490_v50 = vld [vmem:[#allocation28_spill] sm:$0xff]  ;;  %v10491_v52 = vld [vmem:[#allocation29_spill] sm:$0xff] }
 0x73a   :  { %2732 = vmatprep.subr.bf16.mxu1 %v10483_v21  ;;  %2773 = vmatprep.subr.bf16.mxu0 %v10484_v4  ;;  %v10492_v21 = vld [vmem:[#allocation30_spill] sm:$0xff]  ;;  %v10493_v4 = vld [vmem:[#allocation31_spill] sm:$0xff] }
 0x73d   :  { %2733 = vmatpush1.bf16.msra.mxu1 %v10485_v58  ;;  %2774 = vmatpush1.bf16.msra.mxu0 %v10486_v35  ;;  %v10494_v58 = vld [vmem:[#allocation32_spill] sm:$0xff]  ;;  %v10495_v35 = vld [vmem:[#allocation33_spill] sm:$0xff] }
 0x73e   :  { %2844 = vmatprep.subr.bf16.mxu1 %v10487_v2  ;;  %2885 = vmatprep.subr.bf16.mxu0 %v10488_v9  ;;  %v10496_v2 = vld [vmem:[#allocation35_spill] sm:$0xff]  ;;  %v10497_v9 = vld [vmem:[#allocation34_spill] sm:$0xff] }
 0x740   :  { %2735 = vmatmul.mubr.bf16.vlgmr.msra.gmra.mrb[60].mxu1 %v8706_v41  ;;  %2776 = vmatmul.mubr.bf16.vlgmr.msra.gmra.mrb[76].mxu0 %v8706_v41  ;;  %v10499_v41 = vld [vmem:[#allocation37_spill] sm:$0xff] }
 0x741   :  { %2845 = vmatpush1.bf16.msra.mxu1 %v10489_v55  ;;  %2886 = vmatpush1.bf16.msra.mxu0 %v10490_v50  ;;  %v10500_v55 = vld [vmem:[#allocation38_spill] sm:$0xff]  ;;  %v10501_v50 = vld [vmem:[#allocation39_spill] sm:$0xff] }
 0x742   :  { %2846 = vmatprep.subr.bf16.mxu1 %v10491_v52  ;;  %2887 = vmatprep.subr.bf16.mxu0 %v10492_v21  ;;  %v10502_v52 = vld [vmem:[#allocation40_spill] sm:$0xff]  ;;  %v10503_v21 = vld [vmem:[#allocation41_spill] sm:$0xff] }
 0x745   :  { %2847 = vmatpush1.bf16.msra.mxu1 %v10493_v4  ;;  %2888 = vmatpush1.bf16.msra.mxu0 %v10494_v58  ;;  %v10504_v4 = vld [vmem:[#allocation42_spill] sm:$0xff]  ;;  %v10505_v58 = vld [vmem:[#allocation43_spill] sm:$0xff] }
 0x746   :  { %2848 = vmatprep.subr.bf16.mxu1 %v10495_v35  ;;  %2889 = vmatprep.subr.bf16.mxu0 %v10496_v2  ;;  %v10506_v35 = vld [vmem:[#allocation44_spill] sm:$0xff]  ;;  %v10507_v2 = vld [vmem:[#allocation45_spill] sm:$0xff] }
 0x749   :  { %2849 = vmatpush1.bf16.msra.mxu1 %v10497_v9  ;;  %2890 = vmatpush1.bf16.msra.mxu0 %v10498_v62  ;;  %v10508_v9 = vld [vmem:[#allocation46_spill] sm:$0xff]  ;;  %v10509_v62 = vld [vmem:[#allocation47_spill] sm:$0xff] }
 0x74a   :  { %2850 = vmatprep.subr.bf16.mxu1 %v10499_v41  ;;  %2891 = vmatprep.subr.bf16.mxu0 %v10500_v55  ;;  %v10510_v41 = vld [vmem:[#allocation48_spill] sm:$0xff]  ;;  %v10511_v55 = vld [vmem:[#allocation49_spill] sm:$0xff] }
 0x74d   :  { %2851 = vmatpush1.bf16.msra.mxu1 %v10501_v50  ;;  %2892 = vmatpush1.bf16.msra.mxu0 %v10502_v52  ;;  %v10512_v50 = vld [vmem:[#allocation50_spill] sm:$0xff]  ;;  %v10513_v52 = vld [vmem:[#allocation51_spill] sm:$0xff] }
 0x74e   :  { %2852 = vmatprep.subr.bf16.mxu1 %v10503_v21  ;;  %2893 = vmatprep.subr.bf16.mxu0 %v10504_v4  ;;  %v10514_v21 = vld [vmem:[#allocation52_spill] sm:$0xff]  ;;  %v10515_v4 = vld [vmem:[#allocation53_spill] sm:$0xff] }
 0x751   :  { %2853 = vmatpush1.bf16.msra.mxu1 %v10505_v58  ;;  %2894 = vmatpush1.bf16.msra.mxu0 %v10506_v35  ;;  %v10516_v58 = vld [vmem:[#allocation54_spill] sm:$0xff]  ;;  %v10517_v35 = vld [vmem:[#allocation55_spill] sm:$0xff] }
 0x752   :  { %2854 = vmatprep.subr.bf16.mxu1 %v10507_v2  ;;  %2895 = vmatprep.subr.bf16.mxu0 %v10508_v9  ;;  %v10518_v2 = vld [vmem:[#allocation56_spill] sm:$0xff]  ;;  %v10519_v9 = vld [vmem:[#allocation57_spill] sm:$0xff] }
 0x755   :  { %2855 = vmatpush1.bf16.msra.mxu1 %v10509_v62  ;;  %2896 = vmatpush1.bf16.msra.mxu0 %v10510_v41  ;;  %v10520_v62 = vld [vmem:[#allocation58_spill] sm:$0xff]  ;;  %v10521_v41 = vld [vmem:[#allocation59_spill] sm:$0xff] }
 0x756   :  { %2856 = vmatprep.subr.bf16.mxu1 %v10511_v55  ;;  %2897 = vmatprep.subr.bf16.mxu0 %v10512_v50  ;;  %v10522_v55 = vld [vmem:[#allocation60_spill] sm:$0xff]  ;;  %v10523_v50 = vld [vmem:[#allocation61_spill] sm:$0xff] }
 0x759   :  { %2857 = vmatpush1.bf16.msra.mxu1 %v10513_v52  ;;  %2898 = vmatpush1.bf16.msra.mxu0 %v10514_v21  ;;  %v10524_v52 = vld [vmem:[#allocation62_spill] sm:$0xff]  ;;  %v10525_v21 = vld [vmem:[#allocation63_spill] sm:$0xff] }
 0x75a   :  { %2858 = vmatprep.subr.bf16.mxu1 %v10515_v4  ;;  %2899 = vmatprep.subr.bf16.mxu0 %v10516_v58  ;;  %v10526_v4 = vld [vmem:[#allocation64_spill] sm:$0xff]  ;;  %v10527_v58 = vld [vmem:[#allocation65_spill] sm:$0xff] }
 0x75d   :  { %2859 = vmatpush1.bf16.msra.mxu1 %v10517_v35  ;;  %2900 = vmatpush1.bf16.msra.mxu0 %v10518_v2  ;;  %v10528_v35 = vld [vmem:[#allocation66_spill] sm:$0xff]  ;;  %v10529_v2 = vld [vmem:[#allocation67_spill] sm:$0xff] }
 0x75e   :  { %2860 = vmatprep.subr.bf16.mxu1 %v10519_v9  ;;  %2901 = vmatprep.subr.bf16.mxu0 %v10520_v62  ;;  %v10530_v9 = vld [vmem:[#allocation68_spill] sm:$0xff]  ;;  %v10531_v62 = vld [vmem:[#allocation69_spill] sm:$0xff] }
 0x761   :  { %2861 = vmatpush1.bf16.msra.mxu1 %v10521_v41  ;;  %2902 = vmatpush1.bf16.msra.mxu0 %v10522_v55  ;;  %v10532_v41 = vld [vmem:[#allocation70_spill] sm:$0xff]  ;;  %v10533_v55 = vld [vmem:[#allocation71_spill] sm:$0xff] }
 0x762   :  { %2862 = vmatprep.subr.bf16.mxu1 %v10523_v50  ;;  %2903 = vmatprep.subr.bf16.mxu0 %v10524_v52  ;;  %v10534_v50 = vld [vmem:[#allocation72_spill] sm:$0xff]  ;;  %v10535_v52 = vld [vmem:[#allocation73_spill] sm:$0xff] }
 0x765   :  { %2863 = vmatpush1.bf16.msra.mxu1 %v10525_v21  ;;  %2904 = vmatpush1.bf16.msra.mxu0 %v10526_v4  ;;  %v10536_v21 = vld [vmem:[#allocation74_spill] sm:$0xff]  ;;  %v10537_v4 = vld [vmem:[#allocation75_spill] sm:$0xff] }
 0x766   :  { %2864 = vmatprep.subr.bf16.mxu1 %v10527_v58  ;;  %2905 = vmatprep.subr.bf16.mxu0 %v10528_v35  ;;  %v10538_v58 = vld [vmem:[#allocation76_spill] sm:$0xff]  ;;  %v10539_v35 = vld [vmem:[#allocation77_spill] sm:$0xff] }
 0x769   :  { %2865 = vmatpush1.bf16.msra.mxu1 %v10529_v2  ;;  %2906 = vmatpush1.bf16.msra.mxu0 %v10530_v9  ;;  %v10540_v2 = vld [vmem:[#allocation78_spill] sm:$0xff]  ;;  %v10541_v9 = vld [vmem:[#allocation79_spill] sm:$0xff] }
 0x76a   :  { %2866 = vmatprep.subr.bf16.mxu1 %v10531_v62  ;;  %2907 = vmatprep.subr.bf16.mxu0 %v10532_v41  ;;  %v10542_v62 = vld [vmem:[#allocation80_spill] sm:$0xff]  ;;  %v10543_v41 = vld [vmem:[#allocation81_spill] sm:$0xff] }
 0x76d   :  { %2867 = vmatpush1.bf16.msra.mxu1 %v10533_v55  ;;  %2908 = vmatpush1.bf16.msra.mxu0 %v10534_v50  ;;  %v10544_v55 = vld [vmem:[#allocation82_spill] sm:$0xff]  ;;  %v10545_v50 = vld [vmem:[#allocation83_spill] sm:$0xff] }
 0x76e   :  { %2868 = vmatprep.subr.bf16.mxu1 %v10535_v52  ;;  %2909 = vmatprep.subr.bf16.mxu0 %v10536_v21  ;;  %v10546_v52 = vld [vmem:[#allocation84_spill] sm:$0xff]  ;;  %v10547_v21 = vld [vmem:[#allocation85_spill] sm:$0xff] }
 0x771   :  { %2869 = vmatpush1.bf16.msra.mxu1 %v10537_v4  ;;  %2910 = vmatpush1.bf16.msra.mxu0 %v10538_v58  ;;  %v10548_v4 = vld [vmem:[#allocation86_spill] sm:$0xff]  ;;  %v10549_v58 = vld [vmem:[#allocation87_spill] sm:$0xff] }
 0x772   :  { %2870 = vmatprep.subr.bf16.mxu1 %v10539_v35  ;;  %2911 = vmatprep.subr.bf16.mxu0 %v10540_v2  ;;  %v10550_v35 = vld [vmem:[#allocation88_spill] sm:$0xff]  ;;  %v10551_v2 = vld [vmem:[#allocation89_spill] sm:$0xff] }
 0x775   :  { %2871 = vmatpush1.bf16.msra.mxu1 %v10541_v9  ;;  %2912 = vmatpush1.bf16.msra.mxu0 %v10542_v62  ;;  %v10552_v9 = vld [vmem:[#allocation90_spill] sm:$0xff] }
 0x776   :  { %2872 = vmatprep.subr.bf16.mxu1 %v10543_v41  ;;  %2913 = vmatprep.subr.bf16.mxu0 %v10544_v55 }
 0x779   :  { %2873 = vmatpush1.bf16.msra.mxu1 %v10545_v50  ;;  %2914 = vmatpush1.bf16.msra.mxu0 %v10546_v52 }
 0x77a   :  { %2874 = vmatprep.subr.bf16.mxu1 %v10547_v21  ;;  %2915 = vmatprep.subr.bf16.mxu0 %v10548_v4 }
 0x77d   :  { %2875 = vmatpush1.bf16.msra.mxu1 %v10549_v58  ;;  %2916 = vmatpush1.bf16.msra.mxu0 %v10550_v35 }
 0x77e   :  { %2926 = vmatprep.subr.bf16.mxu1 %v10551_v2  ;;  %2967 = vmatprep.subr.bf16.mxu0 %v10552_v9 }
 0x7d3   :  { %v2654_v62 = vpop.f32.mrb[56].mxu1  ;;  %v2695_v41 = vpop.f32.mrb[72].mxu0 }
 0x7d4   :  { %v2784_v55 = vadd.f32 %v2654_v62, %v10553_v44  ;;  %v2786_v50 = vadd.f32 %v2695_v41, %v10554_v46  ;;  %v2656_v34 = vpop.f32.mrb[57].mxu1  ;;  %v2697_v52 = vpop.f32.mrb[73].mxu0  ;;  %v10560_v41 = vld [vmem:[#allocation134_spill] sm:$0xff] }
 0x7d5   :  { %v2785_v21 = vadd.f32 %v2656_v34, %v10555_v0  ;;  %v2787_v4 = vadd.f32 %v2697_v52, %v10556_v37  ;;  %v2658_v16 = vpop.f32.mrb[58].mxu1  ;;  %v2699_v58 = vpop.f32.mrb[74].mxu0 }
 0x7d6   :  { %v2792_v43 = vsub.f32 0.0, %v2784_v55  ;;  %v2659_v35 = vpop.f32.mrb[59].mxu1  ;;  %v2700_v29 = vpop.f32.mrb[75].mxu0 }
 0x7d7   :  { %v2798_v2 = vsub.f32 0.0, %v2785_v21 }
 0x7d8   :  { %v2793_v6 = vmul.f32 1.442695, %v2792_v43 }
 0x7d9   :  { %v2799_v9 = vmul.f32 1.442695, %v2798_v2  ;;  %v10557_v2 = vld [vmem:[#allocation131_spill] sm:$0xff] }
 0x7da   :  { %6844 = vpow2.f32 %v2793_v6 }
 0x7db   :  { %6846 = vpow2.f32 %v2799_v9  ;;  %v10558_v9 = vld [vmem:[#allocation132_spill] sm:$0xff] }
 0x7dc   :  { %6848 = vtanh.f32 %v2786_v50  ;;  %v10559_v50 = vld [vmem:[#allocation133_spill] sm:$0xff] }
 0x7e4   :  { %v6845_v45 = vpop.eup %6844 }
 0x7e5   :  { %v6847_v44 = vpop.eup %6846  ;;  %v2795_v62 = vadd.f32 1.0, %v6845_v45 }
 0x7e6   :  { %v2801_v46 = vadd.f32 1.0, %v6847_v44  ;;  %v6849_v0 = vpop.eup %6848 }
 0x7e7   :  { %6850 = vrcp.f32 %v2795_v62 }
 0x7e8   :  { %6852 = vrcp.f32 %v2801_v46 }
 0x7f1   :  { %v6851_v34 = vpop.eup %6850 }
 0x7f2   :  { %v6853_v37 = vpop.eup %6852  ;;  %v2812_v16 = vmul.f32 %v6851_v34, %v6849_v0 }
 0x7f3   :  { %v2811_v58 = vmul.f32 %v6853_v37, %v8687_v18 }
 0x7f5   :  { %v8845_v35 = vadd.f32 %v2812_v16, %v2811_v58  ;;  %v2805_v58 = vsub.f32 0.0, %v2787_v4 }
 0x813   :  { %v2736_v29 = vpop.f32.mrb[60].mxu1  ;;  %v2777_v43 = vpop.f32.mrb[76].mxu0 }
 0x814   :  { %v2788_v6 = vadd.f32 %v2736_v29, %v10557_v2  ;;  %v2790_v55 = vadd.f32 %v2777_v43, %v10558_v9  ;;  %v2738_v52 = vpop.f32.mrb[61].mxu1  ;;  %v2779_v45 = vpop.f32.mrb[77].mxu0  ;;  %v2806_v2 = vmul.f32 1.442695, %v2805_v58 }
 0x815   :  { %v2789_v21 = vadd.f32 %v2738_v52, %v10559_v50  ;;  %v2791_v44 = vadd.f32 %v2779_v45, %v10560_v41  ;;  %v2740_v62 = vpop.f32.mrb[62].mxu1  ;;  %v2781_v46 = vpop.f32.mrb[78].mxu0 }
 0x816   :  { %v2816_v61 = vsub.f32 0.0, %v2788_v6  ;;  %v2741_v0 = vpop.f32.mrb[63].mxu1  ;;  %v2782_v34 = vpop.f32.mrb[79].mxu0 }
 0x817   :  { %v2822_v18 = vsub.f32 0.0, %v2789_v21  ;;  %v2829_v29 = vsub.f32 0.0, %v2791_v44 }
 0x818   :  { %v2817_v37 = vmul.f32 1.442695, %v2816_v61 }
 0x819   :  { %v2823_v16 = vmul.f32 1.442695, %v2822_v18  ;;  %v2830_v43 = vmul.f32 1.442695, %v2829_v29  ;;  %v10563_v29 = vld [vmem:[#allocation187_spill] sm:$0xff] }
 0x81a   :  { %6854 = vpow2.f32 %v2817_v37 }
 0x81b   :  { %6856 = vpow2.f32 %v2823_v16 }
 0x81c   :  { %6858 = vpow2.f32 %v2806_v2  ;;  %v10564_v2 = vld [vmem:[#allocation188_spill] sm:$0xff] }
 0x81d   :  { %6860 = vpow2.f32 %v2830_v43  ;;  %v10565_v43 = vld [vmem:[#allocation189_spill] sm:$0xff] }
 0x81e   :  { %6862 = vtanh.f32 %v2790_v55 }
 0x824   :  { %v6855_v9 = vpop.eup %6854 }
 0x825   :  { %v6857_v14 = vpop.eup %6856  ;;  %v2819_v52 = vadd.f32 1.0, %v6855_v9  ;;  %v10566_v9 = vld [vmem:[#allocation190_spill] sm:$0xff] }
 0x826   :  { %v2825_v45 = vadd.f32 1.0, %v6857_v14  ;;  %v6859_v6 = vpop.eup %6858 }
 0x827   :  { %6864 = vrcp.f32 %v2819_v52  ;;  %v6861_v50 = vpop.eup %6860  ;;  %v2808_v41 = vadd.f32 1.0, %v6859_v6  ;;  %v10567_v52 = vld [vmem:[#allocation191_spill] sm:$0xff]  ;;  %v10569_v6 = vld [vmem:[#allocation193_spill] sm:$0xff] }
 0x828   :  { %6866 = vrcp.f32 %v2825_v45  ;;  %v6863_v21 = vpop.eup %6862  ;;  %v2832_v4 = vadd.f32 1.0, %v6861_v50  ;;  %v10568_v45 = vld [vmem:[#allocation192_spill] sm:$0xff]  ;;  %v10570_v50 = vld [vmem:[#allocation194_spill] sm:$0xff] }
 0x829   :  { %6868 = vtanh.f32 %v8845_v35 }
 0x82a   :  { %6870 = vrcp.f32 %v2808_v41  ;;  %v10573_v41 = vld [vmem:[#allocation197_spill] sm:$0xff] }
 0x82b   :  { %6872 = vrcp.f32 %v2832_v4  ;;  %v10576_v4 = vld [vmem:[#allocation200_spill] sm:$0xff] }
 0x831   :  { %v6865_v61 = vpop.eup %6864 }
 0x832   :  { %v6867_v62 = vpop.eup %6866  ;;  %v2836_v46 = vmul.f32 %v6865_v61, %v6863_v21  ;;  %v10571_v21 = vld [vmem:[#allocation195_spill] sm:$0xff]  ;;  %v10572_v61 = vld [vmem:[#allocation196_spill] sm:$0xff] }
 0x833   :  { %v2835_v44 = vmul.f32 %v6867_v62, %v8695_v1  ;;  %v6869_v14 = vpop.eup %6868  ;;  %v10574_v62 = vld [vmem:[#allocation198_spill] sm:$0xff] }
 0x834   :  { %v6871_v55 = vpop.eup %6870 }
 0x835   :  { %v8853_v0 = vadd.f32 %v2836_v46, %v2835_v44  ;;  %v6873_v34 = vpop.eup %6872  ;;  %v8856_v37 = vmul.f32 %v6871_v55, %v6869_v14  ;;  %v10575_v46 = vld [vmem:[#allocation199_spill] sm:$0xff]  ;;  %v10577_v44 = vld [vmem:[#allocation201_spill] sm:$0xff]  ;;  %v10578_v14 = vld [vmem:[#allocation202_spill] sm:$0xff] }
 0x836   :  { %v10579_v55 = vld [vmem:[#allocation203_spill] sm:$0xff] }
 0x837   :  { %6874 = vtanh.f32 %v8853_v0  ;;  %10561 = vst [vmem:[#allocation145_spill] sm:$0xff] %v8856_v37  ;;  %v8864_v1 = vpack.c.bf16 %v8856_v37, %v8856_v37  ;;  %v10583_v37 = vld [vmem:[#allocation207_spill] sm:$0xff] }
 0x841   :  { %v6875_v18 = vpop.eup %6874 }
 0x842   :  { %v8858_v16 = vmul.f32 %v6875_v18, %v6873_v34  ;;  %v10580_v34 = vld [vmem:[#allocation204_spill] sm:$0xff]  ;;  %v10581_v18 = vld [vmem:[#allocation205_spill] sm:$0xff] }
 0x844   :  { %10562 = vst [vmem:[#allocation146_spill] sm:$0xff] %v8858_v16  ;;  %v2843_v58 = vpack.c.bf16 %v8858_v16, %v8858_v16  ;;  %v10584_v16 = vld [vmem:[#allocation208_spill] sm:$0xff] }
 0x846   :  { %2876 = vmatprep.mubr.bf16.mxu1 %v2843_v58  ;;  %2917 = vmatprep.mubr.bf16.mxu0 %v2843_v58 }
 0x847   :  { %2877 = vmatmul.mubr.bf16.vlgmr.msra.gmra.mrb[64].mxu1 %v8864_v1  ;;  %2918 = vmatmul.mubr.bf16.vlgmr.msra.gmra.mrb[80].mxu0 %v8864_v1 }
 0x848   :  { %2927 = vmatpush1.bf16.msra.mxu1 %v7866_v10  ;;  %2968 = vmatpush1.bf16.msra.mxu0 %v7868_v60 }
 0x849   :  { %2958 = vmatprep.mubr.bf16.mxu1 %v2843_v58  ;;  %2999 = vmatprep.mubr.bf16.mxu0 %v2843_v58  ;;  %v10582_v58 = vld [vmem:[#allocation206_spill] sm:$0xff] }
 0x84a   :  { %2928 = vmatprep.subr.bf16.mxu1 %v10266_v28  ;;  %2969 = vmatprep.subr.bf16.mxu0 %v10267_v8 }
 0x84c   :  { %2929 = vmatpush1.bf16.msra.mxu1 %v10268_v33  ;;  %2970 = vmatpush1.bf16.msra.mxu0 %v10269_v23 }
 0x84d   :  { %2930 = vmatprep.subr.bf16.mxu1 %v10270_v13  ;;  %2971 = vmatprep.subr.bf16.mxu0 %v10271_v15 }
 0x850   :  { %2931 = vmatpush1.bf16.msra.mxu1 %v10272_v24  ;;  %2972 = vmatpush1.bf16.msra.mxu0 %v10273_v12 }
 0x851   :  { %2932 = vmatprep.subr.bf16.mxu1 %v10274_v3  ;;  %2973 = vmatprep.subr.bf16.mxu0 %v10275_v51 }
 0x854   :  { %2933 = vmatpush1.bf16.msra.mxu1 %v10276_v20  ;;  %2974 = vmatpush1.bf16.msra.mxu0 %v10365_v32 }
 0x855   :  { %2934 = vmatprep.subr.bf16.mxu1 %v10366_v54  ;;  %2975 = vmatprep.subr.bf16.mxu0 %v10367_v36 }
 0x858   :  { %2935 = vmatpush1.bf16.msra.mxu1 %v10368_v56  ;;  %2976 = vmatpush1.bf16.msra.mxu0 %v10369_v63 }
 0x859   :  { %2936 = vmatprep.subr.bf16.mxu1 %v10370_v30  ;;  %2977 = vmatprep.subr.bf16.mxu0 %v10371_v31 }
 0x85c   :  { %2937 = vmatpush1.bf16.msra.mxu1 %v10372_v7  ;;  %2978 = vmatpush1.bf16.msra.mxu0 %v10373_v11 }
 0x85d   :  { %2938 = vmatprep.subr.bf16.mxu1 %v10374_v27  ;;  %2979 = vmatprep.subr.bf16.mxu0 %v10375_v42 }
 0x860   :  { %2939 = vmatpush1.bf16.msra.mxu1 %v10464_v38  ;;  %2980 = vmatpush1.bf16.msra.mxu0 %v10465_v19 }
 0x861   :  { %2940 = vmatprep.subr.bf16.mxu1 %v10378_v57  ;;  %2981 = vmatprep.subr.bf16.mxu0 %v10379_v48 }
 0x864   :  { %2941 = vmatpush1.bf16.msra.mxu1 %v10380_v22  ;;  %2982 = vmatpush1.bf16.msra.mxu0 %v10466_v26 }
 0x865   :  { %2942 = vmatprep.subr.bf16.mxu1 %v10467_v17  ;;  %2983 = vmatprep.subr.bf16.mxu0 %v10383_v53 }
 0x868   :  { %2943 = vmatpush1.bf16.msra.mxu1 %v10384_v49  ;;  %2984 = vmatpush1.bf16.msra.mxu0 %v10385_v40 }
 0x869   :  { %2944 = vmatprep.subr.bf16.mxu1 %v10386_v39  ;;  %2985 = vmatprep.subr.bf16.mxu0 %v10387_v5 }
 0x86c   :  { %2945 = vmatpush1.bf16.msra.mxu1 %v10388_v47  ;;  %2986 = vmatpush1.bf16.msra.mxu0 %v10301_v25 }
 0x86d   :  { %2946 = vmatprep.subr.bf16.mxu1 %v10302_v59  ;;  %2987 = vmatprep.subr.bf16.mxu0 %v10563_v29 }
 0x870   :  { %2947 = vmatpush1.bf16.msra.mxu1 %v10564_v2  ;;  %2988 = vmatpush1.bf16.msra.mxu0 %v10565_v43 }
 0x871   :  { %2948 = vmatprep.subr.bf16.mxu1 %v10566_v9  ;;  %2989 = vmatprep.subr.bf16.mxu0 %v10567_v52 }
 0x874   :  { %2949 = vmatpush1.bf16.msra.mxu1 %v10568_v45  ;;  %2990 = vmatpush1.bf16.msra.mxu0 %v10569_v6 }
 0x875   :  { %2950 = vmatprep.subr.bf16.mxu1 %v10570_v50  ;;  %2991 = vmatprep.subr.bf16.mxu0 %v10571_v21  ;;  %v10654_v21 = vld [vmem:[#allocation109_spill] sm:$0xff]  ;;  %v10655_v50 = vld [vmem:[#allocation110_spill] sm:$0xff] }
 0x878   :  { %2951 = vmatpush1.bf16.msra.mxu1 %v10572_v61  ;;  %2992 = vmatpush1.bf16.msra.mxu0 %v10573_v41  ;;  %v10653_v41 = vld [vmem:[#allocation108_spill] sm:$0xff] }
 0x879   :  { %2952 = vmatprep.subr.bf16.mxu1 %v10574_v62  ;;  %2993 = vmatprep.subr.bf16.mxu0 %v10575_v46  ;;  %v10585_v62 = vld [vmem:[#allocation209_spill] sm:$0xff] }
 0x87a   :  { %v10586_v46 = vld [vmem:[#allocation25_spill] sm:$0xff] }
 0x87c   :  { %2953 = vmatpush1.bf16.msra.mxu1 %v10576_v4  ;;  %2994 = vmatpush1.bf16.msra.mxu0 %v10577_v44  ;;  %v10587_v4 = vld [vmem:[#allocation27_spill] sm:$0xff] }
 0x87d   :  { %2954 = vmatprep.subr.bf16.mxu1 %v10578_v14  ;;  %2995 = vmatprep.subr.bf16.mxu0 %v10579_v55  ;;  %v10588_v55 = vld [vmem:[#allocation26_spill] sm:$0xff]  ;;  %v10597_v14 = vld [vmem:[#allocation36_spill] sm:$0xff]  ;;  %v10652_v44 = vld [vmem:[#allocation107_spill] sm:$0xff] }
 0x880   :  { %2955 = vmatpush1.bf16.msra.mxu1 %v10580_v34  ;;  %2996 = vmatpush1.bf16.msra.mxu0 %v10581_v18  ;;  %v10589_v34 = vld [vmem:[#allocation28_spill] sm:$0xff]  ;;  %v10590_v18 = vld [vmem:[#allocation29_spill] sm:$0xff] }
 0x881   :  { %2956 = vmatprep.subr.bf16.mxu1 %v10582_v58  ;;  %2997 = vmatprep.subr.bf16.mxu0 %v10583_v37  ;;  %v10591_v58 = vld [vmem:[#allocation30_spill] sm:$0xff]  ;;  %v10592_v37 = vld [vmem:[#allocation31_spill] sm:$0xff] }
 0x884   :  { %2957 = vmatpush1.bf16.msra.mxu1 %v10584_v16  ;;  %2998 = vmatpush1.bf16.msra.mxu0 %v10585_v62  ;;  %v10593_v16 = vld [vmem:[#allocation32_spill] sm:$0xff]  ;;  %v10594_v62 = vld [vmem:[#allocation33_spill] sm:$0xff] }
 0x885   :  { %3068 = vmatprep.subr.bf16.mxu1 %v10586_v46  ;;  %3109 = vmatprep.subr.bf16.mxu0 %v10587_v4  ;;  %v10595_v46 = vld [vmem:[#allocation35_spill] sm:$0xff]  ;;  %v10596_v4 = vld [vmem:[#allocation34_spill] sm:$0xff] }
 0x887   :  { %2959 = vmatmul.mubr.bf16.vlgmr.msra.gmra.mrb[68].mxu1 %v8864_v1  ;;  %3000 = vmatmul.mubr.bf16.vlgmr.msra.gmra.mrb[84].mxu0 %v8864_v1  ;;  %v10598_v1 = vld [vmem:[#allocation37_spill] sm:$0xff] }
 0x888   :  { %3069 = vmatpush1.bf16.msra.mxu1 %v10588_v55  ;;  %3110 = vmatpush1.bf16.msra.mxu0 %v10589_v34  ;;  %v10599_v55 = vld [vmem:[#allocation38_spill] sm:$0xff]  ;;  %v10600_v34 = vld [vmem:[#allocation39_spill] sm:$0xff] }
 0x889   :  { %3070 = vmatprep.subr.bf16.mxu1 %v10590_v18  ;;  %3111 = vmatprep.subr.bf16.mxu0 %v10591_v58  ;;  %v10601_v18 = vld [vmem:[#allocation40_spill] sm:$0xff]  ;;  %v10602_v58 = vld [vmem:[#allocation41_spill] sm:$0xff] }
 0x88c   :  { %3071 = vmatpush1.bf16.msra.mxu1 %v10592_v37  ;;  %3112 = vmatpush1.bf16.msra.mxu0 %v10593_v16  ;;  %v10603_v37 = vld [vmem:[#allocation42_spill] sm:$0xff]  ;;  %v10604_v16 = vld [vmem:[#allocation43_spill] sm:$0xff] }
 0x88d   :  { %3072 = vmatprep.subr.bf16.mxu1 %v10594_v62  ;;  %3113 = vmatprep.subr.bf16.mxu0 %v10595_v46  ;;  %v10605_v62 = vld [vmem:[#allocation44_spill] sm:$0xff]  ;;  %v10606_v46 = vld [vmem:[#allocation45_spill] sm:$0xff] }
 0x890   :  { %3073 = vmatpush1.bf16.msra.mxu1 %v10596_v4  ;;  %3114 = vmatpush1.bf16.msra.mxu0 %v10597_v14  ;;  %v10607_v4 = vld [vmem:[#allocation46_spill] sm:$0xff]  ;;  %v10608_v14 = vld [vmem:[#allocation47_spill] sm:$0xff] }
 0x891   :  { %3074 = vmatprep.subr.bf16.mxu1 %v10598_v1  ;;  %3115 = vmatprep.subr.bf16.mxu0 %v10599_v55  ;;  %v10609_v1 = vld [vmem:[#allocation48_spill] sm:$0xff]  ;;  %v10610_v55 = vld [vmem:[#allocation49_spill] sm:$0xff] }
 0x894   :  { %3075 = vmatpush1.bf16.msra.mxu1 %v10600_v34  ;;  %3116 = vmatpush1.bf16.msra.mxu0 %v10601_v18  ;;  %v10611_v34 = vld [vmem:[#allocation50_spill] sm:$0xff]  ;;  %v10612_v18 = vld [vmem:[#allocation51_spill] sm:$0xff] }
 0x895   :  { %3076 = vmatprep.subr.bf16.mxu1 %v10602_v58  ;;  %3117 = vmatprep.subr.bf16.mxu0 %v10603_v37  ;;  %v10613_v58 = vld [vmem:[#allocation52_spill] sm:$0xff]  ;;  %v10614_v37 = vld [vmem:[#allocation53_spill] sm:$0xff] }
 0x898   :  { %3077 = vmatpush1.bf16.msra.mxu1 %v10604_v16  ;;  %3118 = vmatpush1.bf16.msra.mxu0 %v10605_v62  ;;  %v10615_v16 = vld [vmem:[#allocation54_spill] sm:$0xff]  ;;  %v10616_v62 = vld [vmem:[#allocation55_spill] sm:$0xff] }
 0x899   :  { %3078 = vmatprep.subr.bf16.mxu1 %v10606_v46  ;;  %3119 = vmatprep.subr.bf16.mxu0 %v10607_v4  ;;  %v10617_v46 = vld [vmem:[#allocation56_spill] sm:$0xff]  ;;  %v10618_v4 = vld [vmem:[#allocation57_spill] sm:$0xff] }
 0x89c   :  { %3079 = vmatpush1.bf16.msra.mxu1 %v10608_v14  ;;  %3120 = vmatpush1.bf16.msra.mxu0 %v10609_v1  ;;  %v10619_v14 = vld [vmem:[#allocation58_spill] sm:$0xff]  ;;  %v10620_v1 = vld [vmem:[#allocation59_spill] sm:$0xff] }
 0x89d   :  { %3080 = vmatprep.subr.bf16.mxu1 %v10610_v55  ;;  %3121 = vmatprep.subr.bf16.mxu0 %v10611_v34  ;;  %v10621_v55 = vld [vmem:[#allocation60_spill] sm:$0xff]  ;;  %v10622_v34 = vld [vmem:[#allocation61_spill] sm:$0xff] }
 0x8a0   :  { %3081 = vmatpush1.bf16.msra.mxu1 %v10612_v18  ;;  %3122 = vmatpush1.bf16.msra.mxu0 %v10613_v58  ;;  %v10623_v18 = vld [vmem:[#allocation62_spill] sm:$0xff]  ;;  %v10624_v58 = vld [vmem:[#allocation63_spill] sm:$0xff] }
 0x8a1   :  { %3082 = vmatprep.subr.bf16.mxu1 %v10614_v37  ;;  %3123 = vmatprep.subr.bf16.mxu0 %v10615_v16  ;;  %v10625_v37 = vld [vmem:[#allocation64_spill] sm:$0xff]  ;;  %v10626_v16 = vld [vmem:[#allocation65_spill] sm:$0xff] }
 0x8a4   :  { %3083 = vmatpush1.bf16.msra.mxu1 %v10616_v62  ;;  %3124 = vmatpush1.bf16.msra.mxu0 %v10617_v46  ;;  %v10627_v62 = vld [vmem:[#allocation66_spill] sm:$0xff]  ;;  %v10628_v46 = vld [vmem:[#allocation67_spill] sm:$0xff] }
 0x8a5   :  { %3084 = vmatprep.subr.bf16.mxu1 %v10618_v4  ;;  %3125 = vmatprep.subr.bf16.mxu0 %v10619_v14  ;;  %v10629_v4 = vld [vmem:[#allocation68_spill] sm:$0xff]  ;;  %v10630_v14 = vld [vmem:[#allocation69_spill] sm:$0xff] }
 0x8a8   :  { %3085 = vmatpush1.bf16.msra.mxu1 %v10620_v1  ;;  %3126 = vmatpush1.bf16.msra.mxu0 %v10621_v55  ;;  %v10631_v1 = vld [vmem:[#allocation70_spill] sm:$0xff]  ;;  %v10632_v55 = vld [vmem:[#allocation71_spill] sm:$0xff] }
 0x8a9   :  { %3086 = vmatprep.subr.bf16.mxu1 %v10622_v34  ;;  %3127 = vmatprep.subr.bf16.mxu0 %v10623_v18  ;;  %v10633_v34 = vld [vmem:[#allocation72_spill] sm:$0xff]  ;;  %v10634_v18 = vld [vmem:[#allocation73_spill] sm:$0xff] }
 0x8ac   :  { %3087 = vmatpush1.bf16.msra.mxu1 %v10624_v58  ;;  %3128 = vmatpush1.bf16.msra.mxu0 %v10625_v37  ;;  %v10635_v58 = vld [vmem:[#allocation74_spill] sm:$0xff]  ;;  %v10636_v37 = vld [vmem:[#allocation75_spill] sm:$0xff] }
 0x8ad   :  { %3088 = vmatprep.subr.bf16.mxu1 %v10626_v16  ;;  %3129 = vmatprep.subr.bf16.mxu0 %v10627_v62  ;;  %v10637_v16 = vld [vmem:[#allocation76_spill] sm:$0xff]  ;;  %v10638_v62 = vld [vmem:[#allocation77_spill] sm:$0xff] }
 0x8b0   :  { %3089 = vmatpush1.bf16.msra.mxu1 %v10628_v46  ;;  %3130 = vmatpush1.bf16.msra.mxu0 %v10629_v4  ;;  %v10639_v46 = vld [vmem:[#allocation78_spill] sm:$0xff]  ;;  %v10640_v4 = vld [vmem:[#allocation79_spill] sm:$0xff] }
 0x8b1   :  { %3090 = vmatprep.subr.bf16.mxu1 %v10630_v14  ;;  %3131 = vmatprep.subr.bf16.mxu0 %v10631_v1  ;;  %v10641_v14 = vld [vmem:[#allocation80_spill] sm:$0xff]  ;;  %v10642_v1 = vld [vmem:[#allocation81_spill] sm:$0xff] }
 0x8b4   :  { %3091 = vmatpush1.bf16.msra.mxu1 %v10632_v55  ;;  %3132 = vmatpush1.bf16.msra.mxu0 %v10633_v34  ;;  %v10643_v55 = vld [vmem:[#allocation82_spill] sm:$0xff]  ;;  %v10644_v34 = vld [vmem:[#allocation83_spill] sm:$0xff] }
 0x8b5   :  { %3092 = vmatprep.subr.bf16.mxu1 %v10634_v18  ;;  %3133 = vmatprep.subr.bf16.mxu0 %v10635_v58  ;;  %v10645_v18 = vld [vmem:[#allocation84_spill] sm:$0xff]  ;;  %v10646_v58 = vld [vmem:[#allocation85_spill] sm:$0xff] }
 0x8b8   :  { %3093 = vmatpush1.bf16.msra.mxu1 %v10636_v37  ;;  %3134 = vmatpush1.bf16.msra.mxu0 %v10637_v16  ;;  %v10647_v37 = vld [vmem:[#allocation86_spill] sm:$0xff]  ;;  %v10648_v16 = vld [vmem:[#allocation87_spill] sm:$0xff] }
 0x8b9   :  { %3094 = vmatprep.subr.bf16.mxu1 %v10638_v62  ;;  %3135 = vmatprep.subr.bf16.mxu0 %v10639_v46  ;;  %v10649_v62 = vld [vmem:[#allocation88_spill] sm:$0xff]  ;;  %v10650_v46 = vld [vmem:[#allocation89_spill] sm:$0xff] }
 0x8bc   :  { %3095 = vmatpush1.bf16.msra.mxu1 %v10640_v4  ;;  %3136 = vmatpush1.bf16.msra.mxu0 %v10641_v14  ;;  %v10651_v4 = vld [vmem:[#allocation90_spill] sm:$0xff] }
 0x8bd   :  { %3096 = vmatprep.subr.bf16.mxu1 %v10642_v1  ;;  %3137 = vmatprep.subr.bf16.mxu0 %v10643_v55 }
 0x8c0   :  { %3097 = vmatpush1.bf16.msra.mxu1 %v10644_v34  ;;  %3138 = vmatpush1.bf16.msra.mxu0 %v10645_v18 }
 0x8c1   :  { %3098 = vmatprep.subr.bf16.mxu1 %v10646_v58  ;;  %3139 = vmatprep.subr.bf16.mxu0 %v10647_v37 }
 0x8c4   :  { %3099 = vmatpush1.bf16.msra.mxu1 %v10648_v16  ;;  %3140 = vmatpush1.bf16.msra.mxu0 %v10649_v62 }
 0x8c5   :  { %3150 = vmatprep.subr.bf16.mxu1 %v10650_v46  ;;  %3191 = vmatprep.subr.bf16.mxu0 %v10651_v4 }
 0x91a   :  { %v2878_v14 = vpop.f32.mrb[64].mxu1  ;;  %v2919_v1 = vpop.f32.mrb[80].mxu0 }
 0x91b   :  { %v3008_v55 = vadd.f32 %v2878_v14, %v10652_v44  ;;  %v3010_v34 = vadd.f32 %v2919_v1, %v10653_v41  ;;  %v2880_v61 = vpop.f32.mrb[65].mxu1  ;;  %v2921_v18 = vpop.f32.mrb[81].mxu0  ;;  %v10659_v1 = vld [vmem:[#allocation130_spill] sm:$0xff] }
 0x91c   :  { %v3009_v58 = vadd.f32 %v2880_v61, %v10654_v21  ;;  %v3011_v37 = vadd.f32 %v2921_v18, %v10655_v50  ;;  %v2882_v6 = vpop.f32.mrb[66].mxu1  ;;  %v2923_v16 = vpop.f32.mrb[82].mxu0 }
 0x91d   :  { %v3016_v45 = vsub.f32 0.0, %v3008_v55  ;;  %v2883_v62 = vpop.f32.mrb[67].mxu1  ;;  %v2924_v52 = vpop.f32.mrb[83].mxu0 }
 0x91e   :  { %v3022_v46 = vsub.f32 0.0, %v3009_v58 }
 0x91f   :  { %v3017_v9 = vmul.f32 1.442695, %v3016_v45 }
 0x920   :  { %v3023_v4 = vmul.f32 1.442695, %v3022_v46  ;;  %v10656_v46 = vld [vmem:[#allocation127_spill] sm:$0xff] }
 0x921   :  { %6876 = vpow2.f32 %v3017_v9 }
 0x922   :  { %6878 = vpow2.f32 %v3023_v4  ;;  %v10657_v4 = vld [vmem:[#allocation128_spill] sm:$0xff] }
 0x923   :  { %6880 = vtanh.f32 %v3010_v34  ;;  %v10658_v34 = vld [vmem:[#allocation129_spill] sm:$0xff] }
 0x92b   :  { %v6877_v43 = vpop.eup %6876 }
 0x92c   :  { %v6879_v44 = vpop.eup %6878  ;;  %v3019_v14 = vadd.f32 1.0, %v6877_v43 }
 0x92d   :  { %v3025_v41 = vadd.f32 1.0, %v6879_v44  ;;  %v6881_v21 = vpop.eup %6880 }
 0x92e   :  { %6882 = vrcp.f32 %v3019_v14 }
 0x92f   :  { %6884 = vrcp.f32 %v3025_v41 }
 0x938   :  { %v6883_v61 = vpop.eup %6882 }
 0x939   :  { %v6885_v50 = vpop.eup %6884  ;;  %v3036_v6 = vmul.f32 %v6883_v61, %v6881_v21 }
 0x93a   :  { %v3035_v16 = vmul.f32 %v6885_v50, %v8845_v35 }
 0x93c   :  { %v9003_v62 = vadd.f32 %v3036_v6, %v3035_v16  ;;  %v3029_v16 = vsub.f32 0.0, %v3011_v37 }
 0x95a   :  { %v2960_v52 = vpop.f32.mrb[68].mxu1  ;;  %v3001_v45 = vpop.f32.mrb[84].mxu0 }
 0x95b   :  { %v3012_v9 = vadd.f32 %v2960_v52, %v10656_v46  ;;  %v3014_v55 = vadd.f32 %v3001_v45, %v10657_v4  ;;  %v2962_v18 = vpop.f32.mrb[69].mxu1  ;;  %v3003_v43 = vpop.f32.mrb[85].mxu0  ;;  %v3030_v46 = vmul.f32 1.442695, %v3029_v16 }
 0x95c   :  { %v3013_v58 = vadd.f32 %v2962_v18, %v10658_v34  ;;  %v3015_v44 = vadd.f32 %v3003_v43, %v10659_v1  ;;  %v2964_v14 = vpop.f32.mrb[70].mxu1  ;;  %v3005_v41 = vpop.f32.mrb[86].mxu0 }
 0x95d   :  { %v3040_v2 = vsub.f32 0.0, %v3012_v9  ;;  %v2965_v21 = vpop.f32.mrb[71].mxu1  ;;  %v3006_v61 = vpop.f32.mrb[87].mxu0 }
 0x95e   :  { %v3046_v35 = vsub.f32 0.0, %v3013_v58  ;;  %v3053_v52 = vsub.f32 0.0, %v3015_v44 }
 0x95f   :  { %v3041_v50 = vmul.f32 1.442695, %v3040_v2 }
 0x960   :  { %v3047_v6 = vmul.f32 1.442695, %v3046_v35  ;;  %v3054_v45 = vmul.f32 1.442695, %v3053_v52  ;;  %v10662_v52 = vld [vmem:[#allocation187_spill] sm:$0xff] }
 0x961   :  { %6886 = vpow2.f32 %v3041_v50 }
 0x962   :  { %6888 = vpow2.f32 %v3047_v6 }
 0x963   :  { %6890 = vpow2.f32 %v3030_v46  ;;  %v10663_v46 = vld [vmem:[#allocation188_spill] sm:$0xff] }
 0x964   :  { %6892 = vpow2.f32 %v3054_v45  ;;  %v10664_v45 = vld [vmem:[#allocation189_spill] sm:$0xff] }
 0x965   :  { %6894 = vtanh.f32 %v3014_v55 }
 0x96b   :  { %v6887_v4 = vpop.eup %6886 }
 0x96c   :  { %v6889_v29 = vpop.eup %6888  ;;  %v3043_v18 = vadd.f32 1.0, %v6887_v4  ;;  %v10665_v4 = vld [vmem:[#allocation190_spill] sm:$0xff] }
 0x96d   :  { %v3049_v43 = vadd.f32 1.0, %v6889_v29  ;;  %v6891_v9 = vpop.eup %6890 }
 0x96e   :  { %6896 = vrcp.f32 %v3043_v18  ;;  %v6893_v34 = vpop.eup %6892  ;;  %v3032_v1 = vadd.f32 1.0, %v6891_v9  ;;  %v10666_v18 = vld [vmem:[#allocation191_spill] sm:$0xff]  ;;  %v10668_v9 = vld [vmem:[#allocation193_spill] sm:$0xff] }
 0x96f   :  { %6898 = vrcp.f32 %v3049_v43  ;;  %v6895_v58 = vpop.eup %6894  ;;  %v3056_v37 = vadd.f32 1.0, %v6893_v34  ;;  %v10667_v43 = vld [vmem:[#allocation192_spill] sm:$0xff]  ;;  %v10669_v34 = vld [vmem:[#allocation194_spill] sm:$0xff] }
 0x970   :  { %6900 = vtanh.f32 %v9003_v62 }
 0x971   :  { %6902 = vrcp.f32 %v3032_v1  ;;  %v10672_v1 = vld [vmem:[#allocation197_spill] sm:$0xff] }
 0x972   :  { %6904 = vrcp.f32 %v3056_v37  ;;  %v10675_v37 = vld [vmem:[#allocation200_spill] sm:$0xff] }
 0x978   :  { %v6897_v2 = vpop.eup %6896 }
 0x979   :  { %v6899_v14 = vpop.eup %6898  ;;  %v3060_v41 = vmul.f32 %v6897_v2, %v6895_v58  ;;  %v10670_v58 = vld [vmem:[#allocation195_spill] sm:$0xff]  ;;  %v10671_v2 = vld [vmem:[#allocation196_spill] sm:$0xff] }
 0x97a   :  { %v3059_v44 = vmul.f32 %v6899_v14, %v8853_v0  ;;  %v6901_v29 = vpop.eup %6900  ;;  %v10673_v14 = vld [vmem:[#allocation198_spill] sm:$0xff] }
 0x97b   :  { %v6903_v55 = vpop.eup %6902 }
 0x97c   :  { %v9011_v21 = vadd.f32 %v3060_v41, %v3059_v44  ;;  %v6905_v61 = vpop.eup %6904  ;;  %v9014_v50 = vmul.f32 %v6903_v55, %v6901_v29  ;;  %v10674_v41 = vld [vmem:[#allocation199_spill] sm:$0xff]  ;;  %v10676_v44 = vld [vmem:[#allocation201_spill] sm:$0xff]  ;;  %v10677_v29 = vld [vmem:[#allocation202_spill] sm:$0xff] }
 0x97d   :  { %v10678_v55 = vld [vmem:[#allocation203_spill] sm:$0xff] }
 0x97e   :  { %6906 = vtanh.f32 %v9011_v21  ;;  %10660 = vst [vmem:[#allocation150_spill] sm:$0xff] %v9014_v50  ;;  %v9022_v0 = vpack.c.bf16 %v9014_v50, %v9014_v50  ;;  %v10682_v50 = vld [vmem:[#allocation207_spill] sm:$0xff] }
 0x988   :  { %v6907_v35 = vpop.eup %6906 }
 0x989   :  { %v9016_v6 = vmul.f32 %v6907_v35, %v6905_v61  ;;  %v10679_v61 = vld [vmem:[#allocation204_spill] sm:$0xff]  ;;  %v10680_v35 = vld [vmem:[#allocation205_spill] sm:$0xff] }
 0x98b   :  { %10661 = vst [vmem:[#allocation151_spill] sm:$0xff] %v9016_v6  ;;  %v3067_v16 = vpack.c.bf16 %v9016_v6, %v9016_v6  ;;  %v10683_v6 = vld [vmem:[#allocation208_spill] sm:$0xff] }
 0x98d   :  { %3100 = vmatprep.mubr.bf16.mxu1 %v3067_v16  ;;  %3141 = vmatprep.mubr.bf16.mxu0 %v3067_v16 }
 0x98e   :  { %3101 = vmatmul.mubr.bf16.vlgmr.msra.gmra.mrb[72].mxu1 %v9022_v0  ;;  %3142 = vmatmul.mubr.bf16.vlgmr.msra.gmra.mrb[88].mxu0 %v9022_v0 }
 0x98f   :  { %3151 = vmatpush1.bf16.msra.mxu1 %v7866_v10  ;;  %3192 = vmatpush1.bf16.msra.mxu0 %v7868_v60 }
 0x990   :  { %3182 = vmatprep.mubr.bf16.mxu1 %v3067_v16  ;;  %3223 = vmatprep.mubr.bf16.mxu0 %v3067_v16  ;;  %v10681_v16 = vld [vmem:[#allocation206_spill] sm:$0xff] }
 0x991   :  { %3152 = vmatprep.subr.bf16.mxu1 %v10266_v28  ;;  %3193 = vmatprep.subr.bf16.mxu0 %v10267_v8 }
 0x993   :  { %3153 = vmatpush1.bf16.msra.mxu1 %v10268_v33  ;;  %3194 = vmatpush1.bf16.msra.mxu0 %v10269_v23 }
 0x994   :  { %3154 = vmatprep.subr.bf16.mxu1 %v10270_v13  ;;  %3195 = vmatprep.subr.bf16.mxu0 %v10271_v15 }
 0x997   :  { %3155 = vmatpush1.bf16.msra.mxu1 %v10272_v24  ;;  %3196 = vmatpush1.bf16.msra.mxu0 %v10273_v12 }
 0x998   :  { %3156 = vmatprep.subr.bf16.mxu1 %v10274_v3  ;;  %3197 = vmatprep.subr.bf16.mxu0 %v10275_v51 }
 0x99b   :  { %3157 = vmatpush1.bf16.msra.mxu1 %v10276_v20  ;;  %3198 = vmatpush1.bf16.msra.mxu0 %v10365_v32 }
 0x99c   :  { %3158 = vmatprep.subr.bf16.mxu1 %v10366_v54  ;;  %3199 = vmatprep.subr.bf16.mxu0 %v10367_v36 }
 0x99f   :  { %3159 = vmatpush1.bf16.msra.mxu1 %v10368_v56  ;;  %3200 = vmatpush1.bf16.msra.mxu0 %v10369_v63 }
 0x9a0   :  { %3160 = vmatprep.subr.bf16.mxu1 %v10370_v30  ;;  %3201 = vmatprep.subr.bf16.mxu0 %v10371_v31 }
 0x9a3   :  { %3161 = vmatpush1.bf16.msra.mxu1 %v10372_v7  ;;  %3202 = vmatpush1.bf16.msra.mxu0 %v10373_v11 }
 0x9a4   :  { %3162 = vmatprep.subr.bf16.mxu1 %v10374_v27  ;;  %3203 = vmatprep.subr.bf16.mxu0 %v10375_v42 }
 0x9a7   :  { %3163 = vmatpush1.bf16.msra.mxu1 %v10464_v38  ;;  %3204 = vmatpush1.bf16.msra.mxu0 %v10465_v19 }
 0x9a8   :  { %3164 = vmatprep.subr.bf16.mxu1 %v10378_v57  ;;  %3205 = vmatprep.subr.bf16.mxu0 %v10379_v48 }
 0x9ab   :  { %3165 = vmatpush1.bf16.msra.mxu1 %v10380_v22  ;;  %3206 = vmatpush1.bf16.msra.mxu0 %v10466_v26 }
 0x9ac   :  { %3166 = vmatprep.subr.bf16.mxu1 %v10467_v17  ;;  %3207 = vmatprep.subr.bf16.mxu0 %v10383_v53 }
 0x9af   :  { %3167 = vmatpush1.bf16.msra.mxu1 %v10384_v49  ;;  %3208 = vmatpush1.bf16.msra.mxu0 %v10385_v40 }
 0x9b0   :  { %3168 = vmatprep.subr.bf16.mxu1 %v10386_v39  ;;  %3209 = vmatprep.subr.bf16.mxu0 %v10387_v5 }
 0x9b3   :  { %3169 = vmatpush1.bf16.msra.mxu1 %v10388_v47  ;;  %3210 = vmatpush1.bf16.msra.mxu0 %v10301_v25 }
 0x9b4   :  { %3170 = vmatprep.subr.bf16.mxu1 %v10302_v59  ;;  %3211 = vmatprep.subr.bf16.mxu0 %v10662_v52 }
 0x9b7   :  { %3171 = vmatpush1.bf16.msra.mxu1 %v10663_v46  ;;  %3212 = vmatpush1.bf16.msra.mxu0 %v10664_v45 }
 0x9b8   :  { %3172 = vmatprep.subr.bf16.mxu1 %v10665_v4  ;;  %3213 = vmatprep.subr.bf16.mxu0 %v10666_v18 }
 0x9bb   :  { %3173 = vmatpush1.bf16.msra.mxu1 %v10667_v43  ;;  %3214 = vmatpush1.bf16.msra.mxu0 %v10668_v9 }
 0x9bc   :  { %3174 = vmatprep.subr.bf16.mxu1 %v10669_v34  ;;  %3215 = vmatprep.subr.bf16.mxu0 %v10670_v58  ;;  %v10753_v58 = vld [vmem:[#allocation113_spill] sm:$0xff]  ;;  %v10754_v34 = vld [vmem:[#allocation114_spill] sm:$0xff] }
 0x9bf   :  { %3175 = vmatpush1.bf16.msra.mxu1 %v10671_v2  ;;  %3216 = vmatpush1.bf16.msra.mxu0 %v10672_v1  ;;  %v10752_v1 = vld [vmem:[#allocation112_spill] sm:$0xff] }
 0x9c0   :  { %3176 = vmatprep.subr.bf16.mxu1 %v10673_v14  ;;  %3217 = vmatprep.subr.bf16.mxu0 %v10674_v41  ;;  %v10684_v14 = vld [vmem:[#allocation209_spill] sm:$0xff] }
 0x9c1   :  { %v10685_v41 = vld [vmem:[#allocation25_spill] sm:$0xff] }
 0x9c3   :  { %3177 = vmatpush1.bf16.msra.mxu1 %v10675_v37  ;;  %3218 = vmatpush1.bf16.msra.mxu0 %v10676_v44  ;;  %v10686_v37 = vld [vmem:[#allocation27_spill] sm:$0xff] }
 0x9c4   :  { %3178 = vmatprep.subr.bf16.mxu1 %v10677_v29  ;;  %3219 = vmatprep.subr.bf16.mxu0 %v10678_v55  ;;  %v10687_v55 = vld [vmem:[#allocation26_spill] sm:$0xff]  ;;  %v10696_v29 = vld [vmem:[#allocation36_spill] sm:$0xff]  ;;  %v10751_v44 = vld [vmem:[#allocation111_spill] sm:$0xff] }
 0x9c7   :  { %3179 = vmatpush1.bf16.msra.mxu1 %v10679_v61  ;;  %3220 = vmatpush1.bf16.msra.mxu0 %v10680_v35  ;;  %v10688_v61 = vld [vmem:[#allocation28_spill] sm:$0xff]  ;;  %v10689_v35 = vld [vmem:[#allocation29_spill] sm:$0xff] }
 0x9c8   :  { %3180 = vmatprep.subr.bf16.mxu1 %v10681_v16  ;;  %3221 = vmatprep.subr.bf16.mxu0 %v10682_v50  ;;  %v10690_v16 = vld [vmem:[#allocation30_spill] sm:$0xff]  ;;  %v10691_v50 = vld [vmem:[#allocation31_spill] sm:$0xff] }
 0x9cb   :  { %3181 = vmatpush1.bf16.msra.mxu1 %v10683_v6  ;;  %3222 = vmatpush1.bf16.msra.mxu0 %v10684_v14  ;;  %v10692_v6 = vld [vmem:[#allocation32_spill] sm:$0xff]  ;;  %v10693_v14 = vld [vmem:[#allocation33_spill] sm:$0xff] }
 0x9cc   :  { %3292 = vmatprep.subr.bf16.mxu1 %v10685_v41  ;;  %3333 = vmatprep.subr.bf16.mxu0 %v10686_v37  ;;  %v10694_v41 = vld [vmem:[#allocation35_spill] sm:$0xff]  ;;  %v10695_v37 = vld [vmem:[#allocation34_spill] sm:$0xff] }
 0x9ce   :  { %3183 = vmatmul.mubr.bf16.vlgmr.msra.gmra.mrb[76].mxu1 %v9022_v0  ;;  %3224 = vmatmul.mubr.bf16.vlgmr.msra.gmra.mrb[92].mxu0 %v9022_v0  ;;  %v10697_v0 = vld [vmem:[#allocation37_spill] sm:$0xff] }
 0x9cf   :  { %3293 = vmatpush1.bf16.msra.mxu1 %v10687_v55  ;;  %3334 = vmatpush1.bf16.msra.mxu0 %v10688_v61  ;;  %v10698_v55 = vld [vmem:[#allocation38_spill] sm:$0xff]  ;;  %v10699_v61 = vld [vmem:[#allocation39_spill] sm:$0xff] }
 0x9d0   :  { %3294 = vmatprep.subr.bf16.mxu1 %v10689_v35  ;;  %3335 = vmatprep.subr.bf16.mxu0 %v10690_v16  ;;  %v10700_v35 = vld [vmem:[#allocation40_spill] sm:$0xff]  ;;  %v10701_v16 = vld [vmem:[#allocation41_spill] sm:$0xff] }
 0x9d3   :  { %3295 = vmatpush1.bf16.msra.mxu1 %v10691_v50  ;;  %3336 = vmatpush1.bf16.msra.mxu0 %v10692_v6  ;;  %v10702_v50 = vld [vmem:[#allocation42_spill] sm:$0xff]  ;;  %v10703_v6 = vld [vmem:[#allocation43_spill] sm:$0xff] }
 0x9d4   :  { %3296 = vmatprep.subr.bf16.mxu1 %v10693_v14  ;;  %3337 = vmatprep.subr.bf16.mxu0 %v10694_v41  ;;  %v10704_v14 = vld [vmem:[#allocation44_spill] sm:$0xff]  ;;  %v10705_v41 = vld [vmem:[#allocation45_spill] sm:$0xff] }
 0x9d7   :  { %3297 = vmatpush1.bf16.msra.mxu1 %v10695_v37  ;;  %3338 = vmatpush1.bf16.msra.mxu0 %v10696_v29  ;;  %v10706_v37 = vld [vmem:[#allocation46_spill] sm:$0xff]  ;;  %v10707_v29 = vld [vmem:[#allocation47_spill] sm:$0xff] }
 0x9d8   :  { %3298 = vmatprep.subr.bf16.mxu1 %v10697_v0  ;;  %3339 = vmatprep.subr.bf16.mxu0 %v10698_v55  ;;  %v10708_v0 = vld [vmem:[#allocation48_spill] sm:$0xff]  ;;  %v10709_v55 = vld [vmem:[#allocation49_spill] sm:$0xff] }
 0x9db   :  { %3299 = vmatpush1.bf16.msra.mxu1 %v10699_v61  ;;  %3340 = vmatpush1.bf16.msra.mxu0 %v10700_v35  ;;  %v10710_v61 = vld [vmem:[#allocation50_spill] sm:$0xff]  ;;  %v10711_v35 = vld [vmem:[#allocation51_spill] sm:$0xff] }
 0x9dc   :  { %3300 = vmatprep.subr.bf16.mxu1 %v10701_v16  ;;  %3341 = vmatprep.subr.bf16.mxu0 %v10702_v50  ;;  %v10712_v16 = vld [vmem:[#allocation52_spill] sm:$0xff]  ;;  %v10713_v50 = vld [vmem:[#allocation53_spill] sm:$0xff] }
 0x9df   :  { %3301 = vmatpush1.bf16.msra.mxu1 %v10703_v6  ;;  %3342 = vmatpush1.bf16.msra.mxu0 %v10704_v14  ;;  %v10714_v6 = vld [vmem:[#allocation54_spill] sm:$0xff]  ;;  %v10715_v14 = vld [vmem:[#allocation55_spill] sm:$0xff] }
 0x9e0   :  { %3302 = vmatprep.subr.bf16.mxu1 %v10705_v41  ;;  %3343 = vmatprep.subr.bf16.mxu0 %v10706_v37  ;;  %v10716_v41 = vld [vmem:[#allocation56_spill] sm:$0xff]  ;;  %v10717_v37 = vld [vmem:[#allocation57_spill] sm:$0xff] }
 0x9e3   :  { %3303 = vmatpush1.bf16.msra.mxu1 %v10707_v29  ;;  %3344 = vmatpush1.bf16.msra.mxu0 %v10708_v0  ;;  %v10718_v29 = vld [vmem:[#allocation58_spill] sm:$0xff]  ;;  %v10719_v0 = vld [vmem:[#allocation59_spill] sm:$0xff] }
 0x9e4   :  { %3304 = vmatprep.subr.bf16.mxu1 %v10709_v55  ;;  %3345 = vmatprep.subr.bf16.mxu0 %v10710_v61  ;;  %v10720_v55 = vld [vmem:[#allocation60_spill] sm:$0xff]  ;;  %v10721_v61 = vld [vmem:[#allocation61_spill] sm:$0xff] }
 0x9e7   :  { %3305 = vmatpush1.bf16.msra.mxu1 %v10711_v35  ;;  %3346 = vmatpush1.bf16.msra.mxu0 %v10712_v16  ;;  %v10722_v35 = vld [vmem:[#allocation62_spill] sm:$0xff]  ;;  %v10723_v16 = vld [vmem:[#allocation63_spill] sm:$0xff] }
 0x9e8   :  { %3306 = vmatprep.subr.bf16.mxu1 %v10713_v50  ;;  %3347 = vmatprep.subr.bf16.mxu0 %v10714_v6  ;;  %v10724_v50 = vld [vmem:[#allocation64_spill] sm:$0xff]  ;;  %v10725_v6 = vld [vmem:[#allocation65_spill] sm:$0xff] }
 0x9eb   :  { %3307 = vmatpush1.bf16.msra.mxu1 %v10715_v14  ;;  %3348 = vmatpush1.bf16.msra.mxu0 %v10716_v41  ;;  %v10726_v14 = vld [vmem:[#allocation66_spill] sm:$0xff]  ;;  %v10727_v41 = vld [vmem:[#allocation67_spill] sm:$0xff] }
 0x9ec   :  { %3308 = vmatprep.subr.bf16.mxu1 %v10717_v37  ;;  %3349 = vmatprep.subr.bf16.mxu0 %v10718_v29  ;;  %v10728_v37 = vld [vmem:[#allocation68_spill] sm:$0xff]  ;;  %v10729_v29 = vld [vmem:[#allocation69_spill] sm:$0xff] }
 0x9ef   :  { %3309 = vmatpush1.bf16.msra.mxu1 %v10719_v0  ;;  %3350 = vmatpush1.bf16.msra.mxu0 %v10720_v55  ;;  %v10730_v0 = vld [vmem:[#allocation70_spill] sm:$0xff]  ;;  %v10731_v55 = vld [vmem:[#allocation71_spill] sm:$0xff] }
 0x9f0   :  { %3310 = vmatprep.subr.bf16.mxu1 %v10721_v61  ;;  %3351 = vmatprep.subr.bf16.mxu0 %v10722_v35  ;;  %v10732_v61 = vld [vmem:[#allocation72_spill] sm:$0xff]  ;;  %v10733_v35 = vld [vmem:[#allocation73_spill] sm:$0xff] }
 0x9f3   :  { %3311 = vmatpush1.bf16.msra.mxu1 %v10723_v16  ;;  %3352 = vmatpush1.bf16.msra.mxu0 %v10724_v50  ;;  %v10734_v16 = vld [vmem:[#allocation74_spill] sm:$0xff]  ;;  %v10735_v50 = vld [vmem:[#allocation75_spill] sm:$0xff] }
 0x9f4   :  { %3312 = vmatprep.subr.bf16.mxu1 %v10725_v6  ;;  %3353 = vmatprep.subr.bf16.mxu0 %v10726_v14  ;;  %v10736_v6 = vld [vmem:[#allocation76_spill] sm:$0xff]  ;;  %v10737_v14 = vld [vmem:[#allocation77_spill] sm:$0xff] }
 0x9f7   :  { %3313 = vmatpush1.bf16.msra.mxu1 %v10727_v41  ;;  %3354 = vmatpush1.bf16.msra.mxu0 %v10728_v37  ;;  %v10738_v41 = vld [vmem:[#allocation78_spill] sm:$0xff]  ;;  %v10739_v37 = vld [vmem:[#allocation79_spill] sm:$0xff] }
 0x9f8   :  { %3314 = vmatprep.subr.bf16.mxu1 %v10729_v29  ;;  %3355 = vmatprep.subr.bf16.mxu0 %v10730_v0  ;;  %v10740_v29 = vld [vmem:[#allocation80_spill] sm:$0xff]  ;;  %v10741_v0 = vld [vmem:[#allocation81_spill] sm:$0xff] }
 0x9fb   :  { %3315 = vmatpush1.bf16.msra.mxu1 %v10731_v55  ;;  %3356 = vmatpush1.bf16.msra.mxu0 %v10732_v61  ;;  %v10742_v55 = vld [vmem:[#allocation82_spill] sm:$0xff]  ;;  %v10743_v61 = vld [vmem:[#allocation83_spill] sm:$0xff] }
 0x9fc   :  { %3316 = vmatprep.subr.bf16.mxu1 %v10733_v35  ;;  %3357 = vmatprep.subr.bf16.mxu0 %v10734_v16  ;;  %v10744_v35 = vld [vmem:[#allocation84_spill] sm:$0xff]  ;;  %v10745_v16 = vld [vmem:[#allocation85_spill] sm:$0xff] }
 0x9ff   :  { %3317 = vmatpush1.bf16.msra.mxu1 %v10735_v50  ;;  %3358 = vmatpush1.bf16.msra.mxu0 %v10736_v6  ;;  %v10746_v50 = vld [vmem:[#allocation86_spill] sm:$0xff]  ;;  %v10747_v6 = vld [vmem:[#allocation87_spill] sm:$0xff] }
 0xa00   :  { %3318 = vmatprep.subr.bf16.mxu1 %v10737_v14  ;;  %3359 = vmatprep.subr.bf16.mxu0 %v10738_v41  ;;  %v10748_v14 = vld [vmem:[#allocation88_spill] sm:$0xff]  ;;  %v10749_v41 = vld [vmem:[#allocation89_spill] sm:$0xff] }
 0xa03   :  { %3319 = vmatpush1.bf16.msra.mxu1 %v10739_v37  ;;  %3360 = vmatpush1.bf16.msra.mxu0 %v10740_v29  ;;  %v10750_v37 = vld [vmem:[#allocation90_spill] sm:$0xff] }
 0xa04   :  { %3320 = vmatprep.subr.bf16.mxu1 %v10741_v0  ;;  %3361 = vmatprep.subr.bf16.mxu0 %v10742_v55 }
 0xa07   :  { %3321 = vmatpush1.bf16.msra.mxu1 %v10743_v61  ;;  %3362 = vmatpush1.bf16.msra.mxu0 %v10744_v35 }
 0xa08   :  { %3322 = vmatprep.subr.bf16.mxu1 %v10745_v16  ;;  %3363 = vmatprep.subr.bf16.mxu0 %v10746_v50 }
 0xa0b   :  { %3323 = vmatpush1.bf16.msra.mxu1 %v10747_v6  ;;  %3364 = vmatpush1.bf16.msra.mxu0 %v10748_v14 }
 0xa0c   :  { %3374 = vmatprep.subr.bf16.mxu1 %v10749_v41  ;;  %3415 = vmatprep.subr.bf16.mxu0 %v10750_v37 }
 0xa61   :  { %v3102_v29 = vpop.f32.mrb[72].mxu1  ;;  %v3143_v0 = vpop.f32.mrb[88].mxu0 }
 0xa62   :  { %v3232_v55 = vadd.f32 %v3102_v29, %v10751_v44  ;;  %v3234_v61 = vadd.f32 %v3143_v0, %v10752_v1  ;;  %v3104_v2 = vpop.f32.mrb[73].mxu1  ;;  %v3145_v35 = vpop.f32.mrb[89].mxu0 }
 0xa63   :  { %v3233_v16 = vadd.f32 %v3104_v2, %v10753_v58  ;;  %v3235_v50 = vadd.f32 %v3145_v35, %v10754_v34  ;;  %v3106_v9 = vpop.f32.mrb[74].mxu1  ;;  %v3147_v6 = vpop.f32.mrb[90].mxu0  ;;  %v10755_v35 = vld [vmem:[#allocation123_spill] sm:$0xff] }
 0xa64   :  { %v3240_v43 = vsub.f32 0.0, %v3232_v55  ;;  %v3107_v14 = vpop.f32.mrb[75].mxu1  ;;  %v3148_v18 = vpop.f32.mrb[91].mxu0 }
 0xa65   :  { %v3246_v41 = vsub.f32 0.0, %v3233_v16  ;;  %v10756_v16 = vld [vmem:[#allocation124_spill] sm:$0xff] }
 0xa66   :  { %v3241_v4 = vmul.f32 1.442695, %v3240_v43 }
 0xa67   :  { %v3247_v37 = vmul.f32 1.442695, %v3246_v41 }
 0xa68   :  { %6908 = vpow2.f32 %v3241_v4 }
 0xa69   :  { %6910 = vpow2.f32 %v3247_v37  ;;  %v10758_v37 = vld [vmem:[#allocation126_spill] sm:$0xff] }
 0xa6a   :  { %6912 = vtanh.f32 %v3234_v61  ;;  %v10757_v61 = vld [vmem:[#allocation125_spill] sm:$0xff] }
 0xa72   :  { %v6909_v45 = vpop.eup %6908 }
 0xa73   :  { %v6911_v44 = vpop.eup %6910  ;;  %v3243_v29 = vadd.f32 1.0, %v6909_v45 }
 0xa74   :  { %v3249_v1 = vadd.f32 1.0, %v6911_v44  ;;  %v6913_v58 = vpop.eup %6912 }
 0xa75   :  { %6914 = vrcp.f32 %v3243_v29 }
 0xa76   :  { %6916 = vrcp.f32 %v3249_v1 }
 0xa7f   :  { %v6915_v2 = vpop.eup %6914 }
 0xa80   :  { %v6917_v34 = vpop.eup %6916  ;;  %v3260_v9 = vmul.f32 %v6915_v2, %v6913_v58 }
 0xa81   :  { %v3259_v0 = vmul.f32 %v6917_v34, %v9003_v62 }
 0xa83   :  { %v9161_v55 = vadd.f32 %v3260_v9, %v3259_v0  ;;  %v3253_v0 = vsub.f32 0.0, %v3235_v50 }
 0xaa1   :  { %v3184_v18 = vpop.f32.mrb[76].mxu1  ;;  %v3225_v43 = vpop.f32.mrb[92].mxu0 }
 0xaa2   :  { %v3236_v4 = vadd.f32 %v3184_v18, %v10755_v35  ;;  %v3238_v6 = vadd.f32 %v3225_v43, %v10756_v16  ;;  %v3186_v14 = vpop.f32.mrb[77].mxu1  ;;  %v3227_v45 = vpop.f32.mrb[93].mxu0  ;;  %v3254_v35 = vmul.f32 1.442695, %v3253_v0 }
 0xaa3   :  { %v3237_v41 = vadd.f32 %v3186_v14, %v10757_v61  ;;  %v3239_v44 = vadd.f32 %v3227_v45, %v10758_v37  ;;  %v3188_v29 = vpop.f32.mrb[78].mxu1  ;;  %v3229_v1 = vpop.f32.mrb[94].mxu0 }
 0xaa4   :  { %v3264_v46 = vsub.f32 0.0, %v3236_v4  ;;  %v3189_v58 = vpop.f32.mrb[79].mxu1  ;;  %v3230_v2 = vpop.f32.mrb[95].mxu0 }
 0xaa5   :  { %v3270_v62 = vsub.f32 0.0, %v3237_v41  ;;  %v3277_v18 = vsub.f32 0.0, %v3239_v44 }
 0xaa6   :  { %v3265_v34 = vmul.f32 1.442695, %v3264_v46 }
 0xaa7   :  { %v3271_v9 = vmul.f32 1.442695, %v3270_v62  ;;  %v3278_v43 = vmul.f32 1.442695, %v3277_v18  ;;  %v6454_v18 = vld [vmem:[#allocation8 + $0x84] ss:$16 sps:$4 sm:$0xff]  }
 0xaa8   :  { %6918 = vpow2.f32 %v3265_v34 }
 0xaa9   :  { %6920 = vpow2.f32 %v3271_v9 }
 0xaaa   :  { %6922 = vpow2.f32 %v3254_v35  ;;  %v6457_v35 = vld [vmem:[#allocation8 + $0x8c] ss:$16 sps:$4 sm:$0xff]  }
 0xaab   :  { %6924 = vpow2.f32 %v3278_v43  ;;  %v6452_v43 = vld [vmem:[#allocation8 + $0x80] ss:$16 sps:$4 sm:$0xff]  }
 0xaac   :  { %6926 = vtanh.f32 %v3238_v6 }
 0xab2   :  { %v6919_v16 = vpop.eup %6918 }
 0xab3   :  { %v6921_v52 = vpop.eup %6920  ;;  %v3267_v14 = vadd.f32 1.0, %v6919_v16  ;;  %v6455_v16 = vld [vmem:[#allocation8 + $0x88] ss:$16 sps:$4 sm:$0xff]  }
 0xab4   :  { %v3273_v45 = vadd.f32 1.0, %v6921_v52  ;;  %v6923_v4 = vpop.eup %6922 }
 0xab5   :  { %6928 = vrcp.f32 %v3267_v14  ;;  %v6925_v61 = vpop.eup %6924  ;;  %v3256_v37 = vadd.f32 1.0, %v6923_v4  ;;  %v6460_v14 = vld [vmem:[#allocation8 + $0xa4] ss:$16 sps:$4 sm:$0xff]   ;;  %v6458_v4 = vld [vmem:[#allocation8 + $0xa0] ss:$16 sps:$4 sm:$0xff]  }
 0xab6   :  { %6930 = vrcp.f32 %v3273_v45  ;;  %v6927_v41 = vpop.eup %6926  ;;  %v3280_v50 = vadd.f32 1.0, %v6925_v61  ;;  %v6463_v45 = vld [vmem:[#allocation8 + $0xac] ss:$16 sps:$4 sm:$0xff]   ;;  %v6461_v61 = vld [vmem:[#allocation8 + $0xa8] ss:$16 sps:$4 sm:$0xff]  }
 0xab7   :  { %6932 = vtanh.f32 %v9161_v55 }
 0xab8   :  { %6934 = vrcp.f32 %v3256_v37  ;;  %v6464_v37 = vld [vmem:[#allocation8 + $0xc0] ss:$16 sps:$4 sm:$0xff]  }
 0xab9   :  { %6936 = vrcp.f32 %v3280_v50  ;;  %v6475_v50 = vld [vmem:[#allocation8 + $0xec] ss:$16 sps:$4 sm:$0xff]  }
 0xabf   :  { %v6929_v46 = vpop.eup %6928 }
 0xac0   :  { %v6931_v29 = vpop.eup %6930  ;;  %v3284_v1 = vmul.f32 %v6929_v46, %v6927_v41  ;;  %v6466_v41 = vld [vmem:[#allocation8 + $0xc4] ss:$16 sps:$4 sm:$0xff]   ;;  %v6469_v46 = vld [vmem:[#allocation8 + $0xcc] ss:$16 sps:$4 sm:$0xff]  }
 0xac1   :  { %v3283_v44 = vmul.f32 %v6931_v29, %v9011_v21  ;;  %v6933_v52 = vpop.eup %6932  ;;  %v6467_v29 = vld [vmem:[#allocation8 + $0xc8] ss:$16 sps:$4 sm:$0xff]  }
 0xac2   :  { %v6935_v6 = vpop.eup %6934 }
 0xac3   :  { %v9169_v58 = vadd.f32 %v3284_v1, %v3283_v44  ;;  %v6937_v2 = vpop.eup %6936  ;;  %v9172_v34 = vmul.f32 %v6935_v6, %v6933_v52  ;;  %v6472_v1 = vld [vmem:[#allocation8 + $0xe4] ss:$16 sps:$4 sm:$0xff]   ;;  %v6470_v44 = vld [vmem:[#allocation8 + $0xe0] ss:$16 sps:$4 sm:$0xff]   ;;  %v6473_v52 = vld [vmem:[#allocation8 + $0xe8] ss:$16 sps:$4 sm:$0xff]  }
 0xac4   :  { %v6478_v6 = vld [vmem:[#allocation8 + $0x104] ss:$16 sps:$4 sm:$0xff]  }
 0xac5   :  { %6938 = vtanh.f32 %v9169_v58  ;;  %v9180_v21 = vpack.c.bf16 %v9172_v34, %v9172_v34 }
 0xacf   :  { %v6939_v62 = vpop.eup %6938 }
 0xad0   :  { %v9174_v9 = vmul.f32 %v6939_v62, %v6937_v2  ;;  %v6481_v2 = vld [vmem:[#allocation8 + $0x10c] ss:$16 sps:$4 sm:$0xff]   ;;  %v6476_v62 = vld [vmem:[#allocation8 + $0x100] ss:$16 sps:$4 sm:$0xff]  }
 0xad2   :  { %v3291_v0 = vpack.c.bf16 %v9174_v9, %v9174_v9 }
 0xad4   :  { %3324 = vmatprep.mubr.bf16.mxu1 %v3291_v0  ;;  %3365 = vmatprep.mubr.bf16.mxu0 %v3291_v0 }
 0xad5   :  { %3325 = vmatmul.mubr.bf16.vlgmr.msra.gmra.mrb[80].mxu1 %v9180_v21  ;;  %3366 = vmatmul.mubr.bf16.vlgmr.msra.gmra.mrb[96].mxu0 %v9180_v21 }
 0xad6   :  { %3375 = vmatpush1.bf16.msra.mxu1 %v7866_v10  ;;  %3416 = vmatpush1.bf16.msra.mxu0 %v7868_v60  ;;  %v10759_v10 = vld [vmem:[#allocation187_spill] sm:$0xff]  ;;  %v10760_v60 = vld [vmem:[#allocation188_spill] sm:$0xff] }
 0xad7   :  { %3406 = vmatprep.mubr.bf16.mxu1 %v3291_v0  ;;  %3447 = vmatprep.mubr.bf16.mxu0 %v3291_v0  ;;  %v6479_v0 = vld [vmem:[#allocation8 + $0x108] ss:$16 sps:$4 sm:$0xff]  }
 0xad8   :  { %3376 = vmatprep.subr.bf16.mxu1 %v10266_v28  ;;  %3417 = vmatprep.subr.bf16.mxu0 %v10267_v8  ;;  %v10761_v28 = vld [vmem:[#allocation189_spill] sm:$0xff]  ;;  %v10762_v8 = vld [vmem:[#allocation190_spill] sm:$0xff] }
 0xada   :  { %3377 = vmatpush1.bf16.msra.mxu1 %v10268_v33  ;;  %3418 = vmatpush1.bf16.msra.mxu0 %v10269_v23  ;;  %v10763_v33 = vld [vmem:[#allocation191_spill] sm:$0xff]  ;;  %v10764_v23 = vld [vmem:[#allocation192_spill] sm:$0xff] }
 0xadb   :  { %3378 = vmatprep.subr.bf16.mxu1 %v10270_v13  ;;  %3419 = vmatprep.subr.bf16.mxu0 %v10271_v15  ;;  %v10765_v13 = vld [vmem:[#allocation193_spill] sm:$0xff]  ;;  %v10766_v15 = vld [vmem:[#allocation194_spill] sm:$0xff] }
 0xade   :  { %3379 = vmatpush1.bf16.msra.mxu1 %v10272_v24  ;;  %3420 = vmatpush1.bf16.msra.mxu0 %v10273_v12  ;;  %v10767_v24 = vld [vmem:[#allocation195_spill] sm:$0xff]  ;;  %v10768_v12 = vld [vmem:[#allocation196_spill] sm:$0xff] }
 0xadf   :  { %3380 = vmatprep.subr.bf16.mxu1 %v10274_v3  ;;  %3421 = vmatprep.subr.bf16.mxu0 %v10275_v51  ;;  %v10769_v3 = vld [vmem:[#allocation197_spill] sm:$0xff]  ;;  %v10770_v51 = vld [vmem:[#allocation198_spill] sm:$0xff] }
 0xae2   :  { %3381 = vmatpush1.bf16.msra.mxu1 %v10276_v20  ;;  %3422 = vmatpush1.bf16.msra.mxu0 %v10365_v32  ;;  %v10771_v20 = vld [vmem:[#allocation199_spill] sm:$0xff]  ;;  %v10776_v32 = vld [vmem:[#allocation204_spill] sm:$0xff] }
 0xae3   :  { %3382 = vmatprep.subr.bf16.mxu1 %v10366_v54  ;;  %3423 = vmatprep.subr.bf16.mxu0 %v10367_v36  ;;  %v10777_v54 = vld [vmem:[#allocation205_spill] sm:$0xff]  ;;  %v10778_v36 = vld [vmem:[#allocation206_spill] sm:$0xff] }
 0xae6   :  { %3383 = vmatpush1.bf16.msra.mxu1 %v10368_v56  ;;  %3424 = vmatpush1.bf16.msra.mxu0 %v10369_v63  ;;  %v10779_v56 = vld [vmem:[#allocation207_spill] sm:$0xff]  ;;  %v10780_v63 = vld [vmem:[#allocation208_spill] sm:$0xff] }
 0xae7   :  { %3384 = vmatprep.subr.bf16.mxu1 %v10370_v30  ;;  %3425 = vmatprep.subr.bf16.mxu0 %v10371_v31  ;;  %v10781_v30 = vld [vmem:[#allocation209_spill] sm:$0xff] }
 0xae8   :  { %v6428_v31 = vld [vmem:[#allocation8] ss:$16 sps:$4 sm:$0xff]  }
 0xaea   :  { %3385 = vmatpush1.bf16.msra.mxu1 %v10372_v7  ;;  %3426 = vmatpush1.bf16.msra.mxu0 %v10373_v11  ;;  %v6430_v7 = vld [vmem:[#allocation8 + $0x4] ss:$16 sps:$4 sm:$0xff]   ;;  %v6431_v11 = vld [vmem:[#allocation8 + $0x8] ss:$16 sps:$4 sm:$0xff]  }
 0xaeb   :  { %3386 = vmatprep.subr.bf16.mxu1 %v10374_v27  ;;  %3427 = vmatprep.subr.bf16.mxu0 %v10375_v42  ;;  %v6433_v27 = vld [vmem:[#allocation8 + $0xc] ss:$16 sps:$4 sm:$0xff]   ;;  %v6436_v42 = vld [vmem:[#allocation8 + $0x24] ss:$16 sps:$4 sm:$0xff]  }
 0xaee   :  { %3387 = vmatpush1.bf16.msra.mxu1 %v10464_v38  ;;  %3428 = vmatpush1.bf16.msra.mxu0 %v10465_v19  ;;  %v6448_v38 = vld [vmem:[#allocation8 + $0x64] ss:$16 sps:$4 sm:$0xff]   ;;  %v6451_v19 = vld [vmem:[#allocation8 + $0x6c] ss:$16 sps:$4 sm:$0xff]  }
 0xaef   :  { %3388 = vmatprep.subr.bf16.mxu1 %v10378_v57  ;;  %3429 = vmatprep.subr.bf16.mxu0 %v10379_v48  ;;  %v6437_v57 = vld [vmem:[#allocation8 + $0x28] ss:$16 sps:$4 sm:$0xff]   ;;  %v6442_v48 = vld [vmem:[#allocation8 + $0x44] ss:$16 sps:$4 sm:$0xff]  }
 0xaf2   :  { %3389 = vmatpush1.bf16.msra.mxu1 %v10380_v22  ;;  %3430 = vmatpush1.bf16.msra.mxu0 %v10466_v26  ;;  %v6445_v22 = vld [vmem:[#allocation8 + $0x4c] ss:$16 sps:$4 sm:$0xff]   ;;  %v6446_v26 = vld [vmem:[#allocation8 + $0x60] ss:$16 sps:$4 sm:$0xff]  }
 0xaf3   :  { %3390 = vmatprep.subr.bf16.mxu1 %v10467_v17  ;;  %3431 = vmatprep.subr.bf16.mxu0 %v10383_v53  ;;  %v6440_v53 = vld [vmem:[#allocation8 + $0x40] ss:$16 sps:$4 sm:$0xff]   ;;  %v6449_v17 = vld [vmem:[#allocation8 + $0x68] ss:$16 sps:$4 sm:$0xff]  }
 0xaf6   :  { %3391 = vmatpush1.bf16.msra.mxu1 %v10384_v49  ;;  %3432 = vmatpush1.bf16.msra.mxu0 %v10385_v40  ;;  %v10775_v40 = vld [vmem:[#allocation203_spill] sm:$0xff]  ;;  %v6443_v49 = vld [vmem:[#allocation8 + $0x48] ss:$16 sps:$4 sm:$0xff]  }
 0xaf7   :  { %3392 = vmatprep.subr.bf16.mxu1 %v10386_v39  ;;  %3433 = vmatprep.subr.bf16.mxu0 %v10387_v5  ;;  %v10774_v39 = vld [vmem:[#allocation202_spill] sm:$0xff] }
 0xaf8   :  { %v6439_v5 = vld [vmem:[#allocation8 + $0x2c] ss:$16 sps:$4 sm:$0xff]  }
 0xafa   :  { %3393 = vmatpush1.bf16.msra.mxu1 %v10388_v47  ;;  %3434 = vmatpush1.bf16.msra.mxu0 %v10301_v25  ;;  %v10772_v25 = vld [vmem:[#allocation200_spill] sm:$0xff]  ;;  %v6434_v47 = vld [vmem:[#allocation8 + $0x20] ss:$16 sps:$4 sm:$0xff]  }
 0xafb   :  { %3394 = vmatprep.subr.bf16.mxu1 %v10302_v59  ;;  %3435 = vmatprep.subr.bf16.mxu0 %v10759_v10  ;;  %v10773_v59 = vld [vmem:[#allocation201_spill] sm:$0xff]  ;;  %v6487_v10 = vld [vmem:[#allocation8 + $0x12c] ss:$16 sps:$4 sm:$0xff]  }
 0xafe   :  { %3395 = vmatpush1.bf16.msra.mxu1 %v10760_v60  ;;  %3436 = vmatpush1.bf16.msra.mxu0 %v10761_v28  ;;  %v6482_v60 = vld [vmem:[#allocation8 + $0x120] ss:$16 sps:$4 sm:$0xff]   ;;  %v6485_v28 = vld [vmem:[#allocation8 + $0x128] ss:$16 sps:$4 sm:$0xff]  }
 0xaff   :  { %3396 = vmatprep.subr.bf16.mxu1 %v10762_v8  ;;  %3437 = vmatprep.subr.bf16.mxu0 %v10763_v33  ;;  %v6490_v8 = vld [vmem:[#allocation8 + $0x144] ss:$16 sps:$4 sm:$0xff]   ;;  %v6493_v33 = vld [vmem:[#allocation8 + $0x14c] ss:$16 sps:$4 sm:$0xff]  }
 0xb02   :  { %3397 = vmatpush1.bf16.msra.mxu1 %v10764_v23  ;;  %3438 = vmatpush1.bf16.msra.mxu0 %v10765_v13  ;;  %v6488_v23 = vld [vmem:[#allocation8 + $0x140] ss:$16 sps:$4 sm:$0xff]   ;;  %v6491_v13 = vld [vmem:[#allocation8 + $0x148] ss:$16 sps:$4 sm:$0xff]  }
 0xb03   :  { %3398 = vmatprep.subr.bf16.mxu1 %v10766_v15  ;;  %3439 = vmatprep.subr.bf16.mxu0 %v10767_v24  ;;  %v6496_v15 = vld [vmem:[#allocation8 + $0x164] ss:$16 sps:$4 sm:$0xff]   ;;  %v6499_v24 = vld [vmem:[#allocation8 + $0x16c] ss:$16 sps:$4 sm:$0xff]  }
 0xb06   :  { %3399 = vmatpush1.bf16.msra.mxu1 %v10768_v12  ;;  %3440 = vmatpush1.bf16.msra.mxu0 %v10769_v3  ;;  %v6494_v12 = vld [vmem:[#allocation8 + $0x160] ss:$16 sps:$4 sm:$0xff]   ;;  %v6497_v3 = vld [vmem:[#allocation8 + $0x168] ss:$16 sps:$4 sm:$0xff]  }
 0xb07   :  { %3400 = vmatprep.subr.bf16.mxu1 %v10770_v51  ;;  %3441 = vmatprep.subr.bf16.mxu0 %v10771_v20  ;;  %v6502_v51 = vld [vmem:[#allocation8 + $0x184] ss:$16 sps:$4 sm:$0xff]   ;;  %v6505_v20 = vld [vmem:[#allocation8 + $0x18c] ss:$16 sps:$4 sm:$0xff]  }
 0xb0a   :  { %3401 = vmatpush1.bf16.msra.mxu1 %v10772_v25  ;;  %3442 = vmatpush1.bf16.msra.mxu0 %v10773_v59  ;;  %v6500_v25 = vld [vmem:[#allocation8 + $0x180] ss:$16 sps:$4 sm:$0xff]   ;;  %v6503_v59 = vld [vmem:[#allocation8 + $0x188] ss:$16 sps:$4 sm:$0xff]  }
 0xb0b   :  { %3402 = vmatprep.subr.bf16.mxu1 %v10774_v39  ;;  %3443 = vmatprep.subr.bf16.mxu0 %v10775_v40  ;;  %v6508_v39 = vld [vmem:[#allocation8 + $0x1a4] ss:$16 sps:$4 sm:$0xff]   ;;  %v6511_v40 = vld [vmem:[#allocation8 + $0x1ac] ss:$16 sps:$4 sm:$0xff]  }
 0xb0e   :  { %3403 = vmatpush1.bf16.msra.mxu1 %v10776_v32  ;;  %3444 = vmatpush1.bf16.msra.mxu0 %v10777_v54  ;;  %v6506_v32 = vld [vmem:[#allocation8 + $0x1a0] ss:$16 sps:$4 sm:$0xff]   ;;  %v6509_v54 = vld [vmem:[#allocation8 + $0x1a8] ss:$16 sps:$4 sm:$0xff]  }
 0xb0f   :  { %3404 = vmatprep.subr.bf16.mxu1 %v10778_v36  ;;  %3445 = vmatprep.subr.bf16.mxu0 %v10779_v56  ;;  %v6514_v36 = vld [vmem:[#allocation8 + $0x1c4] ss:$16 sps:$4 sm:$0xff]   ;;  %v6517_v56 = vld [vmem:[#allocation8 + $0x1cc] ss:$16 sps:$4 sm:$0xff]  }
 0xb12   :  { %3405 = vmatpush1.bf16.msra.mxu1 %v10780_v63  ;;  %3446 = vmatpush1.bf16.msra.mxu0 %v10781_v30  ;;  %v6512_v63 = vld [vmem:[#allocation8 + $0x1c0] ss:$16 sps:$4 sm:$0xff]   ;;  %v6515_v30 = vld [vmem:[#allocation8 + $0x1c8] ss:$16 sps:$4 sm:$0xff]  }
 0xb13   :  { %3944 = vmatprep.subr.bf16.mxu1 %v6430_v7  ;;  %4017 = vmatprep.subr.bf16.mxu0 %v6433_v27  ;;  %v6523_v7 = vld [vmem:[#allocation8 + $0x1ec] ss:$16 sps:$4 sm:$0xff]   ;;  %v6521_v27 = vld [vmem:[#allocation8 + $0x1e8] ss:$16 sps:$4 sm:$0xff]  }
 0xb15   :  { %3407 = vmatmul.mubr.bf16.vlgmr.msra.gmra.mrb[84].mxu1 %v9180_v21  ;;  %3448 = vmatmul.mubr.bf16.vlgmr.msra.gmra.mrb[100].mxu0 %v9180_v21  ;;  %v6484_v21 = vld [vmem:[#allocation8 + $0x124] ss:$16 sps:$4 sm:$0xff]  }
 0xb16   :  { %3945 = vmatpush1.bf16.msra.mxu1 %v6428_v31  ;;  %4018 = vmatpush1.bf16.msra.mxu0 %v6431_v11  ;;  %v6520_v31 = vld [vmem:[#allocation8 + $0x1e4] ss:$16 sps:$4 sm:$0xff]   ;;  %v6518_v11 = vld [vmem:[#allocation8 + $0x1e0] ss:$16 sps:$4 sm:$0xff]  }
 0xb17   :  { %3946 = vmatprep.subr.bf16.mxu1 %v6436_v42  ;;  %4019 = vmatprep.subr.bf16.mxu0 %v6439_v5 }
 0xb1a   :  { %3947 = vmatpush1.bf16.msra.mxu1 %v6434_v47  ;;  %4020 = vmatpush1.bf16.msra.mxu0 %v6437_v57  ;;  %v10782_v47 = vld [vmem:[#allocation115_spill] sm:$0xff] }
 0xb1b   :  { %3948 = vmatprep.subr.bf16.mxu1 %v6442_v48  ;;  %4021 = vmatprep.subr.bf16.mxu0 %v6445_v22  ;;  %v10783_v48 = vld [vmem:[#allocation116_spill] sm:$0xff] }
 0xb1e   :  { %3949 = vmatpush1.bf16.msra.mxu1 %v6440_v53  ;;  %4022 = vmatpush1.bf16.msra.mxu0 %v6443_v49 }
 0xb1f   :  { %3950 = vmatprep.subr.bf16.mxu1 %v6448_v38  ;;  %4023 = vmatprep.subr.bf16.mxu0 %v6451_v19  ;;  %v10784_v38 = vld [vmem:[#allocation117_spill] sm:$0xff] }
 0xb22   :  { %3951 = vmatpush1.bf16.msra.mxu1 %v6446_v26  ;;  %4024 = vmatpush1.bf16.msra.mxu0 %v6449_v17  ;;  %v10785_v26 = vld [vmem:[#allocation118_spill] sm:$0xff] }
 0xb23   :  { %3952 = vmatprep.subr.bf16.mxu1 %v6454_v18  ;;  %4025 = vmatprep.subr.bf16.mxu0 %v6457_v35 }
 0xb26   :  { %3953 = vmatpush1.bf16.msra.mxu1 %v6452_v43  ;;  %4026 = vmatpush1.bf16.msra.mxu0 %v6455_v16 }
 0xb27   :  { %3954 = vmatprep.subr.bf16.mxu1 %v6460_v14  ;;  %4027 = vmatprep.subr.bf16.mxu0 %v6463_v45 }
 0xb2a   :  { %3955 = vmatpush1.bf16.msra.mxu1 %v6458_v4  ;;  %4028 = vmatpush1.bf16.msra.mxu0 %v6461_v61 }
 0xb2b   :  { %3956 = vmatprep.subr.bf16.mxu1 %v6466_v41  ;;  %4029 = vmatprep.subr.bf16.mxu0 %v6469_v46 }
 0xb2e   :  { %3957 = vmatpush1.bf16.msra.mxu1 %v6464_v37  ;;  %4030 = vmatpush1.bf16.msra.mxu0 %v6467_v29 }
 0xb2f   :  { %3958 = vmatprep.subr.bf16.mxu1 %v6472_v1  ;;  %4031 = vmatprep.subr.bf16.mxu0 %v6475_v50 }
 0xb32   :  { %3959 = vmatpush1.bf16.msra.mxu1 %v6470_v44  ;;  %4032 = vmatpush1.bf16.msra.mxu0 %v6473_v52 }
 0xb33   :  { %3960 = vmatprep.subr.bf16.mxu1 %v6478_v6  ;;  %4033 = vmatprep.subr.bf16.mxu0 %v6481_v2 }
 0xb36   :  { %3961 = vmatpush1.bf16.msra.mxu1 %v6476_v62  ;;  %4034 = vmatpush1.bf16.msra.mxu0 %v6479_v0 }
 0xb37   :  { %3962 = vmatprep.subr.bf16.mxu1 %v6484_v21  ;;  %4035 = vmatprep.subr.bf16.mxu0 %v6487_v10 }
 0xb3a   :  { %3963 = vmatpush1.bf16.msra.mxu1 %v6482_v60  ;;  %4036 = vmatpush1.bf16.msra.mxu0 %v6485_v28 }
 0xb3b   :  { %3964 = vmatprep.subr.bf16.mxu1 %v6490_v8  ;;  %4037 = vmatprep.subr.bf16.mxu0 %v6493_v33 }
 0xb3e   :  { %3965 = vmatpush1.bf16.msra.mxu1 %v6488_v23  ;;  %4038 = vmatpush1.bf16.msra.mxu0 %v6491_v13  ;;  %v10787_v13 = vld [vmem:[#allocation119_spill] sm:$0xff] }
 0xb3f   :  { %3966 = vmatprep.subr.bf16.mxu1 %v6496_v15  ;;  %4039 = vmatprep.subr.bf16.mxu0 %v6499_v24  ;;  %v10788_v24 = vld [vmem:[#allocation120_spill] sm:$0xff] }
 0xb42   :  { %3967 = vmatpush1.bf16.msra.mxu1 %v6494_v12  ;;  %4040 = vmatpush1.bf16.msra.mxu0 %v6497_v3 }
 0xb43   :  { %3968 = vmatprep.subr.bf16.mxu1 %v6502_v51  ;;  %4041 = vmatprep.subr.bf16.mxu0 %v6505_v20  ;;  %v10789_v20 = vld [vmem:[#allocation121_spill] sm:$0xff] }
 0xb46   :  { %3969 = vmatpush1.bf16.msra.mxu1 %v6500_v25  ;;  %4042 = vmatpush1.bf16.msra.mxu0 %v6503_v59  ;;  %v10790_v59 = vld [vmem:[#allocation122_spill] sm:$0xff] }
 0xb47   :  { %3970 = vmatprep.subr.bf16.mxu1 %v6508_v39  ;;  %4043 = vmatprep.subr.bf16.mxu0 %v6511_v40 }
 0xb4a   :  { %3971 = vmatpush1.bf16.msra.mxu1 %v6506_v32  ;;  %4044 = vmatpush1.bf16.msra.mxu0 %v6509_v54 }
 0xb4b   :  { %3972 = vmatprep.subr.bf16.mxu1 %v6514_v36  ;;  %4045 = vmatprep.subr.bf16.mxu0 %v6517_v56 }
 0xb4e   :  { %3973 = vmatpush1.bf16.msra.mxu1 %v6512_v63  ;;  %4046 = vmatpush1.bf16.msra.mxu0 %v6515_v30 }
 0xb4f   :  { %3974 = vmatprep.subr.bf16.mxu1 %v6520_v31  ;;  %4047 = vmatprep.subr.bf16.mxu0 %v6523_v7 }
 0xb52   :  { %3975 = vmatpush1.bf16.msra.mxu1 %v6518_v11  ;;  %4048 = vmatpush1.bf16.msra.mxu0 %v6521_v27 }
 0xba8   :  { %v3326_v42 = vpop.f32.mrb[80].mxu1  ;;  %v3367_v5 = vpop.f32.mrb[96].mxu0 }
 0xba9   :  { %v3456_v57 = vadd.f32 %v3326_v42, %v10782_v47  ;;  %v3458_v22 = vadd.f32 %v3367_v5, %v10783_v48  ;;  %v3328_v53 = vpop.f32.mrb[81].mxu1  ;;  %v3369_v49 = vpop.f32.mrb[97].mxu0 }
 0xbaa   :  { %v3457_v19 = vadd.f32 %v3328_v53, %v10784_v38  ;;  %v3459_v17 = vadd.f32 %v3369_v49, %v10785_v26  ;;  %v3330_v18 = vpop.f32.mrb[82].mxu1  ;;  %v3371_v35 = vpop.f32.mrb[98].mxu0 }
 0xbab   :  { %v3464_v43 = vsub.f32 0.0, %v3456_v57  ;;  %v3331_v16 = vpop.f32.mrb[83].mxu1  ;;  %v3372_v14 = vpop.f32.mrb[99].mxu0 }
 0xbac   :  { %v3470_v45 = vsub.f32 0.0, %v3457_v19  ;;  %v3477_v41 = vsub.f32 0.0, %v3459_v17  ;;  %v10792_v16 = vld [vmem:[#allocation91_spill] sm:$0xff] }
 0xbad   :  { %v3465_v4 = vmul.f32 1.442695, %v3464_v43  ;;  %v10791_v43 = vld [vmem:[#allocation147_spill] sm:$0xff] }
 0xbae   :  { %v3471_v61 = vmul.f32 1.442695, %v3470_v45  ;;  %v3478_v46 = vmul.f32 1.442695, %v3477_v41  ;;  %v3530_v14 = vpack.c.bf16 %v10792_v16, %v10791_v43  ;;  %v10793_v45 = vld [vmem:[#allocation151_spill] sm:$0xff]  ;;  %v10807_v16 = vld [vmem:[#allocation24_spill] sm:$0xff] }
 0xbaf   :  { %6940 = vpow2.f32 %v3465_v4  ;;  %v10794_v4 = vld [vmem:[#allocation146_spill] sm:$0xff]  ;;  %v10796_v41 = vld [vmem:[#allocation143_spill] sm:$0xff] }
 0xbb0   :  { %6942 = vpow2.f32 %v3471_v61  ;;  %v3533_v61 = vpack.c.bf16 %v10794_v4, %v10793_v45 }
 0xbb1   :  { %6944 = vpow2.f32 %v3478_v46 }
 0xbb2   :  { %6946 = vtanh.f32 %v3458_v22 }
 0xbb9   :  { %v6941_v37 = vpop.eup %6940 }
 0xbba   :  { %v6943_v29 = vpop.eup %6942  ;;  %v3467_v1 = vadd.f32 1.0, %v6941_v37  ;;  %v10797_v37 = vld [vmem:[#allocation144_spill] sm:$0xff] }
 0xbbb   :  { %v3473_v50 = vadd.f32 1.0, %v6943_v29  ;;  %v6945_v44 = vpop.eup %6944  ;;  %v10798_v29 = vld [vmem:[#allocation94_spill] sm:$0xff] }
 0xbbc   :  { %6948 = vrcp.f32 %v3467_v1  ;;  %v6947_v52 = vpop.eup %6946  ;;  %v3480_v0 = vadd.f32 1.0, %v6945_v44  ;;  %v3535_v1 = vpack.c.bf16 %v10798_v29, %v10797_v37 }
 0xbbd   :  { %6950 = vrcp.f32 %v3473_v50  ;;  %v10800_v50 = vld [vmem:[#allocation150_spill] sm:$0xff] }
 0xbbe   :  { %6952 = vrcp.f32 %v3480_v0  ;;  %v10803_v0 = vmov 0  }
 0xbc6   :  { %v6949_v6 = vpop.eup %6948 }
 0xbc7   :  { %v6951_v2 = vpop.eup %6950  ;;  %v3484_v62 = vmul.f32 %v6949_v6, %v6947_v52  ;;  %v10801_v52 = vld [vmem:[#allocation92_spill] sm:$0xff] }
 0xbc8   :  { %v3483_v21 = vmul.f32 %v6951_v2, %v9161_v55  ;;  %v6953_v60 = vpop.eup %6952  ;;  %v10802_v6 = vld [vmem:[#allocation148_spill] sm:$0xff] }
 0xbc9   :  { %v3537_v2 = vpack.c.bf16 %v10802_v6, %v10801_v52 }
 0xbca   :  { %v3485_v10 = vadd.f32 %v3484_v62, %v3483_v21  ;;  %v9277_v21 = vld [vmem:[#allocation11 + $0x4] ss:$16 sps:$4 sm:$0xff]  }
 0xbcb   :  { %4307 = vmatprep.subr.bf16.mxu1 %v9277_v21 }
 0xbcc   :  { %6954 = vtanh.f32 %v3485_v10  ;;  %v9279_v10 = vld [vmem:[#allocation11 + $0xc] ss:$16 sps:$4 sm:$0xff]  }
 0xbcd   :  { %4348 = vmatprep.subr.bf16.mxu0 %v9279_v10 }
 0xbd6   :  { %v6955_v28 = vpop.eup %6954 }
 0xbd7   :  { %v9253_v8 = vmul.f32 %v6955_v28, %v6953_v60  ;;  %v9281_v60 = vld [vmem:[#allocation11] ss:$16 sps:$4 sm:$0xff]   ;;  %v9283_v28 = vld [vmem:[#allocation11 + $0x8] ss:$16 sps:$4 sm:$0xff]  }
 0xbd9   :  { %10786 = vst [vmem:[#allocation152_spill] sm:$0xff] %v9253_v8  ;;  %v3536_v62 = vpack.c.bf16 %v9253_v8, %v9172_v34  ;;  %v9289_v34 = vld [vmem:[#allocation11 + $0x24] ss:$16 sps:$4 sm:$0xff]  }
 0xbe8   :  { %v3408_v33 = vpop.f32.mrb[84].mxu1  ;;  %v3449_v23 = vpop.f32.mrb[100].mxu0 }
 0xbe9   :  { %v3460_v15 = vadd.f32 %v3408_v33, %v10787_v13  ;;  %v3462_v12 = vadd.f32 %v3449_v23, %v10788_v24  ;;  %v3410_v3 = vpop.f32.mrb[85].mxu1  ;;  %v3451_v51 = vpop.f32.mrb[101].mxu0  ;;  %v9291_v33 = vld [vmem:[#allocation11 + $0x2c] ss:$16 sps:$4 sm:$0xff]   ;;  %v9293_v23 = vld [vmem:[#allocation11 + $0x20] ss:$16 sps:$4 sm:$0xff]  }
 0xbea   :  { %v3461_v25 = vadd.f32 %v3410_v3, %v10789_v20  ;;  %v3463_v39 = vadd.f32 %v3451_v51, %v10790_v59  ;;  %v3412_v55 = vpop.f32.mrb[86].mxu1  ;;  %v3453_v40 = vpop.f32.mrb[102].mxu0  ;;  %v9295_v13 = vld [vmem:[#allocation11 + $0x28] ss:$16 sps:$4 sm:$0xff]   ;;  %v9303_v24 = vld [vmem:[#allocation11 + $0x4c] ss:$16 sps:$4 sm:$0xff]  }
 0xbeb   :  { %v3488_v32 = vsub.f32 0.0, %v3460_v15  ;;  %v3413_v54 = vpop.f32.mrb[87].mxu1  ;;  %v3454_v36 = vpop.f32.mrb[103].mxu0  ;;  %v9301_v15 = vld [vmem:[#allocation11 + $0x44] ss:$16 sps:$4 sm:$0xff]  }
 0xbec   :  { %v3494_v56 = vsub.f32 0.0, %v3461_v25  ;;  %v3501_v31 = vsub.f32 0.0, %v3463_v39  ;;  %v9307_v3 = vld [vmem:[#allocation11 + $0x48] ss:$16 sps:$4 sm:$0xff]   ;;  %v9313_v51 = vld [vmem:[#allocation11 + $0x64] ss:$16 sps:$4 sm:$0xff]  }
 0xbed   :  { %v3489_v63 = vmul.f32 1.442695, %v3488_v32  ;;  %v9315_v20 = vld [vmem:[#allocation11 + $0x6c] ss:$16 sps:$4 sm:$0xff]   ;;  %v9317_v25 = vld [vmem:[#allocation11 + $0x60] ss:$16 sps:$4 sm:$0xff]  }
 0xbee   :  { %v3495_v30 = vmul.f32 1.442695, %v3494_v56  ;;  %v3502_v7 = vmul.f32 1.442695, %v3501_v31  ;;  %v9319_v59 = vld [vmem:[#allocation11 + $0x68] ss:$16 sps:$4 sm:$0xff]  }
 0xbef   :  { %6956 = vpow2.f32 %v3489_v63  ;;  %v9325_v39 = vld [vmem:[#allocation11 + $0x84] ss:$16 sps:$4 sm:$0xff]   ;;  %v9327_v55 = vld [vmem:[#allocation11 + $0x8c] ss:$16 sps:$4 sm:$0xff]   ;;  %v9329_v40 = vld [vmem:[#allocation11 + $0x80] ss:$16 sps:$4 sm:$0xff]  }
 0xbf0   :  { %6958 = vpow2.f32 %v3495_v30  ;;  %v9331_v32 = vld [vmem:[#allocation11 + $0x88] ss:$16 sps:$4 sm:$0xff]   ;;  %v9335_v54 = vld [vmem:[#allocation11 + $0xa4] ss:$16 sps:$4 sm:$0xff]   ;;  %v9337_v36 = vld [vmem:[#allocation11 + $0xac] ss:$16 sps:$4 sm:$0xff]  }
 0xbf1   :  { %6960 = vpow2.f32 %v3502_v7  ;;  %v9341_v56 = vld [vmem:[#allocation11 + $0xa0] ss:$16 sps:$4 sm:$0xff]   ;;  %v9343_v63 = vld [vmem:[#allocation11 + $0xa8] ss:$16 sps:$4 sm:$0xff]   ;;  %v9347_v30 = vld [vmem:[#allocation11 + $0xc4] ss:$16 sps:$4 sm:$0xff]  }
 0xbf2   :  { %6962 = vtanh.f32 %v3462_v12  ;;  %v9305_v12 = vld [vmem:[#allocation11 + $0x40] ss:$16 sps:$4 sm:$0xff]   ;;  %v9349_v31 = vld [vmem:[#allocation11 + $0xcc] ss:$16 sps:$4 sm:$0xff]  }
 0xbf3   :  { %v9353_v7 = vld [vmem:[#allocation11 + $0xc0] ss:$16 sps:$4 sm:$0xff]  }
 0xbf9   :  { %v6957_v11 = vpop.eup %6956 }
 0xbfa   :  { %v6959_v27 = vpop.eup %6958  ;;  %v3491_v42 = vadd.f32 1.0, %v6957_v11  ;;  %v9355_v11 = vld [vmem:[#allocation11 + $0xc8] ss:$16 sps:$4 sm:$0xff]  }
 0xbfb   :  { %v3497_v5 = vadd.f32 1.0, %v6959_v27  ;;  %v6961_v47 = vpop.eup %6960  ;;  %v9359_v27 = vld [vmem:[#allocation11 + $0xe4] ss:$16 sps:$4 sm:$0xff]  }
 0xbfc   :  { %6964 = vrcp.f32 %v3491_v42  ;;  %v6963_v57 = vpop.eup %6962  ;;  %v3504_v49 = vadd.f32 1.0, %v6961_v47  ;;  %v9361_v42 = vld [vmem:[#allocation11 + $0xec] ss:$16 sps:$4 sm:$0xff]   ;;  %v9367_v47 = vld [vmem:[#allocation11 + $0xe8] ss:$16 sps:$4 sm:$0xff]  }
 0xbfd   :  { %6966 = vrcp.f32 %v3497_v5  ;;  %v9365_v5 = vld [vmem:[#allocation11 + $0xe0] ss:$16 sps:$4 sm:$0xff]  }
 0xbfe   :  { %6968 = vrcp.f32 %v3504_v49 }
 0xc06   :  { %v6965_v48 = vpop.eup %6964 }
 0xc07   :  { %v6967_v22 = vpop.eup %6966  ;;  %v3508_v53 = vmul.f32 %v6965_v48, %v6963_v57  ;;  %v3602_v57 = vld [vmem:[%s9738_s8] sm:$0xf] }
 0xc08   :  { %v3507_v38 = vmul.f32 %v6967_v22, %v9169_v58  ;;  %v6969_v26 = vpop.eup %6968  ;;  %v10795_v58 = vld [vmem:[#allocation93_spill] sm:$0xff] }
 0xc09   :  { %v3532_v46 = vpack.c.bf16 %v10796_v41, %v10795_v58  ;;  %v10804_v48 = vld [vmem:[#allocation21_spill] sm:$0xff] }
 0xc0a   :  { %v3509_v19 = vadd.f32 %v3508_v53, %v3507_v38  ;;  %v9379_v22 = vrot.slane %v3602_v57, %v10804_v48  ;;  %v10805_v53 = vld [vmem:[#allocation23_spill] sm:$0xff] }
 0xc0b   :  { %v9382_v49 = vrot.slane %v3602_v57, %v10805_v53 }
 0xc0c   :  { %6970 = vtanh.f32 %v3509_v19 }
 0xc16   :  { %v6971_v17 = vpop.eup %6970 }
 0xc17   :  { %v3511_v18 = vmul.f32 %v6971_v17, %v6969_v26  ;;  %v10806_v26 = vld [vmem:[#allocation22_spill] sm:$0xff] }
 0xc18   :  { %v9385_v17 = vrot.slane %v3602_v57, %v10806_v26 }
 0xc19   :  { %v3531_v35 = vpack.c.bf16 %v9174_v9, %v3511_v18  ;;  %v10799_v9 = vld [vmem:[#allocation145_spill] sm:$0xff] }
 0xc1a   :  { %v3534_v44 = vpack.c.bf16 %v10800_v50, %v10799_v9 }
 0xc1b   :  { %3976 = vmatprep.mubr.bf16.mxu1 %v3531_v35  ;;  %4049 = vmatprep.mubr.bf16.mxu0 %v3531_v35 }
 0xc1c   :  { %3977 = vmatmul.mubr.bf16.vlgmr.msra.gmra.mrb[88].mxu1 %v3530_v14  ;;  %4050 = vmatmul.mubr.bf16.vlgmr.msra.gmra.mrb[104].mxu0 %v3530_v14  ;;  %v9389_v14 = vrot.slane %v3602_v57, %v10807_v16 }
 0xc1d   :  { %3986 = vmatprep.mubr.bf16.mxu1 %v3533_v61  ;;  %4059 = vmatprep.mubr.bf16.mxu0 %v3533_v61 }
 0xc1e   :  { %4308 = vmatpush1.bf16.msra.mxu1 %v9281_v60  ;;  %4349 = vmatpush1.bf16.msra.mxu0 %v9283_v28 }
 0xc1f   :  { %4309 = vmatprep.subr.bf16.mxu1 %v9289_v34  ;;  %4350 = vmatprep.subr.bf16.mxu0 %v9291_v33 }
 0xc22   :  { %4310 = vmatpush1.bf16.msra.mxu1 %v9293_v23  ;;  %4351 = vmatpush1.bf16.msra.mxu0 %v9295_v13 }
 0xc23   :  { %4311 = vmatprep.subr.bf16.mxu1 %v9301_v15  ;;  %4352 = vmatprep.subr.bf16.mxu0 %v9303_v24 }
 0xc24   :  { %3987 = vmatmul.mubr.bf16.gmra.mrb[92].mxu1 %v3532_v46  ;;  %4060 = vmatmul.mubr.bf16.gmra.mrb[108].mxu0 %v3532_v46 }
 0xc25   :  { %3996 = vmatprep.mubr.bf16.mxu1 %v3535_v1  ;;  %4069 = vmatprep.mubr.bf16.mxu0 %v3535_v1 }
 0xc26   :  { %4312 = vmatpush1.bf16.msra.mxu1 %v9305_v12  ;;  %4353 = vmatpush1.bf16.msra.mxu0 %v9307_v3 }
 0xc27   :  { %4313 = vmatprep.subr.bf16.mxu1 %v9313_v51  ;;  %4354 = vmatprep.subr.bf16.mxu0 %v9315_v20 }
 0xc2a   :  { %4314 = vmatpush1.bf16.msra.mxu1 %v9317_v25  ;;  %4355 = vmatpush1.bf16.msra.mxu0 %v9319_v59 }
 0xc2b   :  { %4315 = vmatprep.subr.bf16.mxu1 %v9325_v39  ;;  %4356 = vmatprep.subr.bf16.mxu0 %v9327_v55 }
 0xc2c   :  { %3997 = vmatmul.mubr.bf16.gmra.mrb[96].mxu1 %v3534_v44  ;;  %4070 = vmatmul.mubr.bf16.gmra.mrb[112].mxu0 %v3534_v44 }
 0xc2d   :  { %4006 = vmatprep.mubr.bf16.mxu1 %v3537_v2  ;;  %4079 = vmatprep.mubr.bf16.mxu0 %v3537_v2 }
 0xc2e   :  { %4316 = vmatpush1.bf16.msra.mxu1 %v9329_v40  ;;  %4357 = vmatpush1.bf16.msra.mxu0 %v9331_v32 }
 0xc2f   :  { %4317 = vmatprep.subr.bf16.mxu1 %v9335_v54  ;;  %4358 = vmatprep.subr.bf16.mxu0 %v9337_v36 }
 0xc32   :  { %4318 = vmatpush1.bf16.msra.mxu1 %v9341_v56  ;;  %4359 = vmatpush1.bf16.msra.mxu0 %v9343_v63 }
 0xc33   :  { %4319 = vmatprep.subr.bf16.mxu1 %v9347_v30  ;;  %4360 = vmatprep.subr.bf16.mxu0 %v9349_v31 }
 0xc34   :  { %4007 = vmatmul.mubr.bf16.gmra.mrb[100].mxu1 %v3536_v62  ;;  %4080 = vmatmul.mubr.bf16.gmra.mrb[116].mxu0 %v3536_v62 }
 0xc35   :  { %4339 = vmatprep.mubr.bf16.mxu1 %v10803_v0  ;;  %4380 = vmatprep.mubr.bf16.mxu0 %v10803_v0 }
 0xc36   :  { %4320 = vmatpush1.bf16.msra.mxu1 %v9353_v7  ;;  %4361 = vmatpush1.bf16.msra.mxu0 %v9355_v11 }
 0xc37   :  { %4321 = vmatprep.subr.bf16.mxu1 %v9359_v27  ;;  %4362 = vmatprep.subr.bf16.mxu0 %v9361_v42 }
 0xc3a   :  { %4322 = vmatpush1.bf16.msra.mxu1 %v9365_v5  ;;  %4363 = vmatpush1.bf16.msra.mxu0 %v9367_v47 }
 0xc3b   :  { %4418 = vmatprep.subr.bf16.mxu1 %v9277_v21  ;;  %4459 = vmatprep.subr.bf16.mxu0 %v9279_v10 }
 0xcef   :  { %v3978_v38 = vpop.f32.mrb[88].mxu1  ;;  %v4051_v19 = vpop.f32.mrb[104].mxu0 }
 0xcf0   :  { %v3979_v18 = vadd.f32 %v3978_v38, %v9379_v22  ;;  %v3980_v35 = vpop.f32.mrb[89].mxu1  ;;  %v4053_v43 = vpop.f32.mrb[105].mxu0 }
 0xcf1   :  { %v3981_v45 = vadd.f32 %v3980_v35, %v9382_v49  ;;  %v3982_v4 = vpop.f32.mrb[90].mxu1  ;;  %v4055_v61 = vpop.f32.mrb[106].mxu0  ;;  %v4054_v6 = vadd.f32 %v4053_v43, %v9389_v14 }
 0xcf2   :  { %v4122_v58 = vsub.f32 0.0, %v3979_v18  ;;  %v9393_v41 = vadd.f32 %v3982_v4, %v9379_v22  ;;  %v9396_v46 = vadd.f32 %v4055_v61, %v9385_v17  ;;  %v3984_v37 = vpop.f32.mrb[91].mxu1  ;;  %v4057_v29 = vpop.f32.mrb[107].mxu0 }
 0xcf3   :  { %v4128_v1 = vsub.f32 0.0, %v3981_v45  ;;  %v9399_v9 = vadd.f32 %v3984_v37, %v9382_v49  ;;  %v9402_v50 = vadd.f32 %v4057_v29, %v9389_v14  ;;  %v4135_v45 = vsub.f32 0.0, %v4054_v6 }
 0xcf4   :  { %v4123_v44 = vmul.f32 1.442695, %v4122_v58 }
 0xcf5   :  { %v4129_v52 = vmul.f32 1.442695, %v4128_v1 }
 0xcf6   :  { %6972 = vpow2.f32 %v4123_v44 }
 0xcf7   :  { %6974 = vpow2.f32 %v4129_v52  ;;  %v3988_v2 = vpop.f32.mrb[92].mxu1  ;;  %v4061_v62 = vpop.f32.mrb[108].mxu0 }
 0xcf8   :  { %v9406_v57 = vadd.f32 %v3988_v2, %v9379_v22  ;;  %v9409_v38 = vadd.f32 %v4061_v62, %v9385_v17  ;;  %v3990_v18 = vpop.f32.mrb[93].mxu1  ;;  %v4063_v35 = vpop.f32.mrb[109].mxu0  ;;  %v4136_v2 = vmul.f32 1.442695, %v4135_v45  ;;  %v4052_v62 = vadd.f32 %v4051_v19, %v9385_v17 }
 0xcf9   :  { %v9412_v4 = vadd.f32 %v3990_v18, %v9382_v49  ;;  %v9415_v61 = vadd.f32 %v4063_v35, %v9389_v14  ;;  %v3992_v43 = vpop.f32.mrb[94].mxu1  ;;  %v4065_v58 = vpop.f32.mrb[110].mxu0 }
 0xcfa   :  { %v9418_v37 = vadd.f32 %v3992_v43, %v9379_v22  ;;  %v9421_v29 = vadd.f32 %v4065_v58, %v9385_v17  ;;  %v3994_v1 = vpop.f32.mrb[95].mxu1  ;;  %v4067_v44 = vpop.f32.mrb[111].mxu0  ;;  %6976 = vpow2.f32 %v4136_v2 }
 0xcfb   :  { %v9424_v52 = vadd.f32 %v3994_v1, %v9382_v49  ;;  %v9427_v6 = vadd.f32 %v4067_v44, %v9389_v14  ;;  %6978 = vtanh.f32 %v4052_v62 }
 0xcfd   :  { %10808 = vst [vmem:[#allocation153_spill] sm:$0xff] %v9427_v6 }
 0xcff   :  { %v3998_v18 = vpop.f32.mrb[96].mxu1  ;;  %v4071_v35 = vpop.f32.mrb[112].mxu0 }
 0xd00   :  { %v6973_v26 = vpop.eup %6972  ;;  %v9431_v43 = vadd.f32 %v3998_v18, %v9379_v22  ;;  %v9434_v58 = vadd.f32 %v4071_v35, %v9385_v17  ;;  %v4000_v16 = vpop.f32.mrb[97].mxu1 }
 0xd01   :  { %v4073_v53 = vpop.f32.mrb[113].mxu0  ;;  %v6975_v48 = vpop.eup %6974  ;;  %v4125_v1 = vadd.f32 1.0, %v6973_v26  ;;  %v9437_v44 = vadd.f32 %v4000_v16, %v9382_v49 }
 0xd02   :  { %10809 = vst [vmem:[#allocation154_spill] sm:$0xff] %v9431_v43  ;;  %10810 = vst [vmem:[#allocation155_spill] sm:$0xff] %v9434_v58  ;;  %v9440_v45 = vadd.f32 %v4073_v53, %v9389_v14  ;;  %v4002_v19 = vpop.f32.mrb[98].mxu1  ;;  %v4075_v8 = vpop.f32.mrb[114].mxu0  ;;  %v4131_v6 = vadd.f32 1.0, %v6975_v48 }
 0xd03   :  { %v9443_v18 = vadd.f32 %v4002_v19, %v9379_v22  ;;  %v9446_v35 = vadd.f32 %v4075_v8, %v9385_v17  ;;  %v4004_v58 = vpop.f32.mrb[99].mxu1  ;;  %v4077_v43 = vpop.f32.mrb[115].mxu0  ;;  %6980 = vrcp.f32 %v4125_v1 }
 0xd04   :  { %10811 = vst [vmem:[#allocation156_spill] sm:$0xff] %v9440_v45  ;;  %v9449_v26 = vadd.f32 %v4004_v58, %v9382_v49  ;;  %v9452_v16 = vadd.f32 %v4077_v43, %v9389_v14  ;;  %6982 = vrcp.f32 %v4131_v6 }
 0xd05   :  { %10812 = vst [vmem:[#allocation157_spill] sm:$0xff] %v9443_v18  ;;  %10813 = vst [vmem:[#allocation158_spill] sm:$0xff] %v9446_v35 }
 0xd06   :  { %10814 = vst [vmem:[#allocation159_spill] sm:$0xff] %v9449_v26  ;;  %10815 = vst [vmem:[#allocation160_spill] sm:$0xff] %v9452_v16 }
 0xd07   :  { %v4008_v53 = vpop.f32.mrb[100].mxu1  ;;  %v4081_v2 = vpop.f32.mrb[116].mxu0 }
 0xd08   :  { %v9455_v48 = vadd.f32 %v4008_v53, %v9379_v22  ;;  %v9458_v62 = vadd.f32 %v4081_v2, %v9385_v17  ;;  %v4010_v8 = vpop.f32.mrb[101].mxu1  ;;  %v4083_v19 = vpop.f32.mrb[117].mxu0 }
 0xd09   :  { %v9461_v35 = vadd.f32 %v4010_v8, %v9382_v49  ;;  %v9464_v58 = vadd.f32 %v4083_v19, %v9389_v14  ;;  %v4012_v1 = vpop.f32.mrb[102].mxu1  ;;  %v4085_v43 = vpop.f32.mrb[118].mxu0 }
 0xd0a   :  { %10816 = vst [vmem:[#allocation185_spill] sm:$0xff] %v9455_v48  ;;  %10817 = vst [vmem:[#allocation186_spill] sm:$0xff] %v9458_v62  ;;  %v9467_v6 = vadd.f32 %v4012_v1, %v9379_v22  ;;  %v9470_v16 = vadd.f32 %v4085_v43, %v9385_v17  ;;  %v4014_v53 = vpop.f32.mrb[103].mxu1  ;;  %v4087_v48 = vpop.f32.mrb[119].mxu0 }
 0xd0b   :  { %10818 = vst [vmem:[#allocation95_spill] sm:$0xff] %v9461_v35  ;;  %10819 = vst [vmem:[#allocation96_spill] sm:$0xff] %v9464_v58  ;;  %v6977_v2 = vpop.eup %6976  ;;  %v9473_v62 = vadd.f32 %v4014_v53, %v9382_v49  ;;  %v9476_v8 = vadd.f32 %v4087_v48, %v9389_v14 }
 0xd0c   :  { %10820 = vst [vmem:[#allocation97_spill] sm:$0xff] %v9470_v16  ;;  %v6979_v35 = vpop.eup %6978  ;;  %v4138_v18 = vadd.f32 1.0, %v6977_v2 }
 0xd0d   :  { %10821 = vst [vmem:[#allocation98_spill] sm:$0xff] %v9473_v62  ;;  %10822 = vst [vmem:[#allocation139_spill] sm:$0xff] %v9476_v8  ;;  %v6981_v19 = vpop.eup %6980 }
 0xd0e   :  { %v6983_v58 = vpop.eup %6982  ;;  %v4142_v26 = vmul.f32 %v6981_v19, %v6979_v35  ;;  %6984 = vrcp.f32 %v4138_v18 }
 0xd0f   :  { %v4141_v45 = vmul.f32 0.0, %v6983_v58 }
 0xd11   :  { %v9478_v22 = vadd.f32 %v4142_v26, %v4141_v45 }
 0xd13   :  { %6986 = vtanh.f32 %v9478_v22 }
 0xd18   :  { %v6985_v17 = vpop.eup %6984 }
 0xd1d   :  { %v6987_v1 = vpop.eup %6986 }
 0xd1e   :  { %v4145_v43 = vmul.f32 %v6987_v1, %v6985_v17 }
 0xd20   :  { %v4146_v16 = vpack.c.bf16 %v4145_v43, %v4145_v43 }
 0xd22   :  { %4340 = vmatmul.mubr.bf16.vlgmr.msra.gmra.mrb[104].mxu1 %v4146_v16  ;;  %4381 = vmatmul.mubr.bf16.vlgmr.msra.gmra.mrb[120].mxu0 %v4146_v16 }
 0xd23   :  { %4419 = vmatpush1.bf16.msra.mxu1 %v9281_v60  ;;  %4460 = vmatpush1.bf16.msra.mxu0 %v9283_v28 }
 0xd24   :  { %4420 = vmatprep.subr.bf16.mxu1 %v9289_v34  ;;  %4461 = vmatprep.subr.bf16.mxu0 %v9291_v33 }
 0xd25   :  { %4450 = vmatprep.mubr.bf16.mxu1 %v10803_v0  ;;  %4491 = vmatprep.mubr.bf16.mxu0 %v10803_v0 }
 0xd27   :  { %4421 = vmatpush1.bf16.msra.mxu1 %v9293_v23  ;;  %4462 = vmatpush1.bf16.msra.mxu0 %v9295_v13 }
 0xd28   :  { %4422 = vmatprep.subr.bf16.mxu1 %v9301_v15  ;;  %4463 = vmatprep.subr.bf16.mxu0 %v9303_v24 }
 0xd2b   :  { %4423 = vmatpush1.bf16.msra.mxu1 %v9305_v12  ;;  %4464 = vmatpush1.bf16.msra.mxu0 %v9307_v3 }
 0xd2c   :  { %4424 = vmatprep.subr.bf16.mxu1 %v9313_v51  ;;  %4465 = vmatprep.subr.bf16.mxu0 %v9315_v20 }
 0xd2f   :  { %4425 = vmatpush1.bf16.msra.mxu1 %v9317_v25  ;;  %4466 = vmatpush1.bf16.msra.mxu0 %v9319_v59 }
 0xd30   :  { %4426 = vmatprep.subr.bf16.mxu1 %v9325_v39  ;;  %4467 = vmatprep.subr.bf16.mxu0 %v9327_v55 }
 0xd33   :  { %4427 = vmatpush1.bf16.msra.mxu1 %v9329_v40  ;;  %4468 = vmatpush1.bf16.msra.mxu0 %v9331_v32 }
 0xd34   :  { %4428 = vmatprep.subr.bf16.mxu1 %v9335_v54  ;;  %4469 = vmatprep.subr.bf16.mxu0 %v9337_v36 }
 0xd37   :  { %4429 = vmatpush1.bf16.msra.mxu1 %v9341_v56  ;;  %4470 = vmatpush1.bf16.msra.mxu0 %v9343_v63 }
 0xd38   :  { %4430 = vmatprep.subr.bf16.mxu1 %v9347_v30  ;;  %4471 = vmatprep.subr.bf16.mxu0 %v9349_v31 }
 0xd3b   :  { %4431 = vmatpush1.bf16.msra.mxu1 %v9353_v7  ;;  %4472 = vmatpush1.bf16.msra.mxu0 %v9355_v11 }
 0xd3c   :  { %4432 = vmatprep.subr.bf16.mxu1 %v9359_v27  ;;  %4473 = vmatprep.subr.bf16.mxu0 %v9361_v42 }
 0xd3f   :  { %4433 = vmatpush1.bf16.msra.mxu1 %v9365_v5  ;;  %4474 = vmatpush1.bf16.msra.mxu0 %v9367_v47 }
 0xd40   :  { %4529 = vmatprep.subr.bf16.mxu1 %v9277_v21  ;;  %4570 = vmatprep.subr.bf16.mxu0 %v9279_v10 }
 0xdf5   :  { %v4341_v49 = vpop.f32.mrb[104].mxu1  ;;  %v4382_v14 = vpop.f32.mrb[120].mxu0 }
 0xdf6   :  { %v4389_v45 = vadd.f32 %v4341_v49, %v9393_v41  ;;  %v4391_v18 = vadd.f32 %v4382_v14, %v9396_v46  ;;  %v4343_v35 = vpop.f32.mrb[105].mxu1  ;;  %v4384_v26 = vpop.f32.mrb[121].mxu0 }
 0xdf7   :  { %v4390_v16 = vadd.f32 %v4343_v35, %v9399_v9  ;;  %v4392_v48 = vadd.f32 %v4384_v26, %v9402_v50  ;;  %v4345_v58 = vpop.f32.mrb[106].mxu1  ;;  %v4386_v53 = vpop.f32.mrb[122].mxu0 }
 0xdf8   :  { %v4393_v2 = vsub.f32 0.0, %v4389_v45  ;;  %v4346_v19 = vpop.f32.mrb[107].mxu1  ;;  %v4387_v17 = vpop.f32.mrb[123].mxu0 }
 0xdf9   :  { %v4399_v1 = vsub.f32 0.0, %v4390_v16  ;;  %v4406_v62 = vsub.f32 0.0, %v4392_v48 }
 0xdfa   :  { %v4394_v43 = vmul.f32 1.442695, %v4393_v2 }
 0xdfb   :  { %v4400_v8 = vmul.f32 1.442695, %v4399_v1  ;;  %v4407_v41 = vmul.f32 1.442695, %v4406_v62 }
 0xdfc   :  { %6988 = vpow2.f32 %v4394_v43 }
 0xdfd   :  { %6990 = vpow2.f32 %v4400_v8 }
 0xdfe   :  { %6992 = vpow2.f32 %v4407_v41 }
 0xdff   :  { %6994 = vtanh.f32 %v4391_v18 }
 0xe06   :  { %v6989_v49 = vpop.eup %6988 }
 0xe07   :  { %v6991_v46 = vpop.eup %6990  ;;  %v4396_v14 = vadd.f32 1.0, %v6989_v49 }
 0xe08   :  { %v4402_v9 = vadd.f32 1.0, %v6991_v46  ;;  %v6993_v50 = vpop.eup %6992 }
 0xe09   :  { %6996 = vrcp.f32 %v4396_v14  ;;  %v6995_v35 = vpop.eup %6994  ;;  %v4409_v16 = vadd.f32 1.0, %v6993_v50 }
 0xe0a   :  { %6998 = vrcp.f32 %v4402_v9 }
 0xe0b   :  { %7000 = vrcp.f32 %v4409_v16 }
 0xe13   :  { %v6997_v45 = vpop.eup %6996 }
 0xe14   :  { %v6999_v26 = vpop.eup %6998  ;;  %v4413_v58 = vmul.f32 %v6997_v45, %v6995_v35 }
 0xe15   :  { %v4412_v53 = vmul.f32 %v6999_v26, %v9478_v22  ;;  %v7001_v62 = vpop.eup %7000 }
 0xe17   :  { %v9520_v2 = vadd.f32 %v4413_v58, %v4412_v53 }
 0xe19   :  { %7002 = vtanh.f32 %v9520_v2 }
 0xe23   :  { %v7003_v8 = vpop.eup %7002 }
 0xe24   :  { %v4416_v48 = vmul.f32 %v7003_v8, %v7001_v62 }
 0xe26   :  { %v4417_v18 = vpack.c.bf16 %v4416_v48, %v4416_v48 }
 0xe28   :  { %4451 = vmatmul.mubr.bf16.vlgmr.msra.gmra.mrb[108].mxu1 %v4417_v18  ;;  %4492 = vmatmul.mubr.bf16.vlgmr.msra.gmra.mrb[124].mxu0 %v4417_v18 }
 0xe29   :  { %4530 = vmatpush1.bf16.msra.mxu1 %v9281_v60  ;;  %4571 = vmatpush1.bf16.msra.mxu0 %v9283_v28 }
 0xe2a   :  { %4531 = vmatprep.subr.bf16.mxu1 %v9289_v34  ;;  %4572 = vmatprep.subr.bf16.mxu0 %v9291_v33 }
 0xe2b   :  { %4561 = vmatprep.mubr.bf16.mxu1 %v10803_v0  ;;  %4602 = vmatprep.mubr.bf16.mxu0 %v10803_v0 }
 0xe2d   :  { %4532 = vmatpush1.bf16.msra.mxu1 %v9293_v23  ;;  %4573 = vmatpush1.bf16.msra.mxu0 %v9295_v13 }
 0xe2e   :  { %4533 = vmatprep.subr.bf16.mxu1 %v9301_v15  ;;  %4574 = vmatprep.subr.bf16.mxu0 %v9303_v24 }
 0xe31   :  { %4534 = vmatpush1.bf16.msra.mxu1 %v9305_v12  ;;  %4575 = vmatpush1.bf16.msra.mxu0 %v9307_v3 }
 0xe32   :  { %4535 = vmatprep.subr.bf16.mxu1 %v9313_v51  ;;  %4576 = vmatprep.subr.bf16.mxu0 %v9315_v20 }
 0xe35   :  { %4536 = vmatpush1.bf16.msra.mxu1 %v9317_v25  ;;  %4577 = vmatpush1.bf16.msra.mxu0 %v9319_v59 }
 0xe36   :  { %4537 = vmatprep.subr.bf16.mxu1 %v9325_v39  ;;  %4578 = vmatprep.subr.bf16.mxu0 %v9327_v55 }
 0xe39   :  { %4538 = vmatpush1.bf16.msra.mxu1 %v9329_v40  ;;  %4579 = vmatpush1.bf16.msra.mxu0 %v9331_v32 }
 0xe3a   :  { %4539 = vmatprep.subr.bf16.mxu1 %v9335_v54  ;;  %4580 = vmatprep.subr.bf16.mxu0 %v9337_v36 }
 0xe3d   :  { %4540 = vmatpush1.bf16.msra.mxu1 %v9341_v56  ;;  %4581 = vmatpush1.bf16.msra.mxu0 %v9343_v63 }
 0xe3e   :  { %4541 = vmatprep.subr.bf16.mxu1 %v9347_v30  ;;  %4582 = vmatprep.subr.bf16.mxu0 %v9349_v31 }
 0xe41   :  { %4542 = vmatpush1.bf16.msra.mxu1 %v9353_v7  ;;  %4583 = vmatpush1.bf16.msra.mxu0 %v9355_v11 }
 0xe42   :  { %4543 = vmatprep.subr.bf16.mxu1 %v9359_v27  ;;  %4584 = vmatprep.subr.bf16.mxu0 %v9361_v42 }
 0xe45   :  { %4544 = vmatpush1.bf16.msra.mxu1 %v9365_v5  ;;  %4585 = vmatpush1.bf16.msra.mxu0 %v9367_v47 }
 0xe46   :  { %4640 = vmatprep.subr.bf16.mxu1 %v9277_v21  ;;  %4681 = vmatprep.subr.bf16.mxu0 %v9279_v10 }
 0xefb   :  { %v4452_v22 = vpop.f32.mrb[108].mxu1  ;;  %v4493_v19 = vpop.f32.mrb[124].mxu0 }
 0xefc   :  { %v4500_v17 = vadd.f32 %v4452_v22, %v9406_v57  ;;  %v4502_v1 = vadd.f32 %v4493_v19, %v9409_v38  ;;  %v4454_v43 = vpop.f32.mrb[109].mxu1  ;;  %v4495_v41 = vpop.f32.mrb[125].mxu0 }
 0xefd   :  { %v4501_v49 = vadd.f32 %v4454_v43, %v9412_v4  ;;  %v4503_v46 = vadd.f32 %v4495_v41, %v9415_v61  ;;  %v4456_v14 = vpop.f32.mrb[110].mxu1  ;;  %v4497_v9 = vpop.f32.mrb[126].mxu0 }
 0xefe   :  { %v4504_v50 = vsub.f32 0.0, %v4500_v17  ;;  %v4457_v35 = vpop.f32.mrb[111].mxu1  ;;  %v4498_v45 = vpop.f32.mrb[127].mxu0 }
 0xeff   :  { %v4510_v26 = vsub.f32 0.0, %v4501_v49  ;;  %v4517_v53 = vsub.f32 0.0, %v4503_v46 }
 0xf00   :  { %v4505_v58 = vmul.f32 1.442695, %v4504_v50 }
 0xf01   :  { %v4511_v16 = vmul.f32 1.442695, %v4510_v26  ;;  %v4518_v57 = vmul.f32 1.442695, %v4517_v53 }
 0xf02   :  { %7004 = vpow2.f32 %v4505_v58 }
 0xf03   :  { %7006 = vpow2.f32 %v4511_v16  ;;  %v10823_v16 = vld [vmem:[#allocation153_spill] sm:$0xff] }
 0xf04   :  { %7008 = vpow2.f32 %v4518_v57 }
 0xf05   :  { %7010 = vtanh.f32 %v4502_v1 }
 0xf0c   :  { %v7005_v62 = vpop.eup %7004 }
 0xf0d   :  { %v7007_v38 = vpop.eup %7006  ;;  %v4507_v8 = vadd.f32 1.0, %v7005_v62 }
 0xf0e   :  { %v4513_v4 = vadd.f32 1.0, %v7007_v38  ;;  %v7009_v61 = vpop.eup %7008 }
 0xf0f   :  { %7012 = vrcp.f32 %v4507_v8  ;;  %v7011_v48 = vpop.eup %7010  ;;  %v4520_v17 = vadd.f32 1.0, %v7009_v61 }
 0xf10   :  { %7014 = vrcp.f32 %v4513_v4 }
 0xf11   :  { %7016 = vrcp.f32 %v4520_v17 }
 0xf19   :  { %v7013_v18 = vpop.eup %7012 }
 0xf1a   :  { %v7015_v22 = vpop.eup %7014  ;;  %v4524_v19 = vmul.f32 %v7013_v18, %v7011_v48 }
 0xf1b   :  { %v4523_v43 = vmul.f32 %v7015_v22, %v9520_v2  ;;  %v7017_v49 = vpop.eup %7016 }
 0xf1d   :  { %v9562_v41 = vadd.f32 %v4524_v19, %v4523_v43 }
 0xf1f   :  { %7018 = vtanh.f32 %v9562_v41 }
 0xf29   :  { %v7019_v46 = vpop.eup %7018 }
 0xf2a   :  { %v4527_v14 = vmul.f32 %v7019_v46, %v7017_v49 }
 0xf2c   :  { %v4528_v1 = vpack.c.bf16 %v4527_v14, %v4527_v14 }
 0xf2e   :  { %4562 = vmatmul.mubr.bf16.vlgmr.msra.gmra.mrb[112].mxu1 %v4528_v1  ;;  %4603 = vmatmul.mubr.bf16.vlgmr.msra.gmra.mrb[128].mxu0 %v4528_v1 }
 0xf2f   :  { %4641 = vmatpush1.bf16.msra.mxu1 %v9281_v60  ;;  %4682 = vmatpush1.bf16.msra.mxu0 %v9283_v28 }
 0xf30   :  { %4642 = vmatprep.subr.bf16.mxu1 %v9289_v34  ;;  %4683 = vmatprep.subr.bf16.mxu0 %v9291_v33 }
 0xf31   :  { %4672 = vmatprep.mubr.bf16.mxu1 %v10803_v0  ;;  %4713 = vmatprep.mubr.bf16.mxu0 %v10803_v0 }
 0xf33   :  { %4643 = vmatpush1.bf16.msra.mxu1 %v9293_v23  ;;  %4684 = vmatpush1.bf16.msra.mxu0 %v9295_v13 }
 0xf34   :  { %4644 = vmatprep.subr.bf16.mxu1 %v9301_v15  ;;  %4685 = vmatprep.subr.bf16.mxu0 %v9303_v24 }
 0xf37   :  { %4645 = vmatpush1.bf16.msra.mxu1 %v9305_v12  ;;  %4686 = vmatpush1.bf16.msra.mxu0 %v9307_v3 }
 0xf38   :  { %4646 = vmatprep.subr.bf16.mxu1 %v9313_v51  ;;  %4687 = vmatprep.subr.bf16.mxu0 %v9315_v20 }
 0xf3b   :  { %4647 = vmatpush1.bf16.msra.mxu1 %v9317_v25  ;;  %4688 = vmatpush1.bf16.msra.mxu0 %v9319_v59 }
 0xf3c   :  { %4648 = vmatprep.subr.bf16.mxu1 %v9325_v39  ;;  %4689 = vmatprep.subr.bf16.mxu0 %v9327_v55 }
 0xf3f   :  { %4649 = vmatpush1.bf16.msra.mxu1 %v9329_v40  ;;  %4690 = vmatpush1.bf16.msra.mxu0 %v9331_v32 }
 0xf40   :  { %4650 = vmatprep.subr.bf16.mxu1 %v9335_v54  ;;  %4691 = vmatprep.subr.bf16.mxu0 %v9337_v36 }
 0xf43   :  { %4651 = vmatpush1.bf16.msra.mxu1 %v9341_v56  ;;  %4692 = vmatpush1.bf16.msra.mxu0 %v9343_v63 }
 0xf44   :  { %4652 = vmatprep.subr.bf16.mxu1 %v9347_v30  ;;  %4693 = vmatprep.subr.bf16.mxu0 %v9349_v31 }
 0xf47   :  { %4653 = vmatpush1.bf16.msra.mxu1 %v9353_v7  ;;  %4694 = vmatpush1.bf16.msra.mxu0 %v9355_v11 }
 0xf48   :  { %4654 = vmatprep.subr.bf16.mxu1 %v9359_v27  ;;  %4695 = vmatprep.subr.bf16.mxu0 %v9361_v42 }
 0xf4b   :  { %4655 = vmatpush1.bf16.msra.mxu1 %v9365_v5  ;;  %4696 = vmatpush1.bf16.msra.mxu0 %v9367_v47 }
 0xf4c   :  { %4751 = vmatprep.subr.bf16.mxu1 %v9277_v21  ;;  %4792 = vmatprep.subr.bf16.mxu0 %v9279_v10 }
0x1001   :  { %v4563_v2 = vpop.f32.mrb[112].mxu1  ;;  %v4604_v9 = vpop.f32.mrb[128].mxu0 }
0x1002   :  { %v4611_v50 = vadd.f32 %v4563_v2, %v9418_v37  ;;  %v4613_v35 = vadd.f32 %v4604_v9, %v9421_v29  ;;  %v4565_v45 = vpop.f32.mrb[113].mxu1  ;;  %v4606_v26 = vpop.f32.mrb[129].mxu0 }
0x1003   :  { %v4612_v58 = vadd.f32 %v4565_v45, %v9424_v52  ;;  %v4614_v53 = vadd.f32 %v4606_v26, %v10823_v16  ;;  %v4567_v57 = vpop.f32.mrb[114].mxu1  ;;  %v4608_v62 = vpop.f32.mrb[130].mxu0 }
0x1004   :  { %v4615_v38 = vsub.f32 0.0, %v4611_v50  ;;  %v4568_v8 = vpop.f32.mrb[115].mxu1  ;;  %v4609_v4 = vpop.f32.mrb[131].mxu0  ;;  %v10825_v62 = vld [vmem:[#allocation155_spill] sm:$0xff] }
0x1005   :  { %v4621_v61 = vsub.f32 0.0, %v4612_v58  ;;  %v4628_v22 = vsub.f32 0.0, %v4614_v53  ;;  %v10824_v53 = vld [vmem:[#allocation154_spill] sm:$0xff] }
0x1006   :  { %v4616_v48 = vmul.f32 1.442695, %v4615_v38 }
0x1007   :  { %v4622_v18 = vmul.f32 1.442695, %v4621_v61  ;;  %v4629_v37 = vmul.f32 1.442695, %v4628_v22 }
0x1008   :  { %7020 = vpow2.f32 %v4616_v48  ;;  %v10826_v48 = vld [vmem:[#allocation156_spill] sm:$0xff] }
0x1009   :  { %7022 = vpow2.f32 %v4622_v18 }
0x100a   :  { %7024 = vpow2.f32 %v4629_v37 }
0x100b   :  { %7026 = vtanh.f32 %v4613_v35 }
0x1012   :  { %v7021_v19 = vpop.eup %7020 }
0x1013   :  { %v7023_v29 = vpop.eup %7022  ;;  %v4618_v17 = vadd.f32 1.0, %v7021_v19 }
0x1014   :  { %v4624_v52 = vadd.f32 1.0, %v7023_v29  ;;  %v7025_v43 = vpop.eup %7024 }
0x1015   :  { %7028 = vrcp.f32 %v4618_v17  ;;  %v7027_v49 = vpop.eup %7026  ;;  %v4631_v2 = vadd.f32 1.0, %v7025_v43 }
0x1016   :  { %7030 = vrcp.f32 %v4624_v52 }
0x1017   :  { %7032 = vrcp.f32 %v4631_v2 }
0x101f   :  { %v7029_v46 = vpop.eup %7028 }
0x1020   :  { %v7031_v14 = vpop.eup %7030  ;;  %v4635_v1 = vmul.f32 %v7029_v46, %v7027_v49 }
0x1021   :  { %v4634_v9 = vmul.f32 %v7031_v14, %v9562_v41  ;;  %v7033_v45 = vpop.eup %7032 }
0x1023   :  { %v9604_v50 = vadd.f32 %v4635_v1, %v4634_v9 }
0x1025   :  { %7034 = vtanh.f32 %v9604_v50 }
0x102f   :  { %v7035_v26 = vpop.eup %7034 }
0x1030   :  { %v4638_v58 = vmul.f32 %v7035_v26, %v7033_v45 }
0x1032   :  { %v4639_v35 = vpack.c.bf16 %v4638_v58, %v4638_v58 }
0x1034   :  { %4673 = vmatmul.mubr.bf16.vlgmr.msra.gmra.mrb[116].mxu1 %v4639_v35  ;;  %4714 = vmatmul.mubr.bf16.vlgmr.msra.gmra.mrb[132].mxu0 %v4639_v35 }
0x1035   :  { %4752 = vmatpush1.bf16.msra.mxu1 %v9281_v60  ;;  %4793 = vmatpush1.bf16.msra.mxu0 %v9283_v28 }
0x1036   :  { %4753 = vmatprep.subr.bf16.mxu1 %v9289_v34  ;;  %4794 = vmatprep.subr.bf16.mxu0 %v9291_v33 }
0x1037   :  { %4783 = vmatprep.mubr.bf16.mxu1 %v10803_v0  ;;  %4824 = vmatprep.mubr.bf16.mxu0 %v10803_v0 }
0x1039   :  { %4754 = vmatpush1.bf16.msra.mxu1 %v9293_v23  ;;  %4795 = vmatpush1.bf16.msra.mxu0 %v9295_v13 }
0x103a   :  { %4755 = vmatprep.subr.bf16.mxu1 %v9301_v15  ;;  %4796 = vmatprep.subr.bf16.mxu0 %v9303_v24 }
0x103d   :  { %4756 = vmatpush1.bf16.msra.mxu1 %v9305_v12  ;;  %4797 = vmatpush1.bf16.msra.mxu0 %v9307_v3 }
0x103e   :  { %4757 = vmatprep.subr.bf16.mxu1 %v9313_v51  ;;  %4798 = vmatprep.subr.bf16.mxu0 %v9315_v20 }
0x1041   :  { %4758 = vmatpush1.bf16.msra.mxu1 %v9317_v25  ;;  %4799 = vmatpush1.bf16.msra.mxu0 %v9319_v59 }
0x1042   :  { %4759 = vmatprep.subr.bf16.mxu1 %v9325_v39  ;;  %4800 = vmatprep.subr.bf16.mxu0 %v9327_v55 }
0x1045   :  { %4760 = vmatpush1.bf16.msra.mxu1 %v9329_v40  ;;  %4801 = vmatpush1.bf16.msra.mxu0 %v9331_v32 }
0x1046   :  { %4761 = vmatprep.subr.bf16.mxu1 %v9335_v54  ;;  %4802 = vmatprep.subr.bf16.mxu0 %v9337_v36 }
0x1049   :  { %4762 = vmatpush1.bf16.msra.mxu1 %v9341_v56  ;;  %4803 = vmatpush1.bf16.msra.mxu0 %v9343_v63 }
0x104a   :  { %4763 = vmatprep.subr.bf16.mxu1 %v9347_v30  ;;  %4804 = vmatprep.subr.bf16.mxu0 %v9349_v31 }
0x104d   :  { %4764 = vmatpush1.bf16.msra.mxu1 %v9353_v7  ;;  %4805 = vmatpush1.bf16.msra.mxu0 %v9355_v11 }
0x104e   :  { %4765 = vmatprep.subr.bf16.mxu1 %v9359_v27  ;;  %4806 = vmatprep.subr.bf16.mxu0 %v9361_v42 }
0x1051   :  { %4766 = vmatpush1.bf16.msra.mxu1 %v9365_v5  ;;  %4807 = vmatpush1.bf16.msra.mxu0 %v9367_v47 }
0x1052   :  { %4862 = vmatprep.subr.bf16.mxu1 %v9277_v21  ;;  %4903 = vmatprep.subr.bf16.mxu0 %v9279_v10 }
0x1107   :  { %v4674_v41 = vpop.f32.mrb[116].mxu1  ;;  %v4715_v16 = vpop.f32.mrb[132].mxu0 }
0x1108   :  { %v4722_v57 = vadd.f32 %v4674_v41, %v10824_v53  ;;  %v4724_v38 = vadd.f32 %v4715_v16, %v10825_v62  ;;  %v4676_v8 = vpop.f32.mrb[117].mxu1  ;;  %v4717_v4 = vpop.f32.mrb[133].mxu0 }
0x1109   :  { %v4723_v61 = vadd.f32 %v4676_v8, %v9437_v44  ;;  %v4725_v18 = vadd.f32 %v4717_v4, %v10826_v48  ;;  %v4678_v22 = vpop.f32.mrb[118].mxu1  ;;  %v4719_v37 = vpop.f32.mrb[134].mxu0 }
0x110a   :  { %v4726_v19 = vsub.f32 0.0, %v4722_v57  ;;  %v4679_v29 = vpop.f32.mrb[119].mxu1  ;;  %v4720_v17 = vpop.f32.mrb[135].mxu0 }
0x110b   :  { %v4732_v52 = vsub.f32 0.0, %v4723_v61  ;;  %v4739_v46 = vsub.f32 0.0, %v4725_v18  ;;  %v7117_v29 = vld [vmem:[#allocation11 + $0x8] ss:$16 sps:$4 sm:$0xff]   ;;  %v7118_v17 = vld [vmem:[#allocation11 + $0x24] ss:$16 sps:$4 sm:$0xff]  }
0x110c   :  { %v4727_v43 = vmul.f32 1.442695, %v4726_v19  ;;  %v7116_v19 = vld [vmem:[#allocation11] ss:$16 sps:$4 sm:$0xff]  }
0x110d   :  { %v4733_v49 = vmul.f32 1.442695, %v4732_v52  ;;  %v4740_v14 = vmul.f32 1.442695, %v4739_v46  ;;  %v7119_v52 = vld [vmem:[#allocation11 + $0x2c] ss:$16 sps:$4 sm:$0xff]  }
0x110e   :  { %7036 = vpow2.f32 %v4727_v43  ;;  %v7120_v43 = vld [vmem:[#allocation11 + $0x20] ss:$16 sps:$4 sm:$0xff]   ;;  %v7122_v46 = vld [vmem:[#allocation11 + $0x44] ss:$16 sps:$4 sm:$0xff]  }
0x110f   :  { %7038 = vpow2.f32 %v4733_v49  ;;  %v7121_v49 = vld [vmem:[#allocation11 + $0x28] ss:$16 sps:$4 sm:$0xff]  }
0x1110   :  { %7040 = vpow2.f32 %v4740_v14  ;;  %v7123_v14 = vld [vmem:[#allocation11 + $0x4c] ss:$16 sps:$4 sm:$0xff]  }
0x1111   :  { %7042 = vtanh.f32 %v4724_v38 }
0x1118   :  { %v7037_v1 = vpop.eup %7036 }
0x1119   :  { %v7039_v2 = vpop.eup %7038  ;;  %v4729_v9 = vadd.f32 1.0, %v7037_v1  ;;  %v7124_v1 = vld [vmem:[#allocation11 + $0x40] ss:$16 sps:$4 sm:$0xff]  }
0x111a   :  { %v4735_v44 = vadd.f32 1.0, %v7039_v2  ;;  %v7041_v45 = vpop.eup %7040  ;;  %v7125_v2 = vld [vmem:[#allocation11 + $0x48] ss:$16 sps:$4 sm:$0xff]  }
0x111b   :  { %7044 = vrcp.f32 %v4729_v9  ;;  %v7043_v26 = vpop.eup %7042  ;;  %v4742_v16 = vadd.f32 1.0, %v7041_v45  ;;  %v7126_v9 = vld [vmem:[#allocation11 + $0x64] ss:$16 sps:$4 sm:$0xff]   ;;  %v7128_v45 = vld [vmem:[#allocation11 + $0x60] ss:$16 sps:$4 sm:$0xff]  }
0x111c   :  { %7046 = vrcp.f32 %v4735_v44  ;;  %v7127_v44 = vld [vmem:[#allocation11 + $0x6c] ss:$16 sps:$4 sm:$0xff]  }
0x111d   :  { %7048 = vrcp.f32 %v4742_v16  ;;  %v7133_v16 = vld [vmem:[#allocation11 + $0x88] ss:$16 sps:$4 sm:$0xff]  }
0x1125   :  { %v7045_v58 = vpop.eup %7044 }
0x1126   :  { %v7047_v35 = vpop.eup %7046  ;;  %v4746_v41 = vmul.f32 %v7045_v58, %v7043_v26  ;;  %v7129_v26 = vld [vmem:[#allocation11 + $0x68] ss:$16 sps:$4 sm:$0xff]   ;;  %v7130_v58 = vld [vmem:[#allocation11 + $0x84] ss:$16 sps:$4 sm:$0xff]  }
0x1127   :  { %v4745_v53 = vmul.f32 %v7047_v35, %v9604_v50  ;;  %v7049_v62 = vpop.eup %7048  ;;  %v7131_v35 = vld [vmem:[#allocation11 + $0x8c] ss:$16 sps:$4 sm:$0xff]  }
0x1129   :  { %v9646_v57 = vadd.f32 %v4746_v41, %v4745_v53  ;;  %v7132_v41 = vld [vmem:[#allocation11 + $0x80] ss:$16 sps:$4 sm:$0xff]   ;;  %v7134_v53 = vld [vmem:[#allocation11 + $0xa4] ss:$16 sps:$4 sm:$0xff]  }
0x112b   :  { %7050 = vtanh.f32 %v9646_v57 }
0x1135   :  { %v7051_v8 = vpop.eup %7050 }
0x1136   :  { %v4749_v4 = vmul.f32 %v7051_v8, %v7049_v62  ;;  %v7136_v62 = vld [vmem:[#allocation11 + $0xa0] ss:$16 sps:$4 sm:$0xff]   ;;  %v7137_v8 = vld [vmem:[#allocation11 + $0xa8] ss:$16 sps:$4 sm:$0xff]  }
0x1138   :  { %v4750_v38 = vpack.c.bf16 %v4749_v4, %v4749_v4  ;;  %v7138_v4 = vld [vmem:[#allocation11 + $0xc4] ss:$16 sps:$4 sm:$0xff]  }
0x113a   :  { %4784 = vmatmul.mubr.bf16.vlgmr.msra.gmra.mrb[120].mxu1 %v4750_v38  ;;  %4825 = vmatmul.mubr.bf16.vlgmr.msra.gmra.mrb[136].mxu0 %v4750_v38  ;;  %v7139_v38 = vld [vmem:[#allocation11 + $0xcc] ss:$16 sps:$4 sm:$0xff]  }
0x113b   :  { %4863 = vmatpush1.bf16.msra.mxu1 %v9281_v60  ;;  %4904 = vmatpush1.bf16.msra.mxu0 %v9283_v28 }
0x113c   :  { %4864 = vmatprep.subr.bf16.mxu1 %v9289_v34  ;;  %4905 = vmatprep.subr.bf16.mxu0 %v9291_v33  ;;  %v10827_v34 = vld [vmem:[#allocation157_spill] sm:$0xff] }
0x113d   :  { %4894 = vmatprep.mubr.bf16.mxu1 %v10803_v0  ;;  %4935 = vmatprep.mubr.bf16.mxu0 %v10803_v0 }
0x113f   :  { %4865 = vmatpush1.bf16.msra.mxu1 %v9293_v23  ;;  %4906 = vmatpush1.bf16.msra.mxu0 %v9295_v13  ;;  %v10828_v23 = vld [vmem:[#allocation158_spill] sm:$0xff] }
0x1140   :  { %4866 = vmatprep.subr.bf16.mxu1 %v9301_v15  ;;  %4907 = vmatprep.subr.bf16.mxu0 %v9303_v24 }
0x1143   :  { %4867 = vmatpush1.bf16.msra.mxu1 %v9305_v12  ;;  %4908 = vmatpush1.bf16.msra.mxu0 %v9307_v3  ;;  %v10829_v12 = vld [vmem:[#allocation159_spill] sm:$0xff] }
0x1144   :  { %4868 = vmatprep.subr.bf16.mxu1 %v9313_v51  ;;  %4909 = vmatprep.subr.bf16.mxu0 %v9315_v20  ;;  %v10830_v51 = vld [vmem:[#allocation160_spill] sm:$0xff] }
0x1147   :  { %4869 = vmatpush1.bf16.msra.mxu1 %v9317_v25  ;;  %4910 = vmatpush1.bf16.msra.mxu0 %v9319_v59 }
0x1148   :  { %4870 = vmatprep.subr.bf16.mxu1 %v9325_v39  ;;  %4911 = vmatprep.subr.bf16.mxu0 %v9327_v55 }
0x114b   :  { %4871 = vmatpush1.bf16.msra.mxu1 %v9329_v40  ;;  %4912 = vmatpush1.bf16.msra.mxu0 %v9331_v32 }
0x114c   :  { %4872 = vmatprep.subr.bf16.mxu1 %v9335_v54  ;;  %4913 = vmatprep.subr.bf16.mxu0 %v9337_v36 }
0x114f   :  { %4873 = vmatpush1.bf16.msra.mxu1 %v9341_v56  ;;  %4914 = vmatpush1.bf16.msra.mxu0 %v9343_v63 }
0x1150   :  { %4874 = vmatprep.subr.bf16.mxu1 %v9347_v30  ;;  %4915 = vmatprep.subr.bf16.mxu0 %v9349_v31 }
0x1153   :  { %4875 = vmatpush1.bf16.msra.mxu1 %v9353_v7  ;;  %4916 = vmatpush1.bf16.msra.mxu0 %v9355_v11 }
0x1154   :  { %4876 = vmatprep.subr.bf16.mxu1 %v9359_v27  ;;  %4917 = vmatprep.subr.bf16.mxu0 %v9361_v42 }
0x1157   :  { %4877 = vmatpush1.bf16.msra.mxu1 %v9365_v5  ;;  %4918 = vmatpush1.bf16.msra.mxu0 %v9367_v47 }
0x1158   :  { %4973 = vmatprep.subr.bf16.mxu1 %v9277_v21  ;;  %5014 = vmatprep.subr.bf16.mxu0 %v9279_v10 }
0x120d   :  { %v4785_v60 = vpop.f32.mrb[120].mxu1  ;;  %v4826_v28 = vpop.f32.mrb[136].mxu0 }
0x120e   :  { %v4833_v33 = vadd.f32 %v4785_v60, %v10827_v34  ;;  %v4835_v13 = vadd.f32 %v4826_v28, %v10828_v23  ;;  %v4787_v15 = vpop.f32.mrb[121].mxu1  ;;  %v4828_v24 = vpop.f32.mrb[137].mxu0  ;;  %v7140_v60 = vld [vmem:[#allocation11 + $0xc0] ss:$16 sps:$4 sm:$0xff]   ;;  %v7141_v28 = vld [vmem:[#allocation11 + $0xc8] ss:$16 sps:$4 sm:$0xff]  }
0x120f   :  { %v4834_v3 = vadd.f32 %v4787_v15, %v10829_v12  ;;  %v4836_v20 = vadd.f32 %v4828_v24, %v10830_v51  ;;  %v4789_v25 = vpop.f32.mrb[122].mxu1  ;;  %v4830_v59 = vpop.f32.mrb[138].mxu0  ;;  %v7142_v34 = vld [vmem:[#allocation11 + $0xe4] ss:$16 sps:$4 sm:$0xff]   ;;  %v7144_v23 = vld [vmem:[#allocation11 + $0xe0] ss:$16 sps:$4 sm:$0xff]  }
0x1210   :  { %v4837_v39 = vsub.f32 0.0, %v4833_v33  ;;  %v4790_v55 = vpop.f32.mrb[123].mxu1  ;;  %v4831_v40 = vpop.f32.mrb[139].mxu0  ;;  %v7143_v33 = vld [vmem:[#allocation11 + $0xec] ss:$16 sps:$4 sm:$0xff]   ;;  %v10831_v51 = vld [vmem:[#allocation185_spill] sm:$0xff] }
0x1211   :  { %v4843_v21 = vsub.f32 0.0, %v4834_v3  ;;  %v4850_v54 = vsub.f32 0.0, %v4836_v20  ;;  %v6574_v15 = vld [vmem:[#allocation10 + $0x4] ss:$16 sps:$4 sm:$0xff]   ;;  %v6577_v24 = vld [vmem:[#allocation10 + $0xc] ss:$16 sps:$4 sm:$0xff]  }
0x1212   :  { %v4838_v32 = vmul.f32 1.442695, %v4837_v39  ;;  %v10832_v25 = vld [vmem:[#allocation186_spill] sm:$0xff]  ;;  %v10833_v40 = vld [vmem:[#allocation95_spill] sm:$0xff] }
0x1213   :  { %v4844_v10 = vmul.f32 1.442695, %v4843_v21  ;;  %v4851_v36 = vmul.f32 1.442695, %v4850_v54 }
0x1214   :  { %7052 = vpow2.f32 %v4838_v32  ;;  %v10834_v32 = vld [vmem:[#allocation96_spill] sm:$0xff] }
0x1215   :  { %7054 = vpow2.f32 %v4844_v10 }
0x1216   :  { %7056 = vpow2.f32 %v4851_v36 }
0x1217   :  { %7058 = vtanh.f32 %v4835_v13  ;;  %v7145_v13 = vld [vmem:[#allocation11 + $0xe8] ss:$16 sps:$4 sm:$0xff]  }
0x121e   :  { %v7053_v56 = vpop.eup %7052 }
0x121f   :  { %v7055_v63 = vpop.eup %7054  ;;  %v4840_v30 = vadd.f32 1.0, %v7053_v56 }
0x1220   :  { %v4846_v31 = vadd.f32 1.0, %v7055_v63  ;;  %v7057_v7 = vpop.eup %7056 }
0x1221   :  { %7060 = vrcp.f32 %v4840_v30  ;;  %v7059_v11 = vpop.eup %7058  ;;  %v4853_v47 = vadd.f32 1.0, %v7057_v7 }
0x1222   :  { %7062 = vrcp.f32 %v4846_v31 }
0x1223   :  { %7064 = vrcp.f32 %v4853_v47 }
0x122b   :  { %v7061_v27 = vpop.eup %7060 }
0x122c   :  { %v7063_v42 = vpop.eup %7062  ;;  %v4857_v5 = vmul.f32 %v7061_v27, %v7059_v11 }
0x122d   :  { %v4856_v50 = vmul.f32 %v7063_v42, %v9646_v57  ;;  %v7065_v48 = vpop.eup %7064  ;;  %v7135_v57 = vld [vmem:[#allocation11 + $0xac] ss:$16 sps:$4 sm:$0xff]  }
0x122f   :  { %v9688_v61 = vadd.f32 %v4857_v5, %v4856_v50 }
0x1231   :  { %7066 = vtanh.f32 %v9688_v61 }
0x123b   :  { %v7067_v18 = vpop.eup %7066 }
0x123c   :  { %v4860_v22 = vmul.f32 %v7067_v18, %v7065_v48 }
0x123e   :  { %v4861_v37 = vpack.c.bf16 %v4860_v22, %v4860_v22 }
0x1240   :  { %4895 = vmatmul.mubr.bf16.vlgmr.msra.gmra.mrb[124].mxu1 %v4861_v37  ;;  %4936 = vmatmul.mubr.bf16.vlgmr.msra.gmra.mrb[140].mxu0 %v4861_v37 }
0x1241   :  { %4974 = vmatpush1.bf16.msra.mxu1 %v7116_v19  ;;  %5015 = vmatpush1.bf16.msra.mxu0 %v7117_v29 }
0x1242   :  { %4975 = vmatprep.subr.bf16.mxu1 %v7118_v17  ;;  %5016 = vmatprep.subr.bf16.mxu0 %v7119_v52 }
0x1243   :  { %5005 = vmatprep.mubr.bf16.mxu1 %v10803_v0  ;;  %5046 = vmatprep.mubr.bf16.mxu0 %v10803_v0 }
0x1245   :  { %4976 = vmatpush1.bf16.msra.mxu1 %v7120_v43  ;;  %5017 = vmatpush1.bf16.msra.mxu0 %v7121_v49 }
0x1246   :  { %4977 = vmatprep.subr.bf16.mxu1 %v7122_v46  ;;  %5018 = vmatprep.subr.bf16.mxu0 %v7123_v14 }
0x1249   :  { %4978 = vmatpush1.bf16.msra.mxu1 %v7124_v1  ;;  %5019 = vmatpush1.bf16.msra.mxu0 %v7125_v2  ;;  %v6572_v1 = vld [vmem:[#allocation10] ss:$16 sps:$4 sm:$0xff]   ;;  %v6575_v2 = vld [vmem:[#allocation10 + $0x8] ss:$16 sps:$4 sm:$0xff]  }
0x124a   :  { %4979 = vmatprep.subr.bf16.mxu1 %v7126_v9  ;;  %5020 = vmatprep.subr.bf16.mxu0 %v7127_v44  ;;  %v6580_v44 = vld [vmem:[#allocation10 + $0x24] ss:$16 sps:$4 sm:$0xff]  }
0x124d   :  { %4980 = vmatpush1.bf16.msra.mxu1 %v7128_v45  ;;  %5021 = vmatpush1.bf16.msra.mxu0 %v7129_v26  ;;  %v6583_v45 = vld [vmem:[#allocation10 + $0x2c] ss:$16 sps:$4 sm:$0xff]   ;;  %v6578_v26 = vld [vmem:[#allocation10 + $0x20] ss:$16 sps:$4 sm:$0xff]  }
0x124e   :  { %4981 = vmatprep.subr.bf16.mxu1 %v7130_v58  ;;  %5022 = vmatprep.subr.bf16.mxu0 %v7131_v35  ;;  %v6581_v58 = vld [vmem:[#allocation10 + $0x28] ss:$16 sps:$4 sm:$0xff]   ;;  %v6586_v35 = vld [vmem:[#allocation10 + $0x44] ss:$16 sps:$4 sm:$0xff]  }
0x1251   :  { %4982 = vmatpush1.bf16.msra.mxu1 %v7132_v41  ;;  %5023 = vmatpush1.bf16.msra.mxu0 %v7133_v16  ;;  %v6589_v41 = vld [vmem:[#allocation10 + $0x4c] ss:$16 sps:$4 sm:$0xff]   ;;  %v6584_v16 = vld [vmem:[#allocation10 + $0x40] ss:$16 sps:$4 sm:$0xff]  }
0x1252   :  { %4983 = vmatprep.subr.bf16.mxu1 %v7134_v53  ;;  %5024 = vmatprep.subr.bf16.mxu0 %v7135_v57  ;;  %v6587_v53 = vld [vmem:[#allocation10 + $0x48] ss:$16 sps:$4 sm:$0xff]   ;;  %v6592_v57 = vld [vmem:[#allocation10 + $0x64] ss:$16 sps:$4 sm:$0xff]  }
0x1255   :  { %4984 = vmatpush1.bf16.msra.mxu1 %v7136_v62  ;;  %5025 = vmatpush1.bf16.msra.mxu0 %v7137_v8  ;;  %v6595_v62 = vld [vmem:[#allocation10 + $0x6c] ss:$16 sps:$4 sm:$0xff]   ;;  %v6590_v8 = vld [vmem:[#allocation10 + $0x60] ss:$16 sps:$4 sm:$0xff]  }
0x1256   :  { %4985 = vmatprep.subr.bf16.mxu1 %v7138_v4  ;;  %5026 = vmatprep.subr.bf16.mxu0 %v7139_v38  ;;  %v6593_v4 = vld [vmem:[#allocation10 + $0x68] ss:$16 sps:$4 sm:$0xff]   ;;  %v6598_v38 = vld [vmem:[#allocation10 + $0x84] ss:$16 sps:$4 sm:$0xff]  }
0x1259   :  { %4986 = vmatpush1.bf16.msra.mxu1 %v7140_v60  ;;  %5027 = vmatpush1.bf16.msra.mxu0 %v7141_v28  ;;  %v6601_v60 = vld [vmem:[#allocation10 + $0x8c] ss:$16 sps:$4 sm:$0xff]   ;;  %v6596_v28 = vld [vmem:[#allocation10 + $0x80] ss:$16 sps:$4 sm:$0xff]  }
0x125a   :  { %4987 = vmatprep.subr.bf16.mxu1 %v7142_v34  ;;  %5028 = vmatprep.subr.bf16.mxu0 %v7143_v33  ;;  %v6599_v34 = vld [vmem:[#allocation10 + $0x88] ss:$16 sps:$4 sm:$0xff]   ;;  %v6604_v33 = vld [vmem:[#allocation10 + $0xa4] ss:$16 sps:$4 sm:$0xff]  }
0x125d   :  { %4988 = vmatpush1.bf16.msra.mxu1 %v7144_v23  ;;  %5029 = vmatpush1.bf16.msra.mxu0 %v7145_v13  ;;  %v6607_v23 = vld [vmem:[#allocation10 + $0xac] ss:$16 sps:$4 sm:$0xff]   ;;  %v6602_v13 = vld [vmem:[#allocation10 + $0xa0] ss:$16 sps:$4 sm:$0xff]  }
0x125e   :  { %5498 = vmatprep.subr.bf16.mxu1 %v6574_v15  ;;  %5539 = vmatprep.subr.bf16.mxu0 %v6577_v24  ;;  %v6605_v15 = vld [vmem:[#allocation10 + $0xa8] ss:$16 sps:$4 sm:$0xff]   ;;  %v6610_v24 = vld [vmem:[#allocation10 + $0xc4] ss:$16 sps:$4 sm:$0xff]  }
0x1313   :  { %v4896_v12 = vpop.f32.mrb[124].mxu1  ;;  %v4937_v3 = vpop.f32.mrb[140].mxu0 }
0x1314   :  { %v4944_v20 = vadd.f32 %v4896_v12, %v10831_v51  ;;  %v4946_v59 = vadd.f32 %v4937_v3, %v10832_v25  ;;  %v4898_v39 = vpop.f32.mrb[125].mxu1  ;;  %v4939_v55 = vpop.f32.mrb[141].mxu0  ;;  %v6613_v12 = vld [vmem:[#allocation10 + $0xcc] ss:$16 sps:$4 sm:$0xff]   ;;  %v6608_v3 = vld [vmem:[#allocation10 + $0xc0] ss:$16 sps:$4 sm:$0xff]  }
0x1315   :  { %v4945_v21 = vadd.f32 %v4898_v39, %v10833_v40  ;;  %v4947_v10 = vadd.f32 %v4939_v55, %v10834_v32  ;;  %v4900_v54 = vpop.f32.mrb[126].mxu1  ;;  %v4941_v36 = vpop.f32.mrb[142].mxu0  ;;  %v6611_v51 = vld [vmem:[#allocation10 + $0xc8] ss:$16 sps:$4 sm:$0xff]   ;;  %v6619_v25 = vld [vmem:[#allocation10 + $0xec] ss:$16 sps:$4 sm:$0xff]  }
0x1316   :  { %v4948_v56 = vsub.f32 0.0, %v4944_v20  ;;  %v4901_v63 = vpop.f32.mrb[127].mxu1  ;;  %v4942_v30 = vpop.f32.mrb[143].mxu0  ;;  %v6616_v20 = vld [vmem:[#allocation10 + $0xe4] ss:$16 sps:$4 sm:$0xff]  }
0x1317   :  { %v4954_v31 = vsub.f32 0.0, %v4945_v21  ;;  %v4961_v27 = vsub.f32 0.0, %v4947_v10  ;;  %v6617_v39 = vld [vmem:[#allocation10 + $0xe8] ss:$16 sps:$4 sm:$0xff]   ;;  %v6622_v55 = vld [vmem:[#allocation10 + $0x104] ss:$16 sps:$4 sm:$0xff]  }
0x1318   :  { %v4949_v7 = vmul.f32 1.442695, %v4948_v56  ;;  %v6625_v40 = vld [vmem:[#allocation10 + $0x10c] ss:$16 sps:$4 sm:$0xff]   ;;  %v6620_v21 = vld [vmem:[#allocation10 + $0x100] ss:$16 sps:$4 sm:$0xff]  }
0x1319   :  { %v4955_v11 = vmul.f32 1.442695, %v4954_v31  ;;  %v4962_v42 = vmul.f32 1.442695, %v4961_v27  ;;  %v6623_v32 = vld [vmem:[#allocation10 + $0x108] ss:$16 sps:$4 sm:$0xff]  }
0x131a   :  { %7068 = vpow2.f32 %v4949_v7  ;;  %v6628_v10 = vld [vmem:[#allocation10 + $0x124] ss:$16 sps:$4 sm:$0xff]   ;;  %v6631_v54 = vld [vmem:[#allocation10 + $0x12c] ss:$16 sps:$4 sm:$0xff]   ;;  %v6626_v36 = vld [vmem:[#allocation10 + $0x120] ss:$16 sps:$4 sm:$0xff]  }
0x131b   :  { %7070 = vpow2.f32 %v4955_v11  ;;  %v6629_v56 = vld [vmem:[#allocation10 + $0x128] ss:$16 sps:$4 sm:$0xff]   ;;  %v6634_v63 = vld [vmem:[#allocation10 + $0x144] ss:$16 sps:$4 sm:$0xff]   ;;  %v6637_v30 = vld [vmem:[#allocation10 + $0x14c] ss:$16 sps:$4 sm:$0xff]  }
0x131c   :  { %7072 = vpow2.f32 %v4962_v42  ;;  %v6632_v31 = vld [vmem:[#allocation10 + $0x140] ss:$16 sps:$4 sm:$0xff]   ;;  %v6635_v7 = vld [vmem:[#allocation10 + $0x148] ss:$16 sps:$4 sm:$0xff]   ;;  %v6640_v11 = vld [vmem:[#allocation10 + $0x164] ss:$16 sps:$4 sm:$0xff]  }
0x131d   :  { %7074 = vtanh.f32 %v4946_v59  ;;  %v6614_v59 = vld [vmem:[#allocation10 + $0xe0] ss:$16 sps:$4 sm:$0xff]   ;;  %v6643_v27 = vld [vmem:[#allocation10 + $0x16c] ss:$16 sps:$4 sm:$0xff]  }
0x131e   :  { %v6638_v42 = vld [vmem:[#allocation10 + $0x160] ss:$16 sps:$4 sm:$0xff]  }
0x1324   :  { %v7069_v5 = vpop.eup %7068 }
0x1325   :  { %v7071_v47 = vpop.eup %7070  ;;  %v4951_v50 = vadd.f32 1.0, %v7069_v5  ;;  %v6641_v5 = vld [vmem:[#allocation10 + $0x168] ss:$16 sps:$4 sm:$0xff]  }
0x1326   :  { %v4957_v48 = vadd.f32 1.0, %v7071_v47  ;;  %v7073_v18 = vpop.eup %7072  ;;  %v6646_v47 = vld [vmem:[#allocation10 + $0x184] ss:$16 sps:$4 sm:$0xff]  }
0x1327   :  { %7076 = vrcp.f32 %v4951_v50  ;;  %v7075_v22 = vpop.eup %7074  ;;  %v4964_v17 = vadd.f32 1.0, %v7073_v18  ;;  %v6649_v50 = vld [vmem:[#allocation10 + $0x18c] ss:$16 sps:$4 sm:$0xff]   ;;  %v6647_v18 = vld [vmem:[#allocation10 + $0x188] ss:$16 sps:$4 sm:$0xff]  }
0x1328   :  { %7078 = vrcp.f32 %v4957_v48  ;;  %v6644_v48 = vld [vmem:[#allocation10 + $0x180] ss:$16 sps:$4 sm:$0xff]  }
0x1329   :  { %7080 = vrcp.f32 %v4964_v17  ;;  %v6658_v17 = vld [vmem:[#allocation10 + $0x1c4] ss:$16 sps:$4 sm:$0xff]  }
0x1331   :  { %v7077_v37 = vpop.eup %7076 }
0x1332   :  { %v7079_v19 = vpop.eup %7078  ;;  %v4968_v29 = vmul.f32 %v7077_v37, %v7075_v22  ;;  %v6652_v22 = vld [vmem:[#allocation10 + $0x1a4] ss:$16 sps:$4 sm:$0xff]   ;;  %v6655_v37 = vld [vmem:[#allocation10 + $0x1ac] ss:$16 sps:$4 sm:$0xff]  }
0x1333   :  { %v4967_v52 = vmul.f32 %v7079_v19, %v9688_v61  ;;  %v7081_v49 = vpop.eup %7080  ;;  %v10835_v61 = vld [vmem:[#allocation149_spill] sm:$0xff] }
0x1334   :  { %v6650_v19 = vld [vmem:[#allocation10 + $0x1a0] ss:$16 sps:$4 sm:$0xff]  }
0x1335   :  { %v9698_v43 = vadd.f32 %v4968_v29, %v4967_v52  ;;  %v6653_v29 = vld [vmem:[#allocation10 + $0x1a8] ss:$16 sps:$4 sm:$0xff]   ;;  %v6661_v52 = vld [vmem:[#allocation10 + $0x1cc] ss:$16 sps:$4 sm:$0xff]  }
0x1337   :  { %7082 = vtanh.f32 %v9698_v43 }
0x1341   :  { %v7083_v46 = vpop.eup %7082 }
0x1342   :  { %v4971_v14 = vmul.f32 %v7083_v46, %v7081_v49  ;;  %v6656_v49 = vld [vmem:[#allocation10 + $0x1c0] ss:$16 sps:$4 sm:$0xff]   ;;  %v6659_v46 = vld [vmem:[#allocation10 + $0x1c8] ss:$16 sps:$4 sm:$0xff]  }
0x1344   :  { %v4972_v9 = vpack.c.bf16 %v4971_v14, %v4971_v14  ;;  %v6664_v14 = vld [vmem:[#allocation10 + $0x1e4] ss:$16 sps:$4 sm:$0xff]  }
0x1346   :  { %5006 = vmatmul.mubr.bf16.vlgmr.msra.gmra.mrb[128].mxu1 %v4972_v9  ;;  %5047 = vmatmul.mubr.bf16.vlgmr.msra.gmra.mrb[144].mxu0 %v4972_v9  ;;  %v6665_v9 = vld [vmem:[#allocation10 + $0x1e8] ss:$16 sps:$4 sm:$0xff]  }
0x1347   :  { %5499 = vmatpush1.bf16.msra.mxu1 %v6572_v1  ;;  %5540 = vmatpush1.bf16.msra.mxu0 %v6575_v2  ;;  %v6667_v1 = vld [vmem:[#allocation10 + $0x1ec] ss:$16 sps:$4 sm:$0xff]   ;;  %v6662_v2 = vld [vmem:[#allocation10 + $0x1e0] ss:$16 sps:$4 sm:$0xff]  }
0x1348   :  { %5530 = vmatprep.mubr.bf16.mxu1 %v10835_v61  ;;  %5571 = vmatprep.mubr.bf16.mxu0 %v10835_v61  ;;  %v6673_v61 = vld [vmem:[#allocation13 + $0x14] ss:$8 sps:$4 sm:$0xff]  }
0x1349   :  { %5500 = vmatprep.subr.bf16.mxu1 %v6580_v44  ;;  %5541 = vmatprep.subr.bf16.mxu0 %v6583_v45  ;;  %v10836_v44 = vld [vmem:[#allocation152_spill] sm:$0xff] }
0x134a   :  { %v6322_v45 = vpack.c.bf16 %v10836_v44, %v10836_v44 }
0x134b   :  { %5501 = vmatpush1.bf16.msra.mxu1 %v6578_v26  ;;  %5542 = vmatpush1.bf16.msra.mxu0 %v6581_v58  ;;  %v6670_v26 = vld [vmem:[#allocation13 + $0x4] ss:$8 sps:$4 sm:$0xff]   ;;  %v6668_v58 = vld [vmem:[#allocation13] ss:$8 sps:$4 sm:$0xff]  }
0x134c   :  { %5502 = vmatprep.subr.bf16.mxu1 %v6586_v35  ;;  %5543 = vmatprep.subr.bf16.mxu0 %v6589_v41  ;;  %v6671_v35 = vld [vmem:[#allocation13 + $0x10] ss:$8 sps:$4 sm:$0xff]   ;;  %v6676_v41 = vld [vmem:[#allocation13 + $0x24] ss:$8 sps:$4 sm:$0xff]  }
0x134f   :  { %5503 = vmatpush1.bf16.msra.mxu1 %v6584_v16  ;;  %5544 = vmatpush1.bf16.msra.mxu0 %v6587_v53  ;;  %v6674_v16 = vld [vmem:[#allocation13 + $0x20] ss:$8 sps:$4 sm:$0xff]   ;;  %v6679_v53 = vld [vmem:[#allocation13 + $0x34] ss:$8 sps:$4 sm:$0xff]  }
0x1350   :  { %5504 = vmatprep.subr.bf16.mxu1 %v6592_v57  ;;  %5545 = vmatprep.subr.bf16.mxu0 %v6595_v62  ;;  %v6677_v57 = vld [vmem:[#allocation13 + $0x30] ss:$8 sps:$4 sm:$0xff]   ;;  %v6682_v62 = vld [vmem:[#allocation13 + $0x44] ss:$8 sps:$4 sm:$0xff]  }
0x1353   :  { %5505 = vmatpush1.bf16.msra.mxu1 %v6590_v8  ;;  %5546 = vmatpush1.bf16.msra.mxu0 %v6593_v4  ;;  %v6680_v8 = vld [vmem:[#allocation13 + $0x40] ss:$8 sps:$4 sm:$0xff]   ;;  %v6683_v4 = vld [vmem:[#allocation13 + $0x50] ss:$8 sps:$4 sm:$0xff]  }
0x1354   :  { %5506 = vmatprep.subr.bf16.mxu1 %v6598_v38  ;;  %5547 = vmatprep.subr.bf16.mxu0 %v6601_v60  ;;  %v6688_v38 = vld [vmem:[#allocation13 + $0x64] ss:$8 sps:$4 sm:$0xff]   ;;  %v6686_v60 = vld [vmem:[#allocation13 + $0x60] ss:$8 sps:$4 sm:$0xff]  }
0x1357   :  { %5507 = vmatpush1.bf16.msra.mxu1 %v6596_v28  ;;  %5548 = vmatpush1.bf16.msra.mxu0 %v6599_v34  ;;  %v6691_v28 = vld [vmem:[#allocation13 + $0x74] ss:$8 sps:$4 sm:$0xff]   ;;  %v6689_v34 = vld [vmem:[#allocation13 + $0x70] ss:$8 sps:$4 sm:$0xff]  }
0x1358   :  { %5508 = vmatprep.subr.bf16.mxu1 %v6604_v33  ;;  %5549 = vmatprep.subr.bf16.mxu0 %v6607_v23  ;;  %v6694_v33 = vld [vmem:[#allocation14 + $0x4] ss:$8 sps:$4 sm:$0xff]   ;;  %v6692_v23 = vld [vmem:[#allocation14] ss:$8 sps:$4 sm:$0xff]  }
0x135b   :  { %5509 = vmatpush1.bf16.msra.mxu1 %v6602_v13  ;;  %5550 = vmatpush1.bf16.msra.mxu0 %v6605_v15  ;;  %v6697_v13 = vld [vmem:[#allocation14 + $0x14] ss:$8 sps:$4 sm:$0xff]   ;;  %v6695_v15 = vld [vmem:[#allocation14 + $0x10] ss:$8 sps:$4 sm:$0xff]  }
0x135c   :  { %5510 = vmatprep.subr.bf16.mxu1 %v6610_v24  ;;  %5551 = vmatprep.subr.bf16.mxu0 %v6613_v12  ;;  %v6700_v24 = vld [vmem:[#allocation14 + $0x24] ss:$8 sps:$4 sm:$0xff]   ;;  %v6698_v12 = vld [vmem:[#allocation14 + $0x20] ss:$8 sps:$4 sm:$0xff]  }
0x135f   :  { %5511 = vmatpush1.bf16.msra.mxu1 %v6608_v3  ;;  %5552 = vmatpush1.bf16.msra.mxu0 %v6611_v51  ;;  %v6703_v3 = vld [vmem:[#allocation14 + $0x34] ss:$8 sps:$4 sm:$0xff]   ;;  %v6701_v51 = vld [vmem:[#allocation14 + $0x30] ss:$8 sps:$4 sm:$0xff]  }
0x1360   :  { %5512 = vmatprep.subr.bf16.mxu1 %v6616_v20  ;;  %5553 = vmatprep.subr.bf16.mxu0 %v6619_v25  ;;  %v6706_v20 = vld [vmem:[#allocation14 + $0x44] ss:$8 sps:$4 sm:$0xff]   ;;  %v6704_v25 = vld [vmem:[#allocation14 + $0x40] ss:$8 sps:$4 sm:$0xff]  }
0x1363   :  { %5513 = vmatpush1.bf16.msra.mxu1 %v6614_v59  ;;  %5554 = vmatpush1.bf16.msra.mxu0 %v6617_v39  ;;  %v6709_v59 = vld [vmem:[#allocation14 + $0x54] ss:$8 sps:$4 sm:$0xff]   ;;  %v6707_v39 = vld [vmem:[#allocation14 + $0x50] ss:$8 sps:$4 sm:$0xff]  }
0x1364   :  { %5514 = vmatprep.subr.bf16.mxu1 %v6622_v55  ;;  %5555 = vmatprep.subr.bf16.mxu0 %v6625_v40  ;;  %v6712_v55 = vld [vmem:[#allocation14 + $0x64] ss:$8 sps:$4 sm:$0xff]   ;;  %v6710_v40 = vld [vmem:[#allocation14 + $0x60] ss:$8 sps:$4 sm:$0xff]  }
0x1367   :  { %5515 = vmatpush1.bf16.msra.mxu1 %v6620_v21  ;;  %5556 = vmatpush1.bf16.msra.mxu0 %v6623_v32  ;;  %v6715_v21 = vld [vmem:[#allocation14 + $0x74] ss:$8 sps:$4 sm:$0xff]   ;;  %v6713_v32 = vld [vmem:[#allocation14 + $0x70] ss:$8 sps:$4 sm:$0xff]  }
0x1368   :  { %5516 = vmatprep.subr.bf16.mxu1 %v6628_v10  ;;  %5557 = vmatprep.subr.bf16.mxu0 %v6631_v54 }
0x136b   :  { %5517 = vmatpush1.bf16.msra.mxu1 %v6626_v36  ;;  %5558 = vmatpush1.bf16.msra.mxu0 %v6629_v56  ;;  %v10837_v56 = vld [vmem:[#allocation97_spill] sm:$0xff] }
0x136c   :  { %5518 = vmatprep.subr.bf16.mxu1 %v6634_v63  ;;  %5559 = vmatprep.subr.bf16.mxu0 %v6637_v30 }
0x136f   :  { %5519 = vmatpush1.bf16.msra.mxu1 %v6632_v31  ;;  %5560 = vmatpush1.bf16.msra.mxu0 %v6635_v7  ;;  %v10838_v7 = vld [vmem:[#allocation98_spill] sm:$0xff] }
0x1370   :  { %5520 = vmatprep.subr.bf16.mxu1 %v6640_v11  ;;  %5561 = vmatprep.subr.bf16.mxu0 %v6643_v27  ;;  %v10839_v27 = vld [vmem:[#allocation139_spill] sm:$0xff] }
0x1373   :  { %5521 = vmatpush1.bf16.msra.mxu1 %v6638_v42  ;;  %5562 = vmatpush1.bf16.msra.mxu0 %v6641_v5 }
0x1374   :  { %5522 = vmatprep.subr.bf16.mxu1 %v6646_v47  ;;  %5563 = vmatprep.subr.bf16.mxu0 %v6649_v50 }
0x1377   :  { %5523 = vmatpush1.bf16.msra.mxu1 %v6644_v48  ;;  %5564 = vmatpush1.bf16.msra.mxu0 %v6647_v18 }
0x1378   :  { %5524 = vmatprep.subr.bf16.mxu1 %v6652_v22  ;;  %5565 = vmatprep.subr.bf16.mxu0 %v6655_v37 }
0x137b   :  { %5525 = vmatpush1.bf16.msra.mxu1 %v6650_v19  ;;  %5566 = vmatpush1.bf16.msra.mxu0 %v6653_v29 }
0x137c   :  { %5526 = vmatprep.subr.bf16.mxu1 %v6658_v17  ;;  %5567 = vmatprep.subr.bf16.mxu0 %v6661_v52 }
0x137f   :  { %5527 = vmatpush1.bf16.msra.mxu1 %v6656_v49  ;;  %5568 = vmatpush1.bf16.msra.mxu0 %v6659_v46 }
0x1380   :  { %5528 = vmatprep.subr.bf16.mxu1 %v6664_v14  ;;  %5569 = vmatprep.subr.bf16.mxu0 %v6667_v1 }
0x1383   :  { %5529 = vmatpush1.bf16.msra.mxu1 %v6662_v2  ;;  %5570 = vmatpush1.bf16.msra.mxu0 %v6665_v9 }
0x1384   :  { %5838 = vmatprep.subr.bf16.mxu0 %v6670_v26  ;;  %5717 = vmatprep.subr.bf16.mxu1 %v6694_v33  ;;  %v10842_v33 = vld [vmem:[#allocation24_spill] sm:$0xff] }
0x1386   :  { %5531 = vmatmul.mubr.bf16.vlgmr.msra.gmra.mrb[132].mxu1 %v6322_v45  ;;  %5572 = vmatmul.mubr.bf16.vlgmr.msra.gmra.mrb[148].mxu0 %v6322_v45 }
0x1387   :  { %5870 = vmatprep.mubr.bf16.mxu0 %v10803_v0  ;;  %5749 = vmatprep.mubr.bf16.mxu1 %v10803_v0  ;;  %v6685_v0 = vld [vmem:[#allocation13 + $0x54] ss:$8 sps:$4 sm:$0xff]  }
0x1388   :  { %5839 = vmatpush1.bf16.msra.mxu0 %v6668_v58  ;;  %5718 = vmatpush1.bf16.msra.mxu1 %v6692_v23 }
0x1389   :  { %5840 = vmatprep.subr.bf16.mxu0 %v6673_v61  ;;  %5719 = vmatprep.subr.bf16.mxu1 %v6697_v13 }
0x138c   :  { %5841 = vmatpush1.bf16.msra.mxu0 %v6671_v35  ;;  %5720 = vmatpush1.bf16.msra.mxu1 %v6695_v15 }
0x138d   :  { %5842 = vmatprep.subr.bf16.mxu0 %v6676_v41  ;;  %5721 = vmatprep.subr.bf16.mxu1 %v6700_v24 }
0x1390   :  { %5843 = vmatpush1.bf16.msra.mxu0 %v6674_v16  ;;  %5722 = vmatpush1.bf16.msra.mxu1 %v6698_v12 }
0x1391   :  { %5844 = vmatprep.subr.bf16.mxu0 %v6679_v53  ;;  %5723 = vmatprep.subr.bf16.mxu1 %v6703_v3  ;;  %v5152_v53 = vld [vmem:[%s9739_s9] sm:$0xf] }
0x1392   :  { %v5169_v23 = vrot.slane %v5152_v53, %v10842_v33 }
0x1394   :  { %5845 = vmatpush1.bf16.msra.mxu0 %v6677_v57  ;;  %5724 = vmatpush1.bf16.msra.mxu1 %v6701_v51  ;;  %v10840_v57 = vld [vmem:[#allocation21_spill] sm:$0xff] }
0x1395   :  { %5846 = vmatprep.subr.bf16.mxu0 %v6682_v62  ;;  %5725 = vmatprep.subr.bf16.mxu1 %v6706_v20  ;;  %v5157_v62 = vrot.slane %v5152_v53, %v10840_v57 }
0x1398   :  { %5847 = vmatpush1.bf16.msra.mxu0 %v6680_v8  ;;  %5726 = vmatpush1.bf16.msra.mxu1 %v6704_v25  ;;  %v10841_v8 = vld [vmem:[#allocation23_spill] sm:$0xff] }
0x1399   :  { %5848 = vmatprep.subr.bf16.mxu0 %v6685_v0  ;;  %5727 = vmatprep.subr.bf16.mxu1 %v6709_v59  ;;  %v5161_v0 = vrot.slane %v5152_v53, %v10841_v8 }
0x139c   :  { %5849 = vmatpush1.bf16.msra.mxu0 %v6683_v4  ;;  %5728 = vmatpush1.bf16.msra.mxu1 %v6707_v39 }
0x139d   :  { %5850 = vmatprep.subr.bf16.mxu0 %v6688_v38  ;;  %5729 = vmatprep.subr.bf16.mxu1 %v6712_v55  ;;  %v10843_v55 = vld [vmem:[#allocation22_spill] sm:$0xff] }
0x13a0   :  { %5851 = vmatpush1.bf16.msra.mxu0 %v6686_v60  ;;  %5730 = vmatpush1.bf16.msra.mxu1 %v6710_v40  ;;  %v5165_v40 = vrot.slane %v5152_v53, %v10843_v55 }
0x13a1   :  { %5852 = vmatprep.subr.bf16.mxu0 %v6691_v28  ;;  %5731 = vmatprep.subr.bf16.mxu1 %v6715_v21 }
0x13a4   :  { %5853 = vmatpush1.bf16.msra.mxu0 %v6689_v34  ;;  %5732 = vmatpush1.bf16.msra.mxu1 %v6713_v32 }
0x1419   :  { %v5007_v10 = vpop.f32.mrb[128].mxu1  ;;  %v5048_v54 = vpop.f32.mrb[144].mxu0 }
0x141a   :  { %v5055_v36 = vadd.f32 %v5007_v10, %v9467_v6  ;;  %v5057_v63 = vadd.f32 %v5048_v54, %v10837_v56  ;;  %v5009_v30 = vpop.f32.mrb[129].mxu1  ;;  %v5050_v31 = vpop.f32.mrb[145].mxu0 }
0x141b   :  { %v5056_v11 = vadd.f32 %v5009_v30, %v10838_v7  ;;  %v5058_v42 = vadd.f32 %v5050_v31, %v10839_v27  ;;  %v5011_v5 = vpop.f32.mrb[130].mxu1  ;;  %v5052_v47 = vpop.f32.mrb[146].mxu0 }
0x141c   :  { %v5059_v50 = vsub.f32 0.0, %v5055_v36  ;;  %v5012_v48 = vpop.f32.mrb[131].mxu1  ;;  %v5053_v18 = vpop.f32.mrb[147].mxu0 }
0x141d   :  { %v5065_v22 = vsub.f32 0.0, %v5056_v11  ;;  %v5072_v29 = vsub.f32 0.0, %v5058_v42 }
0x141e   :  { %v5060_v37 = vmul.f32 1.442695, %v5059_v50 }
0x141f   :  { %v5066_v19 = vmul.f32 1.442695, %v5065_v22  ;;  %v5073_v6 = vmul.f32 1.442695, %v5072_v29 }
0x1420   :  { %7084 = vpow2.f32 %v5060_v37 }
0x1421   :  { %7086 = vpow2.f32 %v5066_v19 }
0x1422   :  { %7088 = vpow2.f32 %v5073_v6  ;;  %v5879_v6 = vld [vmem:[%s9742_s12] sm:$0x3] }
0x1423   :  { %7090 = vtanh.f32 %v5057_v63 }
0x142a   :  { %v7085_v17 = vpop.eup %7084 }
0x142b   :  { %v7087_v52 = vpop.eup %7086  ;;  %v5062_v49 = vadd.f32 1.0, %v7085_v17  ;;  %v5884_v17 = vrot.slane %v5879_v6, %v10840_v57 }
0x142c   :  { %v5068_v46 = vadd.f32 1.0, %v7087_v52  ;;  %v7089_v14 = vpop.eup %7088 }
0x142d   :  { %7092 = vrcp.f32 %v5062_v49  ;;  %v7091_v1 = vpop.eup %7090  ;;  %v5075_v45 = vadd.f32 1.0, %v7089_v14  ;;  %v5888_v49 = vrot.slane %v5879_v6, %v10841_v8 }
0x142e   :  { %7094 = vrcp.f32 %v5068_v46 }
0x142f   :  { %7096 = vrcp.f32 %v5075_v45 }
0x1437   :  { %v7093_v2 = vpop.eup %7092 }
0x1438   :  { %v7095_v9 = vpop.eup %7094  ;;  %v5079_v44 = vmul.f32 %v7093_v2, %v7091_v1 }
0x1439   :  { %v5078_v26 = vmul.f32 %v7095_v9, %v9698_v43  ;;  %v7097_v61 = vpop.eup %7096 }
0x143b   :  { %v5080_v58 = vadd.f32 %v5079_v44, %v5078_v26 }
0x143d   :  { %7098 = vtanh.f32 %v5080_v58 }
0x1447   :  { %v7099_v35 = vpop.eup %7098 }
0x1448   :  { %v5082_v41 = vmul.f32 %v7099_v35, %v7097_v61 }
0x144a   :  { %v5083_v16 = vpack.c.bf16 %v5082_v41, %v5082_v41 }
0x144c   :  { %5871 = vmatmul.mubr.bf16.vlgmr.msra.gmra.mrb[152].mxu0 %v5083_v16 }
0x1459   :  { %v5532_v4 = vpop.f32.mrb[132].mxu1  ;;  %v5573_v38 = vpop.f32.mrb[148].mxu0 }
0x145a   :  { %v5533_v60 = vadd.f32 %v5532_v4, %v5157_v62  ;;  %v5534_v43 = vpop.f32.mrb[133].mxu1  ;;  %v5575_v28 = vpop.f32.mrb[149].mxu0  ;;  %v5574_v32 = vadd.f32 %v5573_v38, %v5165_v40 }
0x145b   :  { %v5535_v34 = vadd.f32 %v5534_v43, %v5161_v0  ;;  %v5536_v13 = vpop.f32.mrb[134].mxu1  ;;  %v5577_v15 = vpop.f32.mrb[150].mxu0  ;;  %v5576_v59 = vadd.f32 %v5575_v28, %v5169_v23 }
0x145c   :  { %v5580_v24 = vsub.f32 0.0, %v5533_v60  ;;  %v5537_v12 = vpop.f32.mrb[135].mxu1  ;;  %v5578_v3 = vpop.f32.mrb[151].mxu0 }
0x145d   :  { %v5586_v51 = vsub.f32 0.0, %v5535_v34  ;;  %v5593_v39 = vsub.f32 0.0, %v5576_v59 }
0x145e   :  { %v5581_v20 = vmul.f32 1.442695, %v5580_v24 }
0x145f   :  { %v5587_v25 = vmul.f32 1.442695, %v5586_v51  ;;  %v5594_v21 = vmul.f32 1.442695, %v5593_v39 }
0x1460   :  { %7100 = vpow2.f32 %v5581_v20 }
0x1461   :  { %7102 = vpow2.f32 %v5587_v25 }
0x1462   :  { %7104 = vpow2.f32 %v5594_v21 }
0x1463   :  { %7106 = vtanh.f32 %v5574_v32 }
0x146a   :  { %v7101_v10 = vpop.eup %7100 }
0x146b   :  { %v7103_v54 = vpop.eup %7102  ;;  %v5583_v36 = vadd.f32 1.0, %v7101_v10 }
0x146c   :  { %v5589_v56 = vadd.f32 1.0, %v7103_v54  ;;  %v7105_v63 = vpop.eup %7104 }
0x146d   :  { %7108 = vrcp.f32 %v5583_v36  ;;  %v7107_v30 = vpop.eup %7106  ;;  %v5596_v27 = vadd.f32 1.0, %v7105_v63 }
0x146e   :  { %7110 = vrcp.f32 %v5589_v56 }
0x146f   :  { %7112 = vrcp.f32 %v5596_v27 }
0x1477   :  { %v7109_v31 = vpop.eup %7108 }
0x1478   :  { %v7111_v7 = vpop.eup %7110  ;;  %v5600_v11 = vmul.f32 %v7109_v31, %v7107_v30 }
0x1479   :  { %v5599_v42 = vmul.f32 0.0, %v7111_v7  ;;  %v7113_v47 = vpop.eup %7112 }
0x147b   :  { %v5601_v5 = vadd.f32 %v5600_v11, %v5599_v42 }
0x147d   :  { %7114 = vtanh.f32 %v5601_v5 }
0x1487   :  { %v7115_v50 = vpop.eup %7114 }
0x1488   :  { %v5603_v48 = vmul.f32 %v7115_v50, %v7113_v47 }
0x148a   :  { %v5620_v18 = vpack.c.bf16 %v5603_v48, %v5603_v48 }
0x148c   :  { %5750 = vmatmul.mubr.bf16.vlgmr.msra.gmra.mrb[136].mxu1 %v5620_v18 }
0x151f   :  { %v5872_v22 = vpop.f32.mrb[152].mxu0 }
0x1520   :  { %v5874_v37 = vpop.f32.mrb[153].mxu0 }
0x1521   :  { %v5876_v19 = vpop.f32.mrb[154].mxu0 }
0x1522   :  { %v5877_v29 = vpop.f32.mrb[155].mxu0 }
0x155f   :  { %v5751_v52 = vpop.f32.mrb[136].mxu1 }
0x1560   :  { %v5873_v46 = vadd.f32 %v5872_v22, %v5751_v52  ;;  %v5753_v14 = vpop.f32.mrb[137].mxu1 }
0x1561   :  { %v5875_v1 = vadd.f32 %v5874_v37, %v5753_v14  ;;  %v5755_v2 = vpop.f32.mrb[138].mxu1 }
0x1562   :  { %v5891_v9 = vadd.f32 %v5884_v17, %v5873_v46  ;;  %v5756_v44 = vpop.f32.mrb[139].mxu1 }
0x1563   :  { %v5892_v45 = vadd.f32 %v5888_v49, %v5875_v1 }
0x1564   :  { %5893 = vst [vmem:[%s9743_s13] sm:$0xff] %v5891_v9 }
0x1565   :  { %5894 = vst [vmem:[%s9743_s13 + $0x8] sm:$0xff] %v5892_v45 }
0x1566   :  { %5899 = vsyncpa [#allocation4], 1 }
0x1567   :  { %5900 = vsyncpa [#allocation6], 1 }
0x1568   :  { %5901 = vsyncpa [#allocation9], 1 }
0x1569   :  { %5902 = vsyncpa [#allocation12], 1 }
0x156a   :  { %5903 = vsyncpa [#allocation15], 1 }

</bundles_post_ra>
